<compile_context>
chip_gen: v6e
topology: v6e:2x2x1
jax: 0.10.0
libtpu: 0.0.40
codegen_flags: <defaults>
</compile_context>

<pallas_src>
import functools
import math

import jax
import jax.numpy as jnp
from jax.experimental import pallas as pl
from jax.experimental.pallas import tpu as pltpu


# --------------------------------------------------------------------------- #
# Pallas kernels
# --------------------------------------------------------------------------- #
def _dense_kernel(x_ref, w_ref, b_ref, o_ref, *, relu):
    y = jnp.dot(x_ref[...], w_ref[...], preferred_element_type=jnp.float32) + b_ref[...]
    if relu:
        y = jnp.maximum(y, 0.0)
    o_ref[...] = y


def pallas_dense(x, w, b, relu=False, pad_out_to=None):
    """y = x @ w + b (optionally ReLU).  x: (..., Din) -> (..., Dout).
    If pad_out_to is given, the output lane dim is zero-padded up to it inside the
    kernel (lane-dense, unmasked stores) and sliced back afterwards."""
    lead = x.shape[:-1]
    x2 = x.reshape(-1, x.shape[-1]).astype(jnp.float32)
    n = x2.shape[0]
    dout = w.shape[1]
    if pad_out_to is not None and dout < pad_out_to:
        w = jnp.pad(w, ((0, 0), (0, pad_out_to - dout)))
        b = jnp.pad(b, (0, pad_out_to - dout))
        dpad = pad_out_to
    else:
        dpad = dout
    y = pl.pallas_call(
        functools.partial(_dense_kernel, relu=relu),
        out_shape=jax.ShapeDtypeStruct((n, dpad), jnp.float32),
    )(x2, w.astype(jnp.float32), b.reshape(1, dpad).astype(jnp.float32))
    if dpad != dout:
        y = y[:, :dout]
    return y.reshape(lead + (dout,))


def _dual_dense_relu_kernel(x1_ref, w1_ref, b1_ref, x2_ref, w2_ref, b2_ref, o_ref):
    y = (jnp.dot(x1_ref[...], w1_ref[...], preferred_element_type=jnp.float32) + b1_ref[...]
         + jnp.dot(x2_ref[...], w2_ref[...], preferred_element_type=jnp.float32) + b2_ref[...])
    o_ref[...] = jnp.maximum(y, 0.0)


def pallas_dual_dense_relu(x1, w1, b1, x2, w2, b2):
    """relu(x1 @ w1 + b1 + x2 @ w2 + b2), fused in a single kernel."""
    lead = x1.shape[:-1]
    x1f = x1.reshape(-1, x1.shape[-1]).astype(jnp.float32)
    x2f = x2.reshape(-1, x2.shape[-1]).astype(jnp.float32)
    n, dout = x1f.shape[0], w1.shape[1]
    y = pl.pallas_call(
        _dual_dense_relu_kernel,
        out_shape=jax.ShapeDtypeStruct((n, dout), jnp.float32),
    )(x1f, w1.astype(jnp.float32), b1.reshape(1, dout).astype(jnp.float32),
      x2f, w2.astype(jnp.float32), b2.reshape(1, dout).astype(jnp.float32))
    return y.reshape(lead + (dout,))


def _sigmoid(z):
    # sigmoid via tanh: transcendental work stays on the EUP slot (no VALU divide)
    return 0.5 * (jnp.tanh(0.5 * z) + 1.0)


def _multi_lstm_kernel(lens_ref, x_ref, wih_ref, whh_ref, b_ref, out_ref):
    """One direction (grid axis) of a batched, length-masked LSTM.

    The full (T, N, I) input slab for this direction is resident in VMEM; the time
    loop is fully unrolled inside the kernel; the 4 gates (PyTorch order i,f,g,o)
    come from a single fused (N, 4H) matmul against (I, 4H)/(H, 4H) weights."""
    t_steps, n, _ = x_ref.shape
    h_dim = out_ref.shape[-1]

    w_ih = wih_ref[...]            # (I, 4H)
    w_hh = whh_ref[...]            # (H, 4H)
    b = b_ref[...]                 # (1, 4H)
    lens = lens_ref[...]           # (N, 1) int32 — packed-sequence lengths

    h = jnp.zeros((n, h_dim), jnp.float32)
    c = jnp.zeros((n, h_dim), jnp.float32)
    for t in range(t_steps):       # trace-time unroll (T is small and static)
        x_t = x_ref[t]             # (N, I)
        z = (jnp.dot(x_t, w_ih, preferred_element_type=jnp.float32)
             + jnp.dot(h, w_hh, preferred_element_type=jnp.float32) + b)   # (N, 4H)
        i_g = _sigmoid(z[:, 0 * h_dim:1 * h_dim])
        f_g = _sigmoid(z[:, 1 * h_dim:2 * h_dim])
        g_g = jnp.tanh(z[:, 2 * h_dim:3 * h_dim])
        o_g = _sigmoid(z[:, 3 * h_dim:4 * h_dim])
        c_new = f_g * c + i_g * g_g
        h_new = o_g * jnp.tanh(c_new)
        valid = lens > t           # (N, 1) bool — packed-sequence masking
        c = jnp.where(valid, c_new, c)
        h = jnp.where(valid, h_new, h)
        out_ref[t] = jnp.where(valid, h_new, 0.0)


def pallas_multi_lstm(x_stack, lens_stack, w_ih, w_hh, b):
    """Batched single-layer LSTMs with packed-sequence semantics.

    x_stack:    (D, N, T, I)  — D independent sequence-sets (directions/branches)
    lens_stack: (D, N)
    w_ih:       (D, I, 4H), w_hh: (D, H, 4H), b: (D, 1, 4H)
    Returns (D, N, T, H); outputs at t >= len are zero."""
    d, n, t_steps, i_dim = x_stack.shape
    h4 = w_hh.shape[-1]
    h_dim = h4 // 4
    x_tm = jnp.transpose(x_stack.astype(jnp.float32), (0, 2, 1, 3))   # (D, T, N, I)
    lens3 = lens_stack.astype(jnp.int32).reshape(d, n, 1)
    out = pl.pallas_call(
        _multi_lstm_kernel,
        out_shape=jax.ShapeDtypeStruct((d, t_steps, n, h_dim), jnp.float32),
        grid=(d,),
        in_specs=[
            pl.BlockSpec((None, n, 1), lambda s: (s, 0, 0)),
            pl.BlockSpec((None, t_steps, n, i_dim), lambda s: (s, 0, 0, 0)),
            pl.BlockSpec((None, i_dim, h4), lambda s: (s, 0, 0)),
            pl.BlockSpec((None, h_dim, h4), lambda s: (s, 0, 0)),
            pl.BlockSpec((None, 1, h4), lambda s: (s, 0, 0)),
        ],
        out_specs=pl.BlockSpec((None, t_steps, n, h_dim), lambda s: (s, 0, 0, 0)),
        # directions are fully independent -> megacore-shardable
        compiler_params=pltpu.CompilerParams(dimension_semantics=("parallel",)),
    )(lens3, x_tm, w_ih.astype(jnp.float32), w_hh.astype(jnp.float32),
      b.astype(jnp.float32))
    return jnp.transpose(out, (0, 2, 1, 3))                           # (D, N, T, H)


def _reverse_within_len(x, lens):
    t_steps = x.shape[1]
    t = jnp.arange(t_steps)[None, :]
    l = lens[:, None]
    idx = jnp.where(t < l, l - 1 - t, t)
    return jnp.take_along_axis(x, idx[:, :, None], axis=1)


def _stack_lstm(p_list):
    return (jnp.stack([p["w_ih"] for p in p_list]),
            jnp.stack([p["w_hh"] for p in p_list]),
            jnp.stack([p["b"] for p in p_list]))


def pallas_bilstm(x, lens, params_fwd, params_bwd):
    """Bidirectional LSTM with packed-sequence semantics; both directions run in a
    single pallas_call (direction = grid axis).  Returns (N, T, 2H)."""
    x_rev = _reverse_within_len(x, lens)
    w_ih, w_hh, b = _stack_lstm([params_fwd, params_bwd])
    out = pallas_multi_lstm(jnp.stack([x, x_rev], axis=0),
                            jnp.stack([lens, lens], axis=0), w_ih, w_hh, b)
    out_b = _reverse_within_len(out[1], lens)
    return jnp.concatenate([out[0], out_b], axis=-1)


def _pad_lstm(p, i_pad, h_pad):
    """Zero-pad fused-gate LSTM params to a common (i_pad, h_pad).
    Padded input rows are zero (ignore padded input features); padded gate columns
    are zero, so padded hidden units stay at 0 and never influence real units."""
    w_ih, w_hh, b = p["w_ih"], p["w_hh"], p["b"]
    i_dim, h4 = w_ih.shape
    h_dim = h4 // 4

    def pad_gates(m, row_pad):
        g = m.reshape(m.shape[0], 4, h_dim)
        g = jnp.pad(g, ((0, row_pad - m.shape[0]), (0, 0), (0, h_pad - h_dim)))
        return g.reshape(row_pad, 4 * h_pad)

    return {"w_ih": pad_gates(w_ih, i_pad),
            "w_hh": pad_gates(w_hh, h_pad),
            "b": pad_gates(b, 1)}


def pallas_path_lstms(gpr_fwd, gpr_bwd, rpr_fwd, rpr_bwd,
                      tok_emb, rel_tok_emb, dep_emb, rel_dep_emb,
                      path_len, rel_path_len):
    """All four unidirectional path LSTMs in ONE pallas_call (4-way direction axis).
    Input dims / hidden dims are zero-padded to a common size (bit-identical)."""
    i_gpr, _ = gpr_fwd["w_ih"].shape
    i_rpr, _ = rpr_fwd["w_ih"].shape
    h_gpr = gpr_fwd["w_hh"].shape[0]
    h_rpr = rpr_fwd["w_hh"].shape[0]
    i_pad = max(i_gpr, i_rpr)
    h_pad = max(h_gpr, h_rpr)

    padded = [_pad_lstm(p, i_pad, h_pad) for p in (gpr_fwd, gpr_bwd, rpr_fwd, rpr_bwd)]
    w_ih, w_hh, b = _stack_lstm(padded)

    def pad_x(x):
        return jnp.pad(x, ((0, 0), (0, 0), (0, i_pad - x.shape[-1])))

    x_stack = jnp.stack([pad_x(tok_emb), pad_x(rel_tok_emb),
                         pad_x(dep_emb), pad_x(rel_dep_emb)], axis=0)
    lens = jnp.stack([path_len, rel_path_len, path_len, rel_path_len], axis=0)
    out = pallas_multi_lstm(x_stack, lens, w_ih, w_hh, b)   # (4, NP, P, h_pad)
    return (out[0, :, :, :h_gpr], out[1, :, :, :h_gpr],
            out[2, :, :, :h_rpr], out[3, :, :, :h_rpr])


# --------------------------------------------------------------------------- #
# Parameters
# --------------------------------------------------------------------------- #
def _uniform(key, shape, scale=0.1):
    return jax.random.uniform(key, shape, jnp.float32, -scale, scale)


def _lstm_params(key, i_dim, h_dim):
    k1, k2, k3 = jax.random.split(key, 3)
    # fused gate layout: [ i | f | g | o ] along the last (4H) axis
    return {"w_ih": _uniform(k1, (i_dim, 4 * h_dim)),
            "w_hh": _uniform(k2, (h_dim, 4 * h_dim)),
            "b": _uniform(k3, (1, 4 * h_dim))}


def init_params(key, cfg):
    ks = jax.random.split(key, 20)
    E, F = cfg["word_embedding_dim"], cfg["feature_size"]
    p = {}
    p["emb_pre"] = _uniform(ks[0], (cfg["vocab_size"], E))
    p["emb_unt"] = _uniform(ks[1], (cfg["vocab_size"], E))
    p["emb_pos"] = _uniform(ks[2], (cfg["pos_set_size"], cfg["pos_embedding_dim"]))
    p["emb_dep"] = _uniform(ks[3], (cfg["depend_set_size"], cfg["depend_embedding_dim"]))
    p["gcr_fwd"] = _lstm_params(ks[4], F, cfg["gcr_hidden_size"])
    p["gcr_bwd"] = _lstm_params(ks[5], F, cfg["gcr_hidden_size"])
    p["out_lstm_fwd"] = _lstm_params(ks[6], F, F)
    p["out_lstm_bwd"] = _lstm_params(ks[7], F, F)
    p["gpr_fwd"] = _lstm_params(ks[8], F, cfg["gpr_hidden_size"])
    p["gpr_bwd"] = _lstm_params(ks[9], F, cfg["gpr_hidden_size"])
    p["rpr_fwd"] = _lstm_params(ks[10], cfg["depend_embedding_dim"], cfg["rpr_hidden_size"])
    p["rpr_bwd"] = _lstm_params(ks[11], cfg["depend_embedding_dim"], cfg["rpr_hidden_size"])
    d_lex = 2 * E + cfg["pos_embedding_dim"]
    p["w_lex"] = _uniform(ks[12], (d_lex, F));  p["b_lex"] = _uniform(ks[13], (F,))
    p["w_ctx"] = _uniform(ks[14], (cfg["gcr_hidden_size"] * 4, F));  p["b_ctx"] = _uniform(ks[15], (F,))
    d_path = cfg["gpr_hidden_size"] * 2 + cfg["rpr_hidden_size"] * 2
    p["w_path"] = _uniform(ks[16], (d_path, F));  p["b_path"] = _uniform(ks[17], (F,))
    p["w_out"] = _uniform(ks[18], (F * 2, cfg["categories"]));  p["b_out"] = _uniform(ks[19], (cfg["categories"],))
    return p


def word_repr_batched(params, tok_pos_pairs):
    """All word_repr projections (embedding lookups + dense ReLU) fused into ONE
    pallas_dense call over the concatenated rows of every (token, pos) pair."""
    shapes = [t.shape for t, _ in tok_pos_pairs]
    toks = jnp.concatenate([t.reshape(-1) for t, _ in tok_pos_pairs], axis=0)
    poss = jnp.concatenate([p.reshape(-1) for _, p in tok_pos_pairs], axis=0)
    x = jnp.concatenate([params["emb_pre"][toks], params["emb_unt"][toks],
                         params["emb_pos"][poss]], axis=-1)
    y = pallas_dense(x, params["w_lex"], params["b_lex"], relu=True)
    feat = y.shape[-1]
    outs, off = [], 0
    for shp in shapes:
        num = math.prod(shp)
        outs.append(y[off:off + num].reshape(shp + (feat,)))
        off += num
    return outs


# --------------------------------------------------------------------------- #
# Forward pass (mirrors UnifiedFramework.forward)
# --------------------------------------------------------------------------- #
def unified_framework_forward(params, word_seq, pos_seq, rel_pos, sent_len,
                              token_index_path, depend_path,
                              rel_token_index_path, rel_depend_path,
                              path_len, rel_path_len):
    B, S = word_seq.shape
    P = token_index_path.shape[2]

    # ---- sort by sentence length (descending) ------------------------------
    sent_sort = jnp.argsort(-sent_len)
    sent_unsort = jnp.argsort(sent_sort)
    sent_len_s = sent_len[sent_sort]

    word_seq_s = word_seq[sent_sort]
    pos_seq_s = pos_seq[sent_sort]
    token_index_path = token_index_path[sent_sort]
    depend_path = depend_path[sent_sort]
    rel_token_index_path = rel_token_index_path[sent_sort]
    rel_depend_path = rel_depend_path[sent_sort]
    path_len = path_len[sent_sort]
    rel_path_len = rel_path_len[sent_sort]

    # ---- gather dependency paths --------------------------------------------
    ws_b = jnp.broadcast_to(word_seq_s[:, None, :], (B, S, S))
    ps_b = jnp.broadcast_to(pos_seq_s[:, None, :], (B, S, S))
    token_path = jnp.take_along_axis(ws_b, token_index_path, axis=2)
    pos_path = jnp.take_along_axis(ps_b, token_index_path, axis=2)
    rel_token_path = jnp.take_along_axis(ws_b, rel_token_index_path, axis=2)
    rel_pos_path = jnp.take_along_axis(ps_b, rel_token_index_path, axis=2)

    NP = B * S
    path_len_f = path_len.reshape(NP)
    rel_path_len_f = rel_path_len.reshape(NP)
    token_path = token_path.reshape(NP, P)
    pos_path = pos_path.reshape(NP, P)
    depend_path_f = depend_path.reshape(NP, P)
    rel_token_path = rel_token_path.reshape(NP, P)
    rel_pos_path = rel_pos_path.reshape(NP, P)
    rel_depend_path_f = rel_depend_path.reshape(NP, P)

    path_sort = jnp.argsort(-path_len_f)
    path_unsort = jnp.argsort(path_sort)
    rel_sort = jnp.argsort(-rel_path_len_f)
    path_len_s = path_len_f[path_sort]
    rel_path_len_s = rel_path_len_f[rel_sort]

    token_path = token_path[path_sort]
    pos_path = pos_path[path_sort]
    depend_path_f = depend_path_f[path_sort]
    rel_token_path = rel_token_path[rel_sort]
    rel_pos_path = rel_pos_path[rel_sort]
    rel_depend_path_f = rel_depend_path_f[rel_sort]

    num_all_paths = jnp.sum(sent_len)          # traced; used only for masking
    former_len = NP

    # ---- fused embed + dense-ReLU for ALL word_repr uses ---------------------
    word_lex, token_path_emb, rel_token_path_emb = word_repr_batched(
        params, [(word_seq_s, pos_seq_s), (token_path, pos_path),
                 (rel_token_path, rel_pos_path)])
    depend_path_emb = params["emb_dep"][depend_path_f]                 # (NP, P, Ed)
    rel_depend_path_emb = params["emb_dep"][rel_depend_path_f]

    # ---- global context BiLSTM (fwd + bwd in one pallas_call) ----------------
    gcr = pallas_bilstm(word_lex, sent_len_s,
                        params["gcr_fwd"], params["gcr_bwd"])          # (B, S, 2*Hg)

    # ---- path LSTMs: gpr fwd/bwd + rpr fwd/bwd, all in ONE pallas_call -------
    out_tp, out_rtp, out_dp, out_rdp = pallas_path_lstms(
        params["gpr_fwd"], params["gpr_bwd"], params["rpr_fwd"], params["rpr_bwd"],
        token_path_emb, rel_token_path_emb, depend_path_emb, rel_depend_path_emb,
        path_len_s, rel_path_len_s)

    # NOTE: the original code indexes ALL four path reprs with (path_len - 1);
    # that quirk is reproduced exactly here.
    sel_idx = (path_len_s - 1)[:, None, None]

    def last(out):
        return jnp.take_along_axis(out, sel_idx, axis=1)[:, 0, :]

    gpr = jnp.concatenate([last(out_tp), last(out_dp)], axis=-1)
    rpr = jnp.concatenate([last(out_rtp), last(out_rdp)], axis=-1)
    spr = jnp.concatenate([gpr, rpr], axis=-1)                          # (NP, Dspr)

    row_ids = jnp.arange(former_len)[:, None]
    restored_spr = jnp.where(row_ids < num_all_paths, spr, 0.0)
    restored_spr = restored_spr[path_unsort]
    restored_spr = restored_spr.reshape(B, S, spr.shape[-1])
    restored_spr = restored_spr[sent_unsort]

    # ---- context side ---------------------------------------------------------
    gcr = gcr[sent_unsort]
    gcr_e2 = gcr[jnp.arange(B), rel_pos, :]                             # (B, 2*Hg)
    gcr_cat = jnp.concatenate(
        [gcr, jnp.broadcast_to(gcr_e2[:, None, :], gcr.shape)], axis=-1)  # (B, S, 4*Hg)
    t_max = jnp.max(sent_len)
    tpos = jnp.arange(S)[None, :, None]
    restored_gcr = jnp.where(tpos < t_max, gcr_cat, 0.0)

    # ---- fused p = relu(Wc gcr + Wp spr) --------------------------------------
    p_feat = pallas_dual_dense_relu(restored_gcr, params["w_ctx"], params["b_ctx"],
                                    restored_spr, params["w_path"], params["b_path"])

    # ---- output BiLSTM + classifier -------------------------------------------
    p_sorted = p_feat[sent_sort]
    out_seq = pallas_bilstm(p_sorted, sent_len_s,
                            params["out_lstm_fwd"], params["out_lstm_bwd"])  # (B, S, 2F)
    pcp = pallas_dense(out_seq, params["w_out"], params["b_out"],
                       relu=False, pad_out_to=128)                           # (B, S, C)
    pcp = pcp[sent_unsort]
    restored_pcp = jnp.where(tpos < t_max, pcp, 0.0)
    return restored_pcp


# --------------------------------------------------------------------------- #
if __name__ == "__main__":
    cfg = dict(vocab_size=50, word_embedding_dim=16,
               pos_set_size=10, pos_embedding_dim=8,
               depend_set_size=12, depend_embedding_dim=8,
               feature_size=32,
               gcr_hidden_size=16, gcr_num_layers=1,
               gpr_hidden_size=16, gpr_num_layers=1,
               rpr_hidden_size=16, rpr_num_layers=1,
               drop_out=0.0, categories=5)

    key = jax.random.PRNGKey(0)
    kparams, kdata = jax.random.split(key)
    params = init_params(kparams, cfg)

    B, S = 2, 8
    ks = jax.random.split(kdata, 8)
    word_seq = jax.random.randint(ks[0], (B, S), 0, cfg["vocab_size"], dtype=jnp.int32)
    pos_seq = jax.random.randint(ks[1], (B, S), 0, cfg["pos_set_size"], dtype=jnp.int32)
    sent_len = jnp.array([8, 5], dtype=jnp.int32)
    rel_pos = jnp.array([3, 2], dtype=jnp.int32)
    token_index_path = jax.random.randint(ks[2], (B, S, S), 0, S, dtype=jnp.int32)
    depend_path = jax.random.randint(ks[3], (B, S, S), 0, cfg["depend_set_size"], dtype=jnp.int32)
    rel_token_index_path = jax.random.randint(ks[4], (B, S, S), 0, S, dtype=jnp.int32)
    rel_depend_path = jax.random.randint(ks[5], (B, S, S), 0, cfg["depend_set_size"], dtype=jnp.int32)
    path_len = jax.random.randint(ks[6], (B, S), 1, S + 1, dtype=jnp.int32)
    rel_path_len = jax.random.randint(ks[7], (B, S), 1, S + 1, dtype=jnp.int32)
    # ensure the max rel-path length >= any path length so the original model's
    # (path_len - 1) indexing of the rel reprs stays in bounds, as torch requires
    rel_path_len = rel_path_len.at[0, 0].set(S)

    forward = jax.jit(unified_framework_forward)
    out = forward(params, word_seq, pos_seq, rel_pos, sent_len,
                  token_index_path, depend_path,
                  rel_token_index_path, rel_depend_path,
                  path_len, rel_path_len)
    jax.block_until_ready(out)
    assert out.shape == (B, S, cfg["categories"])
    print("KERNEL_OK")
</pallas_src>

<mosaic_0001>
module attributes {stable_mosaic.version = 11 : i64} {
  func.func @_dense_kernel(%arg0: memref<272x40xf32, #tpu.memory_space<vmem>>, %arg1: memref<40x32xf32, #tpu.memory_space<vmem>>, %arg2: memref<1x32xf32, #tpu.memory_space<vmem>>, %arg3: memref<272x32xf32, #tpu.memory_space<vmem>>) attributes {dimension_semantics = [], scalar_prefetch = 0 : i64, scratch_operands = 0 : i64, tpu.core_type = #tpu.core_type<tc>} {
    %c0 = arith.constant 0 : index
    %c0_0 = arith.constant 0 : index
    %0 = vector.load %arg0[%c0, %c0_0] : memref<272x40xf32, #tpu.memory_space<vmem>>, vector<272x40xf32>
    %c0_1 = arith.constant 0 : index
    %c0_2 = arith.constant 0 : index
    %1 = vector.load %arg1[%c0_1, %c0_2] : memref<40x32xf32, #tpu.memory_space<vmem>>, vector<40x32xf32>
    %cst = arith.constant dense<0.000000e+00> : vector<272x32xf32>
    %2 = tpu.matmul %0, %1, %cst {dimension_numbers = #tpu.dot_dimension_numbers<[1], [0], [0], [1], [0, 0, 1, 1], [], []>} : vector<272x40xf32>, vector<40x32xf32>, vector<272x32xf32> -> vector<272x32xf32>
    %c0_3 = arith.constant 0 : index
    %c0_4 = arith.constant 0 : index
    %3 = vector.load %arg2[%c0_3, %c0_4] : memref<1x32xf32, #tpu.memory_space<vmem>>, vector<1x32xf32>
    %4 = vector.broadcast %3 : vector<1x32xf32> to vector<272x32xf32>
    %5 = arith.addf %2, %4 : vector<272x32xf32>
    %cst_5 = arith.constant 0.000000e+00 : f32
    %6 = vector.broadcast %cst_5 : f32 to vector<272x32xf32>
    %7 = arith.maximumf %5, %6 : vector<272x32xf32>
    %c0_6 = arith.constant 0 : index
    %c0_7 = arith.constant 0 : index
    %8 = vector.load %arg3[%c0_6, %c0_7] : memref<272x32xf32, #tpu.memory_space<vmem>>, vector<272x32xf32>
    tpu.vector_store %arg3[%c0_6, %c0_7], %7 {strides = array<i32>} : memref<272x32xf32, #tpu.memory_space<vmem>>, vector<272x32xf32>,
    return
  }
}

module attributes {stable_mosaic.version = 11 : i64} {
  func.func @_multi_lstm_kernel(%arg0: i32, %arg1: memref<1x2x1xi32, #tpu.memory_space<vmem>>, %arg2: memref<1x8x2x32xf32, #tpu.memory_space<vmem>>, %arg3: memref<1x32x64xf32, #tpu.memory_space<vmem>>, %arg4: memref<1x16x64xf32, #tpu.memory_space<vmem>>, %arg5: memref<1x1x64xf32, #tpu.memory_space<vmem>>, %arg6: memref<1x8x2x16xf32, #tpu.memory_space<vmem>>) attributes {dimension_semantics = [#tpu.dimension_semantics<parallel>], iteration_bounds = array<i64: 2>, scalar_prefetch = 0 : i64, scratch_operands = 0 : i64, tpu.core_type = #tpu.core_type<tc>, window_params = [{transform_indices = @transform_0, window_bounds = array<i64: 1, 2, 1>}, {transform_indices = @transform_1, window_bounds = array<i64: 1, 8, 2, 32>}, {transform_indices = @transform_2, window_bounds = array<i64: 1, 32, 64>}, {transform_indices = @transform_3, window_bounds = array<i64: 1, 16, 64>}, {transform_indices = @transform_4, window_bounds = array<i64: 1, 1, 64>}, {transform_indices = @transform_5, window_bounds = array<i64: 1, 8, 2, 16>}]} {
    %c0 = arith.constant 0 : index
    %c0_0 = arith.constant 0 : index
    %c0_1 = arith.constant 0 : index
    %0 = vector.load %arg3[%c0, %c0_0, %c0_1] : memref<1x32x64xf32, #tpu.memory_space<vmem>>, vector<1x32x64xf32>
    %1 = vector.shape_cast %0 : vector<1x32x64xf32> to vector<32x64xf32>
    %c0_2 = arith.constant 0 : index
    %c0_3 = arith.constant 0 : index
    %c0_4 = arith.constant 0 : index
    %2 = vector.load %arg4[%c0_2, %c0_3, %c0_4] : memref<1x16x64xf32, #tpu.memory_space<vmem>>, vector<1x16x64xf32>
    %3 = vector.shape_cast %2 : vector<1x16x64xf32> to vector<16x64xf32>
    %c0_5 = arith.constant 0 : index
    %c0_6 = arith.constant 0 : index
    %c0_7 = arith.constant 0 : index
    %4 = vector.load %arg5[%c0_5, %c0_6, %c0_7] : memref<1x1x64xf32, #tpu.memory_space<vmem>>, vector<1x1x64xf32>
    %5 = vector.shape_cast %4 : vector<1x1x64xf32> to vector<1x64xf32>
    %c0_8 = arith.constant 0 : index
    %c0_9 = arith.constant 0 : index
    %c0_10 = arith.constant 0 : index
    %6 = vector.load %arg1[%c0_8, %c0_9, %c0_10] : memref<1x2x1xi32, #tpu.memory_space<vmem>>, vector<1x2x1xi32>
    %7 = vector.shape_cast %6 : vector<1x2x1xi32> to vector<2x1xi32>
    %cst = arith.constant 0.000000e+00 : f32
    %8 = vector.broadcast %cst : f32 to vector<2x16xf32>
    %cst_11 = arith.constant 0.000000e+00 : f32
    %9 = vector.broadcast %cst_11 : f32 to vector<2x16xf32>
    %c0_12 = arith.constant 0 : index
    %c0_13 = arith.constant 0 : index
    %c0_14 = arith.constant 0 : index
    %c0_15 = arith.constant 0 : index
    %10 = vector.load %arg2[%c0_12, %c0_13, %c0_14, %c0_15] : memref<1x8x2x32xf32, #tpu.memory_space<vmem>>, vector<1x1x2x32xf32>
    %11 = vector.shape_cast %10 : vector<1x1x2x32xf32> to vector<2x32xf32>
    %cst_16 = arith.constant dense<0.000000e+00> : vector<2x64xf32>
    %12 = tpu.matmul %11, %1, %cst_16 {dimension_numbers = #tpu.dot_dimension_numbers<[1], [0], [0], [1], [0, 0, 1, 1], [], []>} : vector<2x32xf32>, vector<32x64xf32>, vector<2x64xf32> -> vector<2x64xf32>
    %cst_17 = arith.constant dense<0.000000e+00> : vector<2x64xf32>
    %13 = tpu.matmul %8, %3, %cst_17 {dimension_numbers = #tpu.dot_dimension_numbers<[1], [0], [0], [1], [0, 0, 1, 1], [], []>} : vector<2x16xf32>, vector<16x64xf32>, vector<2x64xf32> -> vector<2x64xf32>
    %14 = arith.addf %12, %13 : vector<2x64xf32>
    %15 = vector.broadcast %5 : vector<1x64xf32> to vector<2x64xf32>
    %16 = arith.addf %14, %15 : vector<2x64xf32>
    %17 = vector.extract_strided_slice %16 {offsets = [0, 0], sizes = [2, 16], strides = [1, 1]} : vector<2x64xf32> to vector<2x16xf32>
    %cst_18 = arith.constant 5.000000e-01 : f32
    %18 = vector.broadcast %cst_18 : f32 to vector<2x16xf32>
    %19 = arith.mulf %18, %17 : vector<2x16xf32>
    %20 = math.tanh %19 : vector<2x16xf32>
    %cst_19 = arith.constant 1.000000e+00 : f32
    %21 = vector.broadcast %cst_19 : f32 to vector<2x16xf32>
    %22 = arith.addf %20, %21 : vector<2x16xf32>
    %cst_20 = arith.constant 5.000000e-01 : f32
    %23 = vector.broadcast %cst_20 : f32 to vector<2x16xf32>
    %24 = arith.mulf %23, %22 : vector<2x16xf32>
    %25 = vector.extract_strided_slice %16 {offsets = [0, 16], sizes = [2, 16], strides = [1, 1]} : vector<2x64xf32> to vector<2x16xf32>
    %cst_21 = arith.constant 5.000000e-01 : f32
    %26 = vector.broadcast %cst_21 : f32 to vector<2x16xf32>
    %27 = arith.mulf %26, %25 : vector<2x16xf32>
    %28 = math.tanh %27 : vector<2x16xf32>
    %cst_22 = arith.constant 1.000000e+00 : f32
    %29 = vector.broadcast %cst_22 : f32 to vector<2x16xf32>
    %30 = arith.addf %28, %29 : vector<2x16xf32>
    %cst_23 = arith.constant 5.000000e-01 : f32
    %31 = vector.broadcast %cst_23 : f32 to vector<2x16xf32>
    %32 = arith.mulf %31, %30 : vector<2x16xf32>
    %33 = vector.extract_strided_slice %16 {offsets = [0, 32], sizes = [2, 16], strides = [1, 1]} : vector<2x64xf32> to vector<2x16xf32>
    %34 = math.tanh %33 : vector<2x16xf32>
    %35 = vector.extract_strided_slice %16 {offsets = [0, 48], sizes = [2, 16], strides = [1, 1]} : vector<2x64xf32> to vector<2x16xf32>
    %cst_24 = arith.constant 5.000000e-01 : f32
    %36 = vector.broadcast %cst_24 : f32 to vector<2x16xf32>
    %37 = arith.mulf %36, %35 : vector<2x16xf32>
    %38 = math.tanh %37 : vector<2x16xf32>
    %cst_25 = arith.constant 1.000000e+00 : f32
    %39 = vector.broadcast %cst_25 : f32 to vector<2x16xf32>
    %40 = arith.addf %38, %39 : vector<2x16xf32>
    %cst_26 = arith.constant 5.000000e-01 : f32
    %41 = vector.broadcast %cst_26 : f32 to vector<2x16xf32>
    %42 = arith.mulf %41, %40 : vector<2x16xf32>
    %43 = arith.mulf %32, %9 : vector<2x16xf32>
    %44 = arith.mulf %24, %34 : vector<2x16xf32>
    %45 = arith.addf %43, %44 : vector<2x16xf32>
    %46 = math.tanh %45 : vector<2x16xf32>
    %47 = arith.mulf %42, %46 : vector<2x16xf32>
    %c0_i32 = arith.constant 0 : i32
    %48 = vector.broadcast %c0_i32 : i32 to vector<2x1xi32>
    %49 = arith.cmpi sgt, %7, %48 : vector<2x1xi32>
    %50 = vector.shape_cast %49 : vector<2x1xi1> to vector<2x1xi1>
    %51 = vector.broadcast %50 : vector<2x1xi1> to vector<2x16xi1>
    %52 = arith.select %51, %45, %9 : vector<2x16xi1>, vector<2x16xf32>
    %53 = vector.shape_cast %49 : vector<2x1xi1> to vector<2x1xi1>
    %54 = vector.broadcast %53 : vector<2x1xi1> to vector<2x16xi1>
    %55 = arith.select %54, %47, %8 : vector<2x16xi1>, vector<2x16xf32>
    %cst_27 = arith.constant 0.000000e+00 : f32
    %56 = vector.shape_cast %49 : vector<2x1xi1> to vector<2x1xi1>
    %57 = vector.broadcast %56 : vector<2x1xi1> to vector<2x16xi1>
    %58 = vector.broadcast %cst_27 : f32 to vector<2x16xf32>
    %59 = arith.select %57, %47, %58 : vector<2x16xi1>, vector<2x16xf32>
    %c0_28 = arith.constant 0 : index
    %c0_29 = arith.constant 0 : index
    %c0_30 = arith.constant 0 : index
    %c0_31 = arith.constant 0 : index
    %60 = vector.load %arg6[%c0_28, %c0_29, %c0_30, %c0_31] : memref<1x8x2x16xf32, #tpu.memory_space<vmem>>, vector<1x1x2x16xf32>
    %61 = vector.shape_cast %60 : vector<1x1x2x16xf32> to vector<2x16xf32>
    %62 = vector.shape_cast %59 : vector<2x16xf32> to vector<1x1x2x16xf32>
    tpu.vector_store %arg6[%c0_28, %c0_29, %c0_30, %c0_31], %62 {strides = array<i32>} : memref<1x8x2x16xf32, #tpu.memory_space<vmem>>, vector<1x1x2x16xf32>,
    %c0_32 = arith.constant 0 : index
    %c1 = arith.constant 1 : index
    %c0_33 = arith.constant 0 : index
    %c0_34 = arith.constant 0 : index
    %63 = vector.load %arg2[%c0_32, %c1, %c0_33, %c0_34] : memref<1x8x2x32xf32, #tpu.memory_space<vmem>>, vector<1x1x2x32xf32>
    %64 = vector.shape_cast %63 : vector<1x1x2x32xf32> to vector<2x32xf32>
    %cst_35 = arith.constant dense<0.000000e+00> : vector<2x64xf32>
    %65 = tpu.matmul %64, %1, %cst_35 {dimension_numbers = #tpu.dot_dimension_numbers<[1], [0], [0], [1], [0, 0, 1, 1], [], []>} : vector<2x32xf32>, vector<32x64xf32>, vector<2x64xf32> -> vector<2x64xf32>
    %cst_36 = arith.constant dense<0.000000e+00> : vector<2x64xf32>
    %66 = tpu.matmul %55, %3, %cst_36 {dimension_numbers = #tpu.dot_dimension_numbers<[1], [0], [0], [1], [0, 0, 1, 1], [], []>} : vector<2x16xf32>, vector<16x64xf32>, vector<2x64xf32> -> vector<2x64xf32>
    %67 = arith.addf %65, %66 : vector<2x64xf32>
    %68 = vector.broadcast %5 : vector<1x64xf32> to vector<2x64xf32>
    %69 = arith.addf %67, %68 : vector<2x64xf32>
    %70 = vector.extract_strided_slice %69 {offsets = [0, 0], sizes = [2, 16], strides = [1, 1]} : vector<2x64xf32> to vector<2x16xf32>
    %cst_37 = arith.constant 5.000000e-01 : f32
    %71 = vector.broadcast %cst_37 : f32 to vector<2x16xf32>
    %72 = arith.mulf %71, %70 : vector<2x16xf32>
    %73 = math.tanh %72 : vector<2x16xf32>
    %cst_38 = arith.constant 1.000000e+00 : f32
    %74 = vector.broadcast %cst_38 : f32 to vector<2x16xf32>
    %75 = arith.addf %73, %74 : vector<2x16xf32>
    %cst_39 = arith.constant 5.000000e-01 : f32
    %76 = vector.broadcast %cst_39 : f32 to vector<2x16xf32>
    %77 = arith.mulf %76, %75 : vector<2x16xf32>
    %78 = vector.extract_strided_slice %69 {offsets = [0, 16], sizes = [2, 16], strides = [1, 1]} : vector<2x64xf32> to vector<2x16xf32>
    %cst_40 = arith.constant 5.000000e-01 : f32
    %79 = vector.broadcast %cst_40 : f32 to vector<2x16xf32>
    %80 = arith.mulf %79, %78 : vector<2x16xf32>
    %81 = math.tanh %80 : vector<2x16xf32>
    %cst_41 = arith.constant 1.000000e+00 : f32
    %82 = vector.broadcast %cst_41 : f32 to vector<2x16xf32>
    %83 = arith.addf %81, %82 : vector<2x16xf32>
    %cst_42 = arith.constant 5.000000e-01 : f32
    %84 = vector.broadcast %cst_42 : f32 to vector<2x16xf32>
    %85 = arith.mulf %84, %83 : vector<2x16xf32>
    %86 = vector.extract_strided_slice %69 {offsets = [0, 32], sizes = [2, 16], strides = [1, 1]} : vector<2x64xf32> to vector<2x16xf32>
    %87 = math.tanh %86 : vector<2x16xf32>
    %88 = vector.extract_strided_slice %69 {offsets = [0, 48], sizes = [2, 16], strides = [1, 1]} : vector<2x64xf32> to vector<2x16xf32>
    %cst_43 = arith.constant 5.000000e-01 : f32
    %89 = vector.broadcast %cst_43 : f32 to vector<2x16xf32>
    %90 = arith.mulf %89, %88 : vector<2x16xf32>
    %91 = math.tanh %90 : vector<2x16xf32>
    %cst_44 = arith.constant 1.000000e+00 : f32
    %92 = vector.broadcast %cst_44 : f32 to vector<2x16xf32>
    %93 = arith.addf %91, %92 : vector<2x16xf32>
    %cst_45 = arith.constant 5.000000e-01 : f32
    %94 = vector.broadcast %cst_45 : f32 to vector<2x16xf32>
    %95 = arith.mulf %94, %93 : vector<2x16xf32>
    %96 = arith.mulf %85, %52 : vector<2x16xf32>
    %97 = arith.mulf %77, %87 : vector<2x16xf32>
    %98 = arith.addf %96, %97 : vector<2x16xf32>
    %99 = math.tanh %98 : vector<2x16xf32>
    %100 = arith.mulf %95, %99 : vector<2x16xf32>
    %c1_i32 = arith.constant 1 : i32
    %101 = vector.broadcast %c1_i32 : i32 to vector<2x1xi32>
    %102 = arith.cmpi sgt, %7, %101 : vector<2x1xi32>
    %103 = vector.shape_cast %102 : vector<2x1xi1> to vector<2x1xi1>
    %104 = vector.broadcast %103 : vector<2x1xi1> to vector<2x16xi1>
    %105 = arith.select %104, %98, %52 : vector<2x16xi1>, vector<2x16xf32>
    %106 = vector.shape_cast %102 : vector<2x1xi1> to vector<2x1xi1>
    %107 = vector.broadcast %106 : vector<2x1xi1> to vector<2x16xi1>
    %108 = arith.select %107, %100, %55 : vector<2x16xi1>, vector<2x16xf32>
    %cst_46 = arith.constant 0.000000e+00 : f32
    %109 = vector.shape_cast %102 : vector<2x1xi1> to vector<2x1xi1>
    %110 = vector.broadcast %109 : vector<2x1xi1> to vector<2x16xi1>
    %111 = vector.broadcast %cst_46 : f32 to vector<2x16xf32>
    %112 = arith.select %110, %100, %111 : vector<2x16xi1>, vector<2x16xf32>
    %c0_47 = arith.constant 0 : index
    %c1_48 = arith.constant 1 : index
    %c0_49 = arith.constant 0 : index
    %c0_50 = arith.constant 0 : index
    %113 = vector.load %arg6[%c0_47, %c1_48, %c0_49, %c0_50] : memref<1x8x2x16xf32, #tpu.memory_space<vmem>>, vector<1x1x2x16xf32>
    %114 = vector.shape_cast %113 : vector<1x1x2x16xf32> to vector<2x16xf32>
    %115 = vector.shape_cast %112 : vector<2x16xf32> to vector<1x1x2x16xf32>
    tpu.vector_store %arg6[%c0_47, %c1_48, %c0_49, %c0_50], %115 {strides = array<i32>} : memref<1x8x2x16xf32, #tpu.memory_space<vmem>>, vector<1x1x2x16xf32>,
    %c0_51 = arith.constant 0 : index
    %c2 = arith.constant 2 : index
    %c0_52 = arith.constant 0 : index
    %c0_53 = arith.constant 0 : index
    %116 = vector.load %arg2[%c0_51, %c2, %c0_52, %c0_53] : memref<1x8x2x32xf32, #tpu.memory_space<vmem>>, vector<1x1x2x32xf32>
    %117 = vector.shape_cast %116 : vector<1x1x2x32xf32> to vector<2x32xf32>
    %cst_54 = arith.constant dense<0.000000e+00> : vector<2x64xf32>
    %118 = tpu.matmul %117, %1, %cst_54 {dimension_numbers = #tpu.dot_dimension_numbers<[1], [0], [0], [1], [0, 0, 1, 1], [], []>} : vector<2x32xf32>, vector<32x64xf32>, vector<2x64xf32> -> vector<2x64xf32>
    %cst_55 = arith.constant dense<0.000000e+00> : vector<2x64xf32>
    %119 = tpu.matmul %108, %3, %cst_55 {dimension_numbers = #tpu.dot_dimension_numbers<[1], [0], [0], [1], [0, 0, 1, 1], [], []>} : vector<2x16xf32>, vector<16x64xf32>, vector<2x64xf32> -> vector<2x64xf32>
    %120 = arith.addf %118, %119 : vector<2x64xf32>
    %121 = vector.broadcast %5 : vector<1x64xf32> to vector<2x64xf32>
    %122 = arith.addf %120, %121 : vector<2x64xf32>
    %123 = vector.extract_strided_slice %122 {offsets = [0, 0], sizes = [2, 16], strides = [1, 1]} : vector<2x64xf32> to vector<2x16xf32>
    %cst_56 = arith.constant 5.000000e-01 : f32
    %124 = vector.broadcast %cst_56 : f32 to vector<2x16xf32>
    %125 = arith.mulf %124, %123 : vector<2x16xf32>
    %126 = math.tanh %125 : vector<2x16xf32>
    %cst_57 = arith.constant 1.000000e+00 : f32
    %127 = vector.broadcast %cst_57 : f32 to vector<2x16xf32>
    %128 = arith.addf %126, %127 : vector<2x16xf32>
    %cst_58 = arith.constant 5.000000e-01 : f32
    %129 = vector.broadcast %cst_58 : f32 to vector<2x16xf32>
    %130 = arith.mulf %129, %128 : vector<2x16xf32>
    %131 = vector.extract_strided_slice %122 {offsets = [0, 16], sizes = [2, 16], strides = [1, 1]} : vector<2x64xf32> to vector<2x16xf32>
    %cst_59 = arith.constant 5.000000e-01 : f32
    %132 = vector.broadcast %cst_59 : f32 to vector<2x16xf32>
    %133 = arith.mulf %132, %131 : vector<2x16xf32>
    %134 = math.tanh %133 : vector<2x16xf32>
    %cst_60 = arith.constant 1.000000e+00 : f32
    %135 = vector.broadcast %cst_60 : f32 to vector<2x16xf32>
    %136 = arith.addf %134, %135 : vector<2x16xf32>
    %cst_61 = arith.constant 5.000000e-01 : f32
    %137 = vector.broadcast %cst_61 : f32 to vector<2x16xf32>
    %138 = arith.mulf %137, %136 : vector<2x16xf32>
    %139 = vector.extract_strided_slice %122 {offsets = [0, 32], sizes = [2, 16], strides = [1, 1]} : vector<2x64xf32> to vector<2x16xf32>
    %140 = math.tanh %139 : vector<2x16xf32>
    %141 = vector.extract_strided_slice %122 {offsets = [0, 48], sizes = [2, 16], strides = [1, 1]} : vector<2x64xf32> to vector<2x16xf32>
    %cst_62 = arith.constant 5.000000e-01 : f32
    %142 = vector.broadcast %cst_62 : f32 to vector<2x16xf32>
    %143 = arith.mulf %142, %141 : vector<2x16xf32>
    %144 = math.tanh %143 : vector<2x16xf32>
    %cst_63 = arith.constant 1.000000e+00 : f32
    %145 = vector.broadcast %cst_63 : f32 to vector<2x16xf32>
    %146 = arith.addf %144, %145 : vector<2x16xf32>
    %cst_64 = arith.constant 5.000000e-01 : f32
    %147 = vector.broadcast %cst_64 : f32 to vector<2x16xf32>
    %148 = arith.mulf %147, %146 : vector<2x16xf32>
    %149 = arith.mulf %138, %105 : vector<2x16xf32>
    %150 = arith.mulf %130, %140 : vector<2x16xf32>
    %151 = arith.addf %149, %150 : vector<2x16xf32>
    %152 = math.tanh %151 : vector<2x16xf32>
    %153 = arith.mulf %148, %152 : vector<2x16xf32>
    %c2_i32 = arith.constant 2 : i32
    %154 = vector.broadcast %c2_i32 : i32 to vector<2x1xi32>
    %155 = arith.cmpi sgt, %7, %154 : vector<2x1xi32>
    %156 = vector.shape_cast %155 : vector<2x1xi1> to vector<2x1xi1>
    %157 = vector.broadcast %156 : vector<2x1xi1> to vector<2x16xi1>
    %158 = arith.select %157, %151, %105 : vector<2x16xi1>, vector<2x16xf32>
    %159 = vector.shape_cast %155 : vector<2x1xi1> to vector<2x1xi1>
    %160 = vector.broadcast %159 : vector<2x1xi1> to vector<2x16xi1>
    %161 = arith.select %160, %153, %108 : vector<2x16xi1>, vector<2x16xf32>
    %cst_65 = arith.constant 0.000000e+00 : f32
    %162 = vector.shape_cast %155 : vector<2x1xi1> to vector<2x1xi1>
    %163 = vector.broadcast %162 : vector<2x1xi1> to vector<2x16xi1>
    %164 = vector.broadcast %cst_65 : f32 to vector<2x16xf32>
    %165 = arith.select %163, %153, %164 : vector<2x16xi1>, vector<2x16xf32>
    %c0_66 = arith.constant 0 : index
    %c2_67 = arith.constant 2 : index
    %c0_68 = arith.constant 0 : index
    %c0_69 = arith.constant 0 : index
    %166 = vector.load %arg6[%c0_66, %c2_67, %c0_68, %c0_69] : memref<1x8x2x16xf32, #tpu.memory_space<vmem>>, vector<1x1x2x16xf32>
    %167 = vector.shape_cast %166 : vector<1x1x2x16xf32> to vector<2x16xf32>
    %168 = vector.shape_cast %165 : vector<2x16xf32> to vector<1x1x2x16xf32>
    tpu.vector_store %arg6[%c0_66, %c2_67, %c0_68, %c0_69], %168 {strides = array<i32>} : memref<1x8x2x16xf32, #tpu.memory_space<vmem>>, vector<1x1x2x16xf32>,
    %c0_70 = arith.constant 0 : index
    %c3 = arith.constant 3 : index
    %c0_71 = arith.constant 0 : index
    %c0_72 = arith.constant 0 : index
    %169 = vector.load %arg2[%c0_70, %c3, %c0_71, %c0_72] : memref<1x8x2x32xf32, #tpu.memory_space<vmem>>, vector<1x1x2x32xf32>
    %170 = vector.shape_cast %169 : vector<1x1x2x32xf32> to vector<2x32xf32>
    %cst_73 = arith.constant dense<0.000000e+00> : vector<2x64xf32>
    %171 = tpu.matmul %170, %1, %cst_73 {dimension_numbers = #tpu.dot_dimension_numbers<[1], [0], [0], [1], [0, 0, 1, 1], [], []>} : vector<2x32xf32>, vector<32x64xf32>, vector<2x64xf32> -> vector<2x64xf32>
    %cst_74 = arith.constant dense<0.000000e+00> : vector<2x64xf32>
    %172 = tpu.matmul %161, %3, %cst_74 {dimension_numbers = #tpu.dot_dimension_numbers<[1], [0], [0], [1], [0, 0, 1, 1], [], []>} : vector<2x16xf32>, vector<16x64xf32>, vector<2x64xf32> -> vector<2x64xf32>
    %173 = arith.addf %171, %172 : vector<2x64xf32>
    %174 = vector.broadcast %5 : vector<1x64xf32> to vector<2x64xf32>
    %175 = arith.addf %173, %174 : vector<2x64xf32>
    %176 = vector.extract_strided_slice %175 {offsets = [0, 0], sizes = [2, 16], strides = [1, 1]} : vector<2x64xf32> to vector<2x16xf32>
    %cst_75 = arith.constant 5.000000e-01 : f32
    %177 = vector.broadcast %cst_75 : f32 to vector<2x16xf32>
    %178 = arith.mulf %177, %176 : vector<2x16xf32>
    %179 = math.tanh %178 : vector<2x16xf32>
    %cst_76 = arith.constant 1.000000e+00 : f32
    %180 = vector.broadcast %cst_76 : f32 to vector<2x16xf32>
    %181 = arith.addf %179, %180 : vector<2x16xf32>
    %cst_77 = arith.constant 5.000000e-01 : f32
    %182 = vector.broadcast %cst_77 : f32 to vector<2x16xf32>
    %183 = arith.mulf %182, %181 : vector<2x16xf32>
    %184 = vector.extract_strided_slice %175 {offsets = [0, 16], sizes = [2, 16], strides = [1, 1]} : vector<2x64xf32> to vector<2x16xf32>
    %cst_78 = arith.constant 5.000000e-01 : f32
    %185 = vector.broadcast %cst_78 : f32 to vector<2x16xf32>
    %186 = arith.mulf %185, %184 : vector<2x16xf32>
    %187 = math.tanh %186 : vector<2x16xf32>
    %cst_79 = arith.constant 1.000000e+00 : f32
    %188 = vector.broadcast %cst_79 : f32 to vector<2x16xf32>
    %189 = arith.addf %187, %188 : vector<2x16xf32>
    %cst_80 = arith.constant 5.000000e-01 : f32
    %190 = vector.broadcast %cst_80 : f32 to vector<2x16xf32>
    %191 = arith.mulf %190, %189 : vector<2x16xf32>
    %192 = vector.extract_strided_slice %175 {offsets = [0, 32], sizes = [2, 16], strides = [1, 1]} : vector<2x64xf32> to vector<2x16xf32>
    %193 = math.tanh %192 : vector<2x16xf32>
    %194 = vector.extract_strided_slice %175 {offsets = [0, 48], sizes = [2, 16], strides = [1, 1]} : vector<2x64xf32> to vector<2x16xf32>
    %cst_81 = arith.constant 5.000000e-01 : f32
    %195 = vector.broadcast %cst_81 : f32 to vector<2x16xf32>
    %196 = arith.mulf %195, %194 : vector<2x16xf32>
    %197 = math.tanh %196 : vector<2x16xf32>
    %cst_82 = arith.constant 1.000000e+00 : f32
    %198 = vector.broadcast %cst_82 : f32 to vector<2x16xf32>
    %199 = arith.addf %197, %198 : vector<2x16xf32>
    %cst_83 = arith.constant 5.000000e-01 : f32
    %200 = vector.broadcast %cst_83 : f32 to vector<2x16xf32>
    %201 = arith.mulf %200, %199 : vector<2x16xf32>
    %202 = arith.mulf %191, %158 : vector<2x16xf32>
    %203 = arith.mulf %183, %193 : vector<2x16xf32>
    %204 = arith.addf %202, %203 : vector<2x16xf32>
    %205 = math.tanh %204 : vector<2x16xf32>
    %206 = arith.mulf %201, %205 : vector<2x16xf32>
    %c3_i32 = arith.constant 3 : i32
    %207 = vector.broadcast %c3_i32 : i32 to vector<2x1xi32>
    %208 = arith.cmpi sgt, %7, %207 : vector<2x1xi32>
    %209 = vector.shape_cast %208 : vector<2x1xi1> to vector<2x1xi1>
    %210 = vector.broadcast %209 : vector<2x1xi1> to vector<2x16xi1>
    %211 = arith.select %210, %204, %158 : vector<2x16xi1>, vector<2x16xf32>
    %212 = vector.shape_cast %208 : vector<2x1xi1> to vector<2x1xi1>
    %213 = vector.broadcast %212 : vector<2x1xi1> to vector<2x16xi1>
    %214 = arith.select %213, %206, %161 : vector<2x16xi1>, vector<2x16xf32>
    %cst_84 = arith.constant 0.000000e+00 : f32
    %215 = vector.shape_cast %208 : vector<2x1xi1> to vector<2x1xi1>
    %216 = vector.broadcast %215 : vector<2x1xi1> to vector<2x16xi1>
    %217 = vector.broadcast %cst_84 : f32 to vector<2x16xf32>
    %218 = arith.select %216, %206, %217 : vector<2x16xi1>, vector<2x16xf32>
    %c0_85 = arith.constant 0 : index
    %c3_86 = arith.constant 3 : index
    %c0_87 = arith.constant 0 : index
    %c0_88 = arith.constant 0 : index
    %219 = vector.load %arg6[%c0_85, %c3_86, %c0_87, %c0_88] : memref<1x8x2x16xf32, #tpu.memory_space<vmem>>, vector<1x1x2x16xf32>
    %220 = vector.shape_cast %219 : vector<1x1x2x16xf32> to vector<2x16xf32>
    %221 = vector.shape_cast %218 : vector<2x16xf32> to vector<1x1x2x16xf32>
    tpu.vector_store %arg6[%c0_85, %c3_86, %c0_87, %c0_88], %221 {strides = array<i32>} : memref<1x8x2x16xf32, #tpu.memory_space<vmem>>, vector<1x1x2x16xf32>,
    %c0_89 = arith.constant 0 : index
    %c4 = arith.constant 4 : index
    %c0_90 = arith.constant 0 : index
    %c0_91 = arith.constant 0 : index
    %222 = vector.load %arg2[%c0_89, %c4, %c0_90, %c0_91] : memref<1x8x2x32xf32, #tpu.memory_space<vmem>>, vector<1x1x2x32xf32>
    %223 = vector.shape_cast %222 : vector<1x1x2x32xf32> to vector<2x32xf32>
    %cst_92 = arith.constant dense<0.000000e+00> : vector<2x64xf32>
    %224 = tpu.matmul %223, %1, %cst_92 {dimension_numbers = #tpu.dot_dimension_numbers<[1], [0], [0], [1], [0, 0, 1, 1], [], []>} : vector<2x32xf32>, vector<32x64xf32>, vector<2x64xf32> -> vector<2x64xf32>
    %cst_93 = arith.constant dense<0.000000e+00> : vector<2x64xf32>
    %225 = tpu.matmul %214, %3, %cst_93 {dimension_numbers = #tpu.dot_dimension_numbers<[1], [0], [0], [1], [0, 0, 1, 1], [], []>} : vector<2x16xf32>, vector<16x64xf32>, vector<2x64xf32> -> vector<2x64xf32>
    %226 = arith.addf %224, %225 : vector<2x64xf32>
    %227 = vector.broadcast %5 : vector<1x64xf32> to vector<2x64xf32>
    %228 = arith.addf %226, %227 : vector<2x64xf32>
    %229 = vector.extract_strided_slice %228 {offsets = [0, 0], sizes = [2, 16], strides = [1, 1]} : vector<2x64xf32> to vector<2x16xf32>
    %cst_94 = arith.constant 5.000000e-01 : f32
    %230 = vector.broadcast %cst_94 : f32 to vector<2x16xf32>
    %231 = arith.mulf %230, %229 : vector<2x16xf32>
    %232 = math.tanh %231 : vector<2x16xf32>
    %cst_95 = arith.constant 1.000000e+00 : f32
    %233 = vector.broadcast %cst_95 : f32 to vector<2x16xf32>
    %234 = arith.addf %232, %233 : vector<2x16xf32>
    %cst_96 = arith.constant 5.000000e-01 : f32
    %235 = vector.broadcast %cst_96 : f32 to vector<2x16xf32>
    %236 = arith.mulf %235, %234 : vector<2x16xf32>
    %237 = vector.extract_strided_slice %228 {offsets = [0, 16], sizes = [2, 16], strides = [1, 1]} : vector<2x64xf32> to vector<2x16xf32>
    %cst_97 = arith.constant 5.000000e-01 : f32
    %238 = vector.broadcast %cst_97 : f32 to vector<2x16xf32>
    %239 = arith.mulf %238, %237 : vector<2x16xf32>
    %240 = math.tanh %239 : vector<2x16xf32>
    %cst_98 = arith.constant 1.000000e+00 : f32
    %241 = vector.broadcast %cst_98 : f32 to vector<2x16xf32>
    %242 = arith.addf %240, %241 : vector<2x16xf32>
    %cst_99 = arith.constant 5.000000e-01 : f32
    %243 = vector.broadcast %cst_99 : f32 to vector<2x16xf32>
    %244 = arith.mulf %243, %242 : vector<2x16xf32>
    %245 = vector.extract_strided_slice %228 {offsets = [0, 32], sizes = [2, 16], strides = [1, 1]} : vector<2x64xf32> to vector<2x16xf32>
    %246 = math.tanh %245 : vector<2x16xf32>
    %247 = vector.extract_strided_slice %228 {offsets = [0, 48], sizes = [2, 16], strides = [1, 1]} : vector<2x64xf32> to vector<2x16xf32>
    %cst_100 = arith.constant 5.000000e-01 : f32
    %248 = vector.broadcast %cst_100 : f32 to vector<2x16xf32>
    %249 = arith.mulf %248, %247 : vector<2x16xf32>
    %250 = math.tanh %249 : vector<2x16xf32>
    %cst_101 = arith.constant 1.000000e+00 : f32
    %251 = vector.broadcast %cst_101 : f32 to vector<2x16xf32>
    %252 = arith.addf %250, %251 : vector<2x16xf32>
    %cst_102 = arith.constant 5.000000e-01 : f32
    %253 = vector.broadcast %cst_102 : f32 to vector<2x16xf32>
    %254 = arith.mulf %253, %252 : vector<2x16xf32>
    %255 = arith.mulf %244, %211 : vector<2x16xf32>
    %256 = arith.mulf %236, %246 : vector<2x16xf32>
    %257 = arith.addf %255, %256 : vector<2x16xf32>
    %258 = math.tanh %257 : vector<2x16xf32>
    %259 = arith.mulf %254, %258 : vector<2x16xf32>
    %c4_i32 = arith.constant 4 : i32
    %260 = vector.broadcast %c4_i32 : i32 to vector<2x1xi32>
    %261 = arith.cmpi sgt, %7, %260 : vector<2x1xi32>
    %262 = vector.shape_cast %261 : vector<2x1xi1> to vector<2x1xi1>
    %263 = vector.broadcast %262 : vector<2x1xi1> to vector<2x16xi1>
    %264 = arith.select %263, %257, %211 : vector<2x16xi1>, vector<2x16xf32>
    %265 = vector.shape_cast %261 : vector<2x1xi1> to vector<2x1xi1>
    %266 = vector.broadcast %265 : vector<2x1xi1> to vector<2x16xi1>
    %267 = arith.select %266, %259, %214 : vector<2x16xi1>, vector<2x16xf32>
    %cst_103 = arith.constant 0.000000e+00 : f32
    %268 = vector.shape_cast %261 : vector<2x1xi1> to vector<2x1xi1>
    %269 = vector.broadcast %268 : vector<2x1xi1> to vector<2x16xi1>
    %270 = vector.broadcast %cst_103 : f32 to vector<2x16xf32>
    %271 = arith.select %269, %259, %270 : vector<2x16xi1>, vector<2x16xf32>
    %c0_104 = arith.constant 0 : index
    %c4_105 = arith.constant 4 : index
    %c0_106 = arith.constant 0 : index
    %c0_107 = arith.constant 0 : index
    %272 = vector.load %arg6[%c0_104, %c4_105, %c0_106, %c0_107] : memref<1x8x2x16xf32, #tpu.memory_space<vmem>>, vector<1x1x2x16xf32>
    %273 = vector.shape_cast %272 : vector<1x1x2x16xf32> to vector<2x16xf32>
    %274 = vector.shape_cast %271 : vector<2x16xf32> to vector<1x1x2x16xf32>
    tpu.vector_store %arg6[%c0_104, %c4_105, %c0_106, %c0_107], %274 {strides = array<i32>} : memref<1x8x2x16xf32, #tpu.memory_space<vmem>>, vector<1x1x2x16xf32>,
    %c0_108 = arith.constant 0 : index
    %c5 = arith.constant 5 : index
    %c0_109 = arith.constant 0 : index
    %c0_110 = arith.constant 0 : index
    %275 = vector.load %arg2[%c0_108, %c5, %c0_109, %c0_110] : memref<1x8x2x32xf32, #tpu.memory_space<vmem>>, vector<1x1x2x32xf32>
    %276 = vector.shape_cast %275 : vector<1x1x2x32xf32> to vector<2x32xf32>
    %cst_111 = arith.constant dense<0.000000e+00> : vector<2x64xf32>
    %277 = tpu.matmul %276, %1, %cst_111 {dimension_numbers = #tpu.dot_dimension_numbers<[1], [0], [0], [1], [0, 0, 1, 1], [], []>} : vector<2x32xf32>, vector<32x64xf32>, vector<2x64xf32> -> vector<2x64xf32>
    %cst_112 = arith.constant dense<0.000000e+00> : vector<2x64xf32>
    %278 = tpu.matmul %267, %3, %cst_112 {dimension_numbers = #tpu.dot_dimension_numbers<[1], [0], [0], [1], [0, 0, 1, 1], [], []>} : vector<2x16xf32>, vector<16x64xf32>, vector<2x64xf32> -> vector<2x64xf32>
    %279 = arith.addf %277, %278 : vector<2x64xf32>
    %280 = vector.broadcast %5 : vector<1x64xf32> to vector<2x64xf32>
    %281 = arith.addf %279, %280 : vector<2x64xf32>
    %282 = vector.extract_strided_slice %281 {offsets = [0, 0], sizes = [2, 16], strides = [1, 1]} : vector<2x64xf32> to vector<2x16xf32>
    %cst_113 = arith.constant 5.000000e-01 : f32
    %283 = vector.broadcast %cst_113 : f32 to vector<2x16xf32>
    %284 = arith.mulf %283, %282 : vector<2x16xf32>
    %285 = math.tanh %284 : vector<2x16xf32>
    %cst_114 = arith.constant 1.000000e+00 : f32
    %286 = vector.broadcast %cst_114 : f32 to vector<2x16xf32>
    %287 = arith.addf %285, %286 : vector<2x16xf32>
    %cst_115 = arith.constant 5.000000e-01 : f32
    %288 = vector.broadcast %cst_115 : f32 to vector<2x16xf32>
    %289 = arith.mulf %288, %287 : vector<2x16xf32>
    %290 = vector.extract_strided_slice %281 {offsets = [0, 16], sizes = [2, 16], strides = [1, 1]} : vector<2x64xf32> to vector<2x16xf32>
    %cst_116 = arith.constant 5.000000e-01 : f32
    %291 = vector.broadcast %cst_116 : f32 to vector<2x16xf32>
    %292 = arith.mulf %291, %290 : vector<2x16xf32>
    %293 = math.tanh %292 : vector<2x16xf32>
    %cst_117 = arith.constant 1.000000e+00 : f32
    %294 = vector.broadcast %cst_117 : f32 to vector<2x16xf32>
    %295 = arith.addf %293, %294 : vector<2x16xf32>
    %cst_118 = arith.constant 5.000000e-01 : f32
    %296 = vector.broadcast %cst_118 : f32 to vector<2x16xf32>
    %297 = arith.mulf %296, %295 : vector<2x16xf32>
    %298 = vector.extract_strided_slice %281 {offsets = [0, 32], sizes = [2, 16], strides = [1, 1]} : vector<2x64xf32> to vector<2x16xf32>
    %299 = math.tanh %298 : vector<2x16xf32>
    %300 = vector.extract_strided_slice %281 {offsets = [0, 48], sizes = [2, 16], strides = [1, 1]} : vector<2x64xf32> to vector<2x16xf32>
    %cst_119 = arith.constant 5.000000e-01 : f32
    %301 = vector.broadcast %cst_119 : f32 to vector<2x16xf32>
    %302 = arith.mulf %301, %300 : vector<2x16xf32>
    %303 = math.tanh %302 : vector<2x16xf32>
    %cst_120 = arith.constant 1.000000e+00 : f32
    %304 = vector.broadcast %cst_120 : f32 to vector<2x16xf32>
    %305 = arith.addf %303, %304 : vector<2x16xf32>
    %cst_121 = arith.constant 5.000000e-01 : f32
    %306 = vector.broadcast %cst_121 : f32 to vector<2x16xf32>
    %307 = arith.mulf %306, %305 : vector<2x16xf32>
    %308 = arith.mulf %297, %264 : vector<2x16xf32>
    %309 = arith.mulf %289, %299 : vector<2x16xf32>
    %310 = arith.addf %308, %309 : vector<2x16xf32>
    %311 = math.tanh %310 : vector<2x16xf32>
    %312 = arith.mulf %307, %311 : vector<2x16xf32>
    %c5_i32 = arith.constant 5 : i32
    %313 = vector.broadcast %c5_i32 : i32 to vector<2x1xi32>
    %314 = arith.cmpi sgt, %7, %313 : vector<2x1xi32>
    %315 = vector.shape_cast %314 : vector<2x1xi1> to vector<2x1xi1>
    %316 = vector.broadcast %315 : vector<2x1xi1> to vector<2x16xi1>
    %317 = arith.select %316, %310, %264 : vector<2x16xi1>, vector<2x16xf32>
    %318 = vector.shape_cast %314 : vector<2x1xi1> to vector<2x1xi1>
    %319 = vector.broadcast %318 : vector<2x1xi1> to vector<2x16xi1>
    %320 = arith.select %319, %312, %267 : vector<2x16xi1>, vector<2x16xf32>
    %cst_122 = arith.constant 0.000000e+00 : f32
    %321 = vector.shape_cast %314 : vector<2x1xi1> to vector<2x1xi1>
    %322 = vector.broadcast %321 : vector<2x1xi1> to vector<2x16xi1>
    %323 = vector.broadcast %cst_122 : f32 to vector<2x16xf32>
    %324 = arith.select %322, %312, %323 : vector<2x16xi1>, vector<2x16xf32>
    %c0_123 = arith.constant 0 : index
    %c5_124 = arith.constant 5 : index
    %c0_125 = arith.constant 0 : index
    %c0_126 = arith.constant 0 : index
    %325 = vector.load %arg6[%c0_123, %c5_124, %c0_125, %c0_126] : memref<1x8x2x16xf32, #tpu.memory_space<vmem>>, vector<1x1x2x16xf32>
    %326 = vector.shape_cast %325 : vector<1x1x2x16xf32> to vector<2x16xf32>
    %327 = vector.shape_cast %324 : vector<2x16xf32> to vector<1x1x2x16xf32>
    tpu.vector_store %arg6[%c0_123, %c5_124, %c0_125, %c0_126], %327 {strides = array<i32>} : memref<1x8x2x16xf32, #tpu.memory_space<vmem>>, vector<1x1x2x16xf32>,
    %c0_127 = arith.constant 0 : index
    %c6 = arith.constant 6 : index
    %c0_128 = arith.constant 0 : index
    %c0_129 = arith.constant 0 : index
    %328 = vector.load %arg2[%c0_127, %c6, %c0_128, %c0_129] : memref<1x8x2x32xf32, #tpu.memory_space<vmem>>, vector<1x1x2x32xf32>
    %329 = vector.shape_cast %328 : vector<1x1x2x32xf32> to vector<2x32xf32>
    %cst_130 = arith.constant dense<0.000000e+00> : vector<2x64xf32>
    %330 = tpu.matmul %329, %1, %cst_130 {dimension_numbers = #tpu.dot_dimension_numbers<[1], [0], [0], [1], [0, 0, 1, 1], [], []>} : vector<2x32xf32>, vector<32x64xf32>, vector<2x64xf32> -> vector<2x64xf32>
    %cst_131 = arith.constant dense<0.000000e+00> : vector<2x64xf32>
    %331 = tpu.matmul %320, %3, %cst_131 {dimension_numbers = #tpu.dot_dimension_numbers<[1], [0], [0], [1], [0, 0, 1, 1], [], []>} : vector<2x16xf32>, vector<16x64xf32>, vector<2x64xf32> -> vector<2x64xf32>
    %332 = arith.addf %330, %331 : vector<2x64xf32>
    %333 = vector.broadcast %5 : vector<1x64xf32> to vector<2x64xf32>
    %334 = arith.addf %332, %333 : vector<2x64xf32>
    %335 = vector.extract_strided_slice %334 {offsets = [0, 0], sizes = [2, 16], strides = [1, 1]} : vector<2x64xf32> to vector<2x16xf32>
    %cst_132 = arith.constant 5.000000e-01 : f32
    %336 = vector.broadcast %cst_132 : f32 to vector<2x16xf32>
    %337 = arith.mulf %336, %335 : vector<2x16xf32>
    %338 = math.tanh %337 : vector<2x16xf32>
    %cst_133 = arith.constant 1.000000e+00 : f32
    %339 = vector.broadcast %cst_133 : f32 to vector<2x16xf32>
    %340 = arith.addf %338, %339 : vector<2x16xf32>
    %cst_134 = arith.constant 5.000000e-01 : f32
    %341 = vector.broadcast %cst_134 : f32 to vector<2x16xf32>
    %342 = arith.mulf %341, %340 : vector<2x16xf32>
    %343 = vector.extract_strided_slice %334 {offsets = [0, 16], sizes = [2, 16], strides = [1, 1]} : vector<2x64xf32> to vector<2x16xf32>
    %cst_135 = arith.constant 5.000000e-01 : f32
    %344 = vector.broadcast %cst_135 : f32 to vector<2x16xf32>
    %345 = arith.mulf %344, %343 : vector<2x16xf32>
    %346 = math.tanh %345 : vector<2x16xf32>
    %cst_136 = arith.constant 1.000000e+00 : f32
    %347 = vector.broadcast %cst_136 : f32 to vector<2x16xf32>
    %348 = arith.addf %346, %347 : vector<2x16xf32>
    %cst_137 = arith.constant 5.000000e-01 : f32
    %349 = vector.broadcast %cst_137 : f32 to vector<2x16xf32>
    %350 = arith.mulf %349, %348 : vector<2x16xf32>
    %351 = vector.extract_strided_slice %334 {offsets = [0, 32], sizes = [2, 16], strides = [1, 1]} : vector<2x64xf32> to vector<2x16xf32>
    %352 = math.tanh %351 : vector<2x16xf32>
    %353 = vector.extract_strided_slice %334 {offsets = [0, 48], sizes = [2, 16], strides = [1, 1]} : vector<2x64xf32> to vector<2x16xf32>
    %cst_138 = arith.constant 5.000000e-01 : f32
    %354 = vector.broadcast %cst_138 : f32 to vector<2x16xf32>
    %355 = arith.mulf %354, %353 : vector<2x16xf32>
    %356 = math.tanh %355 : vector<2x16xf32>
    %cst_139 = arith.constant 1.000000e+00 : f32
    %357 = vector.broadcast %cst_139 : f32 to vector<2x16xf32>
    %358 = arith.addf %356, %357 : vector<2x16xf32>
    %cst_140 = arith.constant 5.000000e-01 : f32
    %359 = vector.broadcast %cst_140 : f32 to vector<2x16xf32>
    %360 = arith.mulf %359, %358 : vector<2x16xf32>
    %361 = arith.mulf %350, %317 : vector<2x16xf32>
    %362 = arith.mulf %342, %352 : vector<2x16xf32>
    %363 = arith.addf %361, %362 : vector<2x16xf32>
    %364 = math.tanh %363 : vector<2x16xf32>
    %365 = arith.mulf %360, %364 : vector<2x16xf32>
    %c6_i32 = arith.constant 6 : i32
    %366 = vector.broadcast %c6_i32 : i32 to vector<2x1xi32>
    %367 = arith.cmpi sgt, %7, %366 : vector<2x1xi32>
    %368 = vector.shape_cast %367 : vector<2x1xi1> to vector<2x1xi1>
    %369 = vector.broadcast %368 : vector<2x1xi1> to vector<2x16xi1>
    %370 = arith.select %369, %363, %317 : vector<2x16xi1>, vector<2x16xf32>
    %371 = vector.shape_cast %367 : vector<2x1xi1> to vector<2x1xi1>
    %372 = vector.broadcast %371 : vector<2x1xi1> to vector<2x16xi1>
    %373 = arith.select %372, %365, %320 : vector<2x16xi1>, vector<2x16xf32>
    %cst_141 = arith.constant 0.000000e+00 : f32
    %374 = vector.shape_cast %367 : vector<2x1xi1> to vector<2x1xi1>
    %375 = vector.broadcast %374 : vector<2x1xi1> to vector<2x16xi1>
    %376 = vector.broadcast %cst_141 : f32 to vector<2x16xf32>
    %377 = arith.select %375, %365, %376 : vector<2x16xi1>, vector<2x16xf32>
    %c0_142 = arith.constant 0 : index
    %c6_143 = arith.constant 6 : index
    %c0_144 = arith.constant 0 : index
    %c0_145 = arith.constant 0 : index
    %378 = vector.load %arg6[%c0_142, %c6_143, %c0_144, %c0_145] : memref<1x8x2x16xf32, #tpu.memory_space<vmem>>, vector<1x1x2x16xf32>
    %379 = vector.shape_cast %378 : vector<1x1x2x16xf32> to vector<2x16xf32>
    %380 = vector.shape_cast %377 : vector<2x16xf32> to vector<1x1x2x16xf32>
    tpu.vector_store %arg6[%c0_142, %c6_143, %c0_144, %c0_145], %380 {strides = array<i32>} : memref<1x8x2x16xf32, #tpu.memory_space<vmem>>, vector<1x1x2x16xf32>,
    %c0_146 = arith.constant 0 : index
    %c7 = arith.constant 7 : index
    %c0_147 = arith.constant 0 : index
    %c0_148 = arith.constant 0 : index
    %381 = vector.load %arg2[%c0_146, %c7, %c0_147, %c0_148] : memref<1x8x2x32xf32, #tpu.memory_space<vmem>>, vector<1x1x2x32xf32>
    %382 = vector.shape_cast %381 : vector<1x1x2x32xf32> to vector<2x32xf32>
    %cst_149 = arith.constant dense<0.000000e+00> : vector<2x64xf32>
    %383 = tpu.matmul %382, %1, %cst_149 {dimension_numbers = #tpu.dot_dimension_numbers<[1], [0], [0], [1], [0, 0, 1, 1], [], []>} : vector<2x32xf32>, vector<32x64xf32>, vector<2x64xf32> -> vector<2x64xf32>
    %cst_150 = arith.constant dense<0.000000e+00> : vector<2x64xf32>
    %384 = tpu.matmul %373, %3, %cst_150 {dimension_numbers = #tpu.dot_dimension_numbers<[1], [0], [0], [1], [0, 0, 1, 1], [], []>} : vector<2x16xf32>, vector<16x64xf32>, vector<2x64xf32> -> vector<2x64xf32>
    %385 = arith.addf %383, %384 : vector<2x64xf32>
    %386 = vector.broadcast %5 : vector<1x64xf32> to vector<2x64xf32>
    %387 = arith.addf %385, %386 : vector<2x64xf32>
    %388 = vector.extract_strided_slice %387 {offsets = [0, 0], sizes = [2, 16], strides = [1, 1]} : vector<2x64xf32> to vector<2x16xf32>
    %cst_151 = arith.constant 5.000000e-01 : f32
    %389 = vector.broadcast %cst_151 : f32 to vector<2x16xf32>
    %390 = arith.mulf %389, %388 : vector<2x16xf32>
    %391 = math.tanh %390 : vector<2x16xf32>
    %cst_152 = arith.constant 1.000000e+00 : f32
    %392 = vector.broadcast %cst_152 : f32 to vector<2x16xf32>
    %393 = arith.addf %391, %392 : vector<2x16xf32>
    %cst_153 = arith.constant 5.000000e-01 : f32
    %394 = vector.broadcast %cst_153 : f32 to vector<2x16xf32>
    %395 = arith.mulf %394, %393 : vector<2x16xf32>
    %396 = vector.extract_strided_slice %387 {offsets = [0, 16], sizes = [2, 16], strides = [1, 1]} : vector<2x64xf32> to vector<2x16xf32>
    %cst_154 = arith.constant 5.000000e-01 : f32
    %397 = vector.broadcast %cst_154 : f32 to vector<2x16xf32>
    %398 = arith.mulf %397, %396 : vector<2x16xf32>
    %399 = math.tanh %398 : vector<2x16xf32>
    %cst_155 = arith.constant 1.000000e+00 : f32
    %400 = vector.broadcast %cst_155 : f32 to vector<2x16xf32>
    %401 = arith.addf %399, %400 : vector<2x16xf32>
    %cst_156 = arith.constant 5.000000e-01 : f32
    %402 = vector.broadcast %cst_156 : f32 to vector<2x16xf32>
    %403 = arith.mulf %402, %401 : vector<2x16xf32>
    %404 = vector.extract_strided_slice %387 {offsets = [0, 32], sizes = [2, 16], strides = [1, 1]} : vector<2x64xf32> to vector<2x16xf32>
    %405 = math.tanh %404 : vector<2x16xf32>
    %406 = vector.extract_strided_slice %387 {offsets = [0, 48], sizes = [2, 16], strides = [1, 1]} : vector<2x64xf32> to vector<2x16xf32>
    %cst_157 = arith.constant 5.000000e-01 : f32
    %407 = vector.broadcast %cst_157 : f32 to vector<2x16xf32>
    %408 = arith.mulf %407, %406 : vector<2x16xf32>
    %409 = math.tanh %408 : vector<2x16xf32>
    %cst_158 = arith.constant 1.000000e+00 : f32
    %410 = vector.broadcast %cst_158 : f32 to vector<2x16xf32>
    %411 = arith.addf %409, %410 : vector<2x16xf32>
    %cst_159 = arith.constant 5.000000e-01 : f32
    %412 = vector.broadcast %cst_159 : f32 to vector<2x16xf32>
    %413 = arith.mulf %412, %411 : vector<2x16xf32>
    %414 = arith.mulf %403, %370 : vector<2x16xf32>
    %415 = arith.mulf %395, %405 : vector<2x16xf32>
    %416 = arith.addf %414, %415 : vector<2x16xf32>
    %417 = math.tanh %416 : vector<2x16xf32>
    %418 = arith.mulf %413, %417 : vector<2x16xf32>
    %c7_i32 = arith.constant 7 : i32
    %419 = vector.broadcast %c7_i32 : i32 to vector<2x1xi32>
    %420 = arith.cmpi sgt, %7, %419 : vector<2x1xi32>
    %cst_160 = arith.constant 0.000000e+00 : f32
    %421 = vector.shape_cast %420 : vector<2x1xi1> to vector<2x1xi1>
    %422 = vector.broadcast %421 : vector<2x1xi1> to vector<2x16xi1>
    %423 = vector.broadcast %cst_160 : f32 to vector<2x16xf32>
    %424 = arith.select %422, %418, %423 : vector<2x16xi1>, vector<2x16xf32>
    %c0_161 = arith.constant 0 : index
    %c7_162 = arith.constant 7 : index
    %c0_163 = arith.constant 0 : index
    %c0_164 = arith.constant 0 : index
    %425 = vector.load %arg6[%c0_161, %c7_162, %c0_163, %c0_164] : memref<1x8x2x16xf32, #tpu.memory_space<vmem>>, vector<1x1x2x16xf32>
    %426 = vector.shape_cast %425 : vector<1x1x2x16xf32> to vector<2x16xf32>
    %427 = vector.shape_cast %424 : vector<2x16xf32> to vector<1x1x2x16xf32>
    tpu.vector_store %arg6[%c0_161, %c7_162, %c0_163, %c0_164], %427 {strides = array<i32>} : memref<1x8x2x16xf32, #tpu.memory_space<vmem>>, vector<1x1x2x16xf32>,
    return
  }
  func.func @transform_0(%arg0: i32) -> (i32, i32, i32) {
    %c0_i32 = arith.constant 0 : i32
    %c0_i32_0 = arith.constant 0 : i32
    %c0_i32_1 = arith.constant 0 : i32
    return %arg0, %c0_i32, %c0_i32_0 : i32, i32, i32
  }
  func.func @transform_1(%arg0: i32) -> (i32, i32, i32, i32) {
    %c0_i32 = arith.constant 0 : i32
    %c0_i32_0 = arith.constant 0 : i32
    %c0_i32_1 = arith.constant 0 : i32
    %c0_i32_2 = arith.constant 0 : i32
    return %arg0, %c0_i32, %c0_i32_0, %c0_i32_1 : i32, i32, i32, i32
  }
  func.func @transform_2(%arg0: i32) -> (i32, i32, i32) {
    %c0_i32 = arith.constant 0 : i32
    %c0_i32_0 = arith.constant 0 : i32
    %c0_i32_1 = arith.constant 0 : i32
    return %arg0, %c0_i32, %c0_i32_0 : i32, i32, i32
  }
  func.func @transform_3(%arg0: i32) -> (i32, i32, i32) {
    %c0_i32 = arith.constant 0 : i32
    %c0_i32_0 = arith.constant 0 : i32
    %c0_i32_1 = arith.constant 0 : i32
    return %arg0, %c0_i32, %c0_i32_0 : i32, i32, i32
  }
  func.func @transform_4(%arg0: i32) -> (i32, i32, i32) {
    %c0_i32 = arith.constant 0 : i32
    %c0_i32_0 = arith.constant 0 : i32
    %c0_i32_1 = arith.constant 0 : i32
    return %arg0, %c0_i32, %c0_i32_0 : i32, i32, i32
  }
  func.func @transform_5(%arg0: i32) -> (i32, i32, i32, i32) {
    %c0_i32 = arith.constant 0 : i32
    %c0_i32_0 = arith.constant 0 : i32
    %c0_i32_1 = arith.constant 0 : i32
    %c0_i32_2 = arith.constant 0 : i32
    return %arg0, %c0_i32, %c0_i32_0, %c0_i32_1 : i32, i32, i32, i32
  }
}

module attributes {stable_mosaic.version = 11 : i64} {
  func.func @_multi_lstm_kernel(%arg0: i32, %arg1: memref<1x16x1xi32, #tpu.memory_space<vmem>>, %arg2: memref<1x8x16x32xf32, #tpu.memory_space<vmem>>, %arg3: memref<1x32x64xf32, #tpu.memory_space<vmem>>, %arg4: memref<1x16x64xf32, #tpu.memory_space<vmem>>, %arg5: memref<1x1x64xf32, #tpu.memory_space<vmem>>, %arg6: memref<1x8x16x16xf32, #tpu.memory_space<vmem>>) attributes {dimension_semantics = [#tpu.dimension_semantics<parallel>], iteration_bounds = array<i64: 4>, scalar_prefetch = 0 : i64, scratch_operands = 0 : i64, tpu.core_type = #tpu.core_type<tc>, window_params = [{transform_indices = @transform_0, window_bounds = array<i64: 1, 16, 1>}, {transform_indices = @transform_1, window_bounds = array<i64: 1, 8, 16, 32>}, {transform_indices = @transform_2, window_bounds = array<i64: 1, 32, 64>}, {transform_indices = @transform_3, window_bounds = array<i64: 1, 16, 64>}, {transform_indices = @transform_4, window_bounds = array<i64: 1, 1, 64>}, {transform_indices = @transform_5, window_bounds = array<i64: 1, 8, 16, 16>}]} {
    %c0 = arith.constant 0 : index
    %c0_0 = arith.constant 0 : index
    %c0_1 = arith.constant 0 : index
    %0 = vector.load %arg3[%c0, %c0_0, %c0_1] : memref<1x32x64xf32, #tpu.memory_space<vmem>>, vector<1x32x64xf32>
    %1 = vector.shape_cast %0 : vector<1x32x64xf32> to vector<32x64xf32>
    %c0_2 = arith.constant 0 : index
    %c0_3 = arith.constant 0 : index
    %c0_4 = arith.constant 0 : index
    %2 = vector.load %arg4[%c0_2, %c0_3, %c0_4] : memref<1x16x64xf32, #tpu.memory_space<vmem>>, vector<1x16x64xf32>
    %3 = vector.shape_cast %2 : vector<1x16x64xf32> to vector<16x64xf32>
    %c0_5 = arith.constant 0 : index
    %c0_6 = arith.constant 0 : index
    %c0_7 = arith.constant 0 : index
    %4 = vector.load %arg5[%c0_5, %c0_6, %c0_7] : memref<1x1x64xf32, #tpu.memory_space<vmem>>, vector<1x1x64xf32>
    %5 = vector.shape_cast %4 : vector<1x1x64xf32> to vector<1x64xf32>
    %c0_8 = arith.constant 0 : index
    %c0_9 = arith.constant 0 : index
    %c0_10 = arith.constant 0 : index
    %6 = vector.load %arg1[%c0_8, %c0_9, %c0_10] : memref<1x16x1xi32, #tpu.memory_space<vmem>>, vector<1x16x1xi32>
    %7 = vector.shape_cast %6 : vector<1x16x1xi32> to vector<16x1xi32>
    %cst = arith.constant 0.000000e+00 : f32
    %8 = vector.broadcast %cst : f32 to vector<16x16xf32>
    %cst_11 = arith.constant 0.000000e+00 : f32
    %9 = vector.broadcast %cst_11 : f32 to vector<16x16xf32>
    %c0_12 = arith.constant 0 : index
    %c0_13 = arith.constant 0 : index
    %c0_14 = arith.constant 0 : index
    %c0_15 = arith.constant 0 : index
    %10 = vector.load %arg2[%c0_12, %c0_13, %c0_14, %c0_15] : memref<1x8x16x32xf32, #tpu.memory_space<vmem>>, vector<1x1x16x32xf32>
    %11 = vector.shape_cast %10 : vector<1x1x16x32xf32> to vector<16x32xf32>
    %cst_16 = arith.constant dense<0.000000e+00> : vector<16x64xf32>
    %12 = tpu.matmul %11, %1, %cst_16 {dimension_numbers = #tpu.dot_dimension_numbers<[1], [0], [0], [1], [0, 0, 1, 1], [], []>} : vector<16x32xf32>, vector<32x64xf32>, vector<16x64xf32> -> vector<16x64xf32>
    %cst_17 = arith.constant dense<0.000000e+00> : vector<16x64xf32>
    %13 = tpu.matmul %8, %3, %cst_17 {dimension_numbers = #tpu.dot_dimension_numbers<[1], [0], [0], [1], [0, 0, 1, 1], [], []>} : vector<16x16xf32>, vector<16x64xf32>, vector<16x64xf32> -> vector<16x64xf32>
    %14 = arith.addf %12, %13 : vector<16x64xf32>
    %15 = vector.broadcast %5 : vector<1x64xf32> to vector<16x64xf32>
    %16 = arith.addf %14, %15 : vector<16x64xf32>
    %17 = vector.extract_strided_slice %16 {offsets = [0, 0], sizes = [16, 16], strides = [1, 1]} : vector<16x64xf32> to vector<16x16xf32>
    %cst_18 = arith.constant 5.000000e-01 : f32
    %18 = vector.broadcast %cst_18 : f32 to vector<16x16xf32>
    %19 = arith.mulf %18, %17 : vector<16x16xf32>
    %20 = math.tanh %19 : vector<16x16xf32>
    %cst_19 = arith.constant 1.000000e+00 : f32
    %21 = vector.broadcast %cst_19 : f32 to vector<16x16xf32>
    %22 = arith.addf %20, %21 : vector<16x16xf32>
    %cst_20 = arith.constant 5.000000e-01 : f32
    %23 = vector.broadcast %cst_20 : f32 to vector<16x16xf32>
    %24 = arith.mulf %23, %22 : vector<16x16xf32>
    %25 = vector.extract_strided_slice %16 {offsets = [0, 16], sizes = [16, 16], strides = [1, 1]} : vector<16x64xf32> to vector<16x16xf32>
    %cst_21 = arith.constant 5.000000e-01 : f32
    %26 = vector.broadcast %cst_21 : f32 to vector<16x16xf32>
    %27 = arith.mulf %26, %25 : vector<16x16xf32>
    %28 = math.tanh %27 : vector<16x16xf32>
    %cst_22 = arith.constant 1.000000e+00 : f32
    %29 = vector.broadcast %cst_22 : f32 to vector<16x16xf32>
    %30 = arith.addf %28, %29 : vector<16x16xf32>
    %cst_23 = arith.constant 5.000000e-01 : f32
    %31 = vector.broadcast %cst_23 : f32 to vector<16x16xf32>
    %32 = arith.mulf %31, %30 : vector<16x16xf32>
    %33 = vector.extract_strided_slice %16 {offsets = [0, 32], sizes = [16, 16], strides = [1, 1]} : vector<16x64xf32> to vector<16x16xf32>
    %34 = math.tanh %33 : vector<16x16xf32>
    %35 = vector.extract_strided_slice %16 {offsets = [0, 48], sizes = [16, 16], strides = [1, 1]} : vector<16x64xf32> to vector<16x16xf32>
    %cst_24 = arith.constant 5.000000e-01 : f32
    %36 = vector.broadcast %cst_24 : f32 to vector<16x16xf32>
    %37 = arith.mulf %36, %35 : vector<16x16xf32>
    %38 = math.tanh %37 : vector<16x16xf32>
    %cst_25 = arith.constant 1.000000e+00 : f32
    %39 = vector.broadcast %cst_25 : f32 to vector<16x16xf32>
    %40 = arith.addf %38, %39 : vector<16x16xf32>
    %cst_26 = arith.constant 5.000000e-01 : f32
    %41 = vector.broadcast %cst_26 : f32 to vector<16x16xf32>
    %42 = arith.mulf %41, %40 : vector<16x16xf32>
    %43 = arith.mulf %32, %9 : vector<16x16xf32>
    %44 = arith.mulf %24, %34 : vector<16x16xf32>
    %45 = arith.addf %43, %44 : vector<16x16xf32>
    %46 = math.tanh %45 : vector<16x16xf32>
    %47 = arith.mulf %42, %46 : vector<16x16xf32>
    %c0_i32 = arith.constant 0 : i32
    %48 = vector.broadcast %c0_i32 : i32 to vector<16x1xi32>
    %49 = arith.cmpi sgt, %7, %48 : vector<16x1xi32>
    %50 = vector.shape_cast %49 : vector<16x1xi1> to vector<16x1xi1>
    %51 = vector.broadcast %50 : vector<16x1xi1> to vector<16x16xi1>
    %52 = arith.select %51, %45, %9 : vector<16x16xi1>, vector<16x16xf32>
    %53 = vector.shape_cast %49 : vector<16x1xi1> to vector<16x1xi1>
    %54 = vector.broadcast %53 : vector<16x1xi1> to vector<16x16xi1>
    %55 = arith.select %54, %47, %8 : vector<16x16xi1>, vector<16x16xf32>
    %cst_27 = arith.constant 0.000000e+00 : f32
    %56 = vector.shape_cast %49 : vector<16x1xi1> to vector<16x1xi1>
    %57 = vector.broadcast %56 : vector<16x1xi1> to vector<16x16xi1>
    %58 = vector.broadcast %cst_27 : f32 to vector<16x16xf32>
    %59 = arith.select %57, %47, %58 : vector<16x16xi1>, vector<16x16xf32>
    %c0_28 = arith.constant 0 : index
    %c0_29 = arith.constant 0 : index
    %c0_30 = arith.constant 0 : index
    %c0_31 = arith.constant 0 : index
    %60 = vector.load %arg6[%c0_28, %c0_29, %c0_30, %c0_31] : memref<1x8x16x16xf32, #tpu.memory_space<vmem>>, vector<1x1x16x16xf32>
    %61 = vector.shape_cast %60 : vector<1x1x16x16xf32> to vector<16x16xf32>
    %62 = vector.shape_cast %59 : vector<16x16xf32> to vector<1x1x16x16xf32>
    tpu.vector_store %arg6[%c0_28, %c0_29, %c0_30, %c0_31], %62 {strides = array<i32>} : memref<1x8x16x16xf32, #tpu.memory_space<vmem>>, vector<1x1x16x16xf32>,
    %c0_32 = arith.constant 0 : index
    %c1 = arith.constant 1 : index
    %c0_33 = arith.constant 0 : index
    %c0_34 = arith.constant 0 : index
    %63 = vector.load %arg2[%c0_32, %c1, %c0_33, %c0_34] : memref<1x8x16x32xf32, #tpu.memory_space<vmem>>, vector<1x1x16x32xf32>
    %64 = vector.shape_cast %63 : vector<1x1x16x32xf32> to vector<16x32xf32>
    %cst_35 = arith.constant dense<0.000000e+00> : vector<16x64xf32>
    %65 = tpu.matmul %64, %1, %cst_35 {dimension_numbers = #tpu.dot_dimension_numbers<[1], [0], [0], [1], [0, 0, 1, 1], [], []>} : vector<16x32xf32>, vector<32x64xf32>, vector<16x64xf32> -> vector<16x64xf32>
    %cst_36 = arith.constant dense<0.000000e+00> : vector<16x64xf32>
    %66 = tpu.matmul %55, %3, %cst_36 {dimension_numbers = #tpu.dot_dimension_numbers<[1], [0], [0], [1], [0, 0, 1, 1], [], []>} : vector<16x16xf32>, vector<16x64xf32>, vector<16x64xf32> -> vector<16x64xf32>
    %67 = arith.addf %65, %66 : vector<16x64xf32>
    %68 = vector.broadcast %5 : vector<1x64xf32> to vector<16x64xf32>
    %69 = arith.addf %67, %68 : vector<16x64xf32>
    %70 = vector.extract_strided_slice %69 {offsets = [0, 0], sizes = [16, 16], strides = [1, 1]} : vector<16x64xf32> to vector<16x16xf32>
    %cst_37 = arith.constant 5.000000e-01 : f32
    %71 = vector.broadcast %cst_37 : f32 to vector<16x16xf32>
    %72 = arith.mulf %71, %70 : vector<16x16xf32>
    %73 = math.tanh %72 : vector<16x16xf32>
    %cst_38 = arith.constant 1.000000e+00 : f32
    %74 = vector.broadcast %cst_38 : f32 to vector<16x16xf32>
    %75 = arith.addf %73, %74 : vector<16x16xf32>
    %cst_39 = arith.constant 5.000000e-01 : f32
    %76 = vector.broadcast %cst_39 : f32 to vector<16x16xf32>
    %77 = arith.mulf %76, %75 : vector<16x16xf32>
    %78 = vector.extract_strided_slice %69 {offsets = [0, 16], sizes = [16, 16], strides = [1, 1]} : vector<16x64xf32> to vector<16x16xf32>
    %cst_40 = arith.constant 5.000000e-01 : f32
    %79 = vector.broadcast %cst_40 : f32 to vector<16x16xf32>
    %80 = arith.mulf %79, %78 : vector<16x16xf32>
    %81 = math.tanh %80 : vector<16x16xf32>
    %cst_41 = arith.constant 1.000000e+00 : f32
    %82 = vector.broadcast %cst_41 : f32 to vector<16x16xf32>
    %83 = arith.addf %81, %82 : vector<16x16xf32>
    %cst_42 = arith.constant 5.000000e-01 : f32
    %84 = vector.broadcast %cst_42 : f32 to vector<16x16xf32>
    %85 = arith.mulf %84, %83 : vector<16x16xf32>
    %86 = vector.extract_strided_slice %69 {offsets = [0, 32], sizes = [16, 16], strides = [1, 1]} : vector<16x64xf32> to vector<16x16xf32>
    %87 = math.tanh %86 : vector<16x16xf32>
    %88 = vector.extract_strided_slice %69 {offsets = [0, 48], sizes = [16, 16], strides = [1, 1]} : vector<16x64xf32> to vector<16x16xf32>
    %cst_43 = arith.constant 5.000000e-01 : f32
    %89 = vector.broadcast %cst_43 : f32 to vector<16x16xf32>
    %90 = arith.mulf %89, %88 : vector<16x16xf32>
    %91 = math.tanh %90 : vector<16x16xf32>
    %cst_44 = arith.constant 1.000000e+00 : f32
    %92 = vector.broadcast %cst_44 : f32 to vector<16x16xf32>
    %93 = arith.addf %91, %92 : vector<16x16xf32>
    %cst_45 = arith.constant 5.000000e-01 : f32
    %94 = vector.broadcast %cst_45 : f32 to vector<16x16xf32>
    %95 = arith.mulf %94, %93 : vector<16x16xf32>
    %96 = arith.mulf %85, %52 : vector<16x16xf32>
    %97 = arith.mulf %77, %87 : vector<16x16xf32>
    %98 = arith.addf %96, %97 : vector<16x16xf32>
    %99 = math.tanh %98 : vector<16x16xf32>
    %100 = arith.mulf %95, %99 : vector<16x16xf32>
    %c1_i32 = arith.constant 1 : i32
    %101 = vector.broadcast %c1_i32 : i32 to vector<16x1xi32>
    %102 = arith.cmpi sgt, %7, %101 : vector<16x1xi32>
    %103 = vector.shape_cast %102 : vector<16x1xi1> to vector<16x1xi1>
    %104 = vector.broadcast %103 : vector<16x1xi1> to vector<16x16xi1>
    %105 = arith.select %104, %98, %52 : vector<16x16xi1>, vector<16x16xf32>
    %106 = vector.shape_cast %102 : vector<16x1xi1> to vector<16x1xi1>
    %107 = vector.broadcast %106 : vector<16x1xi1> to vector<16x16xi1>
    %108 = arith.select %107, %100, %55 : vector<16x16xi1>, vector<16x16xf32>
    %cst_46 = arith.constant 0.000000e+00 : f32
    %109 = vector.shape_cast %102 : vector<16x1xi1> to vector<16x1xi1>
    %110 = vector.broadcast %109 : vector<16x1xi1> to vector<16x16xi1>
    %111 = vector.broadcast %cst_46 : f32 to vector<16x16xf32>
    %112 = arith.select %110, %100, %111 : vector<16x16xi1>, vector<16x16xf32>
    %c0_47 = arith.constant 0 : index
    %c1_48 = arith.constant 1 : index
    %c0_49 = arith.constant 0 : index
    %c0_50 = arith.constant 0 : index
    %113 = vector.load %arg6[%c0_47, %c1_48, %c0_49, %c0_50] : memref<1x8x16x16xf32, #tpu.memory_space<vmem>>, vector<1x1x16x16xf32>
    %114 = vector.shape_cast %113 : vector<1x1x16x16xf32> to vector<16x16xf32>
    %115 = vector.shape_cast %112 : vector<16x16xf32> to vector<1x1x16x16xf32>
    tpu.vector_store %arg6[%c0_47, %c1_48, %c0_49, %c0_50], %115 {strides = array<i32>} : memref<1x8x16x16xf32, #tpu.memory_space<vmem>>, vector<1x1x16x16xf32>,
    %c0_51 = arith.constant 0 : index
    %c2 = arith.constant 2 : index
    %c0_52 = arith.constant 0 : index
    %c0_53 = arith.constant 0 : index
    %116 = vector.load %arg2[%c0_51, %c2, %c0_52, %c0_53] : memref<1x8x16x32xf32, #tpu.memory_space<vmem>>, vector<1x1x16x32xf32>
    %117 = vector.shape_cast %116 : vector<1x1x16x32xf32> to vector<16x32xf32>
    %cst_54 = arith.constant dense<0.000000e+00> : vector<16x64xf32>
    %118 = tpu.matmul %117, %1, %cst_54 {dimension_numbers = #tpu.dot_dimension_numbers<[1], [0], [0], [1], [0, 0, 1, 1], [], []>} : vector<16x32xf32>, vector<32x64xf32>, vector<16x64xf32> -> vector<16x64xf32>
    %cst_55 = arith.constant dense<0.000000e+00> : vector<16x64xf32>
    %119 = tpu.matmul %108, %3, %cst_55 {dimension_numbers = #tpu.dot_dimension_numbers<[1], [0], [0], [1], [0, 0, 1, 1], [], []>} : vector<16x16xf32>, vector<16x64xf32>, vector<16x64xf32> -> vector<16x64xf32>
    %120 = arith.addf %118, %119 : vector<16x64xf32>
    %121 = vector.broadcast %5 : vector<1x64xf32> to vector<16x64xf32>
    %122 = arith.addf %120, %121 : vector<16x64xf32>
    %123 = vector.extract_strided_slice %122 {offsets = [0, 0], sizes = [16, 16], strides = [1, 1]} : vector<16x64xf32> to vector<16x16xf32>
    %cst_56 = arith.constant 5.000000e-01 : f32
    %124 = vector.broadcast %cst_56 : f32 to vector<16x16xf32>
    %125 = arith.mulf %124, %123 : vector<16x16xf32>
    %126 = math.tanh %125 : vector<16x16xf32>
    %cst_57 = arith.constant 1.000000e+00 : f32
    %127 = vector.broadcast %cst_57 : f32 to vector<16x16xf32>
    %128 = arith.addf %126, %127 : vector<16x16xf32>
    %cst_58 = arith.constant 5.000000e-01 : f32
    %129 = vector.broadcast %cst_58 : f32 to vector<16x16xf32>
    %130 = arith.mulf %129, %128 : vector<16x16xf32>
    %131 = vector.extract_strided_slice %122 {offsets = [0, 16], sizes = [16, 16], strides = [1, 1]} : vector<16x64xf32> to vector<16x16xf32>
    %cst_59 = arith.constant 5.000000e-01 : f32
    %132 = vector.broadcast %cst_59 : f32 to vector<16x16xf32>
    %133 = arith.mulf %132, %131 : vector<16x16xf32>
    %134 = math.tanh %133 : vector<16x16xf32>
    %cst_60 = arith.constant 1.000000e+00 : f32
    %135 = vector.broadcast %cst_60 : f32 to vector<16x16xf32>
    %136 = arith.addf %134, %135 : vector<16x16xf32>
    %cst_61 = arith.constant 5.000000e-01 : f32
    %137 = vector.broadcast %cst_61 : f32 to vector<16x16xf32>
    %138 = arith.mulf %137, %136 : vector<16x16xf32>
    %139 = vector.extract_strided_slice %122 {offsets = [0, 32], sizes = [16, 16], strides = [1, 1]} : vector<16x64xf32> to vector<16x16xf32>
    %140 = math.tanh %139 : vector<16x16xf32>
    %141 = vector.extract_strided_slice %122 {offsets = [0, 48], sizes = [16, 16], strides = [1, 1]} : vector<16x64xf32> to vector<16x16xf32>
    %cst_62 = arith.constant 5.000000e-01 : f32
    %142 = vector.broadcast %cst_62 : f32 to vector<16x16xf32>
    %143 = arith.mulf %142, %141 : vector<16x16xf32>
    %144 = math.tanh %143 : vector<16x16xf32>
    %cst_63 = arith.constant 1.000000e+00 : f32
    %145 = vector.broadcast %cst_63 : f32 to vector<16x16xf32>
    %146 = arith.addf %144, %145 : vector<16x16xf32>
    %cst_64 = arith.constant 5.000000e-01 : f32
    %147 = vector.broadcast %cst_64 : f32 to vector<16x16xf32>
    %148 = arith.mulf %147, %146 : vector<16x16xf32>
    %149 = arith.mulf %138, %105 : vector<16x16xf32>
    %150 = arith.mulf %130, %140 : vector<16x16xf32>
    %151 = arith.addf %149, %150 : vector<16x16xf32>
    %152 = math.tanh %151 : vector<16x16xf32>
    %153 = arith.mulf %148, %152 : vector<16x16xf32>
    %c2_i32 = arith.constant 2 : i32
    %154 = vector.broadcast %c2_i32 : i32 to vector<16x1xi32>
    %155 = arith.cmpi sgt, %7, %154 : vector<16x1xi32>
    %156 = vector.shape_cast %155 : vector<16x1xi1> to vector<16x1xi1>
    %157 = vector.broadcast %156 : vector<16x1xi1> to vector<16x16xi1>
    %158 = arith.select %157, %151, %105 : vector<16x16xi1>, vector<16x16xf32>
    %159 = vector.shape_cast %155 : vector<16x1xi1> to vector<16x1xi1>
    %160 = vector.broadcast %159 : vector<16x1xi1> to vector<16x16xi1>
    %161 = arith.select %160, %153, %108 : vector<16x16xi1>, vector<16x16xf32>
    %cst_65 = arith.constant 0.000000e+00 : f32
    %162 = vector.shape_cast %155 : vector<16x1xi1> to vector<16x1xi1>
    %163 = vector.broadcast %162 : vector<16x1xi1> to vector<16x16xi1>
    %164 = vector.broadcast %cst_65 : f32 to vector<16x16xf32>
    %165 = arith.select %163, %153, %164 : vector<16x16xi1>, vector<16x16xf32>
    %c0_66 = arith.constant 0 : index
    %c2_67 = arith.constant 2 : index
    %c0_68 = arith.constant 0 : index
    %c0_69 = arith.constant 0 : index
    %166 = vector.load %arg6[%c0_66, %c2_67, %c0_68, %c0_69] : memref<1x8x16x16xf32, #tpu.memory_space<vmem>>, vector<1x1x16x16xf32>
    %167 = vector.shape_cast %166 : vector<1x1x16x16xf32> to vector<16x16xf32>
    %168 = vector.shape_cast %165 : vector<16x16xf32> to vector<1x1x16x16xf32>
    tpu.vector_store %arg6[%c0_66, %c2_67, %c0_68, %c0_69], %168 {strides = array<i32>} : memref<1x8x16x16xf32, #tpu.memory_space<vmem>>, vector<1x1x16x16xf32>,
    %c0_70 = arith.constant 0 : index
    %c3 = arith.constant 3 : index
    %c0_71 = arith.constant 0 : index
    %c0_72 = arith.constant 0 : index
    %169 = vector.load %arg2[%c0_70, %c3, %c0_71, %c0_72] : memref<1x8x16x32xf32, #tpu.memory_space<vmem>>, vector<1x1x16x32xf32>
    %170 = vector.shape_cast %169 : vector<1x1x16x32xf32> to vector<16x32xf32>
    %cst_73 = arith.constant dense<0.000000e+00> : vector<16x64xf32>
    %171 = tpu.matmul %170, %1, %cst_73 {dimension_numbers = #tpu.dot_dimension_numbers<[1], [0], [0], [1], [0, 0, 1, 1], [], []>} : vector<16x32xf32>, vector<32x64xf32>, vector<16x64xf32> -> vector<16x64xf32>
    %cst_74 = arith.constant dense<0.000000e+00> : vector<16x64xf32>
    %172 = tpu.matmul %161, %3, %cst_74 {dimension_numbers = #tpu.dot_dimension_numbers<[1], [0], [0], [1], [0, 0, 1, 1], [], []>} : vector<16x16xf32>, vector<16x64xf32>, vector<16x64xf32> -> vector<16x64xf32>
    %173 = arith.addf %171, %172 : vector<16x64xf32>
    %174 = vector.broadcast %5 : vector<1x64xf32> to vector<16x64xf32>
    %175 = arith.addf %173, %174 : vector<16x64xf32>
    %176 = vector.extract_strided_slice %175 {offsets = [0, 0], sizes = [16, 16], strides = [1, 1]} : vector<16x64xf32> to vector<16x16xf32>
    %cst_75 = arith.constant 5.000000e-01 : f32
    %177 = vector.broadcast %cst_75 : f32 to vector<16x16xf32>
    %178 = arith.mulf %177, %176 : vector<16x16xf32>
    %179 = math.tanh %178 : vector<16x16xf32>
    %cst_76 = arith.constant 1.000000e+00 : f32
    %180 = vector.broadcast %cst_76 : f32 to vector<16x16xf32>
    %181 = arith.addf %179, %180 : vector<16x16xf32>
    %cst_77 = arith.constant 5.000000e-01 : f32
    %182 = vector.broadcast %cst_77 : f32 to vector<16x16xf32>
    %183 = arith.mulf %182, %181 : vector<16x16xf32>
    %184 = vector.extract_strided_slice %175 {offsets = [0, 16], sizes = [16, 16], strides = [1, 1]} : vector<16x64xf32> to vector<16x16xf32>
    %cst_78 = arith.constant 5.000000e-01 : f32
    %185 = vector.broadcast %cst_78 : f32 to vector<16x16xf32>
    %186 = arith.mulf %185, %184 : vector<16x16xf32>
    %187 = math.tanh %186 : vector<16x16xf32>
    %cst_79 = arith.constant 1.000000e+00 : f32
    %188 = vector.broadcast %cst_79 : f32 to vector<16x16xf32>
    %189 = arith.addf %187, %188 : vector<16x16xf32>
    %cst_80 = arith.constant 5.000000e-01 : f32
    %190 = vector.broadcast %cst_80 : f32 to vector<16x16xf32>
    %191 = arith.mulf %190, %189 : vector<16x16xf32>
    %192 = vector.extract_strided_slice %175 {offsets = [0, 32], sizes = [16, 16], strides = [1, 1]} : vector<16x64xf32> to vector<16x16xf32>
    %193 = math.tanh %192 : vector<16x16xf32>
    %194 = vector.extract_strided_slice %175 {offsets = [0, 48], sizes = [16, 16], strides = [1, 1]} : vector<16x64xf32> to vector<16x16xf32>
    %cst_81 = arith.constant 5.000000e-01 : f32
    %195 = vector.broadcast %cst_81 : f32 to vector<16x16xf32>
    %196 = arith.mulf %195, %194 : vector<16x16xf32>
    %197 = math.tanh %196 : vector<16x16xf32>
    %cst_82 = arith.constant 1.000000e+00 : f32
    %198 = vector.broadcast %cst_82 : f32 to vector<16x16xf32>
    %199 = arith.addf %197, %198 : vector<16x16xf32>
    %cst_83 = arith.constant 5.000000e-01 : f32
    %200 = vector.broadcast %cst_83 : f32 to vector<16x16xf32>
    %201 = arith.mulf %200, %199 : vector<16x16xf32>
    %202 = arith.mulf %191, %158 : vector<16x16xf32>
    %203 = arith.mulf %183, %193 : vector<16x16xf32>
    %204 = arith.addf %202, %203 : vector<16x16xf32>
    %205 = math.tanh %204 : vector<16x16xf32>
    %206 = arith.mulf %201, %205 : vector<16x16xf32>
    %c3_i32 = arith.constant 3 : i32
    %207 = vector.broadcast %c3_i32 : i32 to vector<16x1xi32>
    %208 = arith.cmpi sgt, %7, %207 : vector<16x1xi32>
    %209 = vector.shape_cast %208 : vector<16x1xi1> to vector<16x1xi1>
    %210 = vector.broadcast %209 : vector<16x1xi1> to vector<16x16xi1>
    %211 = arith.select %210, %204, %158 : vector<16x16xi1>, vector<16x16xf32>
    %212 = vector.shape_cast %208 : vector<16x1xi1> to vector<16x1xi1>
    %213 = vector.broadcast %212 : vector<16x1xi1> to vector<16x16xi1>
    %214 = arith.select %213, %206, %161 : vector<16x16xi1>, vector<16x16xf32>
    %cst_84 = arith.constant 0.000000e+00 : f32
    %215 = vector.shape_cast %208 : vector<16x1xi1> to vector<16x1xi1>
    %216 = vector.broadcast %215 : vector<16x1xi1> to vector<16x16xi1>
    %217 = vector.broadcast %cst_84 : f32 to vector<16x16xf32>
    %218 = arith.select %216, %206, %217 : vector<16x16xi1>, vector<16x16xf32>
    %c0_85 = arith.constant 0 : index
    %c3_86 = arith.constant 3 : index
    %c0_87 = arith.constant 0 : index
    %c0_88 = arith.constant 0 : index
    %219 = vector.load %arg6[%c0_85, %c3_86, %c0_87, %c0_88] : memref<1x8x16x16xf32, #tpu.memory_space<vmem>>, vector<1x1x16x16xf32>
    %220 = vector.shape_cast %219 : vector<1x1x16x16xf32> to vector<16x16xf32>
    %221 = vector.shape_cast %218 : vector<16x16xf32> to vector<1x1x16x16xf32>
    tpu.vector_store %arg6[%c0_85, %c3_86, %c0_87, %c0_88], %221 {strides = array<i32>} : memref<1x8x16x16xf32, #tpu.memory_space<vmem>>, vector<1x1x16x16xf32>,
    %c0_89 = arith.constant 0 : index
    %c4 = arith.constant 4 : index
    %c0_90 = arith.constant 0 : index
    %c0_91 = arith.constant 0 : index
    %222 = vector.load %arg2[%c0_89, %c4, %c0_90, %c0_91] : memref<1x8x16x32xf32, #tpu.memory_space<vmem>>, vector<1x1x16x32xf32>
    %223 = vector.shape_cast %222 : vector<1x1x16x32xf32> to vector<16x32xf32>
    %cst_92 = arith.constant dense<0.000000e+00> : vector<16x64xf32>
    %224 = tpu.matmul %223, %1, %cst_92 {dimension_numbers = #tpu.dot_dimension_numbers<[1], [0], [0], [1], [0, 0, 1, 1], [], []>} : vector<16x32xf32>, vector<32x64xf32>, vector<16x64xf32> -> vector<16x64xf32>
    %cst_93 = arith.constant dense<0.000000e+00> : vector<16x64xf32>
    %225 = tpu.matmul %214, %3, %cst_93 {dimension_numbers = #tpu.dot_dimension_numbers<[1], [0], [0], [1], [0, 0, 1, 1], [], []>} : vector<16x16xf32>, vector<16x64xf32>, vector<16x64xf32> -> vector<16x64xf32>
    %226 = arith.addf %224, %225 : vector<16x64xf32>
    %227 = vector.broadcast %5 : vector<1x64xf32> to vector<16x64xf32>
    %228 = arith.addf %226, %227 : vector<16x64xf32>
    %229 = vector.extract_strided_slice %228 {offsets = [0, 0], sizes = [16, 16], strides = [1, 1]} : vector<16x64xf32> to vector<16x16xf32>
    %cst_94 = arith.constant 5.000000e-01 : f32
    %230 = vector.broadcast %cst_94 : f32 to vector<16x16xf32>
    %231 = arith.mulf %230, %229 : vector<16x16xf32>
    %232 = math.tanh %231 : vector<16x16xf32>
    %cst_95 = arith.constant 1.000000e+00 : f32
    %233 = vector.broadcast %cst_95 : f32 to vector<16x16xf32>
    %234 = arith.addf %232, %233 : vector<16x16xf32>
    %cst_96 = arith.constant 5.000000e-01 : f32
    %235 = vector.broadcast %cst_96 : f32 to vector<16x16xf32>
    %236 = arith.mulf %235, %234 : vector<16x16xf32>
    %237 = vector.extract_strided_slice %228 {offsets = [0, 16], sizes = [16, 16], strides = [1, 1]} : vector<16x64xf32> to vector<16x16xf32>
    %cst_97 = arith.constant 5.000000e-01 : f32
    %238 = vector.broadcast %cst_97 : f32 to vector<16x16xf32>
    %239 = arith.mulf %238, %237 : vector<16x16xf32>
    %240 = math.tanh %239 : vector<16x16xf32>
    %cst_98 = arith.constant 1.000000e+00 : f32
    %241 = vector.broadcast %cst_98 : f32 to vector<16x16xf32>
    %242 = arith.addf %240, %241 : vector<16x16xf32>
    %cst_99 = arith.constant 5.000000e-01 : f32
    %243 = vector.broadcast %cst_99 : f32 to vector<16x16xf32>
    %244 = arith.mulf %243, %242 : vector<16x16xf32>
    %245 = vector.extract_strided_slice %228 {offsets = [0, 32], sizes = [16, 16], strides = [1, 1]} : vector<16x64xf32> to vector<16x16xf32>
    %246 = math.tanh %245 : vector<16x16xf32>
    %247 = vector.extract_strided_slice %228 {offsets = [0, 48], sizes = [16, 16], strides = [1, 1]} : vector<16x64xf32> to vector<16x16xf32>
    %cst_100 = arith.constant 5.000000e-01 : f32
    %248 = vector.broadcast %cst_100 : f32 to vector<16x16xf32>
    %249 = arith.mulf %248, %247 : vector<16x16xf32>
    %250 = math.tanh %249 : vector<16x16xf32>
    %cst_101 = arith.constant 1.000000e+00 : f32
    %251 = vector.broadcast %cst_101 : f32 to vector<16x16xf32>
    %252 = arith.addf %250, %251 : vector<16x16xf32>
    %cst_102 = arith.constant 5.000000e-01 : f32
    %253 = vector.broadcast %cst_102 : f32 to vector<16x16xf32>
    %254 = arith.mulf %253, %252 : vector<16x16xf32>
    %255 = arith.mulf %244, %211 : vector<16x16xf32>
    %256 = arith.mulf %236, %246 : vector<16x16xf32>
    %257 = arith.addf %255, %256 : vector<16x16xf32>
    %258 = math.tanh %257 : vector<16x16xf32>
    %259 = arith.mulf %254, %258 : vector<16x16xf32>
    %c4_i32 = arith.constant 4 : i32
    %260 = vector.broadcast %c4_i32 : i32 to vector<16x1xi32>
    %261 = arith.cmpi sgt, %7, %260 : vector<16x1xi32>
    %262 = vector.shape_cast %261 : vector<16x1xi1> to vector<16x1xi1>
    %263 = vector.broadcast %262 : vector<16x1xi1> to vector<16x16xi1>
    %264 = arith.select %263, %257, %211 : vector<16x16xi1>, vector<16x16xf32>
    %265 = vector.shape_cast %261 : vector<16x1xi1> to vector<16x1xi1>
    %266 = vector.broadcast %265 : vector<16x1xi1> to vector<16x16xi1>
    %267 = arith.select %266, %259, %214 : vector<16x16xi1>, vector<16x16xf32>
    %cst_103 = arith.constant 0.000000e+00 : f32
    %268 = vector.shape_cast %261 : vector<16x1xi1> to vector<16x1xi1>
    %269 = vector.broadcast %268 : vector<16x1xi1> to vector<16x16xi1>
    %270 = vector.broadcast %cst_103 : f32 to vector<16x16xf32>
    %271 = arith.select %269, %259, %270 : vector<16x16xi1>, vector<16x16xf32>
    %c0_104 = arith.constant 0 : index
    %c4_105 = arith.constant 4 : index
    %c0_106 = arith.constant 0 : index
    %c0_107 = arith.constant 0 : index
    %272 = vector.load %arg6[%c0_104, %c4_105, %c0_106, %c0_107] : memref<1x8x16x16xf32, #tpu.memory_space<vmem>>, vector<1x1x16x16xf32>
    %273 = vector.shape_cast %272 : vector<1x1x16x16xf32> to vector<16x16xf32>
    %274 = vector.shape_cast %271 : vector<16x16xf32> to vector<1x1x16x16xf32>
    tpu.vector_store %arg6[%c0_104, %c4_105, %c0_106, %c0_107], %274 {strides = array<i32>} : memref<1x8x16x16xf32, #tpu.memory_space<vmem>>, vector<1x1x16x16xf32>,
    %c0_108 = arith.constant 0 : index
    %c5 = arith.constant 5 : index
    %c0_109 = arith.constant 0 : index
    %c0_110 = arith.constant 0 : index
    %275 = vector.load %arg2[%c0_108, %c5, %c0_109, %c0_110] : memref<1x8x16x32xf32, #tpu.memory_space<vmem>>, vector<1x1x16x32xf32>
    %276 = vector.shape_cast %275 : vector<1x1x16x32xf32> to vector<16x32xf32>
    %cst_111 = arith.constant dense<0.000000e+00> : vector<16x64xf32>
    %277 = tpu.matmul %276, %1, %cst_111 {dimension_numbers = #tpu.dot_dimension_numbers<[1], [0], [0], [1], [0, 0, 1, 1], [], []>} : vector<16x32xf32>, vector<32x64xf32>, vector<16x64xf32> -> vector<16x64xf32>
    %cst_112 = arith.constant dense<0.000000e+00> : vector<16x64xf32>
    %278 = tpu.matmul %267, %3, %cst_112 {dimension_numbers = #tpu.dot_dimension_numbers<[1], [0], [0], [1], [0, 0, 1, 1], [], []>} : vector<16x16xf32>, vector<16x64xf32>, vector<16x64xf32> -> vector<16x64xf32>
    %279 = arith.addf %277, %278 : vector<16x64xf32>
    %280 = vector.broadcast %5 : vector<1x64xf32> to vector<16x64xf32>
    %281 = arith.addf %279, %280 : vector<16x64xf32>
    %282 = vector.extract_strided_slice %281 {offsets = [0, 0], sizes = [16, 16], strides = [1, 1]} : vector<16x64xf32> to vector<16x16xf32>
    %cst_113 = arith.constant 5.000000e-01 : f32
    %283 = vector.broadcast %cst_113 : f32 to vector<16x16xf32>
    %284 = arith.mulf %283, %282 : vector<16x16xf32>
    %285 = math.tanh %284 : vector<16x16xf32>
    %cst_114 = arith.constant 1.000000e+00 : f32
    %286 = vector.broadcast %cst_114 : f32 to vector<16x16xf32>
    %287 = arith.addf %285, %286 : vector<16x16xf32>
    %cst_115 = arith.constant 5.000000e-01 : f32
    %288 = vector.broadcast %cst_115 : f32 to vector<16x16xf32>
    %289 = arith.mulf %288, %287 : vector<16x16xf32>
    %290 = vector.extract_strided_slice %281 {offsets = [0, 16], sizes = [16, 16], strides = [1, 1]} : vector<16x64xf32> to vector<16x16xf32>
    %cst_116 = arith.constant 5.000000e-01 : f32
    %291 = vector.broadcast %cst_116 : f32 to vector<16x16xf32>
    %292 = arith.mulf %291, %290 : vector<16x16xf32>
    %293 = math.tanh %292 : vector<16x16xf32>
    %cst_117 = arith.constant 1.000000e+00 : f32
    %294 = vector.broadcast %cst_117 : f32 to vector<16x16xf32>
    %295 = arith.addf %293, %294 : vector<16x16xf32>
    %cst_118 = arith.constant 5.000000e-01 : f32
    %296 = vector.broadcast %cst_118 : f32 to vector<16x16xf32>
    %297 = arith.mulf %296, %295 : vector<16x16xf32>
    %298 = vector.extract_strided_slice %281 {offsets = [0, 32], sizes = [16, 16], strides = [1, 1]} : vector<16x64xf32> to vector<16x16xf32>
    %299 = math.tanh %298 : vector<16x16xf32>
    %300 = vector.extract_strided_slice %281 {offsets = [0, 48], sizes = [16, 16], strides = [1, 1]} : vector<16x64xf32> to vector<16x16xf32>
    %cst_119 = arith.constant 5.000000e-01 : f32
    %301 = vector.broadcast %cst_119 : f32 to vector<16x16xf32>
    %302 = arith.mulf %301, %300 : vector<16x16xf32>
    %303 = math.tanh %302 : vector<16x16xf32>
    %cst_120 = arith.constant 1.000000e+00 : f32
    %304 = vector.broadcast %cst_120 : f32 to vector<16x16xf32>
    %305 = arith.addf %303, %304 : vector<16x16xf32>
    %cst_121 = arith.constant 5.000000e-01 : f32
    %306 = vector.broadcast %cst_121 : f32 to vector<16x16xf32>
    %307 = arith.mulf %306, %305 : vector<16x16xf32>
    %308 = arith.mulf %297, %264 : vector<16x16xf32>
    %309 = arith.mulf %289, %299 : vector<16x16xf32>
    %310 = arith.addf %308, %309 : vector<16x16xf32>
    %311 = math.tanh %310 : vector<16x16xf32>
    %312 = arith.mulf %307, %311 : vector<16x16xf32>
    %c5_i32 = arith.constant 5 : i32
    %313 = vector.broadcast %c5_i32 : i32 to vector<16x1xi32>
    %314 = arith.cmpi sgt, %7, %313 : vector<16x1xi32>
    %315 = vector.shape_cast %314 : vector<16x1xi1> to vector<16x1xi1>
    %316 = vector.broadcast %315 : vector<16x1xi1> to vector<16x16xi1>
    %317 = arith.select %316, %310, %264 : vector<16x16xi1>, vector<16x16xf32>
    %318 = vector.shape_cast %314 : vector<16x1xi1> to vector<16x1xi1>
    %319 = vector.broadcast %318 : vector<16x1xi1> to vector<16x16xi1>
    %320 = arith.select %319, %312, %267 : vector<16x16xi1>, vector<16x16xf32>
    %cst_122 = arith.constant 0.000000e+00 : f32
    %321 = vector.shape_cast %314 : vector<16x1xi1> to vector<16x1xi1>
    %322 = vector.broadcast %321 : vector<16x1xi1> to vector<16x16xi1>
    %323 = vector.broadcast %cst_122 : f32 to vector<16x16xf32>
    %324 = arith.select %322, %312, %323 : vector<16x16xi1>, vector<16x16xf32>
    %c0_123 = arith.constant 0 : index
    %c5_124 = arith.constant 5 : index
    %c0_125 = arith.constant 0 : index
    %c0_126 = arith.constant 0 : index
    %325 = vector.load %arg6[%c0_123, %c5_124, %c0_125, %c0_126] : memref<1x8x16x16xf32, #tpu.memory_space<vmem>>, vector<1x1x16x16xf32>
    %326 = vector.shape_cast %325 : vector<1x1x16x16xf32> to vector<16x16xf32>
    %327 = vector.shape_cast %324 : vector<16x16xf32> to vector<1x1x16x16xf32>
    tpu.vector_store %arg6[%c0_123, %c5_124, %c0_125, %c0_126], %327 {strides = array<i32>} : memref<1x8x16x16xf32, #tpu.memory_space<vmem>>, vector<1x1x16x16xf32>,
    %c0_127 = arith.constant 0 : index
    %c6 = arith.constant 6 : index
    %c0_128 = arith.constant 0 : index
    %c0_129 = arith.constant 0 : index
    %328 = vector.load %arg2[%c0_127, %c6, %c0_128, %c0_129] : memref<1x8x16x32xf32, #tpu.memory_space<vmem>>, vector<1x1x16x32xf32>
    %329 = vector.shape_cast %328 : vector<1x1x16x32xf32> to vector<16x32xf32>
    %cst_130 = arith.constant dense<0.000000e+00> : vector<16x64xf32>
    %330 = tpu.matmul %329, %1, %cst_130 {dimension_numbers = #tpu.dot_dimension_numbers<[1], [0], [0], [1], [0, 0, 1, 1], [], []>} : vector<16x32xf32>, vector<32x64xf32>, vector<16x64xf32> -> vector<16x64xf32>
    %cst_131 = arith.constant dense<0.000000e+00> : vector<16x64xf32>
    %331 = tpu.matmul %320, %3, %cst_131 {dimension_numbers = #tpu.dot_dimension_numbers<[1], [0], [0], [1], [0, 0, 1, 1], [], []>} : vector<16x16xf32>, vector<16x64xf32>, vector<16x64xf32> -> vector<16x64xf32>
    %332 = arith.addf %330, %331 : vector<16x64xf32>
    %333 = vector.broadcast %5 : vector<1x64xf32> to vector<16x64xf32>
    %334 = arith.addf %332, %333 : vector<16x64xf32>
    %335 = vector.extract_strided_slice %334 {offsets = [0, 0], sizes = [16, 16], strides = [1, 1]} : vector<16x64xf32> to vector<16x16xf32>
    %cst_132 = arith.constant 5.000000e-01 : f32
    %336 = vector.broadcast %cst_132 : f32 to vector<16x16xf32>
    %337 = arith.mulf %336, %335 : vector<16x16xf32>
    %338 = math.tanh %337 : vector<16x16xf32>
    %cst_133 = arith.constant 1.000000e+00 : f32
    %339 = vector.broadcast %cst_133 : f32 to vector<16x16xf32>
    %340 = arith.addf %338, %339 : vector<16x16xf32>
    %cst_134 = arith.constant 5.000000e-01 : f32
    %341 = vector.broadcast %cst_134 : f32 to vector<16x16xf32>
    %342 = arith.mulf %341, %340 : vector<16x16xf32>
    %343 = vector.extract_strided_slice %334 {offsets = [0, 16], sizes = [16, 16], strides = [1, 1]} : vector<16x64xf32> to vector<16x16xf32>
    %cst_135 = arith.constant 5.000000e-01 : f32
    %344 = vector.broadcast %cst_135 : f32 to vector<16x16xf32>
    %345 = arith.mulf %344, %343 : vector<16x16xf32>
    %346 = math.tanh %345 : vector<16x16xf32>
    %cst_136 = arith.constant 1.000000e+00 : f32
    %347 = vector.broadcast %cst_136 : f32 to vector<16x16xf32>
    %348 = arith.addf %346, %347 : vector<16x16xf32>
    %cst_137 = arith.constant 5.000000e-01 : f32
    %349 = vector.broadcast %cst_137 : f32 to vector<16x16xf32>
    %350 = arith.mulf %349, %348 : vector<16x16xf32>
    %351 = vector.extract_strided_slice %334 {offsets = [0, 32], sizes = [16, 16], strides = [1, 1]} : vector<16x64xf32> to vector<16x16xf32>
    %352 = math.tanh %351 : vector<16x16xf32>
    %353 = vector.extract_strided_slice %334 {offsets = [0, 48], sizes = [16, 16], strides = [1, 1]} : vector<16x64xf32> to vector<16x16xf32>
    %cst_138 = arith.constant 5.000000e-01 : f32
    %354 = vector.broadcast %cst_138 : f32 to vector<16x16xf32>
    %355 = arith.mulf %354, %353 : vector<16x16xf32>
    %356 = math.tanh %355 : vector<16x16xf32>
    %cst_139 = arith.constant 1.000000e+00 : f32
    %357 = vector.broadcast %cst_139 : f32 to vector<16x16xf32>
    %358 = arith.addf %356, %357 : vector<16x16xf32>
    %cst_140 = arith.constant 5.000000e-01 : f32
    %359 = vector.broadcast %cst_140 : f32 to vector<16x16xf32>
    %360 = arith.mulf %359, %358 : vector<16x16xf32>
    %361 = arith.mulf %350, %317 : vector<16x16xf32>
    %362 = arith.mulf %342, %352 : vector<16x16xf32>
    %363 = arith.addf %361, %362 : vector<16x16xf32>
    %364 = math.tanh %363 : vector<16x16xf32>
    %365 = arith.mulf %360, %364 : vector<16x16xf32>
    %c6_i32 = arith.constant 6 : i32
    %366 = vector.broadcast %c6_i32 : i32 to vector<16x1xi32>
    %367 = arith.cmpi sgt, %7, %366 : vector<16x1xi32>
    %368 = vector.shape_cast %367 : vector<16x1xi1> to vector<16x1xi1>
    %369 = vector.broadcast %368 : vector<16x1xi1> to vector<16x16xi1>
    %370 = arith.select %369, %363, %317 : vector<16x16xi1>, vector<16x16xf32>
    %371 = vector.shape_cast %367 : vector<16x1xi1> to vector<16x1xi1>
    %372 = vector.broadcast %371 : vector<16x1xi1> to vector<16x16xi1>
    %373 = arith.select %372, %365, %320 : vector<16x16xi1>, vector<16x16xf32>
    %cst_141 = arith.constant 0.000000e+00 : f32
    %374 = vector.shape_cast %367 : vector<16x1xi1> to vector<16x1xi1>
    %375 = vector.broadcast %374 : vector<16x1xi1> to vector<16x16xi1>
    %376 = vector.broadcast %cst_141 : f32 to vector<16x16xf32>
    %377 = arith.select %375, %365, %376 : vector<16x16xi1>, vector<16x16xf32>
    %c0_142 = arith.constant 0 : index
    %c6_143 = arith.constant 6 : index
    %c0_144 = arith.constant 0 : index
    %c0_145 = arith.constant 0 : index
    %378 = vector.load %arg6[%c0_142, %c6_143, %c0_144, %c0_145] : memref<1x8x16x16xf32, #tpu.memory_space<vmem>>, vector<1x1x16x16xf32>
    %379 = vector.shape_cast %378 : vector<1x1x16x16xf32> to vector<16x16xf32>
    %380 = vector.shape_cast %377 : vector<16x16xf32> to vector<1x1x16x16xf32>
    tpu.vector_store %arg6[%c0_142, %c6_143, %c0_144, %c0_145], %380 {strides = array<i32>} : memref<1x8x16x16xf32, #tpu.memory_space<vmem>>, vector<1x1x16x16xf32>,
    %c0_146 = arith.constant 0 : index
    %c7 = arith.constant 7 : index
    %c0_147 = arith.constant 0 : index
    %c0_148 = arith.constant 0 : index
    %381 = vector.load %arg2[%c0_146, %c7, %c0_147, %c0_148] : memref<1x8x16x32xf32, #tpu.memory_space<vmem>>, vector<1x1x16x32xf32>
    %382 = vector.shape_cast %381 : vector<1x1x16x32xf32> to vector<16x32xf32>
    %cst_149 = arith.constant dense<0.000000e+00> : vector<16x64xf32>
    %383 = tpu.matmul %382, %1, %cst_149 {dimension_numbers = #tpu.dot_dimension_numbers<[1], [0], [0], [1], [0, 0, 1, 1], [], []>} : vector<16x32xf32>, vector<32x64xf32>, vector<16x64xf32> -> vector<16x64xf32>
    %cst_150 = arith.constant dense<0.000000e+00> : vector<16x64xf32>
    %384 = tpu.matmul %373, %3, %cst_150 {dimension_numbers = #tpu.dot_dimension_numbers<[1], [0], [0], [1], [0, 0, 1, 1], [], []>} : vector<16x16xf32>, vector<16x64xf32>, vector<16x64xf32> -> vector<16x64xf32>
    %385 = arith.addf %383, %384 : vector<16x64xf32>
    %386 = vector.broadcast %5 : vector<1x64xf32> to vector<16x64xf32>
    %387 = arith.addf %385, %386 : vector<16x64xf32>
    %388 = vector.extract_strided_slice %387 {offsets = [0, 0], sizes = [16, 16], strides = [1, 1]} : vector<16x64xf32> to vector<16x16xf32>
    %cst_151 = arith.constant 5.000000e-01 : f32
    %389 = vector.broadcast %cst_151 : f32 to vector<16x16xf32>
    %390 = arith.mulf %389, %388 : vector<16x16xf32>
    %391 = math.tanh %390 : vector<16x16xf32>
    %cst_152 = arith.constant 1.000000e+00 : f32
    %392 = vector.broadcast %cst_152 : f32 to vector<16x16xf32>
    %393 = arith.addf %391, %392 : vector<16x16xf32>
    %cst_153 = arith.constant 5.000000e-01 : f32
    %394 = vector.broadcast %cst_153 : f32 to vector<16x16xf32>
    %395 = arith.mulf %394, %393 : vector<16x16xf32>
    %396 = vector.extract_strided_slice %387 {offsets = [0, 16], sizes = [16, 16], strides = [1, 1]} : vector<16x64xf32> to vector<16x16xf32>
    %cst_154 = arith.constant 5.000000e-01 : f32
    %397 = vector.broadcast %cst_154 : f32 to vector<16x16xf32>
    %398 = arith.mulf %397, %396 : vector<16x16xf32>
    %399 = math.tanh %398 : vector<16x16xf32>
    %cst_155 = arith.constant 1.000000e+00 : f32
    %400 = vector.broadcast %cst_155 : f32 to vector<16x16xf32>
    %401 = arith.addf %399, %400 : vector<16x16xf32>
    %cst_156 = arith.constant 5.000000e-01 : f32
    %402 = vector.broadcast %cst_156 : f32 to vector<16x16xf32>
    %403 = arith.mulf %402, %401 : vector<16x16xf32>
    %404 = vector.extract_strided_slice %387 {offsets = [0, 32], sizes = [16, 16], strides = [1, 1]} : vector<16x64xf32> to vector<16x16xf32>
    %405 = math.tanh %404 : vector<16x16xf32>
    %406 = vector.extract_strided_slice %387 {offsets = [0, 48], sizes = [16, 16], strides = [1, 1]} : vector<16x64xf32> to vector<16x16xf32>
    %cst_157 = arith.constant 5.000000e-01 : f32
    %407 = vector.broadcast %cst_157 : f32 to vector<16x16xf32>
    %408 = arith.mulf %407, %406 : vector<16x16xf32>
    %409 = math.tanh %408 : vector<16x16xf32>
    %cst_158 = arith.constant 1.000000e+00 : f32
    %410 = vector.broadcast %cst_158 : f32 to vector<16x16xf32>
    %411 = arith.addf %409, %410 : vector<16x16xf32>
    %cst_159 = arith.constant 5.000000e-01 : f32
    %412 = vector.broadcast %cst_159 : f32 to vector<16x16xf32>
    %413 = arith.mulf %412, %411 : vector<16x16xf32>
    %414 = arith.mulf %403, %370 : vector<16x16xf32>
    %415 = arith.mulf %395, %405 : vector<16x16xf32>
    %416 = arith.addf %414, %415 : vector<16x16xf32>
    %417 = math.tanh %416 : vector<16x16xf32>
    %418 = arith.mulf %413, %417 : vector<16x16xf32>
    %c7_i32 = arith.constant 7 : i32
    %419 = vector.broadcast %c7_i32 : i32 to vector<16x1xi32>
    %420 = arith.cmpi sgt, %7, %419 : vector<16x1xi32>
    %cst_160 = arith.constant 0.000000e+00 : f32
    %421 = vector.shape_cast %420 : vector<16x1xi1> to vector<16x1xi1>
    %422 = vector.broadcast %421 : vector<16x1xi1> to vector<16x16xi1>
    %423 = vector.broadcast %cst_160 : f32 to vector<16x16xf32>
    %424 = arith.select %422, %418, %423 : vector<16x16xi1>, vector<16x16xf32>
    %c0_161 = arith.constant 0 : index
    %c7_162 = arith.constant 7 : index
    %c0_163 = arith.constant 0 : index
    %c0_164 = arith.constant 0 : index
    %425 = vector.load %arg6[%c0_161, %c7_162, %c0_163, %c0_164] : memref<1x8x16x16xf32, #tpu.memory_space<vmem>>, vector<1x1x16x16xf32>
    %426 = vector.shape_cast %425 : vector<1x1x16x16xf32> to vector<16x16xf32>
    %427 = vector.shape_cast %424 : vector<16x16xf32> to vector<1x1x16x16xf32>
    tpu.vector_store %arg6[%c0_161, %c7_162, %c0_163, %c0_164], %427 {strides = array<i32>} : memref<1x8x16x16xf32, #tpu.memory_space<vmem>>, vector<1x1x16x16xf32>,
    return
  }
  func.func @transform_0(%arg0: i32) -> (i32, i32, i32) {
    %c0_i32 = arith.constant 0 : i32
    %c0_i32_0 = arith.constant 0 : i32
    %c0_i32_1 = arith.constant 0 : i32
    return %arg0, %c0_i32, %c0_i32_0 : i32, i32, i32
  }
  func.func @transform_1(%arg0: i32) -> (i32, i32, i32, i32) {
    %c0_i32 = arith.constant 0 : i32
    %c0_i32_0 = arith.constant 0 : i32
    %c0_i32_1 = arith.constant 0 : i32
    %c0_i32_2 = arith.constant 0 : i32
    return %arg0, %c0_i32, %c0_i32_0, %c0_i32_1 : i32, i32, i32, i32
  }
  func.func @transform_2(%arg0: i32) -> (i32, i32, i32) {
    %c0_i32 = arith.constant 0 : i32
    %c0_i32_0 = arith.constant 0 : i32
    %c0_i32_1 = arith.constant 0 : i32
    return %arg0, %c0_i32, %c0_i32_0 : i32, i32, i32
  }
  func.func @transform_3(%arg0: i32) -> (i32, i32, i32) {
    %c0_i32 = arith.constant 0 : i32
    %c0_i32_0 = arith.constant 0 : i32
    %c0_i32_1 = arith.constant 0 : i32
    return %arg0, %c0_i32, %c0_i32_0 : i32, i32, i32
  }
  func.func @transform_4(%arg0: i32) -> (i32, i32, i32) {
    %c0_i32 = arith.constant 0 : i32
    %c0_i32_0 = arith.constant 0 : i32
    %c0_i32_1 = arith.constant 0 : i32
    return %arg0, %c0_i32, %c0_i32_0 : i32, i32, i32
  }
  func.func @transform_5(%arg0: i32) -> (i32, i32, i32, i32) {
    %c0_i32 = arith.constant 0 : i32
    %c0_i32_0 = arith.constant 0 : i32
    %c0_i32_1 = arith.constant 0 : i32
    %c0_i32_2 = arith.constant 0 : i32
    return %arg0, %c0_i32, %c0_i32_0, %c0_i32_1 : i32, i32, i32, i32
  }
}

module attributes {stable_mosaic.version = 11 : i64} {
  func.func @_dual_dense_relu_kernel(%arg0: memref<16x64xf32, #tpu.memory_space<vmem>>, %arg1: memref<64x32xf32, #tpu.memory_space<vmem>>, %arg2: memref<1x32xf32, #tpu.memory_space<vmem>>, %arg3: memref<16x64xf32, #tpu.memory_space<vmem>>, %arg4: memref<64x32xf32, #tpu.memory_space<vmem>>, %arg5: memref<1x32xf32, #tpu.memory_space<vmem>>, %arg6: memref<16x32xf32, #tpu.memory_space<vmem>>) attributes {dimension_semantics = [], scalar_prefetch = 0 : i64, scratch_operands = 0 : i64, tpu.core_type = #tpu.core_type<tc>} {
    %c0 = arith.constant 0 : index
    %c0_0 = arith.constant 0 : index
    %0 = vector.load %arg0[%c0, %c0_0] : memref<16x64xf32, #tpu.memory_space<vmem>>, vector<16x64xf32>
    %c0_1 = arith.constant 0 : index
    %c0_2 = arith.constant 0 : index
    %1 = vector.load %arg1[%c0_1, %c0_2] : memref<64x32xf32, #tpu.memory_space<vmem>>, vector<64x32xf32>
    %cst = arith.constant dense<0.000000e+00> : vector<16x32xf32>
    %2 = tpu.matmul %0, %1, %cst {dimension_numbers = #tpu.dot_dimension_numbers<[1], [0], [0], [1], [0, 0, 1, 1], [], []>} : vector<16x64xf32>, vector<64x32xf32>, vector<16x32xf32> -> vector<16x32xf32>
    %c0_3 = arith.constant 0 : index
    %c0_4 = arith.constant 0 : index
    %3 = vector.load %arg2[%c0_3, %c0_4] : memref<1x32xf32, #tpu.memory_space<vmem>>, vector<1x32xf32>
    %4 = vector.broadcast %3 : vector<1x32xf32> to vector<16x32xf32>
    %5 = arith.addf %2, %4 : vector<16x32xf32>
    %c0_5 = arith.constant 0 : index
    %c0_6 = arith.constant 0 : index
    %6 = vector.load %arg3[%c0_5, %c0_6] : memref<16x64xf32, #tpu.memory_space<vmem>>, vector<16x64xf32>
    %c0_7 = arith.constant 0 : index
    %c0_8 = arith.constant 0 : index
    %7 = vector.load %arg4[%c0_7, %c0_8] : memref<64x32xf32, #tpu.memory_space<vmem>>, vector<64x32xf32>
    %cst_9 = arith.constant dense<0.000000e+00> : vector<16x32xf32>
    %8 = tpu.matmul %6, %7, %cst_9 {dimension_numbers = #tpu.dot_dimension_numbers<[1], [0], [0], [1], [0, 0, 1, 1], [], []>} : vector<16x64xf32>, vector<64x32xf32>, vector<16x32xf32> -> vector<16x32xf32>
    %9 = arith.addf %5, %8 : vector<16x32xf32>
    %c0_10 = arith.constant 0 : index
    %c0_11 = arith.constant 0 : index
    %10 = vector.load %arg5[%c0_10, %c0_11] : memref<1x32xf32, #tpu.memory_space<vmem>>, vector<1x32xf32>
    %11 = vector.broadcast %10 : vector<1x32xf32> to vector<16x32xf32>
    %12 = arith.addf %9, %11 : vector<16x32xf32>
    %cst_12 = arith.constant 0.000000e+00 : f32
    %13 = vector.broadcast %cst_12 : f32 to vector<16x32xf32>
    %14 = arith.maximumf %12, %13 : vector<16x32xf32>
    %c0_13 = arith.constant 0 : index
    %c0_14 = arith.constant 0 : index
    %15 = vector.load %arg6[%c0_13, %c0_14] : memref<16x32xf32, #tpu.memory_space<vmem>>, vector<16x32xf32>
    tpu.vector_store %arg6[%c0_13, %c0_14], %14 {strides = array<i32>} : memref<16x32xf32, #tpu.memory_space<vmem>>, vector<16x32xf32>,
    return
  }
}

module attributes {stable_mosaic.version = 11 : i64} {
  func.func @_multi_lstm_kernel(%arg0: i32, %arg1: memref<1x2x1xi32, #tpu.memory_space<vmem>>, %arg2: memref<1x8x2x32xf32, #tpu.memory_space<vmem>>, %arg3: memref<1x32x128xf32, #tpu.memory_space<vmem>>, %arg4: memref<1x32x128xf32, #tpu.memory_space<vmem>>, %arg5: memref<1x1x128xf32, #tpu.memory_space<vmem>>, %arg6: memref<1x8x2x32xf32, #tpu.memory_space<vmem>>) attributes {dimension_semantics = [#tpu.dimension_semantics<parallel>], iteration_bounds = array<i64: 2>, scalar_prefetch = 0 : i64, scratch_operands = 0 : i64, tpu.core_type = #tpu.core_type<tc>, window_params = [{transform_indices = @transform_0, window_bounds = array<i64: 1, 2, 1>}, {transform_indices = @transform_1, window_bounds = array<i64: 1, 8, 2, 32>}, {transform_indices = @transform_2, window_bounds = array<i64: 1, 32, 128>}, {transform_indices = @transform_3, window_bounds = array<i64: 1, 32, 128>}, {transform_indices = @transform_4, window_bounds = array<i64: 1, 1, 128>}, {transform_indices = @transform_5, window_bounds = array<i64: 1, 8, 2, 32>}]} {
    %c0 = arith.constant 0 : index
    %c0_0 = arith.constant 0 : index
    %c0_1 = arith.constant 0 : index
    %0 = vector.load %arg3[%c0, %c0_0, %c0_1] : memref<1x32x128xf32, #tpu.memory_space<vmem>>, vector<1x32x128xf32>
    %1 = vector.shape_cast %0 : vector<1x32x128xf32> to vector<32x128xf32>
    %c0_2 = arith.constant 0 : index
    %c0_3 = arith.constant 0 : index
    %c0_4 = arith.constant 0 : index
    %2 = vector.load %arg4[%c0_2, %c0_3, %c0_4] : memref<1x32x128xf32, #tpu.memory_space<vmem>>, vector<1x32x128xf32>
    %3 = vector.shape_cast %2 : vector<1x32x128xf32> to vector<32x128xf32>
    %c0_5 = arith.constant 0 : index
    %c0_6 = arith.constant 0 : index
    %c0_7 = arith.constant 0 : index
    %4 = vector.load %arg5[%c0_5, %c0_6, %c0_7] : memref<1x1x128xf32, #tpu.memory_space<vmem>>, vector<1x1x128xf32>
    %5 = vector.shape_cast %4 : vector<1x1x128xf32> to vector<1x128xf32>
    %c0_8 = arith.constant 0 : index
    %c0_9 = arith.constant 0 : index
    %c0_10 = arith.constant 0 : index
    %6 = vector.load %arg1[%c0_8, %c0_9, %c0_10] : memref<1x2x1xi32, #tpu.memory_space<vmem>>, vector<1x2x1xi32>
    %7 = vector.shape_cast %6 : vector<1x2x1xi32> to vector<2x1xi32>
    %cst = arith.constant 0.000000e+00 : f32
    %8 = vector.broadcast %cst : f32 to vector<2x32xf32>
    %cst_11 = arith.constant 0.000000e+00 : f32
    %9 = vector.broadcast %cst_11 : f32 to vector<2x32xf32>
    %c0_12 = arith.constant 0 : index
    %c0_13 = arith.constant 0 : index
    %c0_14 = arith.constant 0 : index
    %c0_15 = arith.constant 0 : index
    %10 = vector.load %arg2[%c0_12, %c0_13, %c0_14, %c0_15] : memref<1x8x2x32xf32, #tpu.memory_space<vmem>>, vector<1x1x2x32xf32>
    %11 = vector.shape_cast %10 : vector<1x1x2x32xf32> to vector<2x32xf32>
    %cst_16 = arith.constant dense<0.000000e+00> : vector<2x128xf32>
    %12 = tpu.matmul %11, %1, %cst_16 {dimension_numbers = #tpu.dot_dimension_numbers<[1], [0], [0], [1], [0, 0, 1, 1], [], []>} : vector<2x32xf32>, vector<32x128xf32>, vector<2x128xf32> -> vector<2x128xf32>
    %cst_17 = arith.constant dense<0.000000e+00> : vector<2x128xf32>
    %13 = tpu.matmul %8, %3, %cst_17 {dimension_numbers = #tpu.dot_dimension_numbers<[1], [0], [0], [1], [0, 0, 1, 1], [], []>} : vector<2x32xf32>, vector<32x128xf32>, vector<2x128xf32> -> vector<2x128xf32>
    %14 = arith.addf %12, %13 : vector<2x128xf32>
    %15 = vector.broadcast %5 : vector<1x128xf32> to vector<2x128xf32>
    %16 = arith.addf %14, %15 : vector<2x128xf32>
    %17 = vector.extract_strided_slice %16 {offsets = [0, 0], sizes = [2, 32], strides = [1, 1]} : vector<2x128xf32> to vector<2x32xf32>
    %cst_18 = arith.constant 5.000000e-01 : f32
    %18 = vector.broadcast %cst_18 : f32 to vector<2x32xf32>
    %19 = arith.mulf %18, %17 : vector<2x32xf32>
    %20 = math.tanh %19 : vector<2x32xf32>
    %cst_19 = arith.constant 1.000000e+00 : f32
    %21 = vector.broadcast %cst_19 : f32 to vector<2x32xf32>
    %22 = arith.addf %20, %21 : vector<2x32xf32>
    %cst_20 = arith.constant 5.000000e-01 : f32
    %23 = vector.broadcast %cst_20 : f32 to vector<2x32xf32>
    %24 = arith.mulf %23, %22 : vector<2x32xf32>
    %25 = vector.extract_strided_slice %16 {offsets = [0, 32], sizes = [2, 32], strides = [1, 1]} : vector<2x128xf32> to vector<2x32xf32>
    %cst_21 = arith.constant 5.000000e-01 : f32
    %26 = vector.broadcast %cst_21 : f32 to vector<2x32xf32>
    %27 = arith.mulf %26, %25 : vector<2x32xf32>
    %28 = math.tanh %27 : vector<2x32xf32>
    %cst_22 = arith.constant 1.000000e+00 : f32
    %29 = vector.broadcast %cst_22 : f32 to vector<2x32xf32>
    %30 = arith.addf %28, %29 : vector<2x32xf32>
    %cst_23 = arith.constant 5.000000e-01 : f32
    %31 = vector.broadcast %cst_23 : f32 to vector<2x32xf32>
    %32 = arith.mulf %31, %30 : vector<2x32xf32>
    %33 = vector.extract_strided_slice %16 {offsets = [0, 64], sizes = [2, 32], strides = [1, 1]} : vector<2x128xf32> to vector<2x32xf32>
    %34 = math.tanh %33 : vector<2x32xf32>
    %35 = vector.extract_strided_slice %16 {offsets = [0, 96], sizes = [2, 32], strides = [1, 1]} : vector<2x128xf32> to vector<2x32xf32>
    %cst_24 = arith.constant 5.000000e-01 : f32
    %36 = vector.broadcast %cst_24 : f32 to vector<2x32xf32>
    %37 = arith.mulf %36, %35 : vector<2x32xf32>
    %38 = math.tanh %37 : vector<2x32xf32>
    %cst_25 = arith.constant 1.000000e+00 : f32
    %39 = vector.broadcast %cst_25 : f32 to vector<2x32xf32>
    %40 = arith.addf %38, %39 : vector<2x32xf32>
    %cst_26 = arith.constant 5.000000e-01 : f32
    %41 = vector.broadcast %cst_26 : f32 to vector<2x32xf32>
    %42 = arith.mulf %41, %40 : vector<2x32xf32>
    %43 = arith.mulf %32, %9 : vector<2x32xf32>
    %44 = arith.mulf %24, %34 : vector<2x32xf32>
    %45 = arith.addf %43, %44 : vector<2x32xf32>
    %46 = math.tanh %45 : vector<2x32xf32>
    %47 = arith.mulf %42, %46 : vector<2x32xf32>
    %c0_i32 = arith.constant 0 : i32
    %48 = vector.broadcast %c0_i32 : i32 to vector<2x1xi32>
    %49 = arith.cmpi sgt, %7, %48 : vector<2x1xi32>
    %50 = vector.shape_cast %49 : vector<2x1xi1> to vector<2x1xi1>
    %51 = vector.broadcast %50 : vector<2x1xi1> to vector<2x32xi1>
    %52 = arith.select %51, %45, %9 : vector<2x32xi1>, vector<2x32xf32>
    %53 = vector.shape_cast %49 : vector<2x1xi1> to vector<2x1xi1>
    %54 = vector.broadcast %53 : vector<2x1xi1> to vector<2x32xi1>
    %55 = arith.select %54, %47, %8 : vector<2x32xi1>, vector<2x32xf32>
    %cst_27 = arith.constant 0.000000e+00 : f32
    %56 = vector.shape_cast %49 : vector<2x1xi1> to vector<2x1xi1>
    %57 = vector.broadcast %56 : vector<2x1xi1> to vector<2x32xi1>
    %58 = vector.broadcast %cst_27 : f32 to vector<2x32xf32>
    %59 = arith.select %57, %47, %58 : vector<2x32xi1>, vector<2x32xf32>
    %c0_28 = arith.constant 0 : index
    %c0_29 = arith.constant 0 : index
    %c0_30 = arith.constant 0 : index
    %c0_31 = arith.constant 0 : index
    %60 = vector.load %arg6[%c0_28, %c0_29, %c0_30, %c0_31] : memref<1x8x2x32xf32, #tpu.memory_space<vmem>>, vector<1x1x2x32xf32>
    %61 = vector.shape_cast %60 : vector<1x1x2x32xf32> to vector<2x32xf32>
    %62 = vector.shape_cast %59 : vector<2x32xf32> to vector<1x1x2x32xf32>
    tpu.vector_store %arg6[%c0_28, %c0_29, %c0_30, %c0_31], %62 {strides = array<i32>} : memref<1x8x2x32xf32, #tpu.memory_space<vmem>>, vector<1x1x2x32xf32>,
    %c0_32 = arith.constant 0 : index
    %c1 = arith.constant 1 : index
    %c0_33 = arith.constant 0 : index
    %c0_34 = arith.constant 0 : index
    %63 = vector.load %arg2[%c0_32, %c1, %c0_33, %c0_34] : memref<1x8x2x32xf32, #tpu.memory_space<vmem>>, vector<1x1x2x32xf32>
    %64 = vector.shape_cast %63 : vector<1x1x2x32xf32> to vector<2x32xf32>
    %cst_35 = arith.constant dense<0.000000e+00> : vector<2x128xf32>
    %65 = tpu.matmul %64, %1, %cst_35 {dimension_numbers = #tpu.dot_dimension_numbers<[1], [0], [0], [1], [0, 0, 1, 1], [], []>} : vector<2x32xf32>, vector<32x128xf32>, vector<2x128xf32> -> vector<2x128xf32>
    %cst_36 = arith.constant dense<0.000000e+00> : vector<2x128xf32>
    %66 = tpu.matmul %55, %3, %cst_36 {dimension_numbers = #tpu.dot_dimension_numbers<[1], [0], [0], [1], [0, 0, 1, 1], [], []>} : vector<2x32xf32>, vector<32x128xf32>, vector<2x128xf32> -> vector<2x128xf32>
    %67 = arith.addf %65, %66 : vector<2x128xf32>
    %68 = vector.broadcast %5 : vector<1x128xf32> to vector<2x128xf32>
    %69 = arith.addf %67, %68 : vector<2x128xf32>
    %70 = vector.extract_strided_slice %69 {offsets = [0, 0], sizes = [2, 32], strides = [1, 1]} : vector<2x128xf32> to vector<2x32xf32>
    %cst_37 = arith.constant 5.000000e-01 : f32
    %71 = vector.broadcast %cst_37 : f32 to vector<2x32xf32>
    %72 = arith.mulf %71, %70 : vector<2x32xf32>
    %73 = math.tanh %72 : vector<2x32xf32>
    %cst_38 = arith.constant 1.000000e+00 : f32
    %74 = vector.broadcast %cst_38 : f32 to vector<2x32xf32>
    %75 = arith.addf %73, %74 : vector<2x32xf32>
    %cst_39 = arith.constant 5.000000e-01 : f32
    %76 = vector.broadcast %cst_39 : f32 to vector<2x32xf32>
    %77 = arith.mulf %76, %75 : vector<2x32xf32>
    %78 = vector.extract_strided_slice %69 {offsets = [0, 32], sizes = [2, 32], strides = [1, 1]} : vector<2x128xf32> to vector<2x32xf32>
    %cst_40 = arith.constant 5.000000e-01 : f32
    %79 = vector.broadcast %cst_40 : f32 to vector<2x32xf32>
    %80 = arith.mulf %79, %78 : vector<2x32xf32>
    %81 = math.tanh %80 : vector<2x32xf32>
    %cst_41 = arith.constant 1.000000e+00 : f32
    %82 = vector.broadcast %cst_41 : f32 to vector<2x32xf32>
    %83 = arith.addf %81, %82 : vector<2x32xf32>
    %cst_42 = arith.constant 5.000000e-01 : f32
    %84 = vector.broadcast %cst_42 : f32 to vector<2x32xf32>
    %85 = arith.mulf %84, %83 : vector<2x32xf32>
    %86 = vector.extract_strided_slice %69 {offsets = [0, 64], sizes = [2, 32], strides = [1, 1]} : vector<2x128xf32> to vector<2x32xf32>
    %87 = math.tanh %86 : vector<2x32xf32>
    %88 = vector.extract_strided_slice %69 {offsets = [0, 96], sizes = [2, 32], strides = [1, 1]} : vector<2x128xf32> to vector<2x32xf32>
    %cst_43 = arith.constant 5.000000e-01 : f32
    %89 = vector.broadcast %cst_43 : f32 to vector<2x32xf32>
    %90 = arith.mulf %89, %88 : vector<2x32xf32>
    %91 = math.tanh %90 : vector<2x32xf32>
    %cst_44 = arith.constant 1.000000e+00 : f32
    %92 = vector.broadcast %cst_44 : f32 to vector<2x32xf32>
    %93 = arith.addf %91, %92 : vector<2x32xf32>
    %cst_45 = arith.constant 5.000000e-01 : f32
    %94 = vector.broadcast %cst_45 : f32 to vector<2x32xf32>
    %95 = arith.mulf %94, %93 : vector<2x32xf32>
    %96 = arith.mulf %85, %52 : vector<2x32xf32>
    %97 = arith.mulf %77, %87 : vector<2x32xf32>
    %98 = arith.addf %96, %97 : vector<2x32xf32>
    %99 = math.tanh %98 : vector<2x32xf32>
    %100 = arith.mulf %95, %99 : vector<2x32xf32>
    %c1_i32 = arith.constant 1 : i32
    %101 = vector.broadcast %c1_i32 : i32 to vector<2x1xi32>
    %102 = arith.cmpi sgt, %7, %101 : vector<2x1xi32>
    %103 = vector.shape_cast %102 : vector<2x1xi1> to vector<2x1xi1>
    %104 = vector.broadcast %103 : vector<2x1xi1> to vector<2x32xi1>
    %105 = arith.select %104, %98, %52 : vector<2x32xi1>, vector<2x32xf32>
    %106 = vector.shape_cast %102 : vector<2x1xi1> to vector<2x1xi1>
    %107 = vector.broadcast %106 : vector<2x1xi1> to vector<2x32xi1>
    %108 = arith.select %107, %100, %55 : vector<2x32xi1>, vector<2x32xf32>
    %cst_46 = arith.constant 0.000000e+00 : f32
    %109 = vector.shape_cast %102 : vector<2x1xi1> to vector<2x1xi1>
    %110 = vector.broadcast %109 : vector<2x1xi1> to vector<2x32xi1>
    %111 = vector.broadcast %cst_46 : f32 to vector<2x32xf32>
    %112 = arith.select %110, %100, %111 : vector<2x32xi1>, vector<2x32xf32>
    %c0_47 = arith.constant 0 : index
    %c1_48 = arith.constant 1 : index
    %c0_49 = arith.constant 0 : index
    %c0_50 = arith.constant 0 : index
    %113 = vector.load %arg6[%c0_47, %c1_48, %c0_49, %c0_50] : memref<1x8x2x32xf32, #tpu.memory_space<vmem>>, vector<1x1x2x32xf32>
    %114 = vector.shape_cast %113 : vector<1x1x2x32xf32> to vector<2x32xf32>
    %115 = vector.shape_cast %112 : vector<2x32xf32> to vector<1x1x2x32xf32>
    tpu.vector_store %arg6[%c0_47, %c1_48, %c0_49, %c0_50], %115 {strides = array<i32>} : memref<1x8x2x32xf32, #tpu.memory_space<vmem>>, vector<1x1x2x32xf32>,
    %c0_51 = arith.constant 0 : index
    %c2 = arith.constant 2 : index
    %c0_52 = arith.constant 0 : index
    %c0_53 = arith.constant 0 : index
    %116 = vector.load %arg2[%c0_51, %c2, %c0_52, %c0_53] : memref<1x8x2x32xf32, #tpu.memory_space<vmem>>, vector<1x1x2x32xf32>
    %117 = vector.shape_cast %116 : vector<1x1x2x32xf32> to vector<2x32xf32>
    %cst_54 = arith.constant dense<0.000000e+00> : vector<2x128xf32>
    %118 = tpu.matmul %117, %1, %cst_54 {dimension_numbers = #tpu.dot_dimension_numbers<[1], [0], [0], [1], [0, 0, 1, 1], [], []>} : vector<2x32xf32>, vector<32x128xf32>, vector<2x128xf32> -> vector<2x128xf32>
    %cst_55 = arith.constant dense<0.000000e+00> : vector<2x128xf32>
    %119 = tpu.matmul %108, %3, %cst_55 {dimension_numbers = #tpu.dot_dimension_numbers<[1], [0], [0], [1], [0, 0, 1, 1], [], []>} : vector<2x32xf32>, vector<32x128xf32>, vector<2x128xf32> -> vector<2x128xf32>
    %120 = arith.addf %118, %119 : vector<2x128xf32>
    %121 = vector.broadcast %5 : vector<1x128xf32> to vector<2x128xf32>
    %122 = arith.addf %120, %121 : vector<2x128xf32>
    %123 = vector.extract_strided_slice %122 {offsets = [0, 0], sizes = [2, 32], strides = [1, 1]} : vector<2x128xf32> to vector<2x32xf32>
    %cst_56 = arith.constant 5.000000e-01 : f32
    %124 = vector.broadcast %cst_56 : f32 to vector<2x32xf32>
    %125 = arith.mulf %124, %123 : vector<2x32xf32>
    %126 = math.tanh %125 : vector<2x32xf32>
    %cst_57 = arith.constant 1.000000e+00 : f32
    %127 = vector.broadcast %cst_57 : f32 to vector<2x32xf32>
    %128 = arith.addf %126, %127 : vector<2x32xf32>
    %cst_58 = arith.constant 5.000000e-01 : f32
    %129 = vector.broadcast %cst_58 : f32 to vector<2x32xf32>
    %130 = arith.mulf %129, %128 : vector<2x32xf32>
    %131 = vector.extract_strided_slice %122 {offsets = [0, 32], sizes = [2, 32], strides = [1, 1]} : vector<2x128xf32> to vector<2x32xf32>
    %cst_59 = arith.constant 5.000000e-01 : f32
    %132 = vector.broadcast %cst_59 : f32 to vector<2x32xf32>
    %133 = arith.mulf %132, %131 : vector<2x32xf32>
    %134 = math.tanh %133 : vector<2x32xf32>
    %cst_60 = arith.constant 1.000000e+00 : f32
    %135 = vector.broadcast %cst_60 : f32 to vector<2x32xf32>
    %136 = arith.addf %134, %135 : vector<2x32xf32>
    %cst_61 = arith.constant 5.000000e-01 : f32
    %137 = vector.broadcast %cst_61 : f32 to vector<2x32xf32>
    %138 = arith.mulf %137, %136 : vector<2x32xf32>
    %139 = vector.extract_strided_slice %122 {offsets = [0, 64], sizes = [2, 32], strides = [1, 1]} : vector<2x128xf32> to vector<2x32xf32>
    %140 = math.tanh %139 : vector<2x32xf32>
    %141 = vector.extract_strided_slice %122 {offsets = [0, 96], sizes = [2, 32], strides = [1, 1]} : vector<2x128xf32> to vector<2x32xf32>
    %cst_62 = arith.constant 5.000000e-01 : f32
    %142 = vector.broadcast %cst_62 : f32 to vector<2x32xf32>
    %143 = arith.mulf %142, %141 : vector<2x32xf32>
    %144 = math.tanh %143 : vector<2x32xf32>
    %cst_63 = arith.constant 1.000000e+00 : f32
    %145 = vector.broadcast %cst_63 : f32 to vector<2x32xf32>
    %146 = arith.addf %144, %145 : vector<2x32xf32>
    %cst_64 = arith.constant 5.000000e-01 : f32
    %147 = vector.broadcast %cst_64 : f32 to vector<2x32xf32>
    %148 = arith.mulf %147, %146 : vector<2x32xf32>
    %149 = arith.mulf %138, %105 : vector<2x32xf32>
    %150 = arith.mulf %130, %140 : vector<2x32xf32>
    %151 = arith.addf %149, %150 : vector<2x32xf32>
    %152 = math.tanh %151 : vector<2x32xf32>
    %153 = arith.mulf %148, %152 : vector<2x32xf32>
    %c2_i32 = arith.constant 2 : i32
    %154 = vector.broadcast %c2_i32 : i32 to vector<2x1xi32>
    %155 = arith.cmpi sgt, %7, %154 : vector<2x1xi32>
    %156 = vector.shape_cast %155 : vector<2x1xi1> to vector<2x1xi1>
    %157 = vector.broadcast %156 : vector<2x1xi1> to vector<2x32xi1>
    %158 = arith.select %157, %151, %105 : vector<2x32xi1>, vector<2x32xf32>
    %159 = vector.shape_cast %155 : vector<2x1xi1> to vector<2x1xi1>
    %160 = vector.broadcast %159 : vector<2x1xi1> to vector<2x32xi1>
    %161 = arith.select %160, %153, %108 : vector<2x32xi1>, vector<2x32xf32>
    %cst_65 = arith.constant 0.000000e+00 : f32
    %162 = vector.shape_cast %155 : vector<2x1xi1> to vector<2x1xi1>
    %163 = vector.broadcast %162 : vector<2x1xi1> to vector<2x32xi1>
    %164 = vector.broadcast %cst_65 : f32 to vector<2x32xf32>
    %165 = arith.select %163, %153, %164 : vector<2x32xi1>, vector<2x32xf32>
    %c0_66 = arith.constant 0 : index
    %c2_67 = arith.constant 2 : index
    %c0_68 = arith.constant 0 : index
    %c0_69 = arith.constant 0 : index
    %166 = vector.load %arg6[%c0_66, %c2_67, %c0_68, %c0_69] : memref<1x8x2x32xf32, #tpu.memory_space<vmem>>, vector<1x1x2x32xf32>
    %167 = vector.shape_cast %166 : vector<1x1x2x32xf32> to vector<2x32xf32>
    %168 = vector.shape_cast %165 : vector<2x32xf32> to vector<1x1x2x32xf32>
    tpu.vector_store %arg6[%c0_66, %c2_67, %c0_68, %c0_69], %168 {strides = array<i32>} : memref<1x8x2x32xf32, #tpu.memory_space<vmem>>, vector<1x1x2x32xf32>,
    %c0_70 = arith.constant 0 : index
    %c3 = arith.constant 3 : index
    %c0_71 = arith.constant 0 : index
    %c0_72 = arith.constant 0 : index
    %169 = vector.load %arg2[%c0_70, %c3, %c0_71, %c0_72] : memref<1x8x2x32xf32, #tpu.memory_space<vmem>>, vector<1x1x2x32xf32>
    %170 = vector.shape_cast %169 : vector<1x1x2x32xf32> to vector<2x32xf32>
    %cst_73 = arith.constant dense<0.000000e+00> : vector<2x128xf32>
    %171 = tpu.matmul %170, %1, %cst_73 {dimension_numbers = #tpu.dot_dimension_numbers<[1], [0], [0], [1], [0, 0, 1, 1], [], []>} : vector<2x32xf32>, vector<32x128xf32>, vector<2x128xf32> -> vector<2x128xf32>
    %cst_74 = arith.constant dense<0.000000e+00> : vector<2x128xf32>
    %172 = tpu.matmul %161, %3, %cst_74 {dimension_numbers = #tpu.dot_dimension_numbers<[1], [0], [0], [1], [0, 0, 1, 1], [], []>} : vector<2x32xf32>, vector<32x128xf32>, vector<2x128xf32> -> vector<2x128xf32>
    %173 = arith.addf %171, %172 : vector<2x128xf32>
    %174 = vector.broadcast %5 : vector<1x128xf32> to vector<2x128xf32>
    %175 = arith.addf %173, %174 : vector<2x128xf32>
    %176 = vector.extract_strided_slice %175 {offsets = [0, 0], sizes = [2, 32], strides = [1, 1]} : vector<2x128xf32> to vector<2x32xf32>
    %cst_75 = arith.constant 5.000000e-01 : f32
    %177 = vector.broadcast %cst_75 : f32 to vector<2x32xf32>
    %178 = arith.mulf %177, %176 : vector<2x32xf32>
    %179 = math.tanh %178 : vector<2x32xf32>
    %cst_76 = arith.constant 1.000000e+00 : f32
    %180 = vector.broadcast %cst_76 : f32 to vector<2x32xf32>
    %181 = arith.addf %179, %180 : vector<2x32xf32>
    %cst_77 = arith.constant 5.000000e-01 : f32
    %182 = vector.broadcast %cst_77 : f32 to vector<2x32xf32>
    %183 = arith.mulf %182, %181 : vector<2x32xf32>
    %184 = vector.extract_strided_slice %175 {offsets = [0, 32], sizes = [2, 32], strides = [1, 1]} : vector<2x128xf32> to vector<2x32xf32>
    %cst_78 = arith.constant 5.000000e-01 : f32
    %185 = vector.broadcast %cst_78 : f32 to vector<2x32xf32>
    %186 = arith.mulf %185, %184 : vector<2x32xf32>
    %187 = math.tanh %186 : vector<2x32xf32>
    %cst_79 = arith.constant 1.000000e+00 : f32
    %188 = vector.broadcast %cst_79 : f32 to vector<2x32xf32>
    %189 = arith.addf %187, %188 : vector<2x32xf32>
    %cst_80 = arith.constant 5.000000e-01 : f32
    %190 = vector.broadcast %cst_80 : f32 to vector<2x32xf32>
    %191 = arith.mulf %190, %189 : vector<2x32xf32>
    %192 = vector.extract_strided_slice %175 {offsets = [0, 64], sizes = [2, 32], strides = [1, 1]} : vector<2x128xf32> to vector<2x32xf32>
    %193 = math.tanh %192 : vector<2x32xf32>
    %194 = vector.extract_strided_slice %175 {offsets = [0, 96], sizes = [2, 32], strides = [1, 1]} : vector<2x128xf32> to vector<2x32xf32>
    %cst_81 = arith.constant 5.000000e-01 : f32
    %195 = vector.broadcast %cst_81 : f32 to vector<2x32xf32>
    %196 = arith.mulf %195, %194 : vector<2x32xf32>
    %197 = math.tanh %196 : vector<2x32xf32>
    %cst_82 = arith.constant 1.000000e+00 : f32
    %198 = vector.broadcast %cst_82 : f32 to vector<2x32xf32>
    %199 = arith.addf %197, %198 : vector<2x32xf32>
    %cst_83 = arith.constant 5.000000e-01 : f32
    %200 = vector.broadcast %cst_83 : f32 to vector<2x32xf32>
    %201 = arith.mulf %200, %199 : vector<2x32xf32>
    %202 = arith.mulf %191, %158 : vector<2x32xf32>
    %203 = arith.mulf %183, %193 : vector<2x32xf32>
    %204 = arith.addf %202, %203 : vector<2x32xf32>
    %205 = math.tanh %204 : vector<2x32xf32>
    %206 = arith.mulf %201, %205 : vector<2x32xf32>
    %c3_i32 = arith.constant 3 : i32
    %207 = vector.broadcast %c3_i32 : i32 to vector<2x1xi32>
    %208 = arith.cmpi sgt, %7, %207 : vector<2x1xi32>
    %209 = vector.shape_cast %208 : vector<2x1xi1> to vector<2x1xi1>
    %210 = vector.broadcast %209 : vector<2x1xi1> to vector<2x32xi1>
    %211 = arith.select %210, %204, %158 : vector<2x32xi1>, vector<2x32xf32>
    %212 = vector.shape_cast %208 : vector<2x1xi1> to vector<2x1xi1>
    %213 = vector.broadcast %212 : vector<2x1xi1> to vector<2x32xi1>
    %214 = arith.select %213, %206, %161 : vector<2x32xi1>, vector<2x32xf32>
    %cst_84 = arith.constant 0.000000e+00 : f32
    %215 = vector.shape_cast %208 : vector<2x1xi1> to vector<2x1xi1>
    %216 = vector.broadcast %215 : vector<2x1xi1> to vector<2x32xi1>
    %217 = vector.broadcast %cst_84 : f32 to vector<2x32xf32>
    %218 = arith.select %216, %206, %217 : vector<2x32xi1>, vector<2x32xf32>
    %c0_85 = arith.constant 0 : index
    %c3_86 = arith.constant 3 : index
    %c0_87 = arith.constant 0 : index
    %c0_88 = arith.constant 0 : index
    %219 = vector.load %arg6[%c0_85, %c3_86, %c0_87, %c0_88] : memref<1x8x2x32xf32, #tpu.memory_space<vmem>>, vector<1x1x2x32xf32>
    %220 = vector.shape_cast %219 : vector<1x1x2x32xf32> to vector<2x32xf32>
    %221 = vector.shape_cast %218 : vector<2x32xf32> to vector<1x1x2x32xf32>
    tpu.vector_store %arg6[%c0_85, %c3_86, %c0_87, %c0_88], %221 {strides = array<i32>} : memref<1x8x2x32xf32, #tpu.memory_space<vmem>>, vector<1x1x2x32xf32>,
    %c0_89 = arith.constant 0 : index
    %c4 = arith.constant 4 : index
    %c0_90 = arith.constant 0 : index
    %c0_91 = arith.constant 0 : index
    %222 = vector.load %arg2[%c0_89, %c4, %c0_90, %c0_91] : memref<1x8x2x32xf32, #tpu.memory_space<vmem>>, vector<1x1x2x32xf32>
    %223 = vector.shape_cast %222 : vector<1x1x2x32xf32> to vector<2x32xf32>
    %cst_92 = arith.constant dense<0.000000e+00> : vector<2x128xf32>
    %224 = tpu.matmul %223, %1, %cst_92 {dimension_numbers = #tpu.dot_dimension_numbers<[1], [0], [0], [1], [0, 0, 1, 1], [], []>} : vector<2x32xf32>, vector<32x128xf32>, vector<2x128xf32> -> vector<2x128xf32>
    %cst_93 = arith.constant dense<0.000000e+00> : vector<2x128xf32>
    %225 = tpu.matmul %214, %3, %cst_93 {dimension_numbers = #tpu.dot_dimension_numbers<[1], [0], [0], [1], [0, 0, 1, 1], [], []>} : vector<2x32xf32>, vector<32x128xf32>, vector<2x128xf32> -> vector<2x128xf32>
    %226 = arith.addf %224, %225 : vector<2x128xf32>
    %227 = vector.broadcast %5 : vector<1x128xf32> to vector<2x128xf32>
    %228 = arith.addf %226, %227 : vector<2x128xf32>
    %229 = vector.extract_strided_slice %228 {offsets = [0, 0], sizes = [2, 32], strides = [1, 1]} : vector<2x128xf32> to vector<2x32xf32>
    %cst_94 = arith.constant 5.000000e-01 : f32
    %230 = vector.broadcast %cst_94 : f32 to vector<2x32xf32>
    %231 = arith.mulf %230, %229 : vector<2x32xf32>
    %232 = math.tanh %231 : vector<2x32xf32>
    %cst_95 = arith.constant 1.000000e+00 : f32
    %233 = vector.broadcast %cst_95 : f32 to vector<2x32xf32>
    %234 = arith.addf %232, %233 : vector<2x32xf32>
    %cst_96 = arith.constant 5.000000e-01 : f32
    %235 = vector.broadcast %cst_96 : f32 to vector<2x32xf32>
    %236 = arith.mulf %235, %234 : vector<2x32xf32>
    %237 = vector.extract_strided_slice %228 {offsets = [0, 32], sizes = [2, 32], strides = [1, 1]} : vector<2x128xf32> to vector<2x32xf32>
    %cst_97 = arith.constant 5.000000e-01 : f32
    %238 = vector.broadcast %cst_97 : f32 to vector<2x32xf32>
    %239 = arith.mulf %238, %237 : vector<2x32xf32>
    %240 = math.tanh %239 : vector<2x32xf32>
    %cst_98 = arith.constant 1.000000e+00 : f32
    %241 = vector.broadcast %cst_98 : f32 to vector<2x32xf32>
    %242 = arith.addf %240, %241 : vector<2x32xf32>
    %cst_99 = arith.constant 5.000000e-01 : f32
    %243 = vector.broadcast %cst_99 : f32 to vector<2x32xf32>
    %244 = arith.mulf %243, %242 : vector<2x32xf32>
    %245 = vector.extract_strided_slice %228 {offsets = [0, 64], sizes = [2, 32], strides = [1, 1]} : vector<2x128xf32> to vector<2x32xf32>
    %246 = math.tanh %245 : vector<2x32xf32>
    %247 = vector.extract_strided_slice %228 {offsets = [0, 96], sizes = [2, 32], strides = [1, 1]} : vector<2x128xf32> to vector<2x32xf32>
    %cst_100 = arith.constant 5.000000e-01 : f32
    %248 = vector.broadcast %cst_100 : f32 to vector<2x32xf32>
    %249 = arith.mulf %248, %247 : vector<2x32xf32>
    %250 = math.tanh %249 : vector<2x32xf32>
    %cst_101 = arith.constant 1.000000e+00 : f32
    %251 = vector.broadcast %cst_101 : f32 to vector<2x32xf32>
    %252 = arith.addf %250, %251 : vector<2x32xf32>
    %cst_102 = arith.constant 5.000000e-01 : f32
    %253 = vector.broadcast %cst_102 : f32 to vector<2x32xf32>
    %254 = arith.mulf %253, %252 : vector<2x32xf32>
    %255 = arith.mulf %244, %211 : vector<2x32xf32>
    %256 = arith.mulf %236, %246 : vector<2x32xf32>
    %257 = arith.addf %255, %256 : vector<2x32xf32>
    %258 = math.tanh %257 : vector<2x32xf32>
    %259 = arith.mulf %254, %258 : vector<2x32xf32>
    %c4_i32 = arith.constant 4 : i32
    %260 = vector.broadcast %c4_i32 : i32 to vector<2x1xi32>
    %261 = arith.cmpi sgt, %7, %260 : vector<2x1xi32>
    %262 = vector.shape_cast %261 : vector<2x1xi1> to vector<2x1xi1>
    %263 = vector.broadcast %262 : vector<2x1xi1> to vector<2x32xi1>
    %264 = arith.select %263, %257, %211 : vector<2x32xi1>, vector<2x32xf32>
    %265 = vector.shape_cast %261 : vector<2x1xi1> to vector<2x1xi1>
    %266 = vector.broadcast %265 : vector<2x1xi1> to vector<2x32xi1>
    %267 = arith.select %266, %259, %214 : vector<2x32xi1>, vector<2x32xf32>
    %cst_103 = arith.constant 0.000000e+00 : f32
    %268 = vector.shape_cast %261 : vector<2x1xi1> to vector<2x1xi1>
    %269 = vector.broadcast %268 : vector<2x1xi1> to vector<2x32xi1>
    %270 = vector.broadcast %cst_103 : f32 to vector<2x32xf32>
    %271 = arith.select %269, %259, %270 : vector<2x32xi1>, vector<2x32xf32>
    %c0_104 = arith.constant 0 : index
    %c4_105 = arith.constant 4 : index
    %c0_106 = arith.constant 0 : index
    %c0_107 = arith.constant 0 : index
    %272 = vector.load %arg6[%c0_104, %c4_105, %c0_106, %c0_107] : memref<1x8x2x32xf32, #tpu.memory_space<vmem>>, vector<1x1x2x32xf32>
    %273 = vector.shape_cast %272 : vector<1x1x2x32xf32> to vector<2x32xf32>
    %274 = vector.shape_cast %271 : vector<2x32xf32> to vector<1x1x2x32xf32>
    tpu.vector_store %arg6[%c0_104, %c4_105, %c0_106, %c0_107], %274 {strides = array<i32>} : memref<1x8x2x32xf32, #tpu.memory_space<vmem>>, vector<1x1x2x32xf32>,
    %c0_108 = arith.constant 0 : index
    %c5 = arith.constant 5 : index
    %c0_109 = arith.constant 0 : index
    %c0_110 = arith.constant 0 : index
    %275 = vector.load %arg2[%c0_108, %c5, %c0_109, %c0_110] : memref<1x8x2x32xf32, #tpu.memory_space<vmem>>, vector<1x1x2x32xf32>
    %276 = vector.shape_cast %275 : vector<1x1x2x32xf32> to vector<2x32xf32>
    %cst_111 = arith.constant dense<0.000000e+00> : vector<2x128xf32>
    %277 = tpu.matmul %276, %1, %cst_111 {dimension_numbers = #tpu.dot_dimension_numbers<[1], [0], [0], [1], [0, 0, 1, 1], [], []>} : vector<2x32xf32>, vector<32x128xf32>, vector<2x128xf32> -> vector<2x128xf32>
    %cst_112 = arith.constant dense<0.000000e+00> : vector<2x128xf32>
    %278 = tpu.matmul %267, %3, %cst_112 {dimension_numbers = #tpu.dot_dimension_numbers<[1], [0], [0], [1], [0, 0, 1, 1], [], []>} : vector<2x32xf32>, vector<32x128xf32>, vector<2x128xf32> -> vector<2x128xf32>
    %279 = arith.addf %277, %278 : vector<2x128xf32>
    %280 = vector.broadcast %5 : vector<1x128xf32> to vector<2x128xf32>
    %281 = arith.addf %279, %280 : vector<2x128xf32>
    %282 = vector.extract_strided_slice %281 {offsets = [0, 0], sizes = [2, 32], strides = [1, 1]} : vector<2x128xf32> to vector<2x32xf32>
    %cst_113 = arith.constant 5.000000e-01 : f32
    %283 = vector.broadcast %cst_113 : f32 to vector<2x32xf32>
    %284 = arith.mulf %283, %282 : vector<2x32xf32>
    %285 = math.tanh %284 : vector<2x32xf32>
    %cst_114 = arith.constant 1.000000e+00 : f32
    %286 = vector.broadcast %cst_114 : f32 to vector<2x32xf32>
    %287 = arith.addf %285, %286 : vector<2x32xf32>
    %cst_115 = arith.constant 5.000000e-01 : f32
    %288 = vector.broadcast %cst_115 : f32 to vector<2x32xf32>
    %289 = arith.mulf %288, %287 : vector<2x32xf32>
    %290 = vector.extract_strided_slice %281 {offsets = [0, 32], sizes = [2, 32], strides = [1, 1]} : vector<2x128xf32> to vector<2x32xf32>
    %cst_116 = arith.constant 5.000000e-01 : f32
    %291 = vector.broadcast %cst_116 : f32 to vector<2x32xf32>
    %292 = arith.mulf %291, %290 : vector<2x32xf32>
    %293 = math.tanh %292 : vector<2x32xf32>
    %cst_117 = arith.constant 1.000000e+00 : f32
    %294 = vector.broadcast %cst_117 : f32 to vector<2x32xf32>
    %295 = arith.addf %293, %294 : vector<2x32xf32>
    %cst_118 = arith.constant 5.000000e-01 : f32
    %296 = vector.broadcast %cst_118 : f32 to vector<2x32xf32>
    %297 = arith.mulf %296, %295 : vector<2x32xf32>
    %298 = vector.extract_strided_slice %281 {offsets = [0, 64], sizes = [2, 32], strides = [1, 1]} : vector<2x128xf32> to vector<2x32xf32>
    %299 = math.tanh %298 : vector<2x32xf32>
    %300 = vector.extract_strided_slice %281 {offsets = [0, 96], sizes = [2, 32], strides = [1, 1]} : vector<2x128xf32> to vector<2x32xf32>
    %cst_119 = arith.constant 5.000000e-01 : f32
    %301 = vector.broadcast %cst_119 : f32 to vector<2x32xf32>
    %302 = arith.mulf %301, %300 : vector<2x32xf32>
    %303 = math.tanh %302 : vector<2x32xf32>
    %cst_120 = arith.constant 1.000000e+00 : f32
    %304 = vector.broadcast %cst_120 : f32 to vector<2x32xf32>
    %305 = arith.addf %303, %304 : vector<2x32xf32>
    %cst_121 = arith.constant 5.000000e-01 : f32
    %306 = vector.broadcast %cst_121 : f32 to vector<2x32xf32>
    %307 = arith.mulf %306, %305 : vector<2x32xf32>
    %308 = arith.mulf %297, %264 : vector<2x32xf32>
    %309 = arith.mulf %289, %299 : vector<2x32xf32>
    %310 = arith.addf %308, %309 : vector<2x32xf32>
    %311 = math.tanh %310 : vector<2x32xf32>
    %312 = arith.mulf %307, %311 : vector<2x32xf32>
    %c5_i32 = arith.constant 5 : i32
    %313 = vector.broadcast %c5_i32 : i32 to vector<2x1xi32>
    %314 = arith.cmpi sgt, %7, %313 : vector<2x1xi32>
    %315 = vector.shape_cast %314 : vector<2x1xi1> to vector<2x1xi1>
    %316 = vector.broadcast %315 : vector<2x1xi1> to vector<2x32xi1>
    %317 = arith.select %316, %310, %264 : vector<2x32xi1>, vector<2x32xf32>
    %318 = vector.shape_cast %314 : vector<2x1xi1> to vector<2x1xi1>
    %319 = vector.broadcast %318 : vector<2x1xi1> to vector<2x32xi1>
    %320 = arith.select %319, %312, %267 : vector<2x32xi1>, vector<2x32xf32>
    %cst_122 = arith.constant 0.000000e+00 : f32
    %321 = vector.shape_cast %314 : vector<2x1xi1> to vector<2x1xi1>
    %322 = vector.broadcast %321 : vector<2x1xi1> to vector<2x32xi1>
    %323 = vector.broadcast %cst_122 : f32 to vector<2x32xf32>
    %324 = arith.select %322, %312, %323 : vector<2x32xi1>, vector<2x32xf32>
    %c0_123 = arith.constant 0 : index
    %c5_124 = arith.constant 5 : index
    %c0_125 = arith.constant 0 : index
    %c0_126 = arith.constant 0 : index
    %325 = vector.load %arg6[%c0_123, %c5_124, %c0_125, %c0_126] : memref<1x8x2x32xf32, #tpu.memory_space<vmem>>, vector<1x1x2x32xf32>
    %326 = vector.shape_cast %325 : vector<1x1x2x32xf32> to vector<2x32xf32>
    %327 = vector.shape_cast %324 : vector<2x32xf32> to vector<1x1x2x32xf32>
    tpu.vector_store %arg6[%c0_123, %c5_124, %c0_125, %c0_126], %327 {strides = array<i32>} : memref<1x8x2x32xf32, #tpu.memory_space<vmem>>, vector<1x1x2x32xf32>,
    %c0_127 = arith.constant 0 : index
    %c6 = arith.constant 6 : index
    %c0_128 = arith.constant 0 : index
    %c0_129 = arith.constant 0 : index
    %328 = vector.load %arg2[%c0_127, %c6, %c0_128, %c0_129] : memref<1x8x2x32xf32, #tpu.memory_space<vmem>>, vector<1x1x2x32xf32>
    %329 = vector.shape_cast %328 : vector<1x1x2x32xf32> to vector<2x32xf32>
    %cst_130 = arith.constant dense<0.000000e+00> : vector<2x128xf32>
    %330 = tpu.matmul %329, %1, %cst_130 {dimension_numbers = #tpu.dot_dimension_numbers<[1], [0], [0], [1], [0, 0, 1, 1], [], []>} : vector<2x32xf32>, vector<32x128xf32>, vector<2x128xf32> -> vector<2x128xf32>
    %cst_131 = arith.constant dense<0.000000e+00> : vector<2x128xf32>
    %331 = tpu.matmul %320, %3, %cst_131 {dimension_numbers = #tpu.dot_dimension_numbers<[1], [0], [0], [1], [0, 0, 1, 1], [], []>} : vector<2x32xf32>, vector<32x128xf32>, vector<2x128xf32> -> vector<2x128xf32>
    %332 = arith.addf %330, %331 : vector<2x128xf32>
    %333 = vector.broadcast %5 : vector<1x128xf32> to vector<2x128xf32>
    %334 = arith.addf %332, %333 : vector<2x128xf32>
    %335 = vector.extract_strided_slice %334 {offsets = [0, 0], sizes = [2, 32], strides = [1, 1]} : vector<2x128xf32> to vector<2x32xf32>
    %cst_132 = arith.constant 5.000000e-01 : f32
    %336 = vector.broadcast %cst_132 : f32 to vector<2x32xf32>
    %337 = arith.mulf %336, %335 : vector<2x32xf32>
    %338 = math.tanh %337 : vector<2x32xf32>
    %cst_133 = arith.constant 1.000000e+00 : f32
    %339 = vector.broadcast %cst_133 : f32 to vector<2x32xf32>
    %340 = arith.addf %338, %339 : vector<2x32xf32>
    %cst_134 = arith.constant 5.000000e-01 : f32
    %341 = vector.broadcast %cst_134 : f32 to vector<2x32xf32>
    %342 = arith.mulf %341, %340 : vector<2x32xf32>
    %343 = vector.extract_strided_slice %334 {offsets = [0, 32], sizes = [2, 32], strides = [1, 1]} : vector<2x128xf32> to vector<2x32xf32>
    %cst_135 = arith.constant 5.000000e-01 : f32
    %344 = vector.broadcast %cst_135 : f32 to vector<2x32xf32>
    %345 = arith.mulf %344, %343 : vector<2x32xf32>
    %346 = math.tanh %345 : vector<2x32xf32>
    %cst_136 = arith.constant 1.000000e+00 : f32
    %347 = vector.broadcast %cst_136 : f32 to vector<2x32xf32>
    %348 = arith.addf %346, %347 : vector<2x32xf32>
    %cst_137 = arith.constant 5.000000e-01 : f32
    %349 = vector.broadcast %cst_137 : f32 to vector<2x32xf32>
    %350 = arith.mulf %349, %348 : vector<2x32xf32>
    %351 = vector.extract_strided_slice %334 {offsets = [0, 64], sizes = [2, 32], strides = [1, 1]} : vector<2x128xf32> to vector<2x32xf32>
    %352 = math.tanh %351 : vector<2x32xf32>
    %353 = vector.extract_strided_slice %334 {offsets = [0, 96], sizes = [2, 32], strides = [1, 1]} : vector<2x128xf32> to vector<2x32xf32>
    %cst_138 = arith.constant 5.000000e-01 : f32
    %354 = vector.broadcast %cst_138 : f32 to vector<2x32xf32>
    %355 = arith.mulf %354, %353 : vector<2x32xf32>
    %356 = math.tanh %355 : vector<2x32xf32>
    %cst_139 = arith.constant 1.000000e+00 : f32
    %357 = vector.broadcast %cst_139 : f32 to vector<2x32xf32>
    %358 = arith.addf %356, %357 : vector<2x32xf32>
    %cst_140 = arith.constant 5.000000e-01 : f32
    %359 = vector.broadcast %cst_140 : f32 to vector<2x32xf32>
    %360 = arith.mulf %359, %358 : vector<2x32xf32>
    %361 = arith.mulf %350, %317 : vector<2x32xf32>
    %362 = arith.mulf %342, %352 : vector<2x32xf32>
    %363 = arith.addf %361, %362 : vector<2x32xf32>
    %364 = math.tanh %363 : vector<2x32xf32>
    %365 = arith.mulf %360, %364 : vector<2x32xf32>
    %c6_i32 = arith.constant 6 : i32
    %366 = vector.broadcast %c6_i32 : i32 to vector<2x1xi32>
    %367 = arith.cmpi sgt, %7, %366 : vector<2x1xi32>
    %368 = vector.shape_cast %367 : vector<2x1xi1> to vector<2x1xi1>
    %369 = vector.broadcast %368 : vector<2x1xi1> to vector<2x32xi1>
    %370 = arith.select %369, %363, %317 : vector<2x32xi1>, vector<2x32xf32>
    %371 = vector.shape_cast %367 : vector<2x1xi1> to vector<2x1xi1>
    %372 = vector.broadcast %371 : vector<2x1xi1> to vector<2x32xi1>
    %373 = arith.select %372, %365, %320 : vector<2x32xi1>, vector<2x32xf32>
    %cst_141 = arith.constant 0.000000e+00 : f32
    %374 = vector.shape_cast %367 : vector<2x1xi1> to vector<2x1xi1>
    %375 = vector.broadcast %374 : vector<2x1xi1> to vector<2x32xi1>
    %376 = vector.broadcast %cst_141 : f32 to vector<2x32xf32>
    %377 = arith.select %375, %365, %376 : vector<2x32xi1>, vector<2x32xf32>
    %c0_142 = arith.constant 0 : index
    %c6_143 = arith.constant 6 : index
    %c0_144 = arith.constant 0 : index
    %c0_145 = arith.constant 0 : index
    %378 = vector.load %arg6[%c0_142, %c6_143, %c0_144, %c0_145] : memref<1x8x2x32xf32, #tpu.memory_space<vmem>>, vector<1x1x2x32xf32>
    %379 = vector.shape_cast %378 : vector<1x1x2x32xf32> to vector<2x32xf32>
    %380 = vector.shape_cast %377 : vector<2x32xf32> to vector<1x1x2x32xf32>
    tpu.vector_store %arg6[%c0_142, %c6_143, %c0_144, %c0_145], %380 {strides = array<i32>} : memref<1x8x2x32xf32, #tpu.memory_space<vmem>>, vector<1x1x2x32xf32>,
    %c0_146 = arith.constant 0 : index
    %c7 = arith.constant 7 : index
    %c0_147 = arith.constant 0 : index
    %c0_148 = arith.constant 0 : index
    %381 = vector.load %arg2[%c0_146, %c7, %c0_147, %c0_148] : memref<1x8x2x32xf32, #tpu.memory_space<vmem>>, vector<1x1x2x32xf32>
    %382 = vector.shape_cast %381 : vector<1x1x2x32xf32> to vector<2x32xf32>
    %cst_149 = arith.constant dense<0.000000e+00> : vector<2x128xf32>
    %383 = tpu.matmul %382, %1, %cst_149 {dimension_numbers = #tpu.dot_dimension_numbers<[1], [0], [0], [1], [0, 0, 1, 1], [], []>} : vector<2x32xf32>, vector<32x128xf32>, vector<2x128xf32> -> vector<2x128xf32>
    %cst_150 = arith.constant dense<0.000000e+00> : vector<2x128xf32>
    %384 = tpu.matmul %373, %3, %cst_150 {dimension_numbers = #tpu.dot_dimension_numbers<[1], [0], [0], [1], [0, 0, 1, 1], [], []>} : vector<2x32xf32>, vector<32x128xf32>, vector<2x128xf32> -> vector<2x128xf32>
    %385 = arith.addf %383, %384 : vector<2x128xf32>
    %386 = vector.broadcast %5 : vector<1x128xf32> to vector<2x128xf32>
    %387 = arith.addf %385, %386 : vector<2x128xf32>
    %388 = vector.extract_strided_slice %387 {offsets = [0, 0], sizes = [2, 32], strides = [1, 1]} : vector<2x128xf32> to vector<2x32xf32>
    %cst_151 = arith.constant 5.000000e-01 : f32
    %389 = vector.broadcast %cst_151 : f32 to vector<2x32xf32>
    %390 = arith.mulf %389, %388 : vector<2x32xf32>
    %391 = math.tanh %390 : vector<2x32xf32>
    %cst_152 = arith.constant 1.000000e+00 : f32
    %392 = vector.broadcast %cst_152 : f32 to vector<2x32xf32>
    %393 = arith.addf %391, %392 : vector<2x32xf32>
    %cst_153 = arith.constant 5.000000e-01 : f32
    %394 = vector.broadcast %cst_153 : f32 to vector<2x32xf32>
    %395 = arith.mulf %394, %393 : vector<2x32xf32>
    %396 = vector.extract_strided_slice %387 {offsets = [0, 32], sizes = [2, 32], strides = [1, 1]} : vector<2x128xf32> to vector<2x32xf32>
    %cst_154 = arith.constant 5.000000e-01 : f32
    %397 = vector.broadcast %cst_154 : f32 to vector<2x32xf32>
    %398 = arith.mulf %397, %396 : vector<2x32xf32>
    %399 = math.tanh %398 : vector<2x32xf32>
    %cst_155 = arith.constant 1.000000e+00 : f32
    %400 = vector.broadcast %cst_155 : f32 to vector<2x32xf32>
    %401 = arith.addf %399, %400 : vector<2x32xf32>
    %cst_156 = arith.constant 5.000000e-01 : f32
    %402 = vector.broadcast %cst_156 : f32 to vector<2x32xf32>
    %403 = arith.mulf %402, %401 : vector<2x32xf32>
    %404 = vector.extract_strided_slice %387 {offsets = [0, 64], sizes = [2, 32], strides = [1, 1]} : vector<2x128xf32> to vector<2x32xf32>
    %405 = math.tanh %404 : vector<2x32xf32>
    %406 = vector.extract_strided_slice %387 {offsets = [0, 96], sizes = [2, 32], strides = [1, 1]} : vector<2x128xf32> to vector<2x32xf32>
    %cst_157 = arith.constant 5.000000e-01 : f32
    %407 = vector.broadcast %cst_157 : f32 to vector<2x32xf32>
    %408 = arith.mulf %407, %406 : vector<2x32xf32>
    %409 = math.tanh %408 : vector<2x32xf32>
    %cst_158 = arith.constant 1.000000e+00 : f32
    %410 = vector.broadcast %cst_158 : f32 to vector<2x32xf32>
    %411 = arith.addf %409, %410 : vector<2x32xf32>
    %cst_159 = arith.constant 5.000000e-01 : f32
    %412 = vector.broadcast %cst_159 : f32 to vector<2x32xf32>
    %413 = arith.mulf %412, %411 : vector<2x32xf32>
    %414 = arith.mulf %403, %370 : vector<2x32xf32>
    %415 = arith.mulf %395, %405 : vector<2x32xf32>
    %416 = arith.addf %414, %415 : vector<2x32xf32>
    %417 = math.tanh %416 : vector<2x32xf32>
    %418 = arith.mulf %413, %417 : vector<2x32xf32>
    %c7_i32 = arith.constant 7 : i32
    %419 = vector.broadcast %c7_i32 : i32 to vector<2x1xi32>
    %420 = arith.cmpi sgt, %7, %419 : vector<2x1xi32>
    %cst_160 = arith.constant 0.000000e+00 : f32
    %421 = vector.shape_cast %420 : vector<2x1xi1> to vector<2x1xi1>
    %422 = vector.broadcast %421 : vector<2x1xi1> to vector<2x32xi1>
    %423 = vector.broadcast %cst_160 : f32 to vector<2x32xf32>
    %424 = arith.select %422, %418, %423 : vector<2x32xi1>, vector<2x32xf32>
    %c0_161 = arith.constant 0 : index
    %c7_162 = arith.constant 7 : index
    %c0_163 = arith.constant 0 : index
    %c0_164 = arith.constant 0 : index
    %425 = vector.load %arg6[%c0_161, %c7_162, %c0_163, %c0_164] : memref<1x8x2x32xf32, #tpu.memory_space<vmem>>, vector<1x1x2x32xf32>
    %426 = vector.shape_cast %425 : vector<1x1x2x32xf32> to vector<2x32xf32>
    %427 = vector.shape_cast %424 : vector<2x32xf32> to vector<1x1x2x32xf32>
    tpu.vector_store %arg6[%c0_161, %c7_162, %c0_163, %c0_164], %427 {strides = array<i32>} : memref<1x8x2x32xf32, #tpu.memory_space<vmem>>, vector<1x1x2x32xf32>,
    return
  }
  func.func @transform_0(%arg0: i32) -> (i32, i32, i32) {
    %c0_i32 = arith.constant 0 : i32
    %c0_i32_0 = arith.constant 0 : i32
    %c0_i32_1 = arith.constant 0 : i32
    return %arg0, %c0_i32, %c0_i32_0 : i32, i32, i32
  }
  func.func @transform_1(%arg0: i32) -> (i32, i32, i32, i32) {
    %c0_i32 = arith.constant 0 : i32
    %c0_i32_0 = arith.constant 0 : i32
    %c0_i32_1 = arith.constant 0 : i32
    %c0_i32_2 = arith.constant 0 : i32
    return %arg0, %c0_i32, %c0_i32_0, %c0_i32_1 : i32, i32, i32, i32
  }
  func.func @transform_2(%arg0: i32) -> (i32, i32, i32) {
    %c0_i32 = arith.constant 0 : i32
    %c0_i32_0 = arith.constant 0 : i32
    %c0_i32_1 = arith.constant 0 : i32
    return %arg0, %c0_i32, %c0_i32_0 : i32, i32, i32
  }
  func.func @transform_3(%arg0: i32) -> (i32, i32, i32) {
    %c0_i32 = arith.constant 0 : i32
    %c0_i32_0 = arith.constant 0 : i32
    %c0_i32_1 = arith.constant 0 : i32
    return %arg0, %c0_i32, %c0_i32_0 : i32, i32, i32
  }
  func.func @transform_4(%arg0: i32) -> (i32, i32, i32) {
    %c0_i32 = arith.constant 0 : i32
    %c0_i32_0 = arith.constant 0 : i32
    %c0_i32_1 = arith.constant 0 : i32
    return %arg0, %c0_i32, %c0_i32_0 : i32, i32, i32
  }
  func.func @transform_5(%arg0: i32) -> (i32, i32, i32, i32) {
    %c0_i32 = arith.constant 0 : i32
    %c0_i32_0 = arith.constant 0 : i32
    %c0_i32_1 = arith.constant 0 : i32
    %c0_i32_2 = arith.constant 0 : i32
    return %arg0, %c0_i32, %c0_i32_0, %c0_i32_1 : i32, i32, i32, i32
  }
}

module attributes {stable_mosaic.version = 11 : i64} {
  func.func @_dense_kernel(%arg0: memref<16x64xf32, #tpu.memory_space<vmem>>, %arg1: memref<64x128xf32, #tpu.memory_space<vmem>>, %arg2: memref<1x128xf32, #tpu.memory_space<vmem>>, %arg3: memref<16x128xf32, #tpu.memory_space<vmem>>) attributes {dimension_semantics = [], scalar_prefetch = 0 : i64, scratch_operands = 0 : i64, tpu.core_type = #tpu.core_type<tc>} {
    %c0 = arith.constant 0 : index
    %c0_0 = arith.constant 0 : index
    %0 = vector.load %arg0[%c0, %c0_0] : memref<16x64xf32, #tpu.memory_space<vmem>>, vector<16x64xf32>
    %c0_1 = arith.constant 0 : index
    %c0_2 = arith.constant 0 : index
    %1 = vector.load %arg1[%c0_1, %c0_2] : memref<64x128xf32, #tpu.memory_space<vmem>>, vector<64x128xf32>
    %cst = arith.constant dense<0.000000e+00> : vector<16x128xf32>
    %2 = tpu.matmul %0, %1, %cst {dimension_numbers = #tpu.dot_dimension_numbers<[1], [0], [0], [1], [0, 0, 1, 1], [], []>} : vector<16x64xf32>, vector<64x128xf32>, vector<16x128xf32> -> vector<16x128xf32>
    %c0_3 = arith.constant 0 : index
    %c0_4 = arith.constant 0 : index
    %3 = vector.load %arg2[%c0_3, %c0_4] : memref<1x128xf32, #tpu.memory_space<vmem>>, vector<1x128xf32>
    %4 = vector.broadcast %3 : vector<1x128xf32> to vector<16x128xf32>
    %5 = arith.addf %2, %4 : vector<16x128xf32>
    %c0_5 = arith.constant 0 : index
    %c0_6 = arith.constant 0 : index
    %6 = vector.load %arg3[%c0_5, %c0_6] : memref<16x128xf32, #tpu.memory_space<vmem>>, vector<16x128xf32>
    tpu.vector_store %arg3[%c0_5, %c0_6], %5 {strides = array<i32>} : memref<16x128xf32, #tpu.memory_space<vmem>>, vector<16x128xf32>,
    return
  }
}

</mosaic_0001>

<bundles_post_ra>
// kernel: neg.5
= control target key start
LH: loop header
LB: loop body
LE: loop exit
PB: predicated region body
PF: predicated region fallthrough
CT: control target
= control target key end

     0   :  { %s24_s0 = inlined_call_operand.vmem [shape: s32[16], index: 0, kind: input, shape index: {}]   ;;  %s25_s1 = inlined_call_operand.vmem [shape: s32[16], index: 1, kind: output, shape index: {}]  }
   0x1   :  { %v2_v0 = vld [vmem:[%s24_s0] sm:$0x1] }
   0x2   :  { %v5_v1 = vsub.s32 0, %v2_v0 }
   0x4   :  { %7 = vst [vmem:[%s25_s1] sm:$0x1] %v5_v1 }

// kernel: unified_framework_forward.6
= control target key start
LH: loop header
LB: loop body
LE: loop exit
PB: predicated region body
PF: predicated region fallthrough
CT: control target
= control target key end

     0   :  { %vm60_vm0 = vcmask 326656   ;;  %vm432_vm1 = vcmask 261120   ;;  %s962_s1 = inlined_call_operand.vmem [shape: f32[40,32], index: 1, kind: input, shape index: {}]   ;;  %s963_s0 = inlined_call_operand.vmem [shape: f32[272,40], index: 0, kind: input, shape index: {}]   ;;  %s964_s2 = inlined_call_operand.vmem [shape: f32[1,32], index: 2, kind: input, shape index: {}]   ;;  %s965_s3 = inlined_call_operand.vmem [shape: f32[272,32], index: 3, kind: output, shape index: {}]  }
   0x1   :  { %v52_v0 = vld [vmem:[%s962_s1 + $0x20] sm:$0xff]  ;;  %v51_v1 = vld [vmem:[%s962_s1 + $0x18] sm:$0xff]  ;;  %v50_v2 = vld [vmem:[%s962_s1 + $0x10] sm:$0xff] }
   0x2   :  { %545 = vmatprep.subr.mxu0 %v52_v0  ;;  %606 = vmatprep.subr.mxu1 %v52_v0  ;;  %v49_v3 = vld [vmem:[%s962_s1 + $0x8] sm:$0xff]  ;;  %v48_v4 = vld [vmem:[%s962_s1] sm:$0xff]  ;;  %v32_v7 = vld [vmem:[%s963_s0 + $0x90] sm:$0xff] }
   0x3   :  { %546 = vmatpush3.msra.mxu0 %v52_v0  ;;  %611 = vmatpush3.msra.mxu1 %v52_v0  ;;  %v14_v5 = vld [vmem:[%s963_s0] sm:$0xff]  ;;  %v15_v6 = vld [vmem:[%s963_s0 + $0x8] sm:$0xff]  ;;  %v16_v8 = vld [vmem:[%s963_s0 + $0x10] sm:$0xff] }
   0x4   :  { %547 = vmatprep.subr.mxu0 %v51_v1  ;;  %607 = vmatprep.subr.mxu1 %v51_v1  ;;  %v33_v9 = vld [vmem:[%s963_s0 + $0x98] sm:$0xff]  ;;  %v34_v10 = vld [vmem:[%s963_s0 + $0xa0] sm:$0xff]  ;;  %v35_v13 = vld [vmem:[%s963_s0 + $0xa8] sm:$0xff] }
   0x5   :  { %548 = vmatpush3.msra.mxu0 %v51_v1  ;;  %612 = vmatpush3.msra.mxu1 %v51_v1  ;;  %v17_v11 = vld [vmem:[%s963_s0 + $0x18] sm:$0xff]  ;;  %v18_v12 = vld [vmem:[%s963_s0 + $0x20] sm:$0xff]  ;;  %v36_v14 = vld [vmem:[%s963_s0 + $0xb0] sm:$0xff] }
   0x6   :  { %549 = vmatprep.subr.mxu0 %v50_v2  ;;  %608 = vmatprep.subr.mxu1 %v50_v2  ;;  %v19_v15 = vld [vmem:[%s963_s0 + $0x28] sm:$0xff]  ;;  %v20_v16 = vld [vmem:[%s963_s0 + $0x30] sm:$0xff]  ;;  %v37_v17 = vld [vmem:[%s963_s0 + $0xb8] sm:$0xff] }
   0x7   :  { %550 = vmatpush3.msra.mxu0 %v50_v2  ;;  %613 = vmatpush3.msra.mxu1 %v50_v2  ;;  %v38_v18 = vld [vmem:[%s963_s0 + $0xc0] sm:$0xff]  ;;  %v21_v19 = vld [vmem:[%s963_s0 + $0x38] sm:$0xff]  ;;  %v39_v21 = vld [vmem:[%s963_s0 + $0xc8] sm:$0xff] }
   0x8   :  { %551 = vmatprep.subr.mxu0 %v49_v3  ;;  %609 = vmatprep.subr.mxu1 %v49_v3  ;;  %v22_v20 = vld [vmem:[%s963_s0 + $0x40] sm:$0xff]  ;;  %v40_v22 = vld [vmem:[%s963_s0 + $0xd0] sm:$0xff]  ;;  %v23_v23 = vld [vmem:[%s963_s0 + $0x48] sm:$0xff] }
   0x9   :  { %552 = vmatpush3.msra.mxu0 %v49_v3  ;;  %614 = vmatpush3.msra.mxu1 %v49_v3  ;;  %v24_v24 = vld [vmem:[%s963_s0 + $0x50] sm:$0xff]  ;;  %v41_v25 = vld [vmem:[%s963_s0 + $0xd8] sm:$0xff]  ;;  %v42_v26 = vld [vmem:[%s963_s0 + $0xe0] sm:$0xff] }
   0xa   :  { %553 = vmatprep.subr.mxu0 %v48_v4  ;;  %555 = vmatprep.mubr.msk.f32.mxu0 %vm60_vm0, %v14_v5  ;;  %v25_v27 = vld [vmem:[%s963_s0 + $0x58] sm:$0xff]  ;;  %v26_v28 = vld [vmem:[%s963_s0 + $0x60] sm:$0xff]  ;;  %v43_v29 = vld [vmem:[%s963_s0 + $0xe8] sm:$0xff] }
   0xb   :  { %554 = vmatpush3.msra.mxu0 %v48_v4  ;;  %610 = vmatprep.subr.mxu1 %v48_v4  ;;  %v44_v30 = vld [vmem:[%s963_s0 + $0xf0] sm:$0xff]  ;;  %v27_v31 = vld [vmem:[%s963_s0 + $0x68] sm:$0xff]  ;;  %v45_v33 = vld [vmem:[%s963_s0 + $0xf8] sm:$0xff] }
   0xc   :  { %556 = vmatmul.mubr.msk.f32.vlgmr.msra.gmra.mxu0 %vm60_vm0, %v15_v6  ;;  %615 = vmatpush3.msra.mxu1 %v48_v4  ;;  %v28_v32 = vld [vmem:[%s963_s0 + $0x70] sm:$0xff]  ;;  %v46_v34 = vld [vmem:[%s963_s0 + $0x100] sm:$0xff]  ;;  %v29_v35 = vld [vmem:[%s963_s0 + $0x78] sm:$0xff] }
   0xd   :  { %582 = vmatprep.mubr.msk.f32.mxu1 %vm60_vm0, %v32_v7  ;;  %558 = vmatprep.mubr.msk.f32.mxu0 %vm60_vm0, %v16_v8  ;;  %v30_v36 = vld [vmem:[%s963_s0 + $0x80] sm:$0xff]  ;;  %v47_v37 = vld [vmem:[%s963_s0 + $0x108] sm:$0xff] }
   0xe   :  { %583 = vmatmul.mubr.msk.f32.vlgmr.msra.gmra.mxu1 %vm60_vm0, %v33_v9  ;;  %v31_v38 = vld [vmem:[%s963_s0 + $0x88] sm:$0xff]  ;;  %v790_v39 = vld [vmem:[%s964_s2] ss:$0 sm:$0xff] }
   0xf   :  { %585 = vmatprep.mubr.msk.f32.mxu1 %vm60_vm0, %v34_v10 }
  0x10   :  { %559 = vmatmul.mubr.msk.f32.gmra.mxu0 %vm60_vm0, %v17_v11 }
  0x11   :  { %561 = vmatprep.mubr.msk.f32.mxu0 %vm60_vm0, %v18_v12 }
  0x12   :  { %586 = vmatmul.mubr.msk.f32.gmra.mxu1 %vm60_vm0, %v35_v13 }
  0x13   :  { %588 = vmatprep.mubr.msk.f32.mxu1 %vm60_vm0, %v36_v14 }
  0x14   :  { %562 = vmatmul.mubr.msk.f32.gmra.mxu0 %vm60_vm0, %v19_v15 }
  0x15   :  { %564 = vmatprep.mubr.msk.f32.mxu0 %vm60_vm0, %v20_v16 }
  0x16   :  { %589 = vmatmul.mubr.msk.f32.gmra.mxu1 %vm60_vm0, %v37_v17 }
  0x17   :  { %591 = vmatprep.mubr.msk.f32.mxu1 %vm60_vm0, %v38_v18 }
  0x18   :  { %565 = vmatmul.mubr.msk.f32.gmra.mxu0 %vm60_vm0, %v21_v19 }
  0x19   :  { %567 = vmatprep.mubr.msk.f32.mxu0 %vm60_vm0, %v22_v20 }
  0x1a   :  { %592 = vmatmul.mubr.msk.f32.gmra.mxu1 %vm60_vm0, %v39_v21 }
  0x1b   :  { %594 = vmatprep.mubr.msk.f32.mxu1 %vm60_vm0, %v40_v22 }
  0x1c   :  { %568 = vmatmul.mubr.msk.f32.gmra.mxu0 %vm60_vm0, %v23_v23 }
  0x1d   :  { %570 = vmatprep.mubr.msk.f32.mxu0 %vm60_vm0, %v24_v24 }
  0x1e   :  { %595 = vmatmul.mubr.msk.f32.gmra.mxu1 %vm60_vm0, %v41_v25 }
  0x1f   :  { %597 = vmatprep.mubr.msk.f32.mxu1 %vm60_vm0, %v42_v26 }
  0x20   :  { %571 = vmatmul.mubr.msk.f32.gmra.mxu0 %vm60_vm0, %v25_v27 }
  0x21   :  { %573 = vmatprep.mubr.msk.f32.mxu0 %vm60_vm0, %v26_v28 }
  0x22   :  { %598 = vmatmul.mubr.msk.f32.gmra.mxu1 %vm60_vm0, %v43_v29 }
  0x23   :  { %600 = vmatprep.mubr.msk.f32.mxu1 %vm60_vm0, %v44_v30 }
  0x24   :  { %574 = vmatmul.mubr.msk.f32.gmra.mxu0 %vm60_vm0, %v27_v31 }
  0x25   :  { %576 = vmatprep.mubr.msk.f32.mxu0 %vm60_vm0, %v28_v32 }
  0x26   :  { %601 = vmatmul.mubr.msk.f32.gmra.mxu1 %vm60_vm0, %v45_v33 }
  0x27   :  { %603 = vmatprep.mubr.msk.f32.mxu1 %vm60_vm0, %v46_v34 }
  0x28   :  { %577 = vmatmul.mubr.msk.f32.gmra.mxu0 %vm60_vm0, %v29_v35 }
  0x29   :  { %579 = vmatprep.mubr.msk.f32.mxu0 %vm60_vm0, %v30_v36 }
  0x2a   :  { %604 = vmatmul.mubr.msk.f32.gmra.mxu1 %vm60_vm0, %v47_v37 }
  0x2c   :  { %580 = vmatmul.mubr.msk.f32.gmra.mxu0 %vm60_vm0, %v31_v38 }
  0xcc   :  { %v557_v40 = vpop.f32.mrf.mxu0 }
  0xcd   :  { %v235_v41 = vadd.f32 %v557_v40, %v790_v39 }
  0xce   :  { %v229_v42 = vpop.f32.mrf.mxu0  ;;  %v584_v43 = vpop.f32.mrf.mxu1 }
  0xcf   :  { %v399_v44 = vmax.f32 %v235_v41, 0.0  ;;  %v230_v45 = vadd.f32 %v790_v39, %v229_v42  ;;  %v325_v46 = vadd.f32 %v584_v43, %v790_v39 }
  0xd0   :  { %v560_v47 = vpop.f32.mrf.mxu0  ;;  %v319_v48 = vpop.f32.mrf.mxu1 }
  0xd1   :  { %434 = vst.msk [vmem:[%s965_s3 + $0x8] sm:$0xff] %vm432_vm1, %v399_v44  ;;  %v398_v49 = vmax.f32 %v230_v45, 0.0  ;;  %v417_v50 = vmax.f32 %v325_v46, 0.0  ;;  %v245_v51 = vadd.f32 %v560_v47, %v790_v39  ;;  %v320_v52 = vadd.f32 %v790_v39, %v319_v48 }
  0xd2   :  { %v239_v53 = vpop.f32.mrf.mxu0  ;;  %v587_v54 = vpop.f32.mrf.mxu1 }
  0xd3   :  { %433 = vst.msk [vmem:[%s965_s3] sm:$0xff] %vm432_vm1, %v398_v49  ;;  %452 = vst.msk [vmem:[%s965_s3 + $0x98] sm:$0xff] %vm432_vm1, %v417_v50  ;;  %v401_v55 = vmax.f32 %v245_v51, 0.0  ;;  %v416_v56 = vmax.f32 %v320_v52, 0.0  ;;  %v240_v57 = vadd.f32 %v790_v39, %v239_v53  ;;  %v335_v58 = vadd.f32 %v587_v54, %v790_v39 }
  0xd4   :  { %v563_v59 = vpop.f32.mrf.mxu0  ;;  %v329_v60 = vpop.f32.mrf.mxu1 }
  0xd5   :  { %436 = vst.msk [vmem:[%s965_s3 + $0x18] sm:$0xff] %vm432_vm1, %v401_v55  ;;  %451 = vst.msk [vmem:[%s965_s3 + $0x90] sm:$0xff] %vm432_vm1, %v416_v56  ;;  %v400_v61 = vmax.f32 %v240_v57, 0.0  ;;  %v419_v62 = vmax.f32 %v335_v58, 0.0  ;;  %v255_v63 = vadd.f32 %v563_v59, %v790_v39  ;;  %v330_v0 = vadd.f32 %v790_v39, %v329_v60 }
  0xd6   :  { %v249_v1 = vpop.f32.mrf.mxu0  ;;  %v590_v2 = vpop.f32.mrf.mxu1 }
  0xd7   :  { %435 = vst.msk [vmem:[%s965_s3 + $0x10] sm:$0xff] %vm432_vm1, %v400_v61  ;;  %454 = vst.msk [vmem:[%s965_s3 + $0xa8] sm:$0xff] %vm432_vm1, %v419_v62  ;;  %v403_v3 = vmax.f32 %v255_v63, 0.0  ;;  %v418_v4 = vmax.f32 %v330_v0, 0.0  ;;  %v250_v5 = vadd.f32 %v790_v39, %v249_v1  ;;  %v345_v6 = vadd.f32 %v590_v2, %v790_v39 }
  0xd8   :  { %v566_v7 = vpop.f32.mrf.mxu0  ;;  %v339_v8 = vpop.f32.mrf.mxu1 }
  0xd9   :  { %438 = vst.msk [vmem:[%s965_s3 + $0x28] sm:$0xff] %vm432_vm1, %v403_v3  ;;  %453 = vst.msk [vmem:[%s965_s3 + $0xa0] sm:$0xff] %vm432_vm1, %v418_v4  ;;  %v402_v9 = vmax.f32 %v250_v5, 0.0  ;;  %v421_v10 = vmax.f32 %v345_v6, 0.0  ;;  %v265_v11 = vadd.f32 %v566_v7, %v790_v39  ;;  %v340_v12 = vadd.f32 %v790_v39, %v339_v8 }
  0xda   :  { %v259_v13 = vpop.f32.mrf.mxu0  ;;  %v593_v14 = vpop.f32.mrf.mxu1 }
  0xdb   :  { %437 = vst.msk [vmem:[%s965_s3 + $0x20] sm:$0xff] %vm432_vm1, %v402_v9  ;;  %456 = vst.msk [vmem:[%s965_s3 + $0xb8] sm:$0xff] %vm432_vm1, %v421_v10  ;;  %v405_v15 = vmax.f32 %v265_v11, 0.0  ;;  %v420_v16 = vmax.f32 %v340_v12, 0.0  ;;  %v260_v17 = vadd.f32 %v790_v39, %v259_v13  ;;  %v355_v18 = vadd.f32 %v593_v14, %v790_v39 }
  0xdc   :  { %v569_v19 = vpop.f32.mrf.mxu0  ;;  %v349_v20 = vpop.f32.mrf.mxu1 }
  0xdd   :  { %440 = vst.msk [vmem:[%s965_s3 + $0x38] sm:$0xff] %vm432_vm1, %v405_v15  ;;  %455 = vst.msk [vmem:[%s965_s3 + $0xb0] sm:$0xff] %vm432_vm1, %v420_v16  ;;  %v404_v21 = vmax.f32 %v260_v17, 0.0  ;;  %v423_v22 = vmax.f32 %v355_v18, 0.0  ;;  %v275_v23 = vadd.f32 %v569_v19, %v790_v39  ;;  %v350_v24 = vadd.f32 %v790_v39, %v349_v20 }
  0xde   :  { %v269_v25 = vpop.f32.mrf.mxu0  ;;  %v596_v26 = vpop.f32.mrf.mxu1 }
  0xdf   :  { %439 = vst.msk [vmem:[%s965_s3 + $0x30] sm:$0xff] %vm432_vm1, %v404_v21  ;;  %458 = vst.msk [vmem:[%s965_s3 + $0xc8] sm:$0xff] %vm432_vm1, %v423_v22  ;;  %v407_v27 = vmax.f32 %v275_v23, 0.0  ;;  %v422_v28 = vmax.f32 %v350_v24, 0.0  ;;  %v270_v29 = vadd.f32 %v790_v39, %v269_v25  ;;  %v365_v30 = vadd.f32 %v596_v26, %v790_v39 }
  0xe0   :  { %v572_v31 = vpop.f32.mrf.mxu0  ;;  %v359_v32 = vpop.f32.mrf.mxu1 }
  0xe1   :  { %442 = vst.msk [vmem:[%s965_s3 + $0x48] sm:$0xff] %vm432_vm1, %v407_v27  ;;  %457 = vst.msk [vmem:[%s965_s3 + $0xc0] sm:$0xff] %vm432_vm1, %v422_v28  ;;  %v406_v33 = vmax.f32 %v270_v29, 0.0  ;;  %v425_v34 = vmax.f32 %v365_v30, 0.0  ;;  %v285_v35 = vadd.f32 %v572_v31, %v790_v39  ;;  %v360_v36 = vadd.f32 %v790_v39, %v359_v32 }
  0xe2   :  { %v279_v37 = vpop.f32.mrf.mxu0  ;;  %v599_v38 = vpop.f32.mrf.mxu1 }
  0xe3   :  { %441 = vst.msk [vmem:[%s965_s3 + $0x40] sm:$0xff] %vm432_vm1, %v406_v33  ;;  %460 = vst.msk [vmem:[%s965_s3 + $0xd8] sm:$0xff] %vm432_vm1, %v425_v34  ;;  %v409_v40 = vmax.f32 %v285_v35, 0.0  ;;  %v424_v41 = vmax.f32 %v360_v36, 0.0  ;;  %v280_v42 = vadd.f32 %v790_v39, %v279_v37  ;;  %v375_v43 = vadd.f32 %v599_v38, %v790_v39 }
  0xe4   :  { %v575_v44 = vpop.f32.mrf.mxu0  ;;  %v369_v45 = vpop.f32.mrf.mxu1 }
  0xe5   :  { %444 = vst.msk [vmem:[%s965_s3 + $0x58] sm:$0xff] %vm432_vm1, %v409_v40  ;;  %459 = vst.msk [vmem:[%s965_s3 + $0xd0] sm:$0xff] %vm432_vm1, %v424_v41  ;;  %v408_v46 = vmax.f32 %v280_v42, 0.0  ;;  %v427_v47 = vmax.f32 %v375_v43, 0.0  ;;  %v295_v48 = vadd.f32 %v575_v44, %v790_v39  ;;  %v370_v49 = vadd.f32 %v790_v39, %v369_v45 }
  0xe6   :  { %v289_v50 = vpop.f32.mrf.mxu0  ;;  %v602_v51 = vpop.f32.mrf.mxu1 }
  0xe7   :  { %443 = vst.msk [vmem:[%s965_s3 + $0x50] sm:$0xff] %vm432_vm1, %v408_v46  ;;  %462 = vst.msk [vmem:[%s965_s3 + $0xe8] sm:$0xff] %vm432_vm1, %v427_v47  ;;  %v411_v52 = vmax.f32 %v295_v48, 0.0  ;;  %v426_v53 = vmax.f32 %v370_v49, 0.0  ;;  %v290_v54 = vadd.f32 %v790_v39, %v289_v50  ;;  %v385_v55 = vadd.f32 %v602_v51, %v790_v39 }
  0xe8   :  { %v578_v56 = vpop.f32.mrf.mxu0  ;;  %v379_v57 = vpop.f32.mrf.mxu1 }
  0xe9   :  { %446 = vst.msk [vmem:[%s965_s3 + $0x68] sm:$0xff] %vm432_vm1, %v411_v52  ;;  %461 = vst.msk [vmem:[%s965_s3 + $0xe0] sm:$0xff] %vm432_vm1, %v426_v53  ;;  %v410_v58 = vmax.f32 %v290_v54, 0.0  ;;  %v429_v59 = vmax.f32 %v385_v55, 0.0  ;;  %v305_v60 = vadd.f32 %v578_v56, %v790_v39  ;;  %v380_v61 = vadd.f32 %v790_v39, %v379_v57 }
  0xea   :  { %v299_v62 = vpop.f32.mrf.mxu0  ;;  %v605_v63 = vpop.f32.mrf.mxu1 }
  0xeb   :  { %445 = vst.msk [vmem:[%s965_s3 + $0x60] sm:$0xff] %vm432_vm1, %v410_v58  ;;  %464 = vst.msk [vmem:[%s965_s3 + $0xf8] sm:$0xff] %vm432_vm1, %v429_v59  ;;  %v413_v0 = vmax.f32 %v305_v60, 0.0  ;;  %v428_v1 = vmax.f32 %v380_v61, 0.0  ;;  %v300_v2 = vadd.f32 %v790_v39, %v299_v62  ;;  %v395_v3 = vadd.f32 %v605_v63, %v790_v39 }
  0xec   :  { %v581_v4 = vpop.f32.mrf.mxu0  ;;  %v389_v5 = vpop.f32.mrf.mxu1 }
  0xed   :  { %448 = vst.msk [vmem:[%s965_s3 + $0x78] sm:$0xff] %vm432_vm1, %v413_v0  ;;  %463 = vst.msk [vmem:[%s965_s3 + $0xf0] sm:$0xff] %vm432_vm1, %v428_v1  ;;  %v412_v6 = vmax.f32 %v300_v2, 0.0  ;;  %v431_v7 = vmax.f32 %v395_v3, 0.0  ;;  %v315_v8 = vadd.f32 %v581_v4, %v790_v39  ;;  %v390_v9 = vadd.f32 %v790_v39, %v389_v5 }
  0xee   :  { %v309_v10 = vpop.f32.mrf.mxu0 }
  0xef   :  { %447 = vst.msk [vmem:[%s965_s3 + $0x70] sm:$0xff] %vm432_vm1, %v412_v6  ;;  %466 = vst.msk [vmem:[%s965_s3 + $0x108] sm:$0xff] %vm432_vm1, %v431_v7  ;;  %v415_v11 = vmax.f32 %v315_v8, 0.0  ;;  %v430_v12 = vmax.f32 %v390_v9, 0.0  ;;  %v310_v13 = vadd.f32 %v790_v39, %v309_v10 }
  0xf1   :  { %450 = vst.msk [vmem:[%s965_s3 + $0x88] sm:$0xff] %vm432_vm1, %v415_v11  ;;  %465 = vst.msk [vmem:[%s965_s3 + $0x100] sm:$0xff] %vm432_vm1, %v430_v12  ;;  %v414_v14 = vmax.f32 %v310_v13, 0.0 }
  0xf3   :  { %449 = vst.msk [vmem:[%s965_s3 + $0x80] sm:$0xff] %vm432_vm1, %v414_v14 }

// kernel: unified_framework_forward.7
= control target key start
LH: loop header
LB: loop body
LE: loop exit
PB: predicated region body
PF: predicated region fallthrough
CT: control target
= control target key end

     0   :  { %s2275_s18 = smov 0   ;;  %s2643_s0 = inlined_call_operand.vmem [shape: s32[2,2,1], index: 0, kind: input, shape index: {}]   ;;  %s2644_s1 = inlined_call_operand.vmem [shape: f32[2,8,2,32], index: 1, kind: input, shape index: {}]   ;;  %s2645_s2 = inlined_call_operand.vmem [shape: f32[2,32,64], index: 2, kind: input, shape index: {}]   ;;  %s2646_s3 = inlined_call_operand.vmem [shape: f32[2,16,64], index: 3, kind: input, shape index: {}]   ;;  %s2647_s4 = inlined_call_operand.vmem [shape: f32[2,1,64], index: 4, kind: input, shape index: {}]   ;;  %s2648_s5 = inlined_call_operand.vmem [shape: f32[2,8,2,16], index: 5, kind: output, shape index: {}]  }
   0x1 LB: > { %s1907_s19 = sadd.s32 4294967295, %s2236_s18   ;;  %p1911_p0 = scmp.ge.s32.totalorder %s2236_s18, 1  ;;  %s2236_s18 = sphi %s2275_s18, %s15_s18  }
   0x2   : > { %p224_p1 = scmp.lt.s32.totalorder %s2236_s18, 3 }
   0x4   : > { %p225_p2 = pnand %p1911_p0, %p224_p1 }
   0x5   : > { %p269_p3 = scmp.lt.s32.totalorder (!%p225_p2), %s1907_s19, 1  ;;  %s2241_s13 = smov (!%p225_p2), 96  }
   0x6   : > { %228 = sbr.rel (%p225_p2) target bundleno = 5619 (0x15f3), region = 40  ;;  %s2242_s14 = smov (!%p225_p2), 16  }
   0x7   : > { %s2243_s15 = smov (!%p225_p2), 32   ;;  %s2244_s16 = smov (!%p225_p2), 80  }
   0xb   : > { %v2238_v0 = vmov 0.0   ;;  %vm2239_vm0 = vmmov 0   ;;  %s2650_s19 = smov (!%p269_p3, %s1907_s19), 1  ;;  %vm379_vm1 = vcmask 261120   ;;  %v2240_v8 = vmov 0  }
   0xc   : > { %2021 = vmatprep.subr.mxu1 %v2238_v0  ;;  %2025 = vmatprep.mubr.msk.f32.mxu1 %vm2239_vm0, %v2238_v0  ;;  %s2292_s20 = sshll.u32 %s2650_s19, 4  ;;  %s1954_s21 = sshll.u32 %s2650_s19, 5  ;;  %vm494_vm4 = vcmask 123904   ;;  %vm305_vm5 = vcmask 130048  }
   0xd   : > { %2039 = vmatprep.subr.mxu0 %v2238_v0  ;;  %2043 = vmatprep.mubr.msk.f32.mxu0 %vm2239_vm0, %v2238_v0  ;;  %s287_s24 = scalar_lea.vmem %s2646_s3, %s2292_s20  ;;  %s282_s27 = scalar_lea.vmem %s2645_s2, %s1954_s21 }
   0xe   : > { %v2299_v1 = vld [vmem:[%s287_s24 + $0x8] sm:$0xff]  ;;  %v2301_v2 = vld [vmem:[%s287_s24] sm:$0xff]  ;;  %v2309_v3 = vld [vmem:[%s282_s27 + $0x18] sm:$0xff]  ;;  %s2325_s30 = scalar_lea.vmem %s2644_s1, %s2292_s20  ;;  %s1912_s6 = sshll.u32 %s2650_s19, 1  ;;  %2180 = vset.pattern.permute.xlu1 %v2240_v8  ;;  %2181 = vset.pattern.permute.xlu0 %v2240_v8 }
   0xf   : > { %2022 = vmatpush3.msra.mxu1 %v2299_v1  ;;  %2040 = vmatpush3.msra.mxu0 %v2299_v1  ;;  %v2316_v4 = vld [vmem:[%s282_s27 + $0x10] sm:$0xff]  ;;  %v2328_v5 = vld [vmem:[%s282_s27 + $0x8] sm:$0xff]  ;;  %v2333_v6 = vld [vmem:[%s282_s27] sm:$0xff]  ;;  %s272_s9 = scalar_lea.vmem %s2643_s0, %s1912_s6  ;;  %s290_s12 = scalar_lea.vmem %s2647_s4, %s2650_s19 }
  0x10   : > { %2023 = vmatprep.subr.mxu1 %v2238_v0  ;;  %2041 = vmatprep.subr.mxu0 %v2238_v0  ;;  %v304_v7 = vld [vmem:[%s2325_s30] sm:$0x3]  ;;  %s2373_s21 = scalar_lea.vmem %s2648_s5, %s2292_s20  ;;  %v1923_v34 = vld [vmem:[%s2325_s30 + $0x2] sm:$0x3]  ;;  %v1927_v59 = vld [vmem:[%s2325_s30 + $0x4] sm:$0x3] }
  0x11   : > { %2024 = vmatpush3.msra.mxu1 %v2301_v2  ;;  %2042 = vmatpush3.msra.mxu0 %v2301_v2  ;;  %v2353_v9 = vld [vmem:[%s272_s9] sm:$0x3] }
  0x12   : > { %2026 = vmatmul.mubr.f32.vlgmr.msra.gmra.mxu1 %v2238_v0  ;;  %2028 = vmatprep.subr.mxu1 %v2238_v0  ;;  %vm482_vm2 = vcmp.gt.s32.totalorder %v2353_v9, 0  ;;  %v2361_v13 = vld [vmem:[%s290_s12] ss:$0 sm:$0xff]  ;;  %vm666_vm6 = vcmp.gt.s32.totalorder %v2353_v9, 1  ;;  %vm854_vm8 = vcmp.gt.s32.totalorder %v2353_v9, 2  ;;  %vm1042_vm10 = vcmp.gt.s32.totalorder %v2353_v9, 3 }
  0x13   : > { %2029 = vmatpush3.msra.mxu1 %v2309_v3  ;;  %2036 = vmatprep.mubr.msk.f32.mxu1 %vm2239_vm0, %v2238_v0  ;;  %v483_v10 = vsel %vm482_vm2, 1, %v2240_v8  ;;  %v667_v42 = vsel %vm666_vm6, 1, %v2240_v8  ;;  %vm1230_vm12 = vcmp.gt.s32.totalorder %v2353_v9, 4  ;;  %vm1418_vm14 = vcmp.gt.s32.totalorder %v2353_v9, 5 }
  0x14   : > { %2030 = vmatprep.subr.mxu1 %v2238_v0  ;;  %2046 = vmatprep.subr.mxu0 %v2238_v0  ;;  %vm1606_vm2 = vcmp.gt.s32.totalorder %v2353_v9, 6 }
  0x15   : > { %2031 = vmatpush3.msra.mxu1 %v2316_v4  ;;  %485 = vperm.xlu1 %2180, %v483_v10  }
  0x16   : > { %2032 = vmatprep.subr.mxu1 %v2238_v0 }
  0x17   : > { %2033 = vmatpush3.msra.mxu1 %v2328_v5 }
  0x18   : > { %2034 = vmatprep.subr.mxu1 %v2238_v0 }
  0x19   : > { %2035 = vmatpush3.msra.mxu1 %v2333_v6 }
  0x1a   : > { %2037 = vmatmul.mubr.msk.f32.vlgmr.msra.gmra.mxu1 %vm379_vm1, %v304_v7  ;;  %2057 = vmatprep.subr.mxu1 %v2238_v0 }
  0x1b   : > { %2058 = vmatpush3.msra.mxu1 %v2299_v1  ;;  %2061 = vmatprep.mubr.msk.f32.mxu1 %vm2239_vm0, %v2238_v0 }
  0x1c   : > { %2059 = vmatprep.subr.mxu1 %v2238_v0 }
  0x1d   : > { %2060 = vmatpush3.msra.mxu1 %v2301_v2 }
  0x1e   : > { %2064 = vmatprep.subr.mxu1 %v2238_v0 }
  0x90   : > { %v486_v29 = vpop.permute.xlu1 %485 }
  0x91   : > { %vm487_vm3 = vcmp.eq.s32.totalorder %v486_v29, 1 }
  0xd2   : > { %v375_v11 = vpop.f32.mrf.mxu1 }
  0xd4   : > { %v2027_v12 = vpop.f32.mrf.mxu1 }
  0xd5   : > { %v855_v12 = vsel %vm854_vm8, 1, %v2240_v8 }
  0xda   : > { %v449_v14 = vpop.f32.mrf.mxu1 }
  0xdb   : > { %v450_v15 = vadd.f32 %v449_v14, %v375_v11 }
  0xdc   : > { %v2038_v16 = vpop.f32.mrf.mxu1 }
  0xdd   : > { %v459_v17 = vadd.f32 %v2361_v13, %v450_v15 }
  0xdf   : > { %2182 = vtanh.f32 %v459_v17  ;;  %v460_v19 = vmul.f32 0.5, %v459_v17 }
  0xe1   : > { %2184 = vtanh.f32 %v460_v19 }
  0xec   : > { %v2183_v18 = vpop.eup %2182 }
  0xed   : > { %467 = vrot.lane.b32.xlu0 %v2183_v18, %s2241_s13 }
  0xee   : > { %v2185_v20 = vpop.eup %2184 }
  0xef   : > { %v462_v21 = vadd.f32 1.0, %v2185_v20 }
  0xf1   : > { %v463_v22 = vmul.f32 0.5, %v462_v21 }
  0xf3   : > { %v465_v25 = vmul.f32 0.0, %v463_v22 }
 0x15f   : > { %v468_v23 = vpop.permute.xlu0 %467 }
 0x160   : > { %v470_v24 = vmul.f32 %v468_v23, %v463_v22 }
 0x162   : > { %472 = vrot.lane.b32.xlu0 %v470_v24, %s2242_s14 }
 0x1d4   : > { %v473_v26 = vpop.permute.xlu0 %472 }
 0x1d5   : > { %v475_v27 = vadd.f32 %v473_v26, %v465_v25 }
 0x1d7   : > { %2186 = vtanh.f32 %v475_v27  ;;  %v488_v49 = vsel %vm487_vm3, %v475_v27, 0.0 }
 0x1e4   : > { %v2187_v28 = vpop.eup %2186 }
 0x1e5   : > { %478 = vrot.lane.b32.xlu1 %v2187_v28, %s2243_s15 }
 0x257   : > { %v479_v30 = vpop.permute.xlu1 %478 }
 0x258   : > { %v481_v31 = vmul.f32 %v479_v30, %v463_v22  ;;  %v1931_v30 = vld [vmem:[%s2325_s30 + $0x6] sm:$0x3] }
 0x25a   : > { %v489_v32 = vsel %vm487_vm3, %v481_v31, 0.0 }
 0x25b   : > { %491 = vrot.lane.b32.xlu0 %v489_v32, %s2244_s16 }
 0x2cd   : > { %v492_v33 = vpop.permute.xlu0 %491 }
 0x2ce   : > { %495 = vst.msk [vmem:[%s2373_s21] sm:$0x3] %vm494_vm4, %v492_v33  ;;  %2044 = vmatmul.mubr.msk.f32.vlgmr.msra.gmra.mxu0 %vm305_vm5, %v492_v33 }
 0x2cf   : > { %2047 = vmatpush3.msra.mxu0 %v2309_v3  ;;  %2054 = vmatprep.mubr.msk.f32.mxu0 %vm2239_vm0, %v2238_v0 }
 0x2d0   : > { %2048 = vmatprep.subr.mxu0 %v2238_v0 }
 0x2d1   : > { %2049 = vmatpush3.msra.mxu0 %v2316_v4 }
 0x2d2   : > { %2050 = vmatprep.subr.mxu0 %v2238_v0 }
 0x2d3   : > { %2051 = vmatpush3.msra.mxu0 %v2328_v5 }
 0x2d4   : > { %2052 = vmatprep.subr.mxu0 %v2238_v0 }
 0x2d5   : > { %2053 = vmatpush3.msra.mxu0 %v2333_v6 }
 0x2d6   : > { %2055 = vmatmul.mubr.msk.f32.vlgmr.msra.gmra.mxu0 %vm379_vm1, %v1923_v34  ;;  %2075 = vmatprep.subr.mxu0 %v2238_v0 }
 0x2d7   : > { %2076 = vmatpush3.msra.mxu0 %v2299_v1  ;;  %2079 = vmatprep.mubr.msk.f32.mxu0 %vm2239_vm0, %v2238_v0 }
 0x2d8   : > { %2077 = vmatprep.subr.mxu0 %v2238_v0 }
 0x2d9   : > { %2078 = vmatpush3.msra.mxu0 %v2301_v2 }
 0x2da   : > { %2082 = vmatprep.subr.mxu0 %v2238_v0 }
 0x38e   : > { %v566_v35 = vpop.f32.mrf.mxu0 }
 0x390   : > { %v2045_v36 = vpop.f32.mrf.mxu0 }
 0x396   : > { %v639_v37 = vpop.f32.mrf.mxu0 }
 0x397   : > { %v640_v38 = vadd.f32 %v639_v37, %v566_v35 }
 0x398   : > { %v2056_v39 = vpop.f32.mrf.mxu0 }
 0x399   : > { %v643_v40 = vadd.f32 %v2361_v13, %v640_v38  ;;  %v1043_v38 = vsel %vm1042_vm10, 1, %v2240_v8 }
 0x39b   : > { %2188 = vtanh.f32 %v643_v40  ;;  %v644_v43 = vmul.f32 0.5, %v643_v40 }
 0x39d   : > { %2190 = vtanh.f32 %v644_v43 }
 0x3a8   : > { %v2189_v41 = vpop.eup %2188 }
 0x3a9   : > { %651 = vrot.lane.b32.xlu1 %v2189_v41, %s2241_s13 }
 0x3aa   : > { %v2191_v44 = vpop.eup %2190 }
 0x3ab   : > { %v646_v45 = vadd.f32 1.0, %v2191_v44 }
 0x3ad   : > { %669 = vperm.xlu1 %2180, %v667_v42   ;;  %v647_v46 = vmul.f32 0.5, %v646_v45 }
 0x3af   : > { %v649_v50 = vmul.f32 %v647_v46, %v488_v49 }
 0x41b   : > { %v652_v47 = vpop.permute.xlu1 %651 }
 0x41c   : > { %v654_v48 = vmul.f32 %v652_v47, %v647_v46 }
 0x41e   : > { %656 = vrot.lane.b32.xlu0 %v654_v48, %s2242_s14 }
 0x428   : > { %v2403_v54 = vpop.permute.xlu1 %669 }
 0x429   : > { %vm671_vm7 = vcmp.eq.s32.totalorder %v2403_v54, 1 }
 0x490   : > { %v657_v51 = vpop.permute.xlu0 %656 }
 0x491   : > { %v659_v52 = vadd.f32 %v657_v51, %v649_v50 }
 0x493   : > { %2192 = vtanh.f32 %v659_v52  ;;  %v672_v20 = vsel %vm671_vm7, %v659_v52, %v488_v49 }
 0x4a0   : > { %v2193_v53 = vpop.eup %2192 }
 0x4a1   : > { %662 = vrot.lane.b32.xlu0 %v2193_v53, %s2243_s15 }
 0x513   : > { %v663_v55 = vpop.permute.xlu0 %662 }
 0x514   : > { %v2405_v56 = vmul.f32 %v663_v55, %v647_v46 }
 0x516   : > { %v673_v57 = vsel %vm671_vm7, %v2405_v56, %v489_v32 }
 0x517   : > { %684 = vrot.lane.b32.xlu1 %v673_v57, %s2244_s16 }
 0x589   : > { %v685_v58 = vpop.permute.xlu1 %684 }
 0x58a   : > { %2062 = vmatmul.mubr.msk.f32.vlgmr.msra.gmra.mxu1 %vm305_vm5, %v685_v58 }
 0x58b   : > { %2065 = vmatpush3.msra.mxu1 %v2309_v3  ;;  %2072 = vmatprep.mubr.msk.f32.mxu1 %vm2239_vm0, %v2238_v0 }
 0x58c   : > { %2066 = vmatprep.subr.mxu1 %v2238_v0 }
 0x58d   : > { %2067 = vmatpush3.msra.mxu1 %v2316_v4 }
 0x58e   : > { %2068 = vmatprep.subr.mxu1 %v2238_v0 }
 0x58f   : > { %2069 = vmatpush3.msra.mxu1 %v2328_v5 }
 0x590   : > { %2070 = vmatprep.subr.mxu1 %v2238_v0 }
 0x591   : > { %2071 = vmatpush3.msra.mxu1 %v2333_v6 }
 0x592   : > { %2073 = vmatmul.mubr.msk.f32.vlgmr.msra.gmra.mxu1 %vm379_vm1, %v1927_v59  ;;  %2093 = vmatprep.subr.mxu1 %v2238_v0 }
 0x593   : > { %2094 = vmatpush3.msra.mxu1 %v2299_v1  ;;  %2097 = vmatprep.mubr.msk.f32.mxu1 %vm2239_vm0, %v2238_v0 }
 0x594   : > { %2095 = vmatprep.subr.mxu1 %v2238_v0 }
 0x595   : > { %2096 = vmatpush3.msra.mxu1 %v2301_v2 }
 0x596   : > { %2100 = vmatprep.subr.mxu1 %v2238_v0 }
 0x64a   : > { %v754_v60 = vpop.f32.mrf.mxu1 }
 0x64c   : > { %v2063_v61 = vpop.f32.mrf.mxu1 }
 0x652   : > { %v827_v62 = vpop.f32.mrf.mxu1 }
 0x653   : > { %v828_v63 = vadd.f32 %v827_v62, %v754_v60 }
 0x654   : > { %v2074_v7 = vpop.f32.mrf.mxu1 }
 0x655   : > { %v831_v10 = vadd.f32 %v2361_v13, %v828_v63 }
 0x657   : > { %2194 = vtanh.f32 %v831_v10  ;;  %v832_v14 = vmul.f32 0.5, %v831_v10  ;;  %v1231_v10 = vsel %vm1230_vm12, 1, %v2240_v8 }
 0x659   : > { %2196 = vtanh.f32 %v832_v14 }
 0x664   : > { %v2195_v11 = vpop.eup %2194 }
 0x665   : > { %839 = vrot.lane.b32.xlu0 %v2195_v11, %s2241_s13 }
 0x666   : > { %v2197_v15 = vpop.eup %2196 }
 0x667   : > { %v834_v16 = vadd.f32 1.0, %v2197_v15 }
 0x669   : > { %857 = vperm.xlu0 %2181, %v855_v12   ;;  %v835_v17 = vmul.f32 0.5, %v834_v16 }
 0x66b   : > { %v837_v21 = vmul.f32 %v835_v17, %v672_v20 }
 0x6d7   : > { %v840_v18 = vpop.permute.xlu0 %839 }
 0x6d8   : > { %v842_v19 = vmul.f32 %v840_v18, %v835_v17 }
 0x6da   : > { %844 = vrot.lane.b32.xlu1 %v842_v19, %s2242_s14 }
 0x6e4   : > { %v2439_v25 = vpop.permute.xlu0 %857 }
 0x6e5   : > { %vm859_vm9 = vcmp.eq.s32.totalorder %v2439_v25, 1 }
 0x74c   : > { %v845_v22 = vpop.permute.xlu1 %844 }
 0x74d   : > { %v847_v23 = vadd.f32 %v845_v22, %v837_v21 }
 0x74f   : > { %2198 = vtanh.f32 %v847_v23  ;;  %v860_v45 = vsel %vm859_vm9, %v847_v23, %v672_v20 }
 0x75c   : > { %v2199_v24 = vpop.eup %2198 }
 0x75d   : > { %850 = vrot.lane.b32.xlu1 %v2199_v24, %s2243_s15 }
 0x7cf   : > { %v851_v26 = vpop.permute.xlu1 %850 }
 0x7d0   : > { %v2441_v27 = vmul.f32 %v851_v26, %v835_v17 }
 0x7d2   : > { %v861_v28 = vsel %vm859_vm9, %v2441_v27, %v673_v57  ;;  %v1935_v57 = vld [vmem:[%s2325_s30 + $0x8] sm:$0x3] }
 0x7d3   : > { %872 = vrot.lane.b32.xlu1 %v861_v28, %s2244_s16 }
 0x845   : > { %v873_v29 = vpop.permute.xlu1 %872 }
 0x846   : > { %2080 = vmatmul.mubr.msk.f32.vlgmr.msra.gmra.mxu0 %vm305_vm5, %v873_v29 }
 0x847   : > { %2083 = vmatpush3.msra.mxu0 %v2309_v3  ;;  %2090 = vmatprep.mubr.msk.f32.mxu0 %vm2239_vm0, %v2238_v0 }
 0x848   : > { %2084 = vmatprep.subr.mxu0 %v2238_v0 }
 0x849   : > { %2085 = vmatpush3.msra.mxu0 %v2316_v4 }
 0x84a   : > { %2086 = vmatprep.subr.mxu0 %v2238_v0 }
 0x84b   : > { %2087 = vmatpush3.msra.mxu0 %v2328_v5 }
 0x84c   : > { %2088 = vmatprep.subr.mxu0 %v2238_v0 }
 0x84d   : > { %2089 = vmatpush3.msra.mxu0 %v2333_v6 }
 0x84e   : > { %2091 = vmatmul.mubr.msk.f32.vlgmr.msra.gmra.mxu0 %vm379_vm1, %v1931_v30  ;;  %2111 = vmatprep.subr.mxu0 %v2238_v0  ;;  %v1939_v30 = vld [vmem:[%s2325_s30 + $0xa] sm:$0x3] }
 0x84f   : > { %2112 = vmatpush3.msra.mxu0 %v2299_v1  ;;  %2115 = vmatprep.mubr.msk.f32.mxu0 %vm2239_vm0, %v2238_v0 }
 0x850   : > { %2113 = vmatprep.subr.mxu0 %v2238_v0 }
 0x851   : > { %2114 = vmatpush3.msra.mxu0 %v2301_v2 }
 0x852   : > { %2118 = vmatprep.subr.mxu0 %v2238_v0 }
 0x906   : > { %v942_v31 = vpop.f32.mrf.mxu0 }
 0x908   : > { %v2081_v32 = vpop.f32.mrf.mxu0 }
 0x90e   : > { %v1015_v33 = vpop.f32.mrf.mxu0 }
 0x90f   : > { %v1016_v34 = vadd.f32 %v1015_v33, %v942_v31 }
 0x910   : > { %v2092_v35 = vpop.f32.mrf.mxu0 }
 0x911   : > { %v1019_v36 = vadd.f32 %v2361_v13, %v1016_v34 }
 0x913   : > { %2200 = vtanh.f32 %v1019_v36  ;;  %v1020_v39 = vmul.f32 0.5, %v1019_v36 }
 0x915   : > { %2202 = vtanh.f32 %v1020_v39 }
 0x920   : > { %v2201_v37 = vpop.eup %2200 }
 0x921   : > { %1027 = vrot.lane.b32.xlu0 %v2201_v37, %s2241_s13  ;;  %v1419_v37 = vsel %vm1418_vm14, 1, %v2240_v8 }
 0x922   : > { %v2203_v40 = vpop.eup %2202 }
 0x923   : > { %v1022_v41 = vadd.f32 1.0, %v2203_v40 }
 0x925   : > { %1045 = vperm.xlu0 %2181, %v1043_v38   ;;  %v1023_v42 = vmul.f32 0.5, %v1022_v41 }
 0x927   : > { %v1025_v46 = vmul.f32 %v1023_v42, %v860_v45 }
 0x993   : > { %v1028_v43 = vpop.permute.xlu0 %1027 }
 0x994   : > { %v1030_v44 = vmul.f32 %v1028_v43, %v1023_v42 }
 0x996   : > { %1032 = vrot.lane.b32.xlu1 %v1030_v44, %s2242_s14 }
 0x9a0   : > { %v2475_v50 = vpop.permute.xlu0 %1045 }
 0x9a1   : > { %vm1047_vm11 = vcmp.eq.s32.totalorder %v2475_v50, 1 }
 0xa08   : > { %v1033_v47 = vpop.permute.xlu1 %1032 }
 0xa09   : > { %v1035_v48 = vadd.f32 %v1033_v47, %v1025_v46 }
 0xa0b   : > { %2204 = vtanh.f32 %v1035_v48  ;;  %v1048_v18 = vsel %vm1047_vm11, %v1035_v48, %v860_v45 }
 0xa18   : > { %v2205_v49 = vpop.eup %2204 }
 0xa19   : > { %1038 = vrot.lane.b32.xlu1 %v2205_v49, %s2243_s15 }
 0xa8b   : > { %v1039_v51 = vpop.permute.xlu1 %1038 }
 0xa8c   : > { %v2477_v52 = vmul.f32 %v1039_v51, %v1023_v42 }
 0xa8e   : > { %v1049_v53 = vsel %vm1047_vm11, %v2477_v52, %v861_v28 }
 0xa8f   : > { %1060 = vrot.lane.b32.xlu0 %v1049_v53, %s2244_s16 }
 0xb01   : > { %v1061_v55 = vpop.permute.xlu0 %1060 }
 0xb02   : > { %2098 = vmatmul.mubr.msk.f32.vlgmr.msra.gmra.mxu1 %vm305_vm5, %v1061_v55 }
 0xb03   : > { %2101 = vmatpush3.msra.mxu1 %v2309_v3  ;;  %2108 = vmatprep.mubr.msk.f32.mxu1 %vm2239_vm0, %v2238_v0 }
 0xb04   : > { %2102 = vmatprep.subr.mxu1 %v2238_v0 }
 0xb05   : > { %2103 = vmatpush3.msra.mxu1 %v2316_v4 }
 0xb06   : > { %2104 = vmatprep.subr.mxu1 %v2238_v0 }
 0xb07   : > { %2105 = vmatpush3.msra.mxu1 %v2328_v5 }
 0xb08   : > { %2106 = vmatprep.subr.mxu1 %v2238_v0 }
 0xb09   : > { %2107 = vmatpush3.msra.mxu1 %v2333_v6 }
 0xb0a   : > { %2109 = vmatmul.mubr.msk.f32.vlgmr.msra.gmra.mxu1 %vm379_vm1, %v1935_v57  ;;  %2129 = vmatprep.subr.mxu1 %v2238_v0  ;;  %v1943_v57 = vld [vmem:[%s2325_s30 + $0xc] sm:$0x3] }
 0xb0b   : > { %2130 = vmatpush3.msra.mxu1 %v2299_v1  ;;  %2133 = vmatprep.mubr.msk.f32.mxu1 %vm2239_vm0, %v2238_v0 }
 0xb0c   : > { %2131 = vmatprep.subr.mxu1 %v2238_v0 }
 0xb0d   : > { %2132 = vmatpush3.msra.mxu1 %v2301_v2 }
 0xb0e   : > { %2136 = vmatprep.subr.mxu1 %v2238_v0 }
 0xbc2   : > { %v1130_v58 = vpop.f32.mrf.mxu1 }
 0xbc4   : > { %v2099_v59 = vpop.f32.mrf.mxu1 }
 0xbca   : > { %v1203_v60 = vpop.f32.mrf.mxu1 }
 0xbcb   : > { %v1204_v61 = vadd.f32 %v1203_v60, %v1130_v58 }
 0xbcc   : > { %v2110_v62 = vpop.f32.mrf.mxu1 }
 0xbcd   : > { %v1207_v63 = vadd.f32 %v2361_v13, %v1204_v61 }
 0xbcf   : > { %2206 = vtanh.f32 %v1207_v63  ;;  %v1208_v11 = vmul.f32 0.5, %v1207_v63 }
 0xbd1   : > { %2208 = vtanh.f32 %v1208_v11 }
 0xbdc   : > { %v2207_v7 = vpop.eup %2206 }
 0xbdd   : > { %1215 = vrot.lane.b32.xlu1 %v2207_v7, %s2241_s13 }
 0xbde   : > { %v2209_v12 = vpop.eup %2208 }
 0xbdf   : > { %v1210_v14 = vadd.f32 1.0, %v2209_v12 }
 0xbe1   : > { %1233 = vperm.xlu1 %2180, %v1231_v10   ;;  %v1211_v15 = vmul.f32 0.5, %v1210_v14  ;;  %v1607_v10 = vsel %vm1606_vm2, 1, %v2240_v8 }
 0xbe3   : > { %v1213_v19 = vmul.f32 %v1211_v15, %v1048_v18 }
 0xc4f   : > { %v1216_v16 = vpop.permute.xlu1 %1215 }
 0xc50   : > { %v1218_v17 = vmul.f32 %v1216_v16, %v1211_v15 }
 0xc52   : > { %1220 = vrot.lane.b32.xlu0 %v1218_v17, %s2242_s14 }
 0xc5c   : > { %v2511_v23 = vpop.permute.xlu1 %1233 }
 0xc5d   : > { %vm1235_vm13 = vcmp.eq.s32.totalorder %v2511_v23, 1 }
 0xcc4   : > { %v1221_v20 = vpop.permute.xlu0 %1220 }
 0xcc5   : > { %v1223_v21 = vadd.f32 %v1221_v20, %v1213_v19 }
 0xcc7   : > { %2210 = vtanh.f32 %v1223_v21  ;;  %v1236_v43 = vsel %vm1235_vm13, %v1223_v21, %v1048_v18 }
 0xcd4   : > { %v2211_v22 = vpop.eup %2210 }
 0xcd5   : > { %1226 = vrot.lane.b32.xlu0 %v2211_v22, %s2243_s15 }
 0xd47   : > { %v1227_v24 = vpop.permute.xlu0 %1226 }
 0xd48   : > { %v2513_v26 = vmul.f32 %v1227_v24, %v1211_v15 }
 0xd4a   : > { %v1237_v28 = vsel %vm1235_vm13, %v2513_v26, %v1049_v53 }
 0xd4b   : > { %1248 = vrot.lane.b32.xlu1 %v1237_v28, %s2244_s16 }
 0xdbd   : > { %v1249_v29 = vpop.permute.xlu1 %1248 }
 0xdbe   : > { %2116 = vmatmul.mubr.msk.f32.vlgmr.msra.gmra.mxu0 %vm305_vm5, %v1249_v29 }
 0xdbf   : > { %2119 = vmatpush3.msra.mxu0 %v2309_v3  ;;  %2126 = vmatprep.mubr.msk.f32.mxu0 %vm2239_vm0, %v2238_v0 }
 0xdc0   : > { %2120 = vmatprep.subr.mxu0 %v2238_v0 }
 0xdc1   : > { %2121 = vmatpush3.msra.mxu0 %v2316_v4 }
 0xdc2   : > { %2122 = vmatprep.subr.mxu0 %v2238_v0 }
 0xdc3   : > { %2123 = vmatpush3.msra.mxu0 %v2328_v5 }
 0xdc4   : > { %2124 = vmatprep.subr.mxu0 %v2238_v0 }
 0xdc5   : > { %2125 = vmatpush3.msra.mxu0 %v2333_v6 }
 0xdc6   : > { %2127 = vmatmul.mubr.msk.f32.vlgmr.msra.gmra.mxu0 %vm379_vm1, %v1939_v30  ;;  %2147 = vmatprep.subr.mxu0 %v2238_v0 }
 0xdc7   : > { %2148 = vmatpush3.msra.mxu0 %v2299_v1  ;;  %2151 = vmatprep.mubr.msk.f32.mxu0 %vm2239_vm0, %v2238_v0 }
 0xdc8   : > { %2149 = vmatprep.subr.mxu0 %v2238_v0 }
 0xdc9   : > { %2150 = vmatpush3.msra.mxu0 %v2301_v2 }
 0xdca   : > { %2154 = vmatprep.subr.mxu0 %v2238_v0 }
 0xe7e   : > { %v1318_v31 = vpop.f32.mrf.mxu0 }
 0xe80   : > { %v2117_v32 = vpop.f32.mrf.mxu0 }
 0xe81   : > { %v1947_v32 = vld [vmem:[%s2325_s30 + $0xe] sm:$0x3] }
 0xe86   : > { %v1391_v33 = vpop.f32.mrf.mxu0 }
 0xe87   : > { %v1392_v34 = vadd.f32 %v1391_v33, %v1318_v31 }
 0xe88   : > { %v2128_v35 = vpop.f32.mrf.mxu0 }
 0xe89   : > { %v1395_v36 = vadd.f32 %v2361_v13, %v1392_v34 }
 0xe8b   : > { %2212 = vtanh.f32 %v1395_v36  ;;  %v1396_v38 = vmul.f32 0.5, %v1395_v36 }
 0xe8d   : > { %2214 = vtanh.f32 %v1396_v38 }
 0xe98   : > { %v2213_v1 = vpop.eup %2212 }
 0xe99   : > { %1403 = vrot.lane.b32.xlu0 %v2213_v1, %s2241_s13 }
 0xe9a   : > { %v2215_v2 = vpop.eup %2214 }
 0xe9b   : > { %v1398_v39 = vadd.f32 1.0, %v2215_v2 }
 0xe9d   : > { %1421 = vperm.xlu0 %2181, %v1419_v37   ;;  %v1399_v40 = vmul.f32 0.5, %v1398_v39 }
 0xe9f   : > { %v1401_v44 = vmul.f32 %v1399_v40, %v1236_v43 }
 0xf0b   : > { %v1404_v41 = vpop.permute.xlu0 %1403 }
 0xf0c   : > { %v1406_v42 = vmul.f32 %v1404_v41, %v1399_v40 }
 0xf0e   : > { %1408 = vrot.lane.b32.xlu1 %v1406_v42, %s2242_s14 }
 0xf18   : > { %v2547_v48 = vpop.permute.xlu0 %1421 }
 0xf19   : > { %vm1423_vm15 = vcmp.eq.s32.totalorder %v2547_v48, 1 }
 0xf80   : > { %v1409_v45 = vpop.permute.xlu1 %1408 }
 0xf81   : > { %v1411_v46 = vadd.f32 %v1409_v45, %v1401_v44  ;;  %v862_v45 = vsel %vm859_vm9, %v2441_v27, 0.0 }
 0xf83   : > { %2216 = vtanh.f32 %v1411_v46  ;;  %v1424_v18 = vsel %vm1423_vm15, %v1411_v46, %v1236_v43  ;;  %v1238_v46 = vsel %vm1235_vm13, %v2513_v26, 0.0 }
 0xf90   : > { %v2217_v47 = vpop.eup %2216 }
 0xf91   : > { %1414 = vrot.lane.b32.xlu1 %v2217_v47, %s2243_s15 }
0x1003   : > { %v1415_v49 = vpop.permute.xlu1 %1414 }
0x1004   : > { %v2549_v51 = vmul.f32 %v1415_v49, %v1399_v40 }
0x1006   : > { %v1425_v53 = vsel %vm1423_vm15, %v2549_v51, %v1237_v28 }
0x1007   : > { %1436 = vrot.lane.b32.xlu0 %v1425_v53, %s2244_s16 }
0x1079   : > { %v1437_v55 = vpop.permute.xlu0 %1436 }
0x107a   : > { %2134 = vmatmul.mubr.msk.f32.vlgmr.msra.gmra.mxu1 %vm305_vm5, %v1437_v55 }
0x107b   : > { %2137 = vmatpush3.msra.mxu1 %v2309_v3  ;;  %2144 = vmatprep.mubr.msk.f32.mxu1 %vm2239_vm0, %v2238_v0 }
0x107c   : > { %2138 = vmatprep.subr.mxu1 %v2238_v0 }
0x107d   : > { %2139 = vmatpush3.msra.mxu1 %v2316_v4 }
0x107e   : > { %2140 = vmatprep.subr.mxu1 %v2238_v0 }
0x107f   : > { %2141 = vmatpush3.msra.mxu1 %v2328_v5 }
0x1080   : > { %2142 = vmatprep.subr.mxu1 %v2238_v0 }
0x1081   : > { %2143 = vmatpush3.msra.mxu1 %v2333_v6 }
0x1082   : > { %2145 = vmatmul.mubr.msk.f32.vlgmr.msra.gmra.mxu1 %vm379_vm1, %v1943_v57 }
0x113a   : > { %v1506_v58 = vpop.f32.mrf.mxu1 }
0x113c   : > { %v2135_v59 = vpop.f32.mrf.mxu1 }
0x1142   : > { %v1579_v60 = vpop.f32.mrf.mxu1 }
0x1143   : > { %v1580_v61 = vadd.f32 %v1579_v60, %v1506_v58 }
0x1144   : > { %v2146_v62 = vpop.f32.mrf.mxu1 }
0x1145   : > { %v1583_v63 = vadd.f32 %v2361_v13, %v1580_v61 }
0x1147   : > { %2218 = vtanh.f32 %v1583_v63  ;;  %v1584_v11 = vmul.f32 0.5, %v1583_v63 }
0x1149   : > { %2220 = vtanh.f32 %v1584_v11 }
0x1154   : > { %v2219_v7 = vpop.eup %2218 }
0x1155   : > { %1591 = vrot.lane.b32.xlu1 %v2219_v7, %s2241_s13 }
0x1156   : > { %v2221_v12 = vpop.eup %2220 }
0x1157   : > { %v1586_v14 = vadd.f32 1.0, %v2221_v12 }
0x1159   : > { %1609 = vperm.xlu1 %2180, %v1607_v10   ;;  %v1587_v15 = vmul.f32 0.5, %v1586_v14 }
0x115b   : > { %v1589_v19 = vmul.f32 %v1587_v15, %v1424_v18 }
0x11c7   : > { %v1592_v16 = vpop.permute.xlu1 %1591 }
0x11c8   : > { %v1594_v17 = vmul.f32 %v1592_v16, %v1587_v15 }
0x11ca   : > { %1596 = vrot.lane.b32.xlu0 %v1594_v17, %s2242_s14 }
0x11d4   : > { %v2576_v24 = vpop.permute.xlu1 %1609 }
0x11d5   : > { %vm1611_vm3 = vcmp.eq.s32.totalorder %v2576_v24, 1 }
0x123c   : > { %v1597_v20 = vpop.permute.xlu0 %1596 }
0x123d   : > { %v1599_v21 = vadd.f32 %v1597_v20, %v1589_v19 }
0x123f   : > { %2222 = vtanh.f32 %v1599_v21  ;;  %v1612_v40 = vsel %vm1611_vm3, %v1599_v21, %v1424_v18 }
0x124c   : > { %v2223_v22 = vpop.eup %2222 }
0x124d   : > { %1602 = vrot.lane.b32.xlu0 %v2223_v22, %s2243_s15 }
0x12bf   : > { %v1603_v28 = vpop.permute.xlu0 %1602 }
0x12c0   : > { %v1605_v29 = vmul.f32 %v1603_v28, %v1587_v15 }
0x12c2   : > { %v1613_v30 = vsel %vm1611_vm3, %v1605_v29, %v1425_v53  ;;  %v1614_v47 = vsel %vm1611_vm3, %v1605_v29, 0.0 }
0x12c3   : > { %1624 = vrot.lane.b32.xlu1 %v1613_v30, %s2244_s16 }
0x1335   : > { %v1625_v31 = vpop.permute.xlu1 %1624 }
0x1336   : > { %2152 = vmatmul.mubr.msk.f32.vlgmr.msra.gmra.mxu0 %vm305_vm5, %v1625_v31 }
0x1337   : > { %2155 = vmatpush3.msra.mxu0 %v2309_v3  ;;  %2162 = vmatprep.mubr.msk.f32.mxu0 %vm2239_vm0, %v2238_v0  ;;  %vm1794_vm0 = vcmp.gt.s32.totalorder %v2353_v9, 7  ;;  %v1426_v9 = vsel %vm1423_vm15, %v2549_v51, 0.0 }
0x1338   : > { %2156 = vmatprep.subr.mxu0 %v2238_v0 }
0x1339   : > { %2157 = vmatpush3.msra.mxu0 %v2316_v4 }
0x133a   : > { %2158 = vmatprep.subr.mxu0 %v2238_v0 }
0x133b   : > { %2159 = vmatpush3.msra.mxu0 %v2328_v5  ;;  %v1795_v5 = vsel %vm1794_vm0, 1, %v2240_v8 }
0x133c   : > { %2160 = vmatprep.subr.mxu0 %v2238_v0  ;;  %v674_v0 = vsel %vm671_vm7, %v2405_v56, 0.0 }
0x133d   : > { %2161 = vmatpush3.msra.mxu0 %v2333_v6  ;;  %v1050_v6 = vsel %vm1047_vm11, %v2477_v52, 0.0 }
0x133e   : > { %2163 = vmatmul.mubr.msk.f32.vlgmr.msra.gmra.mxu0 %vm379_vm1, %v1947_v32 }
0x13f6   : > { %v1694_v33 = vpop.f32.mrf.mxu0 }
0x13f8   : > { %v2153_v3 = vpop.f32.mrf.mxu0 }
0x13fe   : > { %v1767_v34 = vpop.f32.mrf.mxu0 }
0x13ff   : > { %v1768_v35 = vadd.f32 %v1767_v34, %v1694_v33 }
0x1400   : > { %v2164_v36 = vpop.f32.mrf.mxu0 }
0x1401   : > { %v1771_v1 = vadd.f32 %v2361_v13, %v1768_v35 }
0x1403   : > { %2224 = vtanh.f32 %v1771_v1  ;;  %v1772_v8 = vmul.f32 0.5, %v1771_v1 }
0x1405   : > { %2226 = vtanh.f32 %v1772_v8 }
0x1410   : > { %v2225_v4 = vpop.eup %2224 }
0x1411   : > { %1779 = vrot.lane.b32.xlu0 %v2225_v4, %s2241_s13 }
0x1412   : > { %v2227_v13 = vpop.eup %2226 }
0x1413   : > { %v1774_v54 = vadd.f32 1.0, %v2227_v13 }
0x1415   : > { %1797 = vperm.xlu0 %2181, %v1795_v5   ;;  %v1775_v56 = vmul.f32 0.5, %v1774_v54 }
0x1417   : > { %v1777_v41 = vmul.f32 %v1775_v56, %v1612_v40 }
0x1419   : > { %676 = vrot.lane.b32.xlu0 %v674_v0, %s2244_s16 }
0x141d   : > { %1052 = vrot.lane.b32.xlu0 %v1050_v6, %s2244_s16 }
0x1421   : > { %1428 = vrot.lane.b32.xlu0 %v1426_v9, %s2244_s16 }
0x1483   : > { %v1780_v37 = vpop.permute.xlu0 %1779 }
0x1484   : > { %v1782_v38 = vmul.f32 %v1780_v37, %v1775_v56 }
0x1486   : > { %1784 = vrot.lane.b32.xlu1 %v1782_v38, %s2242_s14 }
0x1490   : > { %v1798_v50 = vpop.permute.xlu0 %1797 }
0x1491   : > { %vm1799_vm1 = vcmp.eq.s32.totalorder %v1798_v50, 1 }
0x1494   : > { %v677_v52 = vpop.permute.xlu0 %676 }
0x1495   : > { %1926 = vst.msk [vmem:[%s2373_s21 + $0x2] sm:$0x3] %vm494_vm4, %v677_v52 }
0x1498   : > { %v1053_v2 = vpop.permute.xlu0 %1052 }
0x1499   : > { %1934 = vst.msk [vmem:[%s2373_s21 + $0x6] sm:$0x3] %vm494_vm4, %v1053_v2 }
0x149c   : > { %v1429_v39 = vpop.permute.xlu0 %1428 }
0x149d   : > { %1942 = vst.msk [vmem:[%s2373_s21 + $0xa] sm:$0x3] %vm494_vm4, %v1429_v39 }
0x14f8   : > { %v1785_v42 = vpop.permute.xlu1 %1784 }
0x14f9   : > { %v1787_v43 = vadd.f32 %v1785_v42, %v1777_v41 }
0x14fb   : > { %2228 = vtanh.f32 %v1787_v43 }
0x1508   : > { %v2229_v44 = vpop.eup %2228 }
0x1509   : > { %1790 = vrot.lane.b32.xlu1 %v2229_v44, %s2243_s15 }
0x150d   : > { %864 = vrot.lane.b32.xlu1 %v862_v45, %s2244_s16 }
0x1511   : > { %1240 = vrot.lane.b32.xlu1 %v1238_v46, %s2244_s16 }
0x1515   : > { %1616 = vrot.lane.b32.xlu1 %v1614_v47, %s2244_s16 }
0x157b   : > { %v1791_v48 = vpop.permute.xlu1 %1790 }
0x157c   : > { %v1793_v49 = vmul.f32 %v1791_v48, %v1775_v56 }
0x157e   : > { %v1800_v25 = vsel %vm1799_vm1, %v1793_v49, 0.0 }
0x157f   : > { %1802 = vrot.lane.b32.xlu0 %v1800_v25, %s2244_s16  ;;  %v865_v27 = vpop.permute.xlu1 %864 }
0x1580   : > { %1930 = vst.msk [vmem:[%s2373_s21 + $0x4] sm:$0x3] %vm494_vm4, %v865_v27 }
0x1583   : > { %v1241_v51 = vpop.permute.xlu1 %1240 }
0x1584   : > { %1938 = vst.msk [vmem:[%s2373_s21 + $0x8] sm:$0x3] %vm494_vm4, %v1241_v51 }
0x1587   : > { %v1617_v23 = vpop.permute.xlu1 %1616 }
0x1588   : > { %1946 = vst.msk [vmem:[%s2373_s21 + $0xc] sm:$0x3] %vm494_vm4, %v1617_v23 }
0x15f1   : > { %v1803_v26 = vpop.permute.xlu0 %1802 }
0x15f2   : > { %1950 = vst.msk [vmem:[%s2373_s21 + $0xe] sm:$0x3] %vm494_vm4, %v1803_v26 }
0x15f3 PF: > { %s15_s18 = sadd.s32 1, %s2236_s18  }
0x15f4   : > { %p12_p4 = scmp.ge.s32.totalorder %s15_s18, 4  }
0x15f6   :  { %14 = sbr.rel (!%p12_p4) target bundleno = 1 (0x1), region = 96 }

// kernel: unified_framework_forward.9
= control target key start
LH: loop header
LB: loop body
LE: loop exit
PB: predicated region body
PF: predicated region fallthrough
CT: control target
= control target key end

     0   :  { %vm40_vm0 = vcmask 523264   ;;  %vm226_vm1 = vcmask 261120   ;;  %s404_s1 = inlined_call_operand.vmem [shape: f32[64,32], index: 1, kind: input, shape index: {}]   ;;  %s405_s4 = inlined_call_operand.vmem [shape: f32[64,32], index: 4, kind: input, shape index: {}]   ;;  %s406_s0 = inlined_call_operand.vmem [shape: f32[16,64], index: 0, kind: input, shape index: {}]   ;;  %s407_s3 = inlined_call_operand.vmem [shape: f32[16,64], index: 3, kind: input, shape index: {}]   ;;  %s408_s2 = inlined_call_operand.vmem [shape: f32[1,32], index: 2, kind: input, shape index: {}]   ;;  %s409_s5 = inlined_call_operand.vmem [shape: f32[1,32], index: 5, kind: input, shape index: {}]   ;;  %s410_s6 = inlined_call_operand.vmem [shape: f32[16,32], index: 6, kind: output, shape index: {}]  }
   0x1   :  { %v32_v0 = vld [vmem:[%s404_s1 + $0x38] sm:$0xff]  ;;  %v31_v2 = vld [vmem:[%s404_s1 + $0x30] sm:$0xff]  ;;  %v30_v4 = vld [vmem:[%s404_s1 + $0x28] sm:$0xff] }
   0x2   :  { %v131_v1 = vld [vmem:[%s405_s4 + $0x38] sm:$0xff]  ;;  %259 = vmatprep.subr.mxu0 %v32_v0  ;;  %v130_v3 = vld [vmem:[%s405_s4 + $0x30] sm:$0xff]  ;;  %v129_v5 = vld [vmem:[%s405_s4 + $0x28] sm:$0xff] }
   0x3   :  { %278 = vmatprep.subr.mxu1 %v131_v1  ;;  %260 = vmatpush3.msra.mxu0 %v32_v0  ;;  %v29_v6 = vld [vmem:[%s404_s1 + $0x20] sm:$0xff]  ;;  %v28_v8 = vld [vmem:[%s404_s1 + $0x18] sm:$0xff]  ;;  %v27_v10 = vld [vmem:[%s404_s1 + $0x10] sm:$0xff] }
   0x4   :  { %279 = vmatpush3.msra.mxu1 %v131_v1  ;;  %261 = vmatprep.subr.mxu0 %v31_v2  ;;  %v128_v7 = vld [vmem:[%s405_s4 + $0x20] sm:$0xff]  ;;  %v127_v9 = vld [vmem:[%s405_s4 + $0x18] sm:$0xff]  ;;  %v126_v11 = vld [vmem:[%s405_s4 + $0x10] sm:$0xff] }
   0x5   :  { %280 = vmatprep.subr.mxu1 %v130_v3  ;;  %262 = vmatpush3.msra.mxu0 %v31_v2  ;;  %v26_v12 = vld [vmem:[%s404_s1 + $0x8] sm:$0xff]  ;;  %v25_v14 = vld [vmem:[%s404_s1] sm:$0xff] }
   0x6   :  { %281 = vmatpush3.msra.mxu1 %v130_v3  ;;  %263 = vmatprep.subr.mxu0 %v30_v4  ;;  %v125_v13 = vld [vmem:[%s405_s4 + $0x8] sm:$0xff]  ;;  %v124_v15 = vld [vmem:[%s405_s4] sm:$0xff] }
   0x7   :  { %282 = vmatprep.subr.mxu1 %v129_v5  ;;  %264 = vmatpush3.msra.mxu0 %v30_v4  ;;  %v23_v16 = vld [vmem:[%s406_s0] sm:$0xff]  ;;  %v24_v18 = vld [vmem:[%s406_s0 + $0x8] sm:$0xff] }
   0x8   :  { %283 = vmatpush3.msra.mxu1 %v129_v5  ;;  %265 = vmatprep.subr.mxu0 %v29_v6  ;;  %v122_v17 = vld [vmem:[%s407_s3] sm:$0xff]  ;;  %v123_v19 = vld [vmem:[%s407_s3 + $0x8] sm:$0xff] }
   0x9   :  { %284 = vmatprep.subr.mxu1 %v128_v7  ;;  %266 = vmatpush3.msra.mxu0 %v29_v6  ;;  %v233_v20 = vld [vmem:[%s408_s2] ss:$0 sm:$0xff] }
   0xa   :  { %285 = vmatpush3.msra.mxu1 %v128_v7  ;;  %267 = vmatprep.subr.mxu0 %v28_v8  ;;  %v238_v24 = vld [vmem:[%s409_s5] ss:$0 sm:$0xff] }
   0xb   :  { %286 = vmatprep.subr.mxu1 %v127_v9  ;;  %268 = vmatpush3.msra.mxu0 %v28_v8 }
   0xc   :  { %287 = vmatpush3.msra.mxu1 %v127_v9  ;;  %269 = vmatprep.subr.mxu0 %v27_v10 }
   0xd   :  { %288 = vmatprep.subr.mxu1 %v126_v11  ;;  %270 = vmatpush3.msra.mxu0 %v27_v10 }
   0xe   :  { %289 = vmatpush3.msra.mxu1 %v126_v11  ;;  %271 = vmatprep.subr.mxu0 %v26_v12 }
   0xf   :  { %290 = vmatprep.subr.mxu1 %v125_v13  ;;  %272 = vmatpush3.msra.mxu0 %v26_v12 }
  0x10   :  { %291 = vmatpush3.msra.mxu1 %v125_v13  ;;  %273 = vmatprep.subr.mxu0 %v25_v14 }
  0x11   :  { %292 = vmatprep.subr.mxu1 %v124_v15  ;;  %274 = vmatpush3.msra.mxu0 %v25_v14 }
  0x12   :  { %275 = vmatprep.mubr.msk.f32.mxu0 %vm40_vm0, %v23_v16  ;;  %293 = vmatpush3.msra.mxu1 %v124_v15 }
  0x13   :  { %294 = vmatprep.mubr.msk.f32.mxu1 %vm40_vm0, %v122_v17  ;;  %276 = vmatmul.mubr.msk.f32.vlgmr.msra.gmra.mxu0 %vm40_vm0, %v24_v18 }
  0x14   :  { %295 = vmatmul.mubr.msk.f32.vlgmr.msra.gmra.mxu1 %vm40_vm0, %v123_v19 }
  0xd3   :  { %v277_v21 = vpop.f32.mrf.mxu0 }
  0xd4   :  { %v296_v22 = vpop.f32.mrf.mxu1  ;;  %v119_v23 = vadd.f32 %v277_v21, %v233_v20 }
  0xd5   :  { %v113_v25 = vpop.f32.mrf.mxu0 }
  0xd6   :  { %v214_v26 = vadd.f32 %v296_v22, %v119_v23  ;;  %v114_v27 = vadd.f32 %v233_v20, %v113_v25  ;;  %v204_v28 = vpop.f32.mrf.mxu1 }
  0xd8   :  { %v223_v29 = vadd.f32 %v238_v24, %v214_v26  ;;  %v213_v30 = vadd.f32 %v204_v28, %v114_v27 }
  0xda   :  { %v225_v31 = vmax.f32 %v223_v29, 0.0  ;;  %v222_v32 = vadd.f32 %v238_v24, %v213_v30 }
  0xdc   :  { %228 = vst.msk [vmem:[%s410_s6 + $0x8] sm:$0xff] %vm226_vm1, %v225_v31  ;;  %v224_v33 = vmax.f32 %v222_v32, 0.0 }
  0xde   :  { %227 = vst.msk [vmem:[%s410_s6] sm:$0xff] %vm226_vm1, %v224_v33 }

// kernel: unified_framework_forward.11
= control target key start
LH: loop header
LB: loop body
LE: loop exit
PB: predicated region body
PF: predicated region fallthrough
CT: control target
= control target key end

     0   :  { %vm31_vm0 = vcmask 523264   ;;  %s212_s1 = inlined_call_operand.vmem [shape: f32[64,128], index: 1, kind: input, shape index: {}]   ;;  %s213_s0 = inlined_call_operand.vmem [shape: f32[16,64], index: 0, kind: input, shape index: {}]   ;;  %s214_s2 = inlined_call_operand.vmem [shape: f32[1,128], index: 2, kind: input, shape index: {}]   ;;  %s215_s3 = inlined_call_operand.vmem [shape: f32[16,128], index: 3, kind: output, shape index: {}]  }
   0x1   :  { %v23_v0 = vld [vmem:[%s212_s1 + $0x38] sm:$0xff]  ;;  %v22_v1 = vld [vmem:[%s212_s1 + $0x30] sm:$0xff]  ;;  %v21_v2 = vld [vmem:[%s212_s1 + $0x28] sm:$0xff] }
   0x2   :  { %132 = vmatprep.subr.mxu0 %v23_v0  ;;  %v14_v3 = vld [vmem:[%s213_s0] sm:$0xff]  ;;  %v19_v5 = vld [vmem:[%s212_s1 + $0x18] sm:$0xff]  ;;  %v18_v6 = vld [vmem:[%s212_s1 + $0x10] sm:$0xff] }
   0x3   :  { %133 = vmatpush3.msra.mxu0 %v23_v0  ;;  %148 = vmatprep.mubr.msk.f32.mxu0 %vm31_vm0, %v14_v3  ;;  %v20_v4 = vld [vmem:[%s212_s1 + $0x20] sm:$0xff]  ;;  %v17_v7 = vld [vmem:[%s212_s1 + $0x8] sm:$0xff] }
   0x4   :  { %134 = vmatprep.subr.mxu0 %v22_v1  ;;  %v16_v8 = vld [vmem:[%s212_s1] sm:$0xff]  ;;  %v15_v9 = vld [vmem:[%s213_s0 + $0x8] sm:$0xff] }
   0x5   :  { %135 = vmatpush3.msra.mxu0 %v22_v1  ;;  %v119_v10 = vld [vmem:[%s214_s2] ss:$0 sm:$0xff] }
   0x6   :  { %136 = vmatprep.subr.mxu0 %v21_v2 }
   0x7   :  { %137 = vmatpush3.msra.mxu0 %v21_v2 }
   0x8   :  { %138 = vmatprep.subr.mxu0 %v20_v4 }
   0x9   :  { %139 = vmatpush3.msra.mxu0 %v20_v4 }
   0xa   :  { %140 = vmatprep.subr.mxu0 %v19_v5 }
   0xb   :  { %141 = vmatpush3.msra.mxu0 %v19_v5 }
   0xc   :  { %142 = vmatprep.subr.mxu0 %v18_v6 }
   0xd   :  { %143 = vmatpush3.msra.mxu0 %v18_v6 }
   0xe   :  { %144 = vmatprep.subr.mxu0 %v17_v7 }
   0xf   :  { %145 = vmatpush3.msra.mxu0 %v17_v7 }
  0x10   :  { %146 = vmatprep.subr.mxu0 %v16_v8 }
  0x11   :  { %147 = vmatpush3.msra.mxu0 %v16_v8 }
  0x12   :  { %149 = vmatmul.mubr.msk.f32.vlgmr.msra.gmra.mxu0 %vm31_vm0, %v15_v9 }
  0xd2   :  { %v150_v11 = vpop.f32.mrf.mxu0 }
  0xd3   :  { %v110_v12 = vadd.f32 %v150_v11, %v119_v10 }
  0xd4   :  { %v104_v13 = vpop.f32.mrf.mxu0 }
  0xd5   :  { %114 = vst [vmem:[%s215_s3 + $0x8] sm:$0xff] %v110_v12  ;;  %v105_v14 = vadd.f32 %v119_v10, %v104_v13 }
  0xd7   :  { %113 = vst [vmem:[%s215_s3] sm:$0xff] %v105_v14 }

// kernel: unified_framework_forward.8
= control target key start
LH: loop header
LB: loop body
LE: loop exit
PB: predicated region body
PF: predicated region fallthrough
CT: control target
= control target key end

     0   :  { %s2815_s18 = smov 0   ;;  %s3525_s0 = inlined_call_operand.vmem [shape: s32[4,16,1], index: 0, kind: input, shape index: {}]   ;;  %s3526_s1 = inlined_call_operand.vmem [shape: f32[4,8,16,32], index: 1, kind: input, shape index: {}]   ;;  %s3527_s2 = inlined_call_operand.vmem [shape: f32[4,32,64], index: 2, kind: input, shape index: {}]   ;;  %s3528_s3 = inlined_call_operand.vmem [shape: f32[4,16,64], index: 3, kind: input, shape index: {}]   ;;  %s3529_s4 = inlined_call_operand.vmem [shape: f32[4,1,64], index: 4, kind: input, shape index: {}]   ;;  %s3530_s5 = inlined_call_operand.vmem [shape: f32[4,8,16,16], index: 5, kind: output, shape index: {}]  }
   0x1 LB: > { %s2347_s19 = sadd.s32 4294967295, %s2777_s18   ;;  %p2351_p0 = scmp.ge.s32.totalorder %s2777_s18, 1  ;;  %s2777_s18 = sphi %s2815_s18, %s15_s18  }
   0x2   : > { %p225_p1 = scmp.lt.s32.totalorder %s2777_s18, 5 }
   0x4   : > { %p226_p2 = pnand %p2351_p0, %p225_p1 }
   0x5   : > { %p271_p3 = scmp.lt.s32.totalorder (!%p226_p2), %s2347_s19, 3  ;;  %s2781_s13 = smov (!%p226_p2), 96  }
   0x6   : > { %229 = sbr.rel (%p226_p2) target bundleno = 5646 (0x160e), region = 40  ;;  %s2782_s14 = smov (!%p226_p2), 16  }
   0x7   : > { %s2783_s15 = smov (!%p226_p2), 32   ;;  %s2784_s16 = smov (!%p226_p2), 80  }
   0xb   : > { %v2779_v0 = vmov 0.0   ;;  %s3532_s19 = smov (!%p271_p3, %s2347_s19), 3  ;;  %vm389_vm0 = vcmask 261120   ;;  %v2780_v9 = vmov 0   ;;  %vm310_vm5 = vcmask 130048  }
   0xc   : > { %2512 = vmatprep.mubr.f32.mxu1 %v2779_v0  ;;  %s2423_s20 = sshll.u32 %s3532_s19, 4  ;;  %s2425_s21 = sshll.u32 %s3532_s19, 5  ;;  %2666 = vset.pattern.permute.xlu0 %v2780_v9 }
   0xd   : > { %s290_s24 = scalar_lea.vmem %s3528_s3, %s2423_s20  ;;  %s2835_s27 = scalar_lea.vmem %s3527_s2, %s2425_s21  ;;  %2667 = vset.pattern.permute.xlu1 %v2780_v9 }
   0xe   : > { %v2837_v1 = vld [vmem:[%s290_s24 + $0x8] sm:$0xff]  ;;  %v2839_v2 = vld [vmem:[%s290_s24] sm:$0xff]  ;;  %s2424_s28 = sshll.u32 %s3532_s19, 7  ;;  %v2853_v3 = vld [vmem:[%s2835_s27 + $0x18] sm:$0xff]  ;;  %s2893_s9 = scalar_lea.vmem %s3529_s4, %s3532_s19 }
   0xf   : > { %2508 = vmatprep.subr.mxu1 %v2837_v1  ;;  %s2848_s6 = scalar_lea.vmem %s3526_s1, %s2424_s28  ;;  %2526 = vmatprep.subr.mxu0 %v2837_v1  ;;  %v2861_v5 = vld [vmem:[%s2835_s27 + $0x10] sm:$0xff]  ;;  %v2867_v6 = vld [vmem:[%s2835_s27 + $0x8] sm:$0xff]  ;;  %v2874_v7 = vld [vmem:[%s2835_s27] sm:$0xff]  ;;  %s2905_s12 = scalar_lea.vmem %s3525_s0, %s2423_s20 }
  0x10   : > { %2509 = vmatpush3.msra.mxu1 %v2837_v1  ;;  %2527 = vmatpush3.msra.mxu0 %v2837_v1  ;;  %v308_v4 = vld [vmem:[%s2848_s6] sm:$0xff]  ;;  %v309_v8 = vld [vmem:[%s2848_s6 + $0x8] sm:$0xff]  ;;  %s2952_s21 = scalar_lea.vmem %s3530_s5, %s2424_s28  ;;  %v2365_v54 = vld [vmem:[%s2848_s6 + $0x10] sm:$0xff] }
  0x11   : > { %2510 = vmatprep.subr.mxu1 %v2839_v2  ;;  %2528 = vmatprep.subr.mxu0 %v2839_v2  ;;  %v2896_v15 = vld [vmem:[%s2893_s9] ss:$0 sm:$0xff]  ;;  %v2915_v32 = vld [vmem:[%s2905_s12 + $0x8] sm:$0xff]  ;;  %v2366_v56 = vld [vmem:[%s2848_s6 + $0x18] sm:$0xff] }
  0x12   : > { %2511 = vmatpush3.msra.mxu1 %v2839_v2  ;;  %2529 = vmatpush3.msra.mxu0 %v2839_v2  ;;  %v2908_v20 = vld [vmem:[%s2905_s12] sm:$0xff]  ;;  %vm524_vm2 = vcmp.gt.s32.totalorder %v2915_v32, 0  ;;  %vm759_vm6 = vcmp.gt.s32.totalorder %v2915_v32, 1  ;;  %vm1003_vm10 = vcmp.gt.s32.totalorder %v2915_v32, 2  ;;  %vm1247_vm14 = vcmp.gt.s32.totalorder %v2915_v32, 3 }
  0x13   : > { %2513 = vmatmul.mubr.f32.vlgmr.msra.gmra.mxu1 %v2779_v0  ;;  %2515 = vmatprep.subr.mxu1 %v2853_v3  ;;  %vm523_vm1 = vcmp.gt.s32.totalorder %v2908_v20, 0  ;;  %v526_v36 = vsel %vm524_vm2, 1, %v2780_v9  ;;  %vm758_vm7 = vcmp.gt.s32.totalorder %v2908_v20, 1  ;;  %vm1002_vm11 = vcmp.gt.s32.totalorder %v2908_v20, 2 }
  0x14   : > { %2516 = vmatpush3.msra.mxu1 %v2853_v3  ;;  %2523 = vmatprep.mubr.msk.f32.mxu1 %vm389_vm0, %v308_v4  ;;  %v525_v22 = vsel %vm523_vm1, 1, %v2780_v9  ;;  %vm1246_vm15 = vcmp.gt.s32.totalorder %v2908_v20, 3 }
  0x15   : > { %2517 = vmatprep.subr.mxu1 %v2861_v5  ;;  %2533 = vmatprep.subr.mxu0 %v2853_v3 }
  0x16   : > { %2518 = vmatpush3.msra.mxu1 %v2861_v5 }
  0x17   : > { %2519 = vmatprep.subr.mxu1 %v2867_v6 }
  0x18   : > { %2520 = vmatpush3.msra.mxu1 %v2867_v6 }
  0x19   : > { %2521 = vmatprep.subr.mxu1 %v2874_v7 }
  0x1a   : > { %2522 = vmatpush3.msra.mxu1 %v2874_v7 }
  0x1b   : > { %2524 = vmatmul.mubr.msk.f32.vlgmr.msra.gmra.mxu1 %vm389_vm0, %v309_v8  ;;  %2544 = vmatprep.subr.mxu1 %v2837_v1 }
  0x1c   : > { %2545 = vmatpush3.msra.mxu1 %v2837_v1 }
  0x1d   : > { %2546 = vmatprep.subr.mxu1 %v2839_v2 }
  0x1e   : > { %2547 = vmatpush3.msra.mxu1 %v2839_v2 }
  0x1f   : > { %2551 = vmatprep.subr.mxu1 %v2853_v3 }
  0xd3   : > { %v2514_v10 = vpop.f32.mrf.mxu1 }
  0xd5   : > { %v380_v11 = vpop.f32.mrf.mxu1 }
  0xdb   : > { %v2525_v12 = vpop.f32.mrf.mxu1 }
  0xdc   : > { %v468_v16 = vadd.f32 %v2525_v12, %v2514_v10 }
  0xdd   : > { %v462_v13 = vpop.f32.mrf.mxu1 }
  0xde   : > { %v463_v14 = vadd.f32 %v462_v13, %v380_v11  ;;  %v478_v18 = vadd.f32 %v2896_v15, %v468_v16 }
  0xe0   : > { %v477_v17 = vadd.f32 %v2896_v15, %v463_v14  ;;  %v480_v24 = vmul.f32 0.5, %v478_v18 }
  0xe2   : > { %2668 = vtanh.f32 %v477_v17  ;;  %v479_v23 = vmul.f32 0.5, %v477_v17 }
  0xe3   : > { %2670 = vtanh.f32 %v478_v18 }
  0xe4   : > { %2672 = vtanh.f32 %v479_v23 }
  0xe5   : > { %2674 = vtanh.f32 %v480_v24  ;;  %v761_v24 = vsel %vm759_vm6, 1, %v2780_v9 }
  0xef   : > { %v2669_v19 = vpop.eup %2668 }
  0xf0   : > { %493 = vrot.lane.b32.xlu0 %v2669_v19, %s2781_s13  ;;  %v2671_v21 = vpop.eup %2670 }
  0xf1   : > { %v2673_v25 = vpop.eup %2672 }
  0xf2   : > { %v483_v26 = vadd.f32 1.0, %v2673_v25  ;;  %v2675_v27 = vpop.eup %2674  ;;  %v760_v25 = vsel %vm758_vm7, 1, %v2780_v9 }
  0xf3   : > { %v484_v29 = vadd.f32 1.0, %v2675_v27 }
  0xf4   : > { %495 = vrot.lane.b32.xlu0 %v2671_v21, %s2781_s13  ;;  %v485_v28 = vmul.f32 0.5, %v483_v26 }
  0xf5   : > { %v486_v33 = vmul.f32 0.5, %v484_v29 }
  0xf6   : > { %v489_v37 = vmul.f32 0.0, %v485_v28 }
  0xf7   : > { %v490_v40 = vmul.f32 0.0, %v486_v33 }
  0xf8   : > { %528 = vperm.xlu0 %2666, %v525_v22  }
 0x162   : > { %v494_v30 = vpop.permute.xlu0 %493 }
 0x163   : > { %v499_v31 = vmul.f32 %v494_v30, %v485_v28 }
 0x165   : > { %503 = vrot.lane.b32.xlu1 %v499_v31, %s2782_s14 }
 0x166   : > { %v496_v34 = vpop.permute.xlu0 %495 }
 0x167   : > { %v500_v35 = vmul.f32 %v496_v34, %v486_v33 }
 0x169   : > { %505 = vrot.lane.b32.xlu1 %v500_v35, %s2782_s14 }
 0x16d   : > { %531 = vperm.xlu1 %2667, %v526_v36  }
 0x173   : > { %v2931_v46 = vpop.permute.xlu0 %528 }
 0x174   : > { %vm533_vm3 = vcmp.eq.s32.totalorder %v2931_v46, 1  ;;  %v2373_v46 = vld [vmem:[%s2848_s6 + $0x20] sm:$0xff] }
 0x1d7   : > { %v504_v38 = vpop.permute.xlu1 %503 }
 0x1d8   : > { %v2921_v39 = vadd.f32 %v504_v38, %v489_v37 }
 0x1da   : > { %2676 = vtanh.f32 %v2921_v39  ;;  %v2995_v29 = vsel %vm533_vm3, %v2921_v39, 0.0 }
 0x1db   : > { %v506_v41 = vpop.permute.xlu1 %505 }
 0x1dc   : > { %v2924_v42 = vadd.f32 %v506_v41, %v490_v40 }
 0x1de   : > { %2678 = vtanh.f32 %v2924_v42 }
 0x1e7   : > { %v2677_v43 = vpop.eup %2676 }
 0x1e8   : > { %515 = vrot.lane.b32.xlu1 %v2677_v43, %s2783_s15  ;;  %v2929_v45 = vpop.permute.xlu1 %531 }
 0x1e9   : > { %vm534_vm4 = vcmp.eq.s32.totalorder %v2929_v45, 1 }
 0x1ea   : > { %v2989_v26 = vsel %vm534_vm4, %v2924_v42, 0.0 }
 0x1eb   : > { %v2679_v44 = vpop.eup %2678 }
 0x1ec   : > { %517 = vrot.lane.b32.xlu0 %v2679_v44, %s2783_s15 }
 0x25a   : > { %v516_v47 = vpop.permute.xlu1 %515 }
 0x25b   : > { %v521_v48 = vmul.f32 %v516_v47, %v485_v28 }
 0x25d   : > { %v2936_v49 = vsel %vm533_vm3, %v521_v48, 0.0  ;;  %v2374_v48 = vld [vmem:[%s2848_s6 + $0x28] sm:$0xff]  ;;  %vm1491_vm3 = vcmp.gt.s32.totalorder %v2915_v32, 4 }
 0x25e   : > { %541 = vrot.lane.b32.xlu1 %v2936_v49, %s2784_s16  ;;  %v518_v50 = vpop.permute.xlu0 %517 }
 0x25f   : > { %v522_v51 = vmul.f32 %v518_v50, %v486_v33 }
 0x261   : > { %v2943_v52 = vsel %vm534_vm4, %v522_v51, 0.0  ;;  %vm1490_vm4 = vcmp.gt.s32.totalorder %v2908_v20, 4 }
 0x262   : > { %543 = vrot.lane.b32.xlu0 %v2943_v52, %s2784_s16 }
 0x2d0   : > { %v542_v53 = vpop.permute.xlu1 %541 }
 0x2d1   : > { %547 = vst.msk [vmem:[%s2952_s21] sm:$0xff] %vm310_vm5, %v542_v53  ;;  %2530 = vmatprep.mubr.msk.f32.mxu0 %vm310_vm5, %v542_v53 }
 0x2d4   : > { %v544_v55 = vpop.permute.xlu0 %543 }
 0x2d5   : > { %548 = vst.msk [vmem:[%s2952_s21 + $0x8] sm:$0xff] %vm310_vm5, %v544_v55  ;;  %2531 = vmatmul.mubr.msk.f32.vlgmr.msra.gmra.mxu0 %vm310_vm5, %v544_v55 }
 0x2d6   : > { %2534 = vmatpush3.msra.mxu0 %v2853_v3  ;;  %2541 = vmatprep.mubr.msk.f32.mxu0 %vm389_vm0, %v2365_v54 }
 0x2d7   : > { %2535 = vmatprep.subr.mxu0 %v2861_v5 }
 0x2d8   : > { %2536 = vmatpush3.msra.mxu0 %v2861_v5 }
 0x2d9   : > { %2537 = vmatprep.subr.mxu0 %v2867_v6 }
 0x2da   : > { %2538 = vmatpush3.msra.mxu0 %v2867_v6 }
 0x2db   : > { %2539 = vmatprep.subr.mxu0 %v2874_v7 }
 0x2dc   : > { %2540 = vmatpush3.msra.mxu0 %v2874_v7 }
 0x2dd   : > { %2542 = vmatmul.mubr.msk.f32.vlgmr.msra.gmra.mxu0 %vm389_vm0, %v2366_v56  ;;  %2562 = vmatprep.subr.mxu0 %v2837_v1 }
 0x2de   : > { %2563 = vmatpush3.msra.mxu0 %v2837_v1 }
 0x2df   : > { %2564 = vmatprep.subr.mxu0 %v2839_v2 }
 0x2e0   : > { %2565 = vmatpush3.msra.mxu0 %v2839_v2 }
 0x2e1   : > { %2569 = vmatprep.subr.mxu0 %v2853_v3 }
 0x395   : > { %v2532_v57 = vpop.f32.mrf.mxu0 }
 0x397   : > { %v622_v58 = vpop.f32.mrf.mxu0 }
 0x39d   : > { %v2543_v59 = vpop.f32.mrf.mxu0 }
 0x39e   : > { %v709_v60 = vadd.f32 %v2543_v59, %v2532_v57 }
 0x39f   : > { %v703_v61 = vpop.f32.mrf.mxu0 }
 0x3a0   : > { %v713_v62 = vadd.f32 %v2896_v15, %v709_v60  ;;  %v704_v63 = vadd.f32 %v703_v61, %v622_v58 }
 0x3a2   : > { %2680 = vtanh.f32 %v713_v62  ;;  %v712_v0 = vadd.f32 %v2896_v15, %v704_v63  ;;  %v715_v10 = vmul.f32 0.5, %v713_v62 }
 0x3a4   : > { %2682 = vtanh.f32 %v712_v0  ;;  %v714_v11 = vmul.f32 0.5, %v712_v0 }
 0x3a5   : > { %2684 = vtanh.f32 %v715_v10 }
 0x3a6   : > { %2686 = vtanh.f32 %v714_v11 }
 0x3af   : > { %v2681_v4 = vpop.eup %2680 }
 0x3b0   : > { %730 = vrot.lane.b32.xlu0 %v2681_v4, %s2781_s13 }
 0x3b1   : > { %v2683_v8 = vpop.eup %2682 }
 0x3b2   : > { %728 = vrot.lane.b32.xlu1 %v2683_v8, %s2781_s13  ;;  %v2685_v12 = vpop.eup %2684 }
 0x3b3   : > { %v2687_v13 = vpop.eup %2686  ;;  %v719_v14 = vadd.f32 1.0, %v2685_v12 }
 0x3b4   : > { %v718_v16 = vadd.f32 1.0, %v2687_v13 }
 0x3b5   : > { %v721_v17 = vmul.f32 0.5, %v719_v14  ;;  %v1005_v14 = vsel %vm1003_vm10, 1, %v2780_v9  ;;  %vm1735_vm10 = vcmp.gt.s32.totalorder %v2915_v32, 5 }
 0x3b6   : > { %v720_v21 = vmul.f32 0.5, %v718_v16  ;;  %v1004_v16 = vsel %vm1002_vm11, 1, %v2780_v9  ;;  %vm1734_vm11 = vcmp.gt.s32.totalorder %v2908_v20, 5 }
 0x3b7   : > { %v725_v27 = vmul.f32 %v721_v17, %v2989_v26 }
 0x3b8   : > { %v724_v31 = vmul.f32 %v720_v21, %v2995_v29 }
 0x422   : > { %v731_v18 = vpop.permute.xlu0 %730 }
 0x423   : > { %v735_v19 = vmul.f32 %v731_v18, %v721_v17 }
 0x424   : > { %v729_v22 = vpop.permute.xlu1 %728 }
 0x425   : > { %740 = vrot.lane.b32.xlu0 %v735_v19, %s2782_s14  ;;  %v734_v23 = vmul.f32 %v729_v22, %v720_v21 }
 0x427   : > { %738 = vrot.lane.b32.xlu1 %v734_v23, %s2782_s14 }
 0x429   : > { %766 = vperm.xlu0 %2666, %v761_v24  }
 0x42b   : > { %763 = vperm.xlu1 %2667, %v760_v25  }
 0x497   : > { %v741_v28 = vpop.permute.xlu0 %740 }
 0x498   : > { %v2997_v30 = vadd.f32 %v741_v28, %v725_v27 }
 0x499   : > { %v739_v33 = vpop.permute.xlu1 %738 }
 0x49a   : > { %2688 = vtanh.f32 %v2997_v30  ;;  %v3001_v34 = vadd.f32 %v739_v33, %v724_v31 }
 0x49c   : > { %2690 = vtanh.f32 %v3001_v34 }
 0x4a4   : > { %v3006_v37 = vpop.permute.xlu0 %766 }
 0x4a5   : > { %vm769_vm8 = vcmp.eq.s32.totalorder %v3006_v37, 1 }
 0x4a6   : > { %v3008_v38 = vpop.permute.xlu1 %763 }
 0x4a7   : > { %v2689_v35 = vpop.eup %2688  ;;  %vm768_vm9 = vcmp.eq.s32.totalorder %v3008_v38, 1 }
 0x4a8   : > { %752 = vrot.lane.b32.xlu0 %v2689_v35, %s2783_s15 }
 0x4a9   : > { %v2691_v36 = vpop.eup %2690 }
 0x4aa   : > { %750 = vrot.lane.b32.xlu1 %v2691_v36, %s2783_s15 }
 0x51a   : > { %v753_v39 = vpop.permute.xlu0 %752 }
 0x51b   : > { %v3010_v40 = vmul.f32 %v753_v39, %v721_v17  ;;  %v3064_v17 = vsel %vm769_vm8, %v2997_v30, %v2989_v26 }
 0x51c   : > { %v751_v41 = vpop.permute.xlu1 %750 }
 0x51d   : > { %v3017_v42 = vsel %vm769_vm8, %v3010_v40, %v2943_v52  ;;  %v3019_v43 = vmul.f32 %v751_v41, %v720_v21  ;;  %v3071_v21 = vsel %vm768_vm9, %v3001_v34, %v2995_v29  ;;  %v2381_v41 = vld [vmem:[%s2848_s6 + $0x30] sm:$0xff] }
 0x51e   : > { %794 = vrot.lane.b32.xlu0 %v3017_v42, %s2784_s16 }
 0x51f   : > { %v3028_v44 = vsel %vm768_vm9, %v3019_v43, %v2936_v49 }
 0x520   : > { %792 = vrot.lane.b32.xlu1 %v3028_v44, %s2784_s16 }
 0x590   : > { %v795_v47 = vpop.permute.xlu0 %794 }
 0x592   : > { %v793_v45 = vpop.permute.xlu1 %792 }
 0x593   : > { %2548 = vmatprep.mubr.msk.f32.mxu1 %vm310_vm5, %v793_v45 }
 0x594   : > { %2549 = vmatmul.mubr.msk.f32.vlgmr.msra.gmra.mxu1 %vm310_vm5, %v795_v47 }
 0x595   : > { %2552 = vmatpush3.msra.mxu1 %v2853_v3  ;;  %2559 = vmatprep.mubr.msk.f32.mxu1 %vm389_vm0, %v2373_v46 }
 0x596   : > { %2553 = vmatprep.subr.mxu1 %v2861_v5 }
 0x597   : > { %2554 = vmatpush3.msra.mxu1 %v2861_v5 }
 0x598   : > { %2555 = vmatprep.subr.mxu1 %v2867_v6 }
 0x599   : > { %2556 = vmatpush3.msra.mxu1 %v2867_v6 }
 0x59a   : > { %2557 = vmatprep.subr.mxu1 %v2874_v7 }
 0x59b   : > { %2558 = vmatpush3.msra.mxu1 %v2874_v7 }
 0x59c   : > { %2560 = vmatmul.mubr.msk.f32.vlgmr.msra.gmra.mxu1 %vm389_vm0, %v2374_v48  ;;  %2580 = vmatprep.subr.mxu1 %v2837_v1 }
 0x59d   : > { %2581 = vmatpush3.msra.mxu1 %v2837_v1 }
 0x59e   : > { %2582 = vmatprep.subr.mxu1 %v2839_v2 }
 0x59f   : > { %2583 = vmatpush3.msra.mxu1 %v2839_v2 }
 0x5a0   : > { %2587 = vmatprep.subr.mxu1 %v2853_v3 }
 0x654   : > { %v2550_v49 = vpop.f32.mrf.mxu1 }
 0x656   : > { %v866_v50 = vpop.f32.mrf.mxu1 }
 0x65c   : > { %v2561_v51 = vpop.f32.mrf.mxu1 }
 0x65d   : > { %v953_v52 = vadd.f32 %v2561_v51, %v2550_v49 }
 0x65e   : > { %v947_v53 = vpop.f32.mrf.mxu1 }
 0x65f   : > { %v957_v54 = vadd.f32 %v2896_v15, %v953_v52  ;;  %v948_v55 = vadd.f32 %v947_v53, %v866_v50 }
 0x661   : > { %2692 = vtanh.f32 %v957_v54  ;;  %v956_v56 = vadd.f32 %v2896_v15, %v948_v55  ;;  %v959_v59 = vmul.f32 0.5, %v957_v54 }
 0x663   : > { %2694 = vtanh.f32 %v956_v56  ;;  %v958_v60 = vmul.f32 0.5, %v956_v56 }
 0x664   : > { %2696 = vtanh.f32 %v959_v59 }
 0x665   : > { %2698 = vtanh.f32 %v958_v60 }
 0x66e   : > { %v2693_v57 = vpop.eup %2692 }
 0x66f   : > { %974 = vrot.lane.b32.xlu0 %v2693_v57, %s2781_s13 }
 0x670   : > { %v2695_v58 = vpop.eup %2694 }
 0x671   : > { %972 = vrot.lane.b32.xlu1 %v2695_v58, %s2781_s13  ;;  %v2697_v61 = vpop.eup %2696 }
 0x672   : > { %v2699_v62 = vpop.eup %2698  ;;  %v963_v63 = vadd.f32 1.0, %v2697_v61 }
 0x673   : > { %v962_v0 = vadd.f32 1.0, %v2699_v62 }
 0x674   : > { %v965_v4 = vmul.f32 0.5, %v963_v63 }
 0x675   : > { %v964_v11 = vmul.f32 0.5, %v962_v0 }
 0x676   : > { %v969_v18 = vmul.f32 %v965_v4, %v3064_v17 }
 0x677   : > { %v968_v23 = vmul.f32 %v964_v11, %v3071_v21 }
 0x6e1   : > { %v975_v8 = vpop.permute.xlu0 %974 }
 0x6e2   : > { %v979_v10 = vmul.f32 %v975_v8, %v965_v4 }
 0x6e3   : > { %v973_v12 = vpop.permute.xlu1 %972 }
 0x6e4   : > { %984 = vrot.lane.b32.xlu0 %v979_v10, %s2782_s14  ;;  %v978_v13 = vmul.f32 %v973_v12, %v964_v11  ;;  %v1249_v10 = vsel %vm1247_vm14, 1, %v2780_v9 }
 0x6e6   : > { %982 = vrot.lane.b32.xlu1 %v978_v13, %s2782_s14 }
 0x6e8   : > { %1010 = vperm.xlu0 %2666, %v1005_v14  }
 0x6ea   : > { %1007 = vperm.xlu1 %2667, %v1004_v16  }
 0x756   : > { %v985_v19 = vpop.permute.xlu0 %984 }
 0x757   : > { %v3073_v22 = vadd.f32 %v985_v19, %v969_v18 }
 0x758   : > { %v983_v24 = vpop.permute.xlu1 %982 }
 0x759   : > { %2700 = vtanh.f32 %v3073_v22  ;;  %v3077_v25 = vadd.f32 %v983_v24, %v968_v23 }
 0x75b   : > { %2702 = vtanh.f32 %v3077_v25 }
 0x763   : > { %v3082_v28 = vpop.permute.xlu0 %1010 }
 0x764   : > { %vm1013_vm12 = vcmp.eq.s32.totalorder %v3082_v28, 1 }
 0x765   : > { %v3084_v29 = vpop.permute.xlu1 %1007  ;;  %v3140_v12 = vsel %vm1013_vm12, %v3073_v22, %v3064_v17 }
 0x766   : > { %v2701_v26 = vpop.eup %2700  ;;  %vm1012_vm13 = vcmp.eq.s32.totalorder %v3084_v29, 1 }
 0x767   : > { %996 = vrot.lane.b32.xlu0 %v2701_v26, %s2783_s15  ;;  %v3147_v16 = vsel %vm1012_vm13, %v3077_v25, %v3071_v21 }
 0x768   : > { %v2703_v27 = vpop.eup %2702 }
 0x769   : > { %994 = vrot.lane.b32.xlu1 %v2703_v27, %s2783_s15 }
 0x7d9   : > { %v997_v30 = vpop.permute.xlu0 %996 }
 0x7da   : > { %v3086_v31 = vmul.f32 %v997_v30, %v965_v4 }
 0x7db   : > { %v995_v33 = vpop.permute.xlu1 %994 }
 0x7dc   : > { %v3093_v34 = vsel %vm1013_vm12, %v3086_v31, %v3017_v42  ;;  %v3095_v35 = vmul.f32 %v995_v33, %v964_v11  ;;  %v1248_v11 = vsel %vm1246_vm15, 1, %v2780_v9 }
 0x7dd   : > { %1038 = vrot.lane.b32.xlu0 %v3093_v34, %s2784_s16 }
 0x7de   : > { %v3104_v36 = vsel %vm1012_vm13, %v3095_v35, %v3028_v44  ;;  %v2382_v44 = vld [vmem:[%s2848_s6 + $0x38] sm:$0xff] }
 0x7df   : > { %1036 = vrot.lane.b32.xlu1 %v3104_v36, %s2784_s16 }
 0x84f   : > { %v1039_v42 = vpop.permute.xlu0 %1038 }
 0x851   : > { %v1037_v39 = vpop.permute.xlu1 %1036 }
 0x852   : > { %2566 = vmatprep.mubr.msk.f32.mxu0 %vm310_vm5, %v1037_v39 }
 0x853   : > { %2567 = vmatmul.mubr.msk.f32.vlgmr.msra.gmra.mxu0 %vm310_vm5, %v1039_v42 }
 0x854   : > { %2570 = vmatpush3.msra.mxu0 %v2853_v3  ;;  %2577 = vmatprep.mubr.msk.f32.mxu0 %vm389_vm0, %v2381_v41 }
 0x855   : > { %2571 = vmatprep.subr.mxu0 %v2861_v5 }
 0x856   : > { %2572 = vmatpush3.msra.mxu0 %v2861_v5 }
 0x857   : > { %2573 = vmatprep.subr.mxu0 %v2867_v6 }
 0x858   : > { %2574 = vmatpush3.msra.mxu0 %v2867_v6 }
 0x859   : > { %2575 = vmatprep.subr.mxu0 %v2874_v7 }
 0x85a   : > { %2576 = vmatpush3.msra.mxu0 %v2874_v7 }
 0x85b   : > { %2578 = vmatmul.mubr.msk.f32.vlgmr.msra.gmra.mxu0 %vm389_vm0, %v2382_v44  ;;  %2598 = vmatprep.subr.mxu0 %v2837_v1 }
 0x85c   : > { %2599 = vmatpush3.msra.mxu0 %v2837_v1 }
 0x85d   : > { %2600 = vmatprep.subr.mxu0 %v2839_v2 }
 0x85e   : > { %2601 = vmatpush3.msra.mxu0 %v2839_v2 }
 0x85f   : > { %2605 = vmatprep.subr.mxu0 %v2853_v3 }
 0x913   : > { %v2568_v45 = vpop.f32.mrf.mxu0 }
 0x915   : > { %v1110_v46 = vpop.f32.mrf.mxu0 }
 0x91b   : > { %v2579_v47 = vpop.f32.mrf.mxu0 }
 0x91c   : > { %v1197_v48 = vadd.f32 %v2579_v47, %v2568_v45 }
 0x91d   : > { %v1191_v49 = vpop.f32.mrf.mxu0 }
 0x91e   : > { %v1201_v50 = vadd.f32 %v2896_v15, %v1197_v48  ;;  %v1192_v51 = vadd.f32 %v1191_v49, %v1110_v46 }
 0x920   : > { %2704 = vtanh.f32 %v1201_v50  ;;  %v1200_v52 = vadd.f32 %v2896_v15, %v1192_v51  ;;  %v1203_v55 = vmul.f32 0.5, %v1201_v50 }
 0x922   : > { %2706 = vtanh.f32 %v1200_v52  ;;  %v1202_v56 = vmul.f32 0.5, %v1200_v52 }
 0x923   : > { %2708 = vtanh.f32 %v1203_v55 }
 0x924   : > { %2710 = vtanh.f32 %v1202_v56 }
 0x92d   : > { %v2705_v53 = vpop.eup %2704 }
 0x92e   : > { %1218 = vrot.lane.b32.xlu0 %v2705_v53, %s2781_s13 }
 0x92f   : > { %v2707_v54 = vpop.eup %2706 }
 0x930   : > { %1216 = vrot.lane.b32.xlu1 %v2707_v54, %s2781_s13  ;;  %v2709_v57 = vpop.eup %2708 }
 0x931   : > { %v2711_v58 = vpop.eup %2710  ;;  %v1207_v59 = vadd.f32 1.0, %v2709_v57 }
 0x932   : > { %v1206_v60 = vadd.f32 1.0, %v2711_v58 }
 0x933   : > { %v1209_v61 = vmul.f32 0.5, %v1207_v59 }
 0x934   : > { %v1208_v0 = vmul.f32 0.5, %v1206_v60 }
 0x935   : > { %v1213_v13 = vmul.f32 %v1209_v61, %v3140_v12 }
 0x936   : > { %v1212_v19 = vmul.f32 %v1208_v0, %v3147_v16 }
 0x9a0   : > { %v1219_v62 = vpop.permute.xlu0 %1218 }
 0x9a1   : > { %v1223_v63 = vmul.f32 %v1219_v62, %v1209_v61 }
 0x9a2   : > { %v1217_v4 = vpop.permute.xlu1 %1216 }
 0x9a3   : > { %1228 = vrot.lane.b32.xlu0 %v1223_v63, %s2782_s14  ;;  %v1222_v8 = vmul.f32 %v1217_v4, %v1208_v0 }
 0x9a5   : > { %1226 = vrot.lane.b32.xlu1 %v1222_v8, %s2782_s14 }
 0x9a7   : > { %1254 = vperm.xlu0 %2666, %v1249_v10   ;;  %v1493_v10 = vsel %vm1491_vm3, 1, %v2780_v9  ;;  %vm1979_vm3 = vcmp.gt.s32.totalorder %v2915_v32, 6 }
 0x9a9   : > { %1251 = vperm.xlu1 %2667, %v1248_v11   ;;  %v1492_v11 = vsel %vm1490_vm4, 1, %v2780_v9 }
 0xa15   : > { %v1229_v14 = vpop.permute.xlu0 %1228 }
 0xa16   : > { %v3149_v18 = vadd.f32 %v1229_v14, %v1213_v13 }
 0xa17   : > { %v1227_v23 = vpop.permute.xlu1 %1226 }
 0xa18   : > { %2712 = vtanh.f32 %v3149_v18  ;;  %v3153_v24 = vadd.f32 %v1227_v23, %v1212_v19 }
 0xa1a   : > { %2714 = vtanh.f32 %v3153_v24 }
 0xa22   : > { %v3158_v21 = vpop.permute.xlu0 %1254 }
 0xa23   : > { %vm1257_vm1 = vcmp.eq.s32.totalorder %v3158_v21, 1 }
 0xa24   : > { %v3160_v25 = vpop.permute.xlu1 %1251  ;;  %v3216_v13 = vsel %vm1257_vm1, %v3149_v18, %v3140_v12 }
 0xa25   : > { %v2713_v17 = vpop.eup %2712  ;;  %vm1256_vm2 = vcmp.eq.s32.totalorder %v3160_v25, 1 }
 0xa26   : > { %1240 = vrot.lane.b32.xlu0 %v2713_v17, %s2783_s15  ;;  %v3223_v23 = vsel %vm1256_vm2, %v3153_v24, %v3147_v16 }
 0xa27   : > { %v2715_v22 = vpop.eup %2714 }
 0xa28   : > { %1238 = vrot.lane.b32.xlu1 %v2715_v22, %s2783_s15 }
 0xa98   : > { %v1241_v26 = vpop.permute.xlu0 %1240 }
 0xa99   : > { %v3162_v27 = vmul.f32 %v1241_v26, %v1209_v61 }
 0xa9a   : > { %v1239_v30 = vpop.permute.xlu1 %1238 }
 0xa9b   : > { %v3169_v33 = vsel %vm1257_vm1, %v3162_v27, %v3093_v34  ;;  %v3171_v39 = vmul.f32 %v1239_v30, %v1208_v0  ;;  %v2389_v34 = vld [vmem:[%s2848_s6 + $0x40] sm:$0xff]  ;;  %v1263_v37 = vsel %vm1257_vm1, %v3162_v27, 0.0 }
 0xa9c   : > { %1282 = vrot.lane.b32.xlu0 %v3169_v33, %s2784_s16 }
 0xa9d   : > { %v3180_v41 = vsel %vm1256_vm2, %v3171_v39, %v3104_v36  ;;  %v2390_v36 = vld [vmem:[%s2848_s6 + $0x48] sm:$0xff]  ;;  %v1262_v38 = vsel %vm1256_vm2, %v3171_v39, 0.0 }
 0xa9e   : > { %1280 = vrot.lane.b32.xlu1 %v3180_v41, %s2784_s16 }
 0xb0e   : > { %v1283_v44 = vpop.permute.xlu0 %1282 }
 0xb10   : > { %v1281_v42 = vpop.permute.xlu1 %1280 }
 0xb11   : > { %2584 = vmatprep.mubr.msk.f32.mxu1 %vm310_vm5, %v1281_v42 }
 0xb12   : > { %2585 = vmatmul.mubr.msk.f32.vlgmr.msra.gmra.mxu1 %vm310_vm5, %v1283_v44 }
 0xb13   : > { %2588 = vmatpush3.msra.mxu1 %v2853_v3  ;;  %2595 = vmatprep.mubr.msk.f32.mxu1 %vm389_vm0, %v2389_v34 }
 0xb14   : > { %2589 = vmatprep.subr.mxu1 %v2861_v5 }
 0xb15   : > { %2590 = vmatpush3.msra.mxu1 %v2861_v5 }
 0xb16   : > { %2591 = vmatprep.subr.mxu1 %v2867_v6 }
 0xb17   : > { %2592 = vmatpush3.msra.mxu1 %v2867_v6 }
 0xb18   : > { %2593 = vmatprep.subr.mxu1 %v2874_v7 }
 0xb19   : > { %2594 = vmatpush3.msra.mxu1 %v2874_v7 }
 0xb1a   : > { %2596 = vmatmul.mubr.msk.f32.vlgmr.msra.gmra.mxu1 %vm389_vm0, %v2390_v36  ;;  %2616 = vmatprep.subr.mxu1 %v2837_v1 }
 0xb1b   : > { %2617 = vmatpush3.msra.mxu1 %v2837_v1 }
 0xb1c   : > { %2618 = vmatprep.subr.mxu1 %v2839_v2 }
 0xb1d   : > { %2619 = vmatpush3.msra.mxu1 %v2839_v2 }
 0xb1e   : > { %2623 = vmatprep.subr.mxu1 %v2853_v3 }
 0xbd2   : > { %v2586_v45 = vpop.f32.mrf.mxu1 }
 0xbd4   : > { %v1354_v46 = vpop.f32.mrf.mxu1 }
 0xbda   : > { %v2597_v47 = vpop.f32.mrf.mxu1 }
 0xbdb   : > { %v1441_v48 = vadd.f32 %v2597_v47, %v2586_v45 }
 0xbdc   : > { %v1435_v49 = vpop.f32.mrf.mxu1 }
 0xbdd   : > { %v1445_v50 = vadd.f32 %v2896_v15, %v1441_v48  ;;  %v1436_v51 = vadd.f32 %v1435_v49, %v1354_v46 }
 0xbdf   : > { %2716 = vtanh.f32 %v1445_v50  ;;  %v1444_v52 = vadd.f32 %v2896_v15, %v1436_v51  ;;  %v1447_v55 = vmul.f32 0.5, %v1445_v50 }
 0xbe1   : > { %2718 = vtanh.f32 %v1444_v52  ;;  %v1446_v56 = vmul.f32 0.5, %v1444_v52 }
 0xbe2   : > { %2720 = vtanh.f32 %v1447_v55 }
 0xbe3   : > { %2722 = vtanh.f32 %v1446_v56 }
 0xbec   : > { %v2717_v53 = vpop.eup %2716 }
 0xbed   : > { %1462 = vrot.lane.b32.xlu0 %v2717_v53, %s2781_s13 }
 0xbee   : > { %v2719_v54 = vpop.eup %2718 }
 0xbef   : > { %1460 = vrot.lane.b32.xlu1 %v2719_v54, %s2781_s13  ;;  %v2721_v57 = vpop.eup %2720 }
 0xbf0   : > { %v2723_v58 = vpop.eup %2722  ;;  %v1451_v59 = vadd.f32 1.0, %v2721_v57 }
 0xbf1   : > { %v1450_v60 = vadd.f32 1.0, %v2723_v58 }
 0xbf2   : > { %v1453_v61 = vmul.f32 0.5, %v1451_v59 }
 0xbf3   : > { %v1452_v0 = vmul.f32 0.5, %v1450_v60 }
 0xbf4   : > { %v1457_v14 = vmul.f32 %v1453_v61, %v3216_v13 }
 0xbf5   : > { %v1456_v22 = vmul.f32 %v1452_v0, %v3223_v23 }
 0xc5f   : > { %v1463_v62 = vpop.permute.xlu0 %1462 }
 0xc60   : > { %v1467_v63 = vmul.f32 %v1463_v62, %v1453_v61 }
 0xc61   : > { %v1461_v4 = vpop.permute.xlu1 %1460 }
 0xc62   : > { %1472 = vrot.lane.b32.xlu0 %v1467_v63, %s2782_s14  ;;  %v1466_v8 = vmul.f32 %v1461_v4, %v1452_v0 }
 0xc64   : > { %1470 = vrot.lane.b32.xlu1 %v1466_v8, %s2782_s14  ;;  %v1737_v8 = vsel %vm1735_vm10, 1, %v2780_v9 }
 0xc66   : > { %1498 = vperm.xlu0 %2666, %v1493_v10   ;;  %v1736_v10 = vsel %vm1734_vm11, 1, %v2780_v9 }
 0xc68   : > { %1495 = vperm.xlu1 %2667, %v1492_v11  }
 0xcd4   : > { %v1473_v19 = vpop.permute.xlu0 %1472 }
 0xcd5   : > { %v3225_v17 = vadd.f32 %v1473_v19, %v1457_v14 }
 0xcd6   : > { %v1471_v26 = vpop.permute.xlu1 %1470 }
 0xcd7   : > { %2724 = vtanh.f32 %v3225_v17  ;;  %v3229_v30 = vadd.f32 %v1471_v26, %v1456_v22 }
 0xcd9   : > { %2726 = vtanh.f32 %v3229_v30 }
 0xce1   : > { %v3234_v16 = vpop.permute.xlu0 %1498 }
 0xce2   : > { %vm1501_vm6 = vcmp.eq.s32.totalorder %v3234_v16, 1 }
 0xce3   : > { %v3236_v24 = vpop.permute.xlu1 %1495  ;;  %v3292_v11 = vsel %vm1501_vm6, %v3225_v17, %v3216_v13 }
 0xce4   : > { %v2725_v12 = vpop.eup %2724  ;;  %vm1500_vm7 = vcmp.eq.s32.totalorder %v3236_v24, 1 }
 0xce5   : > { %1484 = vrot.lane.b32.xlu0 %v2725_v12, %s2783_s15  ;;  %v3299_v20 = vsel %vm1500_vm7, %v3229_v30, %v3223_v23 }
 0xce6   : > { %v2727_v18 = vpop.eup %2726 }
 0xce7   : > { %1482 = vrot.lane.b32.xlu1 %v2727_v18, %s2783_s15 }
 0xd57   : > { %v1485_v42 = vpop.permute.xlu0 %1484 }
 0xd58   : > { %v3238_v34 = vmul.f32 %v1485_v42, %v1453_v61 }
 0xd59   : > { %v1483_v44 = vpop.permute.xlu1 %1482 }
 0xd5a   : > { %v3245_v36 = vsel %vm1501_vm6, %v3238_v34, %v3169_v33  ;;  %v3247_v45 = vmul.f32 %v1483_v44, %v1452_v0  ;;  %v2397_v33 = vld [vmem:[%s2848_s6 + $0x50] sm:$0xff] }
 0xd5b   : > { %1526 = vrot.lane.b32.xlu0 %v3245_v36, %s2784_s16 }
 0xd5c   : > { %v3256_v46 = vsel %vm1500_vm7, %v3247_v45, %v3180_v41  ;;  %v2398_v41 = vld [vmem:[%s2848_s6 + $0x58] sm:$0xff] }
 0xd5d   : > { %1524 = vrot.lane.b32.xlu1 %v3256_v46, %s2784_s16 }
 0xdcd   : > { %v1527_v48 = vpop.permute.xlu0 %1526 }
 0xdcf   : > { %v1525_v47 = vpop.permute.xlu1 %1524 }
 0xdd0   : > { %2602 = vmatprep.mubr.msk.f32.mxu0 %vm310_vm5, %v1525_v47 }
 0xdd1   : > { %2603 = vmatmul.mubr.msk.f32.vlgmr.msra.gmra.mxu0 %vm310_vm5, %v1527_v48 }
 0xdd2   : > { %2606 = vmatpush3.msra.mxu0 %v2853_v3  ;;  %2613 = vmatprep.mubr.msk.f32.mxu0 %vm389_vm0, %v2397_v33 }
 0xdd3   : > { %2607 = vmatprep.subr.mxu0 %v2861_v5 }
 0xdd4   : > { %2608 = vmatpush3.msra.mxu0 %v2861_v5 }
 0xdd5   : > { %2609 = vmatprep.subr.mxu0 %v2867_v6 }
 0xdd6   : > { %2610 = vmatpush3.msra.mxu0 %v2867_v6 }
 0xdd7   : > { %2611 = vmatprep.subr.mxu0 %v2874_v7 }
 0xdd8   : > { %2612 = vmatpush3.msra.mxu0 %v2874_v7 }
 0xdd9   : > { %2614 = vmatmul.mubr.msk.f32.vlgmr.msra.gmra.mxu0 %vm389_vm0, %v2398_v41  ;;  %2634 = vmatprep.subr.mxu0 %v2837_v1 }
 0xdda   : > { %2635 = vmatpush3.msra.mxu0 %v2837_v1 }
 0xddb   : > { %2636 = vmatprep.subr.mxu0 %v2839_v2 }
 0xddc   : > { %2637 = vmatpush3.msra.mxu0 %v2839_v2 }
 0xddd   : > { %2641 = vmatprep.subr.mxu0 %v2853_v3 }
 0xe91   : > { %v2604_v5 = vpop.f32.mrf.mxu0 }
 0xe93   : > { %v1598_v49 = vpop.f32.mrf.mxu0 }
 0xe99   : > { %v2615_v6 = vpop.f32.mrf.mxu0 }
 0xe9a   : > { %v1685_v50 = vadd.f32 %v2615_v6, %v2604_v5  ;;  %v2405_v5 = vld [vmem:[%s2848_s6 + $0x60] sm:$0xff]  ;;  %v3340_v6 = vld [vmem:[%s2835_s27 + $0x18] sm:$0xff] }
 0xe9b   : > { %v1679_v51 = vpop.f32.mrf.mxu0 }
 0xe9c   : > { %v1689_v52 = vadd.f32 %v2896_v15, %v1685_v50  ;;  %v1680_v53 = vadd.f32 %v1679_v51, %v1598_v49  ;;  %v3345_v50 = vld [vmem:[%s2835_s27 + $0x10] sm:$0xff]  ;;  %v2406_v51 = vld [vmem:[%s2848_s6 + $0x68] sm:$0xff] }
 0xe9e   : > { %2728 = vtanh.f32 %v1689_v52  ;;  %v1688_v54 = vadd.f32 %v2896_v15, %v1680_v53  ;;  %v1691_v2 = vmul.f32 0.5, %v1689_v52 }
 0xea0   : > { %2730 = vtanh.f32 %v1688_v54  ;;  %v1690_v3 = vmul.f32 0.5, %v1688_v54 }
 0xea1   : > { %2732 = vtanh.f32 %v1691_v2 }
 0xea2   : > { %2734 = vtanh.f32 %v1690_v3 }
 0xeab   : > { %v2729_v55 = vpop.eup %2728 }
 0xeac   : > { %1706 = vrot.lane.b32.xlu0 %v2729_v55, %s2781_s13 }
 0xead   : > { %v2731_v1 = vpop.eup %2730 }
 0xeae   : > { %1704 = vrot.lane.b32.xlu1 %v2731_v1, %s2781_s13  ;;  %v2733_v56 = vpop.eup %2732 }
 0xeaf   : > { %v2735_v57 = vpop.eup %2734  ;;  %v1695_v58 = vadd.f32 1.0, %v2733_v56 }
 0xeb0   : > { %v1694_v59 = vadd.f32 1.0, %v2735_v57 }
 0xeb1   : > { %v1697_v60 = vmul.f32 0.5, %v1695_v58 }
 0xeb2   : > { %v1696_v63 = vmul.f32 0.5, %v1694_v59 }
 0xeb3   : > { %v1701_v14 = vmul.f32 %v1697_v60, %v3292_v11 }
 0xeb4   : > { %v1700_v26 = vmul.f32 %v1696_v63, %v3299_v20 }
 0xf1e   : > { %v1707_v61 = vpop.permute.xlu0 %1706 }
 0xf1f   : > { %v1711_v62 = vmul.f32 %v1707_v61, %v1697_v60 }
 0xf20   : > { %v1705_v0 = vpop.permute.xlu1 %1704 }
 0xf21   : > { %1716 = vrot.lane.b32.xlu0 %v1711_v62, %s2782_s14  ;;  %v1710_v4 = vmul.f32 %v1705_v0, %v1696_v63 }
 0xf23   : > { %1714 = vrot.lane.b32.xlu1 %v1710_v4, %s2782_s14 }
 0xf25   : > { %1742 = vperm.xlu0 %2666, %v1737_v8  }
 0xf27   : > { %1739 = vperm.xlu1 %2667, %v1736_v10  }
 0xf93   : > { %v1717_v19 = vpop.permute.xlu0 %1716 }
 0xf94   : > { %v3301_v22 = vadd.f32 %v1717_v19, %v1701_v14  ;;  %v1981_v19 = vsel %vm1979_vm3, 1, %v2780_v9 }
 0xf95   : > { %v1715_v12 = vpop.permute.xlu1 %1714 }
 0xf96   : > { %2736 = vtanh.f32 %v3301_v22  ;;  %v3305_v18 = vadd.f32 %v1715_v12, %v1700_v26  ;;  %v3366_v26 = vld [vmem:[%s2905_s12] sm:$0xff] }
 0xf97   : > { %vm1978_vm4 = vcmp.gt.s32.totalorder %v3366_v26, 6  ;;  %vm2222_vm3 = vcmp.gt.s32.totalorder %v3366_v26, 7 }
 0xf98   : > { %2738 = vtanh.f32 %v3305_v18  ;;  %v1980_v12 = vsel %vm1978_vm4, 1, %v2780_v9 }
 0xfa0   : > { %v3310_v23 = vpop.permute.xlu0 %1742 }
 0xfa1   : > { %vm1745_vm14 = vcmp.eq.s32.totalorder %v3310_v23, 1 }
 0xfa2   : > { %v3312_v30 = vpop.permute.xlu1 %1739  ;;  %v3375_v32 = vsel %vm1745_vm14, %v3301_v22, %v3292_v11 }
 0xfa3   : > { %v2737_v13 = vpop.eup %2736  ;;  %vm1744_vm15 = vcmp.eq.s32.totalorder %v3312_v30, 1 }
 0xfa4   : > { %1728 = vrot.lane.b32.xlu0 %v2737_v13, %s2783_s15 }
 0xfa5   : > { %v2739_v17 = vpop.eup %2738 }
 0xfa6   : > { %1726 = vrot.lane.b32.xlu1 %v2739_v17, %s2783_s15 }
0x1016   : > { %v1729_v42 = vpop.permute.xlu0 %1728 }
0x1017   : > { %v3314_v44 = vmul.f32 %v1729_v42, %v1697_v60  ;;  %v3382_v42 = vsel %vm1744_vm15, %v3305_v18, %v3299_v20 }
0x1018   : > { %v1727_v47 = vpop.permute.xlu1 %1726 }
0x1019   : > { %v3321_v33 = vsel %vm1745_vm14, %v3314_v44, %v3245_v36  ;;  %v3323_v48 = vmul.f32 %v1727_v47, %v1696_v63  ;;  %v1751_v28 = vsel %vm1745_vm14, %v3314_v44, 0.0 }
0x101a   : > { %1770 = vrot.lane.b32.xlu0 %v3321_v33, %s2784_s16 }
0x101b   : > { %v3332_v41 = vsel %vm1744_vm15, %v3323_v48, %v3256_v46  ;;  %v3350_v46 = vld [vmem:[%s2835_s27 + $0x8] sm:$0xff]  ;;  %v1750_v29 = vsel %vm1744_vm15, %v3323_v48, 0.0 }
0x101c   : > { %1768 = vrot.lane.b32.xlu1 %v3332_v41, %s2784_s16 }
0x108c   : > { %v1771_v49 = vpop.permute.xlu0 %1770 }
0x108e   : > { %v1769_v36 = vpop.permute.xlu1 %1768 }
0x108f   : > { %2620 = vmatprep.mubr.msk.f32.mxu1 %vm310_vm5, %v1769_v36 }
0x1090   : > { %2621 = vmatmul.mubr.msk.f32.vlgmr.msra.gmra.mxu1 %vm310_vm5, %v1771_v49 }
0x1091   : > { %2624 = vmatpush3.msra.mxu1 %v3340_v6  ;;  %2631 = vmatprep.mubr.msk.f32.mxu1 %vm389_vm0, %v2405_v5 }
0x1092   : > { %2625 = vmatprep.subr.mxu1 %v3345_v50 }
0x1093   : > { %2626 = vmatpush3.msra.mxu1 %v3345_v50 }
0x1094   : > { %2627 = vmatprep.subr.mxu1 %v3350_v46 }
0x1095   : > { %2628 = vmatpush3.msra.mxu1 %v3350_v46 }
0x1096   : > { %2629 = vmatprep.subr.mxu1 %v2874_v7 }
0x1097   : > { %2630 = vmatpush3.msra.mxu1 %v2874_v7 }
0x1098   : > { %2632 = vmatmul.mubr.msk.f32.vlgmr.msra.gmra.mxu1 %vm389_vm0, %v2406_v51 }
0x1150   : > { %v2622_v52 = vpop.f32.mrf.mxu1 }
0x1152   : > { %v1842_v53 = vpop.f32.mrf.mxu1 }
0x1158   : > { %v2633_v54 = vpop.f32.mrf.mxu1 }
0x1159   : > { %v1929_v55 = vadd.f32 %v2633_v54, %v2622_v52 }
0x115a   : > { %v1923_v1 = vpop.f32.mrf.mxu1 }
0x115b   : > { %v1933_v2 = vadd.f32 %v2896_v15, %v1929_v55  ;;  %v1924_v3 = vadd.f32 %v1923_v1, %v1842_v53 }
0x115d   : > { %2740 = vtanh.f32 %v1933_v2  ;;  %v1932_v56 = vadd.f32 %v2896_v15, %v1924_v3  ;;  %v1935_v7 = vmul.f32 0.5, %v1933_v2  ;;  %v2413_v3 = vld [vmem:[%s2848_s6 + $0x70] sm:$0xff] }
0x115f   : > { %2742 = vtanh.f32 %v1932_v56  ;;  %v1934_v59 = vmul.f32 0.5, %v1932_v56 }
0x1160   : > { %2744 = vtanh.f32 %v1935_v7 }
0x1161   : > { %2746 = vtanh.f32 %v1934_v59 }
0x116a   : > { %v2741_v57 = vpop.eup %2740 }
0x116b   : > { %1950 = vrot.lane.b32.xlu0 %v2741_v57, %s2781_s13 }
0x116c   : > { %v2743_v58 = vpop.eup %2742 }
0x116d   : > { %1948 = vrot.lane.b32.xlu1 %v2743_v58, %s2781_s13  ;;  %v2745_v60 = vpop.eup %2744 }
0x116e   : > { %v2747_v61 = vpop.eup %2746  ;;  %v1939_v62 = vadd.f32 1.0, %v2745_v60  ;;  %v2769_v60 = vld [vmem:[%s2893_s9] ss:$0 sm:$0xff] }
0x116f   : > { %v1938_v63 = vadd.f32 1.0, %v2747_v61 }
0x1170   : > { %v1941_v0 = vmul.f32 0.5, %v1939_v62 }
0x1171   : > { %v1940_v15 = vmul.f32 0.5, %v1938_v63 }
0x1172   : > { %v1945_v13 = vmul.f32 %v1941_v0, %v3375_v32 }
0x1173   : > { %v1944_v36 = vmul.f32 %v1940_v15, %v3382_v42 }
0x11dd   : > { %v1951_v4 = vpop.permute.xlu0 %1950 }
0x11de   : > { %v1955_v8 = vmul.f32 %v1951_v4, %v1941_v0 }
0x11df   : > { %v1949_v10 = vpop.permute.xlu1 %1948 }
0x11e0   : > { %1960 = vrot.lane.b32.xlu0 %v1955_v8, %s2782_s14  ;;  %v1954_v14 = vmul.f32 %v1949_v10, %v1940_v15 }
0x11e2   : > { %1958 = vrot.lane.b32.xlu1 %v1954_v14, %s2782_s14 }
0x11e4   : > { %1986 = vperm.xlu0 %2666, %v1981_v19  }
0x11e6   : > { %1983 = vperm.xlu1 %2667, %v1980_v12  }
0x1252   : > { %v1961_v17 = vpop.permute.xlu0 %1960 }
0x1253   : > { %v3384_v47 = vadd.f32 %v1961_v17, %v1945_v13  ;;  %v2770_v17 = vld [vmem:[%s2905_s12 + $0x8] sm:$0xff] }
0x1254   : > { %v1959_v5 = vpop.permute.xlu1 %1958 }
0x1255   : > { %2748 = vtanh.f32 %v3384_v47  ;;  %v3388_v49 = vadd.f32 %v1959_v5, %v1944_v36 }
0x1257   : > { %2750 = vtanh.f32 %v3388_v49 }
0x125f   : > { %v3393_v20 = vpop.permute.xlu0 %1986 }
0x1260   : > { %vm1989_vm10 = vcmp.eq.s32.totalorder %v3393_v20, 1 }
0x1261   : > { %v3395_v18 = vpop.permute.xlu1 %1983 }
0x1262   : > { %v2749_v11 = vpop.eup %2748  ;;  %vm1988_vm11 = vcmp.eq.s32.totalorder %v3395_v18, 1 }
0x1263   : > { %1972 = vrot.lane.b32.xlu0 %v2749_v11, %s2783_s15 }
0x1264   : > { %v2751_v22 = vpop.eup %2750 }
0x1265   : > { %1970 = vrot.lane.b32.xlu1 %v2751_v22, %s2783_s15 }
0x12d5   : > { %v1973_v51 = vpop.permute.xlu0 %1972 }
0x12d6   : > { %v3397_v52 = vmul.f32 %v1973_v51, %v1941_v0  ;;  %v2224_v51 = vsel %vm2222_vm3, 1, %v2780_v9 }
0x12d7   : > { %v1971_v53 = vpop.permute.xlu1 %1970 }
0x12d8   : > { %v1993_v54 = vsel %vm1989_vm10, %v3397_v52, %v3321_v33  ;;  %v3404_v55 = vmul.f32 %v1971_v53, %v1940_v15  ;;  %v2414_v33 = vld [vmem:[%s2848_s6 + $0x78] sm:$0xff]  ;;  %v1991_v53 = vsel %vm1989_vm10, %v3384_v47, %v3375_v32  ;;  %v775_v32 = vsel %vm769_vm8, %v3010_v40, 0.0 }
0x12d9   : > { %2014 = vrot.lane.b32.xlu0 %v1993_v54, %s2784_s16  ;;  %v1019_v47 = vsel %vm1013_vm12, %v3086_v31, 0.0  ;;  %v1507_v40 = vsel %vm1501_vm6, %v3238_v34, 0.0  ;;  %v1995_v31 = vsel %vm1989_vm10, %v3397_v52, 0.0 }
0x12da   : > { %v1992_v1 = vsel %vm1988_vm11, %v3404_v55, %v3332_v41  ;;  %v2768_v41 = vld [vmem:[%s2835_s27] sm:$0xff] }
0x12db   : > { %2012 = vrot.lane.b32.xlu1 %v1992_v1, %s2784_s16 }
0x134b   : > { %v2015_v56 = vpop.permute.xlu0 %2014 }
0x134d   : > { %v2013_v2 = vpop.permute.xlu1 %2012 }
0x134e   : > { %2638 = vmatprep.mubr.msk.f32.mxu0 %vm310_vm5, %v2013_v2  ;;  %v1990_v2 = vsel %vm1988_vm11, %v3388_v49, %v3382_v42  ;;  %v774_v42 = vsel %vm768_vm9, %v3019_v43, 0.0  ;;  %v1018_v49 = vsel %vm1012_vm13, %v3095_v35, 0.0  ;;  %v1506_v43 = vsel %vm1500_vm7, %v3247_v45, 0.0 }
0x134f   : > { %2639 = vmatmul.mubr.msk.f32.vlgmr.msra.gmra.mxu0 %vm310_vm5, %v2015_v56  ;;  %v1994_v35 = vsel %vm1988_vm11, %v3404_v55, 0.0 }
0x1350   : > { %2642 = vmatpush3.msra.mxu0 %v3340_v6  ;;  %2649 = vmatprep.mubr.msk.f32.mxu0 %vm389_vm0, %v2413_v3 }
0x1351   : > { %2643 = vmatprep.subr.mxu0 %v3345_v50 }
0x1352   : > { %2644 = vmatpush3.msra.mxu0 %v3345_v50 }
0x1353   : > { %2645 = vmatprep.subr.mxu0 %v3350_v46 }
0x1354   : > { %2646 = vmatpush3.msra.mxu0 %v3350_v46 }
0x1355   : > { %2647 = vmatprep.subr.mxu0 %v2768_v41 }
0x1356   : > { %2648 = vmatpush3.msra.mxu0 %v2768_v41 }
0x1357   : > { %2650 = vmatmul.mubr.msk.f32.vlgmr.msra.gmra.mxu0 %vm389_vm0, %v2414_v33  ;;  %vm2223_vm0 = vcmp.gt.s32.totalorder %v2770_v17, 7 }
0x1358   : > { %v2225_v22 = vsel %vm2223_vm0, 1, %v2780_v9 }
0x140f   : > { %v2640_v57 = vpop.f32.mrf.mxu0 }
0x1411   : > { %v2086_v58 = vpop.f32.mrf.mxu0 }
0x1417   : > { %v2651_v6 = vpop.f32.mrf.mxu0 }
0x1418   : > { %v2173_v7 = vadd.f32 %v2651_v6, %v2640_v57 }
0x1419   : > { %v2167_v59 = vpop.f32.mrf.mxu0 }
0x141a   : > { %v2177_v61 = vadd.f32 %v2769_v60, %v2173_v7  ;;  %v2168_v62 = vadd.f32 %v2167_v59, %v2086_v58 }
0x141c   : > { %2752 = vtanh.f32 %v2177_v61  ;;  %v2176_v50 = vadd.f32 %v2769_v60, %v2168_v62  ;;  %v2179_v0 = vmul.f32 0.5, %v2177_v61 }
0x141e   : > { %2754 = vtanh.f32 %v2176_v50  ;;  %v2178_v4 = vmul.f32 0.5, %v2176_v50 }
0x141f   : > { %2756 = vtanh.f32 %v2179_v0 }
0x1420   : > { %2758 = vtanh.f32 %v2178_v4 }
0x1429   : > { %v2753_v63 = vpop.eup %2752 }
0x142a   : > { %2194 = vrot.lane.b32.xlu0 %v2753_v63, %s2781_s13 }
0x142b   : > { %v2755_v46 = vpop.eup %2754 }
0x142c   : > { %2192 = vrot.lane.b32.xlu1 %v2755_v46, %s2781_s13  ;;  %v2757_v8 = vpop.eup %2756 }
0x142d   : > { %v2759_v15 = vpop.eup %2758  ;;  %v2183_v10 = vadd.f32 1.0, %v2757_v8 }
0x142e   : > { %v2182_v14 = vadd.f32 1.0, %v2759_v15 }
0x142f   : > { %v2185_v19 = vmul.f32 0.5, %v2183_v10 }
0x1430   : > { %v2184_v36 = vmul.f32 0.5, %v2182_v14 }
0x1431   : > { %v2189_v54 = vmul.f32 %v2185_v19, %v1991_v53 }
0x1432   : > { %v2188_v26 = vmul.f32 %v2184_v36, %v1990_v2 }
0x149c   : > { %v2195_v12 = vpop.permute.xlu0 %2194 }
0x149d   : > { %v2199_v13 = vmul.f32 %v2195_v12, %v2185_v19 }
0x149e   : > { %v2193_v5 = vpop.permute.xlu1 %2192 }
0x149f   : > { %2204 = vrot.lane.b32.xlu0 %v2199_v13, %s2782_s14  ;;  %v2198_v11 = vmul.f32 %v2193_v5, %v2184_v36 }
0x14a1   : > { %2202 = vrot.lane.b32.xlu1 %v2198_v11, %s2782_s14 }
0x14a3   : > { %2230 = vperm.xlu0 %2666, %v2225_v22  }
0x14a5   : > { %2227 = vperm.xlu1 %2667, %v2224_v51  }
0x1511   : > { %v2205_v1 = vpop.permute.xlu0 %2204 }
0x1512   : > { %v2209_v3 = vadd.f32 %v2205_v1, %v2189_v54 }
0x1513   : > { %v2203_v56 = vpop.permute.xlu1 %2202 }
0x1514   : > { %2760 = vtanh.f32 %v2209_v3  ;;  %v2208_v33 = vadd.f32 %v2203_v56, %v2188_v26 }
0x1516   : > { %2762 = vtanh.f32 %v2208_v33 }
0x151e   : > { %v2231_v21 = vpop.permute.xlu0 %2230 }
0x151f   : > { %vm2233_vm8 = vcmp.eq.s32.totalorder %v2231_v21, 1 }
0x1520   : > { %v2228_v25 = vpop.permute.xlu1 %2227 }
0x1521   : > { %v2761_v9 = vpop.eup %2760  ;;  %vm2232_vm9 = vcmp.eq.s32.totalorder %v2228_v25, 1 }
0x1522   : > { %2216 = vrot.lane.b32.xlu0 %v2761_v9, %s2783_s15 }
0x1523   : > { %v2763_v41 = vpop.eup %2762 }
0x1524   : > { %2214 = vrot.lane.b32.xlu1 %v2763_v41, %s2783_s15 }
0x1526   : > { %780 = vrot.lane.b32.xlu0 %v775_v32, %s2784_s16 }
0x1528   : > { %778 = vrot.lane.b32.xlu1 %v774_v42, %s2784_s16 }
0x152a   : > { %1024 = vrot.lane.b32.xlu0 %v1019_v47, %s2784_s16 }
0x152c   : > { %1022 = vrot.lane.b32.xlu1 %v1018_v49, %s2784_s16 }
0x152e   : > { %1268 = vrot.lane.b32.xlu0 %v1263_v37, %s2784_s16 }
0x1530   : > { %1266 = vrot.lane.b32.xlu1 %v1262_v38, %s2784_s16 }
0x1532   : > { %1512 = vrot.lane.b32.xlu0 %v1507_v40, %s2784_s16 }
0x1534   : > { %1510 = vrot.lane.b32.xlu1 %v1506_v43, %s2784_s16 }
0x1536   : > { %1756 = vrot.lane.b32.xlu0 %v1751_v28, %s2784_s16 }
0x1538   : > { %1754 = vrot.lane.b32.xlu1 %v1750_v29, %s2784_s16 }
0x153a   : > { %2000 = vrot.lane.b32.xlu0 %v1995_v31, %s2784_s16 }
0x153c   : > { %1998 = vrot.lane.b32.xlu1 %v1994_v35, %s2784_s16 }
0x1594   : > { %v2217_v27 = vpop.permute.xlu0 %2216 }
0x1595   : > { %v2221_v39 = vmul.f32 %v2217_v27, %v2185_v19 }
0x1596   : > { %v2215_v16 = vpop.permute.xlu1 %2214 }
0x1597   : > { %v2235_v24 = vsel %vm2233_vm8, %v2221_v39, 0.0  ;;  %v2220_v34 = vmul.f32 %v2215_v16, %v2184_v36 }
0x1598   : > { %2240 = vrot.lane.b32.xlu0 %v2235_v24, %s2784_s16  ;;  %v781_v45 = vpop.permute.xlu0 %780 }
0x1599   : > { %2372 = vst.msk [vmem:[%s2952_s21 + $0x18] sm:$0xff] %vm310_vm5, %v781_v45  ;;  %v2234_v23 = vsel %vm2232_vm9, %v2220_v34, 0.0 }
0x159a   : > { %2238 = vrot.lane.b32.xlu1 %v2234_v23, %s2784_s16  ;;  %v779_v30 = vpop.permute.xlu1 %778 }
0x159b   : > { %2371 = vst.msk [vmem:[%s2952_s21 + $0x10] sm:$0xff] %vm310_vm5, %v779_v30 }
0x159c   : > { %v1025_v44 = vpop.permute.xlu0 %1024 }
0x159d   : > { %2380 = vst.msk [vmem:[%s2952_s21 + $0x28] sm:$0xff] %vm310_vm5, %v1025_v44 }
0x159e   : > { %v1023_v48 = vpop.permute.xlu1 %1022 }
0x159f   : > { %2379 = vst.msk [vmem:[%s2952_s21 + $0x20] sm:$0xff] %vm310_vm5, %v1023_v48 }
0x15a0   : > { %v1269_v20 = vpop.permute.xlu0 %1268 }
0x15a1   : > { %2388 = vst.msk [vmem:[%s2952_s21 + $0x38] sm:$0xff] %vm310_vm5, %v1269_v20 }
0x15a2   : > { %v1267_v18 = vpop.permute.xlu1 %1266 }
0x15a3   : > { %2387 = vst.msk [vmem:[%s2952_s21 + $0x30] sm:$0xff] %vm310_vm5, %v1267_v18 }
0x15a4   : > { %v1513_v52 = vpop.permute.xlu0 %1512 }
0x15a5   : > { %2396 = vst.msk [vmem:[%s2952_s21 + $0x48] sm:$0xff] %vm310_vm5, %v1513_v52 }
0x15a6   : > { %v1511_v55 = vpop.permute.xlu1 %1510 }
0x15a7   : > { %2395 = vst.msk [vmem:[%s2952_s21 + $0x40] sm:$0xff] %vm310_vm5, %v1511_v55 }
0x15a8   : > { %v1757_v57 = vpop.permute.xlu0 %1756 }
0x15a9   : > { %2404 = vst.msk [vmem:[%s2952_s21 + $0x58] sm:$0xff] %vm310_vm5, %v1757_v57 }
0x15aa   : > { %v1755_v58 = vpop.permute.xlu1 %1754 }
0x15ab   : > { %2403 = vst.msk [vmem:[%s2952_s21 + $0x50] sm:$0xff] %vm310_vm5, %v1755_v58 }
0x15ac   : > { %v2001_v6 = vpop.permute.xlu0 %2000 }
0x15ad   : > { %2412 = vst.msk [vmem:[%s2952_s21 + $0x68] sm:$0xff] %vm310_vm5, %v2001_v6 }
0x15ae   : > { %v1999_v7 = vpop.permute.xlu1 %1998 }
0x15af   : > { %2411 = vst.msk [vmem:[%s2952_s21 + $0x60] sm:$0xff] %vm310_vm5, %v1999_v7 }
0x160a   : > { %v2241_v59 = vpop.permute.xlu0 %2240 }
0x160b   : > { %2420 = vst.msk [vmem:[%s2952_s21 + $0x78] sm:$0xff] %vm310_vm5, %v2241_v59 }
0x160c   : > { %v2239_v60 = vpop.permute.xlu1 %2238 }
0x160d   : > { %2419 = vst.msk [vmem:[%s2952_s21 + $0x70] sm:$0xff] %vm310_vm5, %v2239_v60 }
0x160e PF: > { %s15_s18 = sadd.s32 1, %s2777_s18  }
0x160f   : > { %p12_p4 = scmp.ge.s32.totalorder %s15_s18, 6  }
0x1611   :  { %14 = sbr.rel (!%p12_p4) target bundleno = 1 (0x1), region = 96 }

// kernel: unified_framework_forward.10
= control target key start
LH: loop header
LB: loop body
LE: loop exit
PB: predicated region body
PF: predicated region fallthrough
CT: control target
= control target key end

     0   :  { %s2320_s18 = smov 0   ;;  %s2717_s0 = inlined_call_operand.vmem [shape: s32[2,2,1], index: 0, kind: input, shape index: {}]   ;;  %s2718_s1 = inlined_call_operand.vmem [shape: f32[2,8,2,32], index: 1, kind: input, shape index: {}]   ;;  %s2719_s2 = inlined_call_operand.vmem [shape: f32[2,32,128], index: 2, kind: input, shape index: {}]   ;;  %s2720_s3 = inlined_call_operand.vmem [shape: f32[2,32,128], index: 3, kind: input, shape index: {}]   ;;  %s2721_s4 = inlined_call_operand.vmem [shape: f32[2,1,128], index: 4, kind: input, shape index: {}]   ;;  %s2722_s5 = inlined_call_operand.vmem [shape: f32[2,8,2,32], index: 5, kind: output, shape index: {}]  }
   0x1 LB: > { %s1908_s19 = sadd.s32 4294967295, %s2283_s18   ;;  %p1912_p0 = scmp.ge.s32.totalorder %s2283_s18, 1  ;;  %s2283_s18 = sphi %s2320_s18, %s15_s18  }
   0x2   : > { %p224_p1 = scmp.lt.s32.totalorder %s2283_s18, 3 }
   0x4   : > { %p225_p2 = pnand %p1912_p0, %p224_p1 }
   0x5   : > { %p269_p3 = scmp.lt.s32.totalorder (!%p225_p2), %s1908_s19, 1  ;;  %s2288_s13 = smov (!%p225_p2), 64  }
   0x6   : > { %228 = sbr.rel (%p225_p2) target bundleno = 5560 (0x15b8), region = 40  ;;  %s2289_s14 = smov (!%p225_p2), 32  }
   0xb   : > { %v2285_v0 = vmov 0.0   ;;  %s2724_s19 = smov (!%p269_p3, %s1908_s19), 1  ;;  %vm2286_vm0 = vmmov 0   ;;  %vm307_vm1 = vcmask 261120   ;;  %v2287_v10 = vmov 0  }
   0xc   : > { %2038 = vmatprep.subr.mxu0 %v2285_v0  ;;  %2049 = vmatprep.subr.mxu1 %v2285_v0  ;;  %s1955_s20 = sshll.u32 %s2724_s19, 5  ;;  %s1954_s21 = sshll.u32 %s2724_s19, 4  ;;  %vm495_vm4 = vcmask 254976  }
   0xd   : > { %2046 = vmatprep.mubr.msk.f32.mxu0 %vm2286_vm0, %v2285_v0  ;;  %2057 = vmatprep.mubr.msk.f32.mxu1 %vm2286_vm0, %v2285_v0  ;;  %s287_s24 = scalar_lea.vmem %s2720_s3, %s1955_s20  ;;  %s282_s27 = scalar_lea.vmem %s2719_s2, %s1955_s20 }
   0xe   : > { %v2344_v1 = vld [vmem:[%s287_s24 + $0x18] sm:$0xff]  ;;  %v2348_v3 = vld [vmem:[%s287_s24 + $0x10] sm:$0xff]  ;;  %v2356_v5 = vld [vmem:[%s287_s24 + $0x8] sm:$0xff]  ;;  %s2365_s30 = scalar_lea.vmem %s2718_s1, %s1954_s21  ;;  %s1913_s6 = sshll.u32 %s2724_s19, 1  ;;  %2227 = vset.pattern.permute.xlu1 %v2287_v10  ;;  %2228 = vset.pattern.permute.xlu0 %v2287_v10 }
   0xf   : > { %v2346_v2 = vld [vmem:[%s282_s27 + $0x18] sm:$0xff]  ;;  %2039 = vmatpush3.msra.mxu0 %v2344_v1  ;;  %v2352_v4 = vld [vmem:[%s282_s27 + $0x10] sm:$0xff]  ;;  %v2358_v6 = vld [vmem:[%s282_s27 + $0x8] sm:$0xff]  ;;  %s272_s9 = scalar_lea.vmem %s2717_s0, %s1913_s6  ;;  %s290_s12 = scalar_lea.vmem %s2721_s4, %s2724_s19 }
  0x10   : > { %2050 = vmatpush3.msra.mxu1 %v2346_v2  ;;  %2040 = vmatprep.subr.mxu0 %v2285_v0  ;;  %v2371_v7 = vld [vmem:[%s287_s24] sm:$0xff]  ;;  %s2445_s17 = scalar_lea.vmem %s2722_s5, %s1954_s21 }
  0x11   : > { %2051 = vmatprep.subr.mxu1 %v2285_v0  ;;  %2041 = vmatpush3.msra.mxu0 %v2348_v3  ;;  %v2373_v8 = vld [vmem:[%s282_s27] sm:$0xff] }
  0x12   : > { %2052 = vmatpush3.msra.mxu1 %v2352_v4  ;;  %2042 = vmatprep.subr.mxu0 %v2285_v0  ;;  %v306_v9 = vld [vmem:[%s2365_s30] sm:$0x3]  ;;  %v1924_v30 = vld [vmem:[%s2365_s30 + $0x2] sm:$0x3]  ;;  %v1928_v55 = vld [vmem:[%s2365_s30 + $0x4] sm:$0x3] }
  0x13   : > { %2053 = vmatprep.subr.mxu1 %v2285_v0  ;;  %2043 = vmatpush3.msra.mxu0 %v2356_v5  ;;  %v2412_v11 = vld [vmem:[%s272_s9] sm:$0x3] }
  0x14   : > { %2054 = vmatpush3.msra.mxu1 %v2358_v6  ;;  %2044 = vmatprep.subr.mxu0 %v2285_v0  ;;  %vm483_vm2 = vcmp.gt.s32.totalorder %v2412_v11, 0  ;;  %v2420_v14 = vld [vmem:[%s290_s12] ss:$0 sm:$0xff]  ;;  %vm667_vm5 = vcmp.gt.s32.totalorder %v2412_v11, 1  ;;  %vm855_vm7 = vcmp.gt.s32.totalorder %v2412_v11, 2  ;;  %vm1043_vm9 = vcmp.gt.s32.totalorder %v2412_v11, 3 }
  0x15   : > { %2055 = vmatprep.subr.mxu1 %v2285_v0  ;;  %2045 = vmatpush3.msra.mxu0 %v2371_v7  ;;  %v484_v12 = vsel %vm483_vm2, 1, %v2287_v10  ;;  %v668_v44 = vsel %vm667_vm5, 1, %v2287_v10  ;;  %vm1231_vm11 = vcmp.gt.s32.totalorder %v2412_v11, 4  ;;  %vm1419_vm13 = vcmp.gt.s32.totalorder %v2412_v11, 5 }
  0x16   : > { %2056 = vmatpush3.msra.mxu1 %v2373_v8  ;;  %2047 = vmatmul.mubr.f32.vlgmr.msra.gmra.mxu0 %v2285_v0  ;;  %vm1607_vm15 = vcmp.gt.s32.totalorder %v2412_v11, 6  ;;  %vm1795_vm2 = vcmp.gt.s32.totalorder %v2412_v11, 7 }
  0x17   : > { %2058 = vmatmul.mubr.msk.f32.vlgmr.msra.gmra.mxu1 %vm307_vm1, %v306_v9  ;;  %2071 = vmatprep.subr.mxu1 %v2285_v0 }
  0x18   : > { %2060 = vmatprep.subr.mxu0 %v2285_v0  ;;  %2072 = vmatpush3.msra.mxu1 %v2346_v2 }
  0x19   : > { %2061 = vmatpush3.msra.mxu0 %v2344_v1  ;;  %2073 = vmatprep.subr.mxu1 %v2285_v0 }
  0x1a   : > { %2062 = vmatprep.subr.mxu0 %v2285_v0  ;;  %2074 = vmatpush3.msra.mxu1 %v2352_v4 }
  0x1b   : > { %2063 = vmatpush3.msra.mxu0 %v2348_v3  ;;  %2075 = vmatprep.subr.mxu1 %v2285_v0 }
  0x1c   : > { %2064 = vmatprep.subr.mxu0 %v2285_v0  ;;  %2076 = vmatpush3.msra.mxu1 %v2358_v6 }
  0x1d   : > { %2065 = vmatpush3.msra.mxu0 %v2356_v5  ;;  %2077 = vmatprep.subr.mxu1 %v2285_v0 }
  0x1e   : > { %2079 = vmatprep.mubr.msk.f32.mxu1 %vm2286_vm0, %v2285_v0  ;;  %2078 = vmatpush3.msra.mxu1 %v2373_v8 }
  0x1f   : > { %2066 = vmatprep.subr.mxu0 %v2285_v0  ;;  %2068 = vmatprep.mubr.msk.f32.mxu0 %vm2286_vm0, %v2285_v0 }
  0x20   : > { %2067 = vmatpush3.msra.mxu0 %v2371_v7  ;;  %2093 = vmatprep.subr.mxu1 %v2285_v0 }
  0x21   : > { %2082 = vmatprep.subr.mxu0 %v2285_v0  ;;  %486 = vperm.xlu1 %2227, %v484_v12  }
  0x22   : > { %2080 = vmatmul.mubr.msk.f32.vlgmr.msra.gmra.mxu1 %vm307_vm1, %v1924_v30 }
  0x23   : > { %2094 = vmatpush3.msra.mxu1 %v2346_v2  ;;  %2101 = vmatprep.mubr.msk.f32.mxu1 %vm2286_vm0, %v2285_v0 }
  0x24   : > { %2095 = vmatprep.subr.mxu1 %v2285_v0 }
  0x25   : > { %2096 = vmatpush3.msra.mxu1 %v2352_v4 }
  0x26   : > { %2097 = vmatprep.subr.mxu1 %v2285_v0 }
  0x27   : > { %2098 = vmatpush3.msra.mxu1 %v2358_v6 }
  0x28   : > { %2099 = vmatprep.subr.mxu1 %v2285_v0 }
  0x29   : > { %2100 = vmatpush3.msra.mxu1 %v2373_v8 }
  0x2a   : > { %2115 = vmatprep.subr.mxu1 %v2285_v0  ;;  %2102 = vmatmul.mubr.msk.f32.vlgmr.msra.gmra.mxu1 %vm307_vm1, %v1928_v55 }
  0x2b   : > { %2116 = vmatpush3.msra.mxu1 %v2346_v2  ;;  %2123 = vmatprep.mubr.msk.f32.mxu1 %vm2286_vm0, %v2285_v0 }
  0x2c   : > { %2117 = vmatprep.subr.mxu1 %v2285_v0 }
  0x2d   : > { %2118 = vmatpush3.msra.mxu1 %v2352_v4 }
  0x2e   : > { %2119 = vmatprep.subr.mxu1 %v2285_v0 }
  0x2f   : > { %2120 = vmatpush3.msra.mxu1 %v2358_v6 }
  0x30   : > { %2121 = vmatprep.subr.mxu1 %v2285_v0 }
  0x31   : > { %2122 = vmatpush3.msra.mxu1 %v2373_v8 }
  0x32   : > { %2137 = vmatprep.subr.mxu1 %v2285_v0 }
  0x9c   : > { %v487_v32 = vpop.permute.xlu1 %486 }
  0x9d   : > { %vm488_vm3 = vcmp.eq.s32.totalorder %v487_v32, 1 }
  0xd6   : > { %v377_v13 = vpop.f32.mrf.mxu0 }
  0xd7   : > { %v450_v15 = vpop.f32.mrf.mxu1 }
  0xd8   : > { %v451_v16 = vadd.f32 %v450_v15, %v377_v13  ;;  %v2048_v17 = vpop.f32.mrf.mxu0 }
  0xd9   : > { %v2059_v18 = vpop.f32.mrf.mxu1  ;;  %v856_v17 = vsel %vm855_vm7, 1, %v2287_v10 }
  0xda   : > { %v460_v19 = vadd.f32 %v2420_v14, %v451_v16 }
  0xdc   : > { %2229 = vtanh.f32 %v460_v19  ;;  %v461_v21 = vmul.f32 0.5, %v460_v19 }
  0xde   : > { %2231 = vtanh.f32 %v461_v21 }
  0xe2   : > { %v640_v36 = vpop.f32.mrf.mxu1 }
  0xe4   : > { %v2081_v37 = vpop.f32.mrf.mxu1 }
  0xe9   : > { %v2230_v20 = vpop.eup %2229 }
  0xea   : > { %468 = vrot.lane.b32.xlu0 %v2230_v20, %s2288_s13  ;;  %v828_v61 = vpop.f32.mrf.mxu1 }
  0xeb   : > { %v2232_v22 = vpop.eup %2231 }
  0xec   : > { %v463_v23 = vadd.f32 1.0, %v2232_v22  ;;  %v2103_v62 = vpop.f32.mrf.mxu1 }
  0xee   : > { %v464_v24 = vmul.f32 0.5, %v463_v23 }
  0xf0   : > { %v466_v27 = vmul.f32 0.0, %v464_v24 }
 0x15c   : > { %v469_v25 = vpop.permute.xlu0 %468 }
 0x15d   : > { %v471_v26 = vmul.f32 %v469_v25, %v464_v24 }
 0x15f   : > { %473 = vrot.lane.b32.xlu0 %v471_v26, %s2289_s14 }
 0x1d1   : > { %v474_v28 = vpop.permute.xlu0 %473 }
 0x1d2   : > { %v476_v29 = vadd.f32 %v474_v28, %v466_v27  ;;  %v1932_v28 = vld [vmem:[%s2365_s30 + $0x6] sm:$0x3] }
 0x1d3   : > { %2124 = vmatmul.mubr.msk.f32.vlgmr.msra.gmra.mxu1 %vm307_vm1, %v1932_v28  ;;  %v1940_v28 = vld [vmem:[%s2365_s30 + $0xa] sm:$0x3] }
 0x1d4   : > { %2233 = vtanh.f32 %v476_v29  ;;  %v489_v51 = vsel %vm488_vm3, %v476_v29, 0.0  ;;  %2138 = vmatpush3.msra.mxu1 %v2346_v2  ;;  %2145 = vmatprep.mubr.msk.f32.mxu1 %vm2286_vm0, %v2285_v0 }
 0x1d5   : > { %2139 = vmatprep.subr.mxu1 %v2285_v0 }
 0x1d6   : > { %2140 = vmatpush3.msra.mxu1 %v2352_v4 }
 0x1d7   : > { %2141 = vmatprep.subr.mxu1 %v2285_v0 }
 0x1d8   : > { %2142 = vmatpush3.msra.mxu1 %v2358_v6 }
 0x1d9   : > { %2143 = vmatprep.subr.mxu1 %v2285_v0 }
 0x1da   : > { %2144 = vmatpush3.msra.mxu1 %v2373_v8 }
 0x1db   : > { %2159 = vmatprep.subr.mxu1 %v2285_v0 }
 0x1e1   : > { %v2234_v31 = vpop.eup %2233 }
 0x1e2   : > { %479 = vrot.lane.b32.xlu1 %v2234_v31, %s2288_s13 }
 0x254   : > { %v480_v33 = vpop.permute.xlu1 %479 }
 0x255   : > { %v482_v34 = vmul.f32 %v480_v33, %v464_v24 }
 0x257   : > { %v490_v35 = vsel %vm488_vm3, %v482_v34, 0.0 }
 0x258   : > { %492 = vrot.lane.b32.xlu0 %v490_v35, %s2289_s14 }
 0x293   : > { %v1016_v34 = vpop.f32.mrf.mxu1 }
 0x2ca   : > { %v493_v38 = vpop.permute.xlu0 %492 }
 0x2cb   : > { %496 = vst.msk [vmem:[%s2445_s17] sm:$0x3] %vm495_vm4, %v493_v38  ;;  %2069 = vmatmul.mubr.msk.f32.vlgmr.msra.gmra.mxu0 %vm307_vm1, %v493_v38 }
 0x2cc   : > { %2083 = vmatpush3.msra.mxu0 %v2344_v1  ;;  %2090 = vmatprep.mubr.msk.f32.mxu0 %vm2286_vm0, %v2285_v0 }
 0x2cd   : > { %2084 = vmatprep.subr.mxu0 %v2285_v0 }
 0x2ce   : > { %2085 = vmatpush3.msra.mxu0 %v2348_v3 }
 0x2cf   : > { %2086 = vmatprep.subr.mxu0 %v2285_v0 }
 0x2d0   : > { %2087 = vmatpush3.msra.mxu0 %v2356_v5 }
 0x2d1   : > { %2088 = vmatprep.subr.mxu0 %v2285_v0 }
 0x2d2   : > { %2089 = vmatpush3.msra.mxu0 %v2371_v7 }
 0x2d3   : > { %2104 = vmatprep.subr.mxu0 %v2285_v0 }
 0x38b   : > { %v567_v39 = vpop.f32.mrf.mxu0 }
 0x38c   : > { %v641_v40 = vadd.f32 %v640_v36, %v567_v39 }
 0x38d   : > { %v2070_v41 = vpop.f32.mrf.mxu0 }
 0x38e   : > { %v644_v42 = vadd.f32 %v2420_v14, %v641_v40 }
 0x390   : > { %2235 = vtanh.f32 %v644_v42  ;;  %v645_v45 = vmul.f32 0.5, %v644_v42  ;;  %v1044_v42 = vsel %vm1043_vm9, 1, %v2287_v10 }
 0x392   : > { %2237 = vtanh.f32 %v645_v45 }
 0x39d   : > { %v2236_v43 = vpop.eup %2235 }
 0x39e   : > { %652 = vrot.lane.b32.xlu1 %v2236_v43, %s2288_s13 }
 0x39f   : > { %v2238_v46 = vpop.eup %2237 }
 0x3a0   : > { %v647_v47 = vadd.f32 1.0, %v2238_v46 }
 0x3a2   : > { %670 = vperm.xlu1 %2227, %v668_v44   ;;  %v648_v48 = vmul.f32 0.5, %v647_v47 }
 0x3a4   : > { %v650_v52 = vmul.f32 %v648_v48, %v489_v51 }
 0x410   : > { %v653_v49 = vpop.permute.xlu1 %652 }
 0x411   : > { %v655_v50 = vmul.f32 %v653_v49, %v648_v48 }
 0x413   : > { %657 = vrot.lane.b32.xlu0 %v655_v50, %s2289_s14 }
 0x41d   : > { %v2479_v57 = vpop.permute.xlu1 %670 }
 0x41e   : > { %vm672_vm6 = vcmp.eq.s32.totalorder %v2479_v57, 1 }
 0x485   : > { %v658_v53 = vpop.permute.xlu0 %657 }
 0x486   : > { %v660_v54 = vadd.f32 %v658_v53, %v650_v52  ;;  %v1936_v53 = vld [vmem:[%s2365_s30 + $0x8] sm:$0x3] }
 0x487   : > { %2146 = vmatmul.mubr.msk.f32.vlgmr.msra.gmra.mxu1 %vm307_vm1, %v1936_v53 }
 0x488   : > { %2239 = vtanh.f32 %v660_v54  ;;  %v673_v24 = vsel %vm672_vm6, %v660_v54, %v489_v51  ;;  %2160 = vmatpush3.msra.mxu1 %v2346_v2  ;;  %2167 = vmatprep.mubr.msk.f32.mxu1 %vm2286_vm0, %v2285_v0 }
 0x489   : > { %2161 = vmatprep.subr.mxu1 %v2285_v0 }
 0x48a   : > { %2162 = vmatpush3.msra.mxu1 %v2352_v4 }
 0x48b   : > { %2163 = vmatprep.subr.mxu1 %v2285_v0 }
 0x48c   : > { %2164 = vmatpush3.msra.mxu1 %v2358_v6 }
 0x48d   : > { %2165 = vmatprep.subr.mxu1 %v2285_v0 }
 0x48e   : > { %2166 = vmatpush3.msra.mxu1 %v2373_v8 }
 0x48f   : > { %2181 = vmatprep.subr.mxu1 %v2285_v0  ;;  %2168 = vmatmul.mubr.msk.f32.vlgmr.msra.gmra.mxu1 %vm307_vm1, %v1940_v28 }
 0x490   : > { %2182 = vmatpush3.msra.mxu1 %v2346_v2  ;;  %2189 = vmatprep.mubr.msk.f32.mxu1 %vm2286_vm0, %v2285_v0 }
 0x491   : > { %2183 = vmatprep.subr.mxu1 %v2285_v0 }
 0x492   : > { %2184 = vmatpush3.msra.mxu1 %v2352_v4 }
 0x493   : > { %2185 = vmatprep.subr.mxu1 %v2285_v0 }
 0x494   : > { %2186 = vmatpush3.msra.mxu1 %v2358_v6 }
 0x495   : > { %v2240_v56 = vpop.eup %2239  ;;  %2187 = vmatprep.subr.mxu1 %v2285_v0 }
 0x496   : > { %663 = vrot.lane.b32.xlu0 %v2240_v56, %s2288_s13  ;;  %2188 = vmatpush3.msra.mxu1 %v2373_v8 }
 0x497   : > { %2203 = vmatprep.subr.mxu1 %v2285_v0 }
 0x508   : > { %v664_v58 = vpop.permute.xlu0 %663 }
 0x509   : > { %v2481_v59 = vmul.f32 %v664_v58, %v648_v48 }
 0x50b   : > { %v674_v60 = vsel %vm672_vm6, %v2481_v59, %v490_v35  ;;  %v2125_v35 = vpop.f32.mrf.mxu1 }
 0x50c   : > { %685 = vrot.lane.b32.xlu1 %v674_v60, %s2289_s14 }
 0x57e   : > { %v686_v63 = vpop.permute.xlu1 %685 }
 0x57f   : > { %2091 = vmatmul.mubr.msk.f32.vlgmr.msra.gmra.mxu0 %vm307_vm1, %v686_v63 }
 0x580   : > { %2105 = vmatpush3.msra.mxu0 %v2344_v1  ;;  %2112 = vmatprep.mubr.msk.f32.mxu0 %vm2286_vm0, %v2285_v0 }
 0x581   : > { %2106 = vmatprep.subr.mxu0 %v2285_v0 }
 0x582   : > { %2107 = vmatpush3.msra.mxu0 %v2348_v3 }
 0x583   : > { %2108 = vmatprep.subr.mxu0 %v2285_v0 }
 0x584   : > { %2109 = vmatpush3.msra.mxu0 %v2356_v5 }
 0x585   : > { %2110 = vmatprep.subr.mxu0 %v2285_v0 }
 0x586   : > { %2111 = vmatpush3.msra.mxu0 %v2371_v7 }
 0x587   : > { %2126 = vmatprep.subr.mxu0 %v2285_v0 }
 0x63f   : > { %v755_v9 = vpop.f32.mrf.mxu0 }
 0x640   : > { %v829_v12 = vadd.f32 %v828_v61, %v755_v9  ;;  %v1204_v61 = vpop.f32.mrf.mxu1 }
 0x641   : > { %v2092_v13 = vpop.f32.mrf.mxu0 }
 0x642   : > { %v832_v15 = vadd.f32 %v2420_v14, %v829_v12  ;;  %v2147_v62 = vpop.f32.mrf.mxu1 }
 0x644   : > { %2241 = vtanh.f32 %v832_v15  ;;  %v833_v18 = vmul.f32 0.5, %v832_v15 }
 0x646   : > { %2243 = vtanh.f32 %v833_v18 }
 0x651   : > { %v2242_v16 = vpop.eup %2241 }
 0x652   : > { %840 = vrot.lane.b32.xlu0 %v2242_v16, %s2288_s13 }
 0x653   : > { %v2244_v19 = vpop.eup %2243 }
 0x654   : > { %v835_v20 = vadd.f32 1.0, %v2244_v19 }
 0x656   : > { %858 = vperm.xlu0 %2228, %v856_v17   ;;  %v836_v21 = vmul.f32 0.5, %v835_v20  ;;  %v1232_v17 = vsel %vm1231_vm11, 1, %v2287_v10 }
 0x658   : > { %v838_v25 = vmul.f32 %v836_v21, %v673_v24 }
 0x6c4   : > { %v841_v22 = vpop.permute.xlu0 %840 }
 0x6c5   : > { %v843_v23 = vmul.f32 %v841_v22, %v836_v21 }
 0x6c7   : > { %845 = vrot.lane.b32.xlu1 %v843_v23, %s2289_s14 }
 0x6d1   : > { %v2519_v30 = vpop.permute.xlu0 %858 }
 0x6d2   : > { %vm860_vm8 = vcmp.eq.s32.totalorder %v2519_v30, 1 }
 0x739   : > { %v846_v26 = vpop.permute.xlu1 %845 }
 0x73a   : > { %v848_v27 = vadd.f32 %v846_v26, %v838_v25 }
 0x73c   : > { %2245 = vtanh.f32 %v848_v27  ;;  %v861_v49 = vsel %vm860_vm8, %v848_v27, %v673_v24 }
 0x749   : > { %v2246_v29 = vpop.eup %2245 }
 0x74a   : > { %851 = vrot.lane.b32.xlu1 %v2246_v29, %s2288_s13 }
 0x7bc   : > { %v852_v31 = vpop.permute.xlu1 %851 }
 0x7bd   : > { %v2521_v32 = vmul.f32 %v852_v31, %v836_v21 }
 0x7bf   : > { %v862_v33 = vsel %vm860_vm8, %v2521_v32, %v674_v60 }
 0x7c0   : > { %873 = vrot.lane.b32.xlu1 %v862_v33, %s2289_s14 }
 0x832   : > { %v874_v36 = vpop.permute.xlu1 %873 }
 0x833   : > { %2113 = vmatmul.mubr.msk.f32.vlgmr.msra.gmra.mxu0 %vm307_vm1, %v874_v36  ;;  %v1392_v36 = vpop.f32.mrf.mxu1 }
 0x834   : > { %2127 = vmatpush3.msra.mxu0 %v2344_v1  ;;  %2134 = vmatprep.mubr.msk.f32.mxu0 %vm2286_vm0, %v2285_v0 }
 0x835   : > { %2128 = vmatprep.subr.mxu0 %v2285_v0 }
 0x836   : > { %2129 = vmatpush3.msra.mxu0 %v2348_v3 }
 0x837   : > { %2130 = vmatprep.subr.mxu0 %v2285_v0 }
 0x838   : > { %2131 = vmatpush3.msra.mxu0 %v2356_v5 }
 0x839   : > { %2132 = vmatprep.subr.mxu0 %v2285_v0 }
 0x83a   : > { %2133 = vmatpush3.msra.mxu0 %v2371_v7 }
 0x83b   : > { %2148 = vmatprep.subr.mxu0 %v2285_v0 }
 0x8f3   : > { %v943_v37 = vpop.f32.mrf.mxu0 }
 0x8f4   : > { %v1017_v38 = vadd.f32 %v1016_v34, %v943_v37  ;;  %v2169_v37 = vpop.f32.mrf.mxu1 }
 0x8f5   : > { %v2114_v39 = vpop.f32.mrf.mxu0 }
 0x8f6   : > { %v1020_v40 = vadd.f32 %v2420_v14, %v1017_v38 }
 0x8f8   : > { %2247 = vtanh.f32 %v1020_v40  ;;  %v1021_v43 = vmul.f32 0.5, %v1020_v40 }
 0x8fa   : > { %2249 = vtanh.f32 %v1021_v43 }
 0x905   : > { %v2248_v41 = vpop.eup %2247 }
 0x906   : > { %1028 = vrot.lane.b32.xlu0 %v2248_v41, %s2288_s13 }
 0x907   : > { %v2250_v44 = vpop.eup %2249 }
 0x908   : > { %v1023_v45 = vadd.f32 1.0, %v2250_v44  ;;  %v1420_v44 = vsel %vm1419_vm13, 1, %v2287_v10 }
 0x90a   : > { %1046 = vperm.xlu0 %2228, %v1044_v42   ;;  %v1024_v46 = vmul.f32 0.5, %v1023_v45 }
 0x90c   : > { %v1026_v50 = vmul.f32 %v1024_v46, %v861_v49 }
 0x978   : > { %v1029_v47 = vpop.permute.xlu0 %1028 }
 0x979   : > { %v1031_v48 = vmul.f32 %v1029_v47, %v1024_v46 }
 0x97b   : > { %1033 = vrot.lane.b32.xlu1 %v1031_v48, %s2289_s14 }
 0x985   : > { %v2559_v55 = vpop.permute.xlu0 %1046 }
 0x986   : > { %vm1048_vm10 = vcmp.eq.s32.totalorder %v2559_v55, 1 }
 0x9ed   : > { %v1034_v51 = vpop.permute.xlu1 %1033 }
 0x9ee   : > { %v1036_v52 = vadd.f32 %v1034_v51, %v1026_v50 }
 0x9f0   : > { %2251 = vtanh.f32 %v1036_v52  ;;  %v1049_v24 = vsel %vm1048_vm10, %v1036_v52, %v861_v49 }
 0x9fd   : > { %v2252_v54 = vpop.eup %2251 }
 0x9fe   : > { %1039 = vrot.lane.b32.xlu1 %v2252_v54, %s2288_s13 }
 0xa70   : > { %v1040_v56 = vpop.permute.xlu1 %1039 }
 0xa71   : > { %v2561_v58 = vmul.f32 %v1040_v56, %v1024_v46  ;;  %v1944_v56 = vld [vmem:[%s2365_s30 + $0xc] sm:$0x3] }
 0xa72   : > { %2190 = vmatmul.mubr.msk.f32.vlgmr.msra.gmra.mxu1 %vm307_vm1, %v1944_v56 }
 0xa73   : > { %v1050_v60 = vsel %vm1048_vm10, %v2561_v58, %v862_v33  ;;  %2204 = vmatpush3.msra.mxu1 %v2346_v2  ;;  %2211 = vmatprep.mubr.msk.f32.mxu1 %vm2286_vm0, %v2285_v0 }
 0xa74   : > { %1061 = vrot.lane.b32.xlu0 %v1050_v60, %s2289_s14  ;;  %2205 = vmatprep.subr.mxu1 %v2285_v0 }
 0xa75   : > { %2206 = vmatpush3.msra.mxu1 %v2352_v4 }
 0xa76   : > { %2207 = vmatprep.subr.mxu1 %v2285_v0 }
 0xa77   : > { %2208 = vmatpush3.msra.mxu1 %v2358_v6 }
 0xa78   : > { %2209 = vmatprep.subr.mxu1 %v2285_v0 }
 0xa79   : > { %2210 = vmatpush3.msra.mxu1 %v2373_v8 }
 0xae6   : > { %v1062_v63 = vpop.permute.xlu0 %1061 }
 0xae7   : > { %2135 = vmatmul.mubr.msk.f32.vlgmr.msra.gmra.mxu0 %vm307_vm1, %v1062_v63 }
 0xae8   : > { %2149 = vmatpush3.msra.mxu0 %v2344_v1  ;;  %2156 = vmatprep.mubr.msk.f32.mxu0 %vm2286_vm0, %v2285_v0 }
 0xae9   : > { %2150 = vmatprep.subr.mxu0 %v2285_v0 }
 0xaea   : > { %2151 = vmatpush3.msra.mxu0 %v2348_v3 }
 0xaeb   : > { %2152 = vmatprep.subr.mxu0 %v2285_v0 }
 0xaec   : > { %2153 = vmatpush3.msra.mxu0 %v2356_v5 }
 0xaed   : > { %2154 = vmatprep.subr.mxu0 %v2285_v0 }
 0xaee   : > { %2155 = vmatpush3.msra.mxu0 %v2371_v7 }
 0xaef   : > { %2170 = vmatprep.subr.mxu0 %v2285_v0 }
 0xb32   : > { %v1580_v6 = vpop.f32.mrf.mxu1 }
 0xb34   : > { %v2191_v63 = vpop.f32.mrf.mxu1 }
 0xba7   : > { %v1131_v9 = vpop.f32.mrf.mxu0 }
 0xba8   : > { %v1205_v12 = vadd.f32 %v1204_v61, %v1131_v9 }
 0xba9   : > { %v2136_v13 = vpop.f32.mrf.mxu0 }
 0xbaa   : > { %v1208_v15 = vadd.f32 %v2420_v14, %v1205_v12 }
 0xbac   : > { %2253 = vtanh.f32 %v1208_v15  ;;  %v1209_v18 = vmul.f32 0.5, %v1208_v15 }
 0xbae   : > { %2255 = vtanh.f32 %v1209_v18 }
 0xbb9   : > { %v2254_v16 = vpop.eup %2253 }
 0xbba   : > { %1216 = vrot.lane.b32.xlu1 %v2254_v16, %s2288_s13 }
 0xbbb   : > { %v2256_v19 = vpop.eup %2255 }
 0xbbc   : > { %v1211_v20 = vadd.f32 1.0, %v2256_v19 }
 0xbbe   : > { %1234 = vperm.xlu1 %2227, %v1232_v17   ;;  %v1212_v21 = vmul.f32 0.5, %v1211_v20 }
 0xbc0   : > { %v1214_v25 = vmul.f32 %v1212_v21, %v1049_v24 }
 0xc2c   : > { %v1217_v22 = vpop.permute.xlu1 %1216 }
 0xc2d   : > { %v1219_v23 = vmul.f32 %v1217_v22, %v1212_v21 }
 0xc2f   : > { %1221 = vrot.lane.b32.xlu0 %v1219_v23, %s2289_s14  ;;  %v1948_v23 = vld [vmem:[%s2365_s30 + $0xe] sm:$0x3] }
 0xc30   : > { %2212 = vmatmul.mubr.msk.f32.vlgmr.msra.gmra.mxu1 %vm307_vm1, %v1948_v23 }
 0xc39   : > { %v2599_v31 = vpop.permute.xlu1 %1234 }
 0xc3a   : > { %vm1236_vm12 = vcmp.eq.s32.totalorder %v2599_v31, 1 }
 0xca1   : > { %v1222_v26 = vpop.permute.xlu0 %1221 }
 0xca2   : > { %v1224_v27 = vadd.f32 %v1222_v26, %v1214_v25 }
 0xca4   : > { %2257 = vtanh.f32 %v1224_v27  ;;  %v1237_v51 = vsel %vm1236_vm12, %v1224_v27, %v1049_v24 }
 0xcb1   : > { %v2258_v29 = vpop.eup %2257 }
 0xcb2   : > { %1227 = vrot.lane.b32.xlu0 %v2258_v29, %s2288_s13 }
 0xcf0   : > { %v1768_v29 = vpop.f32.mrf.mxu1 }
 0xd24   : > { %v1228_v33 = vpop.permute.xlu0 %1227 }
 0xd25   : > { %v2601_v34 = vmul.f32 %v1228_v33, %v1212_v21  ;;  %v2213_v33 = vpop.f32.mrf.mxu1 }
 0xd27   : > { %v1238_v35 = vsel %vm1236_vm12, %v2601_v34, %v1050_v60 }
 0xd28   : > { %1249 = vrot.lane.b32.xlu1 %v1238_v35, %s2289_s14 }
 0xd9a   : > { %v1250_v38 = vpop.permute.xlu1 %1249 }
 0xd9b   : > { %2157 = vmatmul.mubr.msk.f32.vlgmr.msra.gmra.mxu0 %vm307_vm1, %v1250_v38 }
 0xd9c   : > { %2171 = vmatpush3.msra.mxu0 %v2344_v1  ;;  %2178 = vmatprep.mubr.msk.f32.mxu0 %vm2286_vm0, %v2285_v0 }
 0xd9d   : > { %2172 = vmatprep.subr.mxu0 %v2285_v0 }
 0xd9e   : > { %2173 = vmatpush3.msra.mxu0 %v2348_v3 }
 0xd9f   : > { %2174 = vmatprep.subr.mxu0 %v2285_v0 }
 0xda0   : > { %2175 = vmatpush3.msra.mxu0 %v2356_v5 }
 0xda1   : > { %2176 = vmatprep.subr.mxu0 %v2285_v0 }
 0xda2   : > { %2177 = vmatpush3.msra.mxu0 %v2371_v7 }
 0xda3   : > { %2192 = vmatprep.subr.mxu0 %v2285_v0 }
 0xe5b   : > { %v1319_v39 = vpop.f32.mrf.mxu0 }
 0xe5c   : > { %v1393_v40 = vadd.f32 %v1392_v36, %v1319_v39 }
 0xe5d   : > { %v2158_v41 = vpop.f32.mrf.mxu0 }
 0xe5e   : > { %v1396_v42 = vadd.f32 %v2420_v14, %v1393_v40  ;;  %v1796_v41 = vsel %vm1795_vm2, 1, %v2287_v10 }
 0xe60   : > { %2259 = vtanh.f32 %v1396_v42  ;;  %v1397_v45 = vmul.f32 0.5, %v1396_v42  ;;  %v675_v42 = vsel %vm672_vm6, %v2481_v59, 0.0 }
 0xe62   : > { %2261 = vtanh.f32 %v1397_v45 }
 0xe6d   : > { %v2260_v43 = vpop.eup %2259 }
 0xe6e   : > { %1404 = vrot.lane.b32.xlu0 %v2260_v43, %s2288_s13 }
 0xe6f   : > { %v2262_v46 = vpop.eup %2261 }
 0xe70   : > { %v1399_v47 = vadd.f32 1.0, %v2262_v46 }
 0xe72   : > { %1422 = vperm.xlu0 %2228, %v1420_v44   ;;  %v1400_v48 = vmul.f32 0.5, %v1399_v47 }
 0xe74   : > { %v1402_v52 = vmul.f32 %v1400_v48, %v1237_v51 }
 0xee0   : > { %v1405_v49 = vpop.permute.xlu0 %1404 }
 0xee1   : > { %v1407_v50 = vmul.f32 %v1405_v49, %v1400_v48 }
 0xee3   : > { %1409 = vrot.lane.b32.xlu1 %v1407_v50, %s2289_s14 }
 0xeed   : > { %v2638_v61 = vpop.permute.xlu0 %1422 }
 0xeee   : > { %vm1424_vm14 = vcmp.eq.s32.totalorder %v2638_v61, 1 }
 0xf55   : > { %v1410_v53 = vpop.permute.xlu1 %1409 }
 0xf56   : > { %v1412_v54 = vadd.f32 %v1410_v53, %v1402_v52  ;;  %v863_v53 = vsel %vm860_vm8, %v2521_v32, 0.0 }
 0xf58   : > { %2263 = vtanh.f32 %v1412_v54  ;;  %v1425_v19 = vsel %vm1424_vm14, %v1412_v54, %v1237_v51  ;;  %v1239_v54 = vsel %vm1236_vm12, %v2601_v34, 0.0 }
 0xf65   : > { %v2264_v60 = vpop.eup %2263 }
 0xf66   : > { %1415 = vrot.lane.b32.xlu1 %v2264_v60, %s2288_s13 }
 0xfd8   : > { %v1416_v2 = vpop.permute.xlu1 %1415 }
 0xfd9   : > { %v2640_v62 = vmul.f32 %v1416_v2, %v1400_v48 }
 0xfdb   : > { %v1426_v4 = vsel %vm1424_vm14, %v2640_v62, %v1238_v35  ;;  %v1427_v11 = vsel %vm1424_vm14, %v2640_v62, 0.0 }
 0xfdc   : > { %1437 = vrot.lane.b32.xlu0 %v1426_v4, %s2289_s14 }
0x104e   : > { %v1438_v9 = vpop.permute.xlu0 %1437 }
0x104f   : > { %2179 = vmatmul.mubr.msk.f32.vlgmr.msra.gmra.mxu0 %vm307_vm1, %v1438_v9 }
0x1050   : > { %2193 = vmatpush3.msra.mxu0 %v2344_v1  ;;  %2200 = vmatprep.mubr.msk.f32.mxu0 %vm2286_vm0, %v2285_v0 }
0x1051   : > { %2194 = vmatprep.subr.mxu0 %v2285_v0 }
0x1052   : > { %2195 = vmatpush3.msra.mxu0 %v2348_v3  ;;  %v1608_v3 = vsel %vm1607_vm15, 1, %v2287_v10 }
0x1053   : > { %2196 = vmatprep.subr.mxu0 %v2285_v0 }
0x1054   : > { %2197 = vmatpush3.msra.mxu0 %v2356_v5 }
0x1055   : > { %2198 = vmatprep.subr.mxu0 %v2285_v0 }
0x1056   : > { %2199 = vmatpush3.msra.mxu0 %v2371_v7 }
0x110f   : > { %v1507_v8 = vpop.f32.mrf.mxu0 }
0x1110   : > { %v1581_v12 = vadd.f32 %v1580_v6, %v1507_v8 }
0x1111   : > { %v2180_v13 = vpop.f32.mrf.mxu0 }
0x1112   : > { %v1584_v1 = vadd.f32 %v2420_v14, %v1581_v12 }
0x1114   : > { %2265 = vtanh.f32 %v1584_v1  ;;  %v1585_v5 = vmul.f32 0.5, %v1584_v1 }
0x1116   : > { %2267 = vtanh.f32 %v1585_v5 }
0x1121   : > { %v2266_v15 = vpop.eup %2265 }
0x1122   : > { %1592 = vrot.lane.b32.xlu1 %v2266_v15, %s2288_s13 }
0x1123   : > { %v2268_v0 = vpop.eup %2267 }
0x1124   : > { %v1587_v16 = vadd.f32 1.0, %v2268_v0 }
0x1126   : > { %1610 = vperm.xlu1 %2227, %v1608_v3   ;;  %v1588_v7 = vmul.f32 0.5, %v1587_v16 }
0x1128   : > { %v1590_v20 = vmul.f32 %v1588_v7, %v1425_v19 }
0x1194   : > { %v1593_v17 = vpop.permute.xlu1 %1592 }
0x1195   : > { %v1595_v18 = vmul.f32 %v1593_v17, %v1588_v7 }
0x1197   : > { %1597 = vrot.lane.b32.xlu0 %v1595_v18, %s2289_s14 }
0x11a1   : > { %v1611_v25 = vpop.permute.xlu1 %1610 }
0x11a2   : > { %vm1612_vm0 = vcmp.eq.s32.totalorder %v1611_v25, 1 }
0x1209   : > { %v1598_v21 = vpop.permute.xlu0 %1597 }
0x120a   : > { %v1600_v22 = vadd.f32 %v1598_v21, %v1590_v20 }
0x120c   : > { %2269 = vtanh.f32 %v1600_v22  ;;  %v1613_v48 = vsel %vm1612_vm0, %v1600_v22, %v1425_v19 }
0x1219   : > { %v2270_v24 = vpop.eup %2269 }
0x121a   : > { %1603 = vrot.lane.b32.xlu0 %v2270_v24, %s2288_s13 }
0x128c   : > { %v1604_v26 = vpop.permute.xlu0 %1603 }
0x128d   : > { %v1606_v27 = vmul.f32 %v1604_v26, %v1588_v7 }
0x128f   : > { %v1614_v28 = vsel %vm1612_vm0, %v1606_v27, %v1426_v4  ;;  %v1615_v56 = vsel %vm1612_vm0, %v1606_v27, 0.0 }
0x1290   : > { %1625 = vrot.lane.b32.xlu1 %v1614_v28, %s2289_s14 }
0x1302   : > { %v1626_v35 = vpop.permute.xlu1 %1625 }
0x1303   : > { %2201 = vmatmul.mubr.msk.f32.vlgmr.msra.gmra.mxu0 %vm307_vm1, %v1626_v35 }
0x13c3   : > { %v1695_v36 = vpop.f32.mrf.mxu0 }
0x13c4   : > { %v1769_v37 = vadd.f32 %v1768_v29, %v1695_v36 }
0x13c5   : > { %v2202_v38 = vpop.f32.mrf.mxu0 }
0x13c6   : > { %v1772_v39 = vadd.f32 %v2420_v14, %v1769_v37  ;;  %v1051_v14 = vsel %vm1048_vm10, %v2561_v58, 0.0 }
0x13c8   : > { %2271 = vtanh.f32 %v1772_v39  ;;  %v1773_v10 = vmul.f32 0.5, %v1772_v39 }
0x13ca   : > { %2273 = vtanh.f32 %v1773_v10 }
0x13d5   : > { %v2272_v40 = vpop.eup %2271 }
0x13d6   : > { %1780 = vrot.lane.b32.xlu0 %v2272_v40, %s2288_s13 }
0x13d7   : > { %v2274_v57 = vpop.eup %2273 }
0x13d8   : > { %v1775_v59 = vadd.f32 1.0, %v2274_v57 }
0x13da   : > { %1798 = vperm.xlu0 %2228, %v1796_v41   ;;  %v1776_v43 = vmul.f32 0.5, %v1775_v59 }
0x13dc   : > { %v1778_v49 = vmul.f32 %v1776_v43, %v1613_v48 }
0x13de   : > { %677 = vrot.lane.b32.xlu0 %v675_v42, %s2289_s14 }
0x13e2   : > { %1053 = vrot.lane.b32.xlu0 %v1051_v14, %s2289_s14 }
0x13e6   : > { %1429 = vrot.lane.b32.xlu0 %v1427_v11, %s2289_s14 }
0x1448   : > { %v1781_v44 = vpop.permute.xlu0 %1780 }
0x1449   : > { %v1783_v45 = vmul.f32 %v1781_v44, %v1776_v43 }
0x144b   : > { %1785 = vrot.lane.b32.xlu1 %v1783_v45, %s2289_s14 }
0x1455   : > { %v1799_v55 = vpop.permute.xlu0 %1798 }
0x1456   : > { %vm1800_vm1 = vcmp.eq.s32.totalorder %v1799_v55, 1 }
0x1459   : > { %v678_v58 = vpop.permute.xlu0 %677 }
0x145a   : > { %1927 = vst.msk [vmem:[%s2445_s17 + $0x2] sm:$0x3] %vm495_vm4, %v678_v58 }
0x145d   : > { %v1054_v46 = vpop.permute.xlu0 %1053 }
0x145e   : > { %1935 = vst.msk [vmem:[%s2445_s17 + $0x6] sm:$0x3] %vm495_vm4, %v1054_v46 }
0x1461   : > { %v1430_v47 = vpop.permute.xlu0 %1429 }
0x1462   : > { %1943 = vst.msk [vmem:[%s2445_s17 + $0xa] sm:$0x3] %vm495_vm4, %v1430_v47 }
0x14bd   : > { %v1786_v50 = vpop.permute.xlu1 %1785 }
0x14be   : > { %v1788_v51 = vadd.f32 %v1786_v50, %v1778_v49 }
0x14c0   : > { %2275 = vtanh.f32 %v1788_v51 }
0x14cd   : > { %v2276_v52 = vpop.eup %2275 }
0x14ce   : > { %1791 = vrot.lane.b32.xlu1 %v2276_v52, %s2288_s13 }
0x14d2   : > { %865 = vrot.lane.b32.xlu1 %v863_v53, %s2289_s14 }
0x14d6   : > { %1241 = vrot.lane.b32.xlu1 %v1239_v54, %s2289_s14 }
0x14da   : > { %1617 = vrot.lane.b32.xlu1 %v1615_v56, %s2289_s14 }
0x1540   : > { %v1792_v60 = vpop.permute.xlu1 %1791 }
0x1541   : > { %v1794_v61 = vmul.f32 %v1792_v60, %v1776_v43 }
0x1543   : > { %v1801_v2 = vsel %vm1800_vm1, %v1794_v61, 0.0 }
0x1544   : > { %1803 = vrot.lane.b32.xlu0 %v1801_v2, %s2289_s14  ;;  %v866_v30 = vpop.permute.xlu1 %865 }
0x1545   : > { %1931 = vst.msk [vmem:[%s2445_s17 + $0x4] sm:$0x3] %vm495_vm4, %v866_v30 }
0x1548   : > { %v1242_v32 = vpop.permute.xlu1 %1241 }
0x1549   : > { %1939 = vst.msk [vmem:[%s2445_s17 + $0x8] sm:$0x3] %vm495_vm4, %v1242_v32 }
0x154c   : > { %v1618_v31 = vpop.permute.xlu1 %1617 }
0x154d   : > { %1947 = vst.msk [vmem:[%s2445_s17 + $0xc] sm:$0x3] %vm495_vm4, %v1618_v31 }
0x15b6   : > { %v1804_v34 = vpop.permute.xlu0 %1803 }
0x15b7   : > { %1951 = vst.msk [vmem:[%s2445_s17 + $0xe] sm:$0x3] %vm495_vm4, %v1804_v34 }
0x15b8 PF: > { %s15_s18 = sadd.s32 1, %s2283_s18  }
0x15b9   : > { %p12_p4 = scmp.ge.s32.totalorder %s15_s18, 4  }
0x15bb   :  { %14 = sbr.rel (!%p12_p4) target bundleno = 1 (0x1), region = 96 }

</bundles_post_ra>
